<compile_context>
chip_gen: v6e
topology: v6e:2x2x1
jax: 0.10.0
libtpu: 0.0.40
codegen_flags: <defaults>
</compile_context>

<pallas_src>
import jax
import jax.numpy as jnp
import numpy as np
from jax.experimental import pallas as pl
from jax.experimental.pallas import tpu as pltpu

CPAD = 32        # conv input/output channel counts padded to 32 (real: 18 / 32)
COUT_HEAD = 8    # 1x1 head output channels padded 4 -> 8 (full sublane group)
N_CONV3 = 4      # number of 3x3 VALID convs in the stack
MARGIN = 2 * N_CONV3   # spatial margin consumed by the conv stack (== 8)


def _round_up(x, m):
    return (x + m - 1) // m * m


def _make_kernel(Wp, Bblk, NSEG, NCOLS, SW):
    """Wp: padded spatial width; NSEG: per-sample column segment (mult of 128);
    NCOLS = Bblk*NSEG matmul columns per step; SW = scratch width (>= NCOLS + 2*Wp+2)."""
    TAPS = [(dy, dx) for dy in range(3) for dx in range(3)]

    def kernel(z_ref, m_ref, c_ref, wc_ref, bc_ref, w5_ref, b5_ref,
               out_ref, s0, s1, col):
        f32 = jnp.float32

        # ---- per-step input build: z * mask + coord rows, per sample segment ----
        m = m_ref[...]          # (CPAD, NSEG) f32: 1.0 where row<zdim and col<N
        coord = c_ref[...]      # (CPAD, NSEG) f32: y/x coord rows, 0 elsewhere
        for n in range(Bblk):   # static, small
            seg = z_ref[n] * m + coord                     # (CPAD, NSEG) f32
            s0[:, n * NSEG:(n + 1) * NSEG] = seg.astype(s0.dtype)

        # Only the outer tail [NCOLS:SW] is ever read before being written;
        # zero it per step (cheap, a couple of vreg stores per buffer).
        # NOTE: deliberately NOT behind @pl.when(program_id==0) — the batch axis
        # is "parallel" (v7x megacore), each step must init its own scratch.
        tail = jnp.zeros((CPAD, SW - NCOLS), s0.dtype)
        s0[:, NCOLS:] = tail
        s1[:, NCOLS:] = tail

        def conv3x3_relu(src, layer, dst):
            # im2col: load the source tile once, store the 9 lane-shifted views
            # with dense aligned row-block writes into the persistent staging
            # scratch, then one K=288 bf16 MXU matmul with f32 accumulation.
            x = src[...]                                   # (CPAD, SW) bf16
            for idx, (dy, dx) in enumerate(TAPS):
                off = dy * Wp + dx                          # flattened tap offset
                col[idx * CPAD:(idx + 1) * CPAD, :] = x[:, off:off + NCOLS]
            y = jnp.dot(wc_ref[layer], col[...], preferred_element_type=f32)
            y = jnp.maximum(y + bc_ref[layer], 0.0)
            dst[:, :NCOLS] = y.astype(dst.dtype)

        conv3x3_relu(s0, 0, s1)
        conv3x3_relu(s1, 1, s0)
        conv3x3_relu(s0, 2, s1)
        conv3x3_relu(s1, 3, s0)

        # 1x1 head, lane-dense (COUT_HEAD, NCOLS) store (NCOLS multiple of 128).
        out_ref[0] = (jnp.dot(w5_ref[...], s0[:, :NCOLS],
                              preferred_element_type=f32) + b5_ref[...])

    return kernel


def decoder_forward(z, params, height, width):
    B, zdim = z.shape
    assert MARGIN == 8, "margin must match the 4x Conv2d(...,3) VALID stack"
    Hp, Wp = height + MARGIN, width + MARGIN
    N = Hp * Wp
    shift_max = 2 * Wp + 2                      # largest flattened 3x3 tap offset
    NSEG = _round_up(N + shift_max, 128)        # per-sample segment (keeps taps in-segment)

    # ---- batch blocking: amortize per-step overhead over more matmul columns,
    #      but keep >= 2 grid steps when B >= 2 so v7x's two TCs both get work.
    max_cols = 4096
    Bblk = max(1, min(B, max_cols // NSEG))
    if B >= 2:
        Bblk = min(Bblk, (B + 1) // 2)
    num_steps = -(-B // Bblk)
    Bpad = num_steps * Bblk
    NCOLS = Bblk * NSEG
    SW = _round_up(NCOLS + shift_max, 128)      # scratch width, shifted reads in bounds

    # ---- repack PyTorch OIHW weights for the channels-first im2col ----------
    def repack3x3(w):             # (cout,cin,3,3) -> (cout, 9*CPAD) bf16, tap-major
        cout, cin, kh, kw = w.shape
        wt = jnp.transpose(w, (0, 2, 3, 1))                        # (cout,3,3,cin)
        wt = jnp.pad(wt, ((0, 0), (0, 0), (0, 0), (0, CPAD - cin)))
        return wt.reshape(cout, kh * kw * CPAD).astype(jnp.bfloat16)

    def bias_col(b, rows):        # (cout,) -> (rows, 1) f32 (zero padded)
        return jnp.pad(b.reshape(-1, 1),
                       ((0, rows - b.shape[0]), (0, 0))).astype(jnp.float32)

    wc = jnp.stack([repack3x3(params[k]) for k in ("w1", "w2", "w3", "w4")])    # (4,32,288)
    bc = jnp.stack([bias_col(params[k], CPAD) for k in ("b1", "b2", "b3", "b4")])  # (4,32,1)
    w5 = jnp.pad(params["w5"].reshape(4, 32),
                 ((0, COUT_HEAD - 4), (0, 0))).astype(jnp.bfloat16)
    b5 = bias_col(params["b5"], COUT_HEAD)

    # ---- constants hoisted out of the kernel: coord rows + z-channel mask ----
    ys = jnp.linspace(-1.0, 1.0, Hp)
    xs = jnp.linspace(-1.0, 1.0, Wp)
    yy, xx = jnp.meshgrid(ys, xs, indexing="ij")
    coord = jnp.zeros((CPAD, NSEG), jnp.float32)
    coord = coord.at[zdim, :N].set(yy.reshape(-1))
    coord = coord.at[zdim + 1, :N].set(xx.reshape(-1))
    rows = jnp.arange(CPAD)[:, None]
    cols = jnp.arange(NSEG)[None, :]
    zmask = ((rows < zdim) & (cols < N)).astype(jnp.float32)

    # z as (Bpad, CPAD, 1) f32 -> cheap lane-broadcast inside the kernel.
    z3 = jnp.pad(z.astype(jnp.float32),
                 ((0, Bpad - B), (0, CPAD - zdim)))[:, :, None]

    kernel = _make_kernel(Wp, Bblk, NSEG, NCOLS, SW)

    grid_spec = pltpu.PrefetchScalarGridSpec(
        num_scalar_prefetch=0,
        grid=(num_steps,),
        in_specs=[
            pl.BlockSpec((Bblk, CPAD, 1), lambda b: (b, 0, 0)),        # z
            pl.BlockSpec((CPAD, NSEG), lambda b: (0, 0)),              # z mask   (resident)
            pl.BlockSpec((CPAD, NSEG), lambda b: (0, 0)),              # coords   (resident)
            pl.BlockSpec((N_CONV3, CPAD, 9 * CPAD), lambda b: (0, 0, 0)),  # conv weights
            pl.BlockSpec((N_CONV3, CPAD, 1), lambda b: (0, 0, 0)),         # conv biases
            pl.BlockSpec((COUT_HEAD, CPAD), lambda b: (0, 0)),         # w5
            pl.BlockSpec((COUT_HEAD, 1), lambda b: (0, 0)),            # b5
        ],
        out_specs=pl.BlockSpec((1, COUT_HEAD, NCOLS), lambda b: (b, 0, 0)),
        scratch_shapes=[
            pltpu.VMEM((CPAD, SW), jnp.bfloat16),          # ping
            pltpu.VMEM((CPAD, SW), jnp.bfloat16),          # pong
            pltpu.VMEM((9 * CPAD, NCOLS), jnp.bfloat16),   # im2col staging
        ],
    )

    out_full = pl.pallas_call(
        kernel,
        out_shape=jax.ShapeDtypeStruct((num_steps, COUT_HEAD, NCOLS), jnp.float32),
        grid_spec=grid_spec,
        compiler_params=pltpu.CompilerParams(
            dimension_semantics=("parallel",),           # batch steps across TCs (v7x)
            vmem_limit_bytes=32 * 1024 * 1024),
    )(z3, zmask, coord, wc, bc, w5, b5)

    # (steps, 8, Bblk*NSEG) -> (B, 4, H, W): drop channel pad, margin columns, window pad.
    out = out_full.reshape(num_steps, COUT_HEAD, Bblk, NSEG)
    out = out.transpose(0, 2, 1, 3).reshape(Bpad, COUT_HEAD, NSEG)
    out = out[:B, :4, :N].reshape(B, 4, Hp, Wp)
    return out[:, :, :height, :width]


def decoder_forward_ref(z, params, height, width):
    """Pure-JAX (XLA conv) reference, NCHW, identical semantics to the torch module."""
    B, zdim = z.shape
    Hp, Wp = height + 8, width + 8
    ys = jnp.linspace(-1.0, 1.0, Hp)
    xs = jnp.linspace(-1.0, 1.0, Wp)
    yy, xx = jnp.meshgrid(ys, xs, indexing="ij")
    coord = jnp.stack([yy, xx])[None]                                  # (1,2,Hp,Wp)
    z_tiled = jnp.broadcast_to(z[:, :, None, None], (B, zdim, Hp, Wp))
    x = jnp.concatenate(
        [z_tiled, jnp.broadcast_to(coord, (B, 2, Hp, Wp))], axis=1)

    def conv(x, w, b):
        y = jax.lax.conv_general_dilated(
            x, w, window_strides=(1, 1), padding="VALID",
            dimension_numbers=("NCHW", "OIHW", "NCHW"))
        return y + b[None, :, None, None]

    x = jax.nn.relu(conv(x, params["w1"], params["b1"]))
    x = jax.nn.relu(conv(x, params["w2"], params["b2"]))
    x = jax.nn.relu(conv(x, params["w3"], params["b3"]))
    x = jax.nn.relu(conv(x, params["w4"], params["b4"]))
    return conv(x, params["w5"], params["b5"])


if __name__ == "__main__":
    H = W = 16     # module spatial output size
    B = 2
    ZDIM = 16      # 16 latent channels + 2 coord channels = 18 conv-in channels

    key = jax.random.PRNGKey(0)
    ks = jax.random.split(key, 11)
    params = {
        "w1": jax.random.normal(ks[0], (32, 18, 3, 3), jnp.float32) * 0.1,
        "b1": jax.random.normal(ks[1], (32,), jnp.float32) * 0.1,
        "w2": jax.random.normal(ks[2], (32, 32, 3, 3), jnp.float32) * 0.1,
        "b2": jax.random.normal(ks[3], (32,), jnp.float32) * 0.1,
        "w3": jax.random.normal(ks[4], (32, 32, 3, 3), jnp.float32) * 0.1,
        "b3": jax.random.normal(ks[5], (32,), jnp.float32) * 0.1,
        "w4": jax.random.normal(ks[6], (32, 32, 3, 3), jnp.float32) * 0.1,
        "b4": jax.random.normal(ks[7], (32,), jnp.float32) * 0.1,
        "w5": jax.random.normal(ks[8], (4, 32, 1, 1), jnp.float32) * 0.1,
        "b5": jax.random.normal(ks[9], (4,), jnp.float32) * 0.1,
    }
    z = jax.random.normal(ks[10], (B, ZDIM), jnp.float32)

    # main shape (tolerance reflects bf16 MXU operands with f32 accumulation)
    out = jax.block_until_ready(decoder_forward(z, params, H, W))
    assert out.shape == (B, 4, H, W), out.shape
    ref = jax.block_until_ready(decoder_forward_ref(z, params, H, W))
    np.testing.assert_allclose(np.asarray(out), np.asarray(ref),
                               rtol=3e-2, atol=3e-2)

    # non-square spatial size: locks in the flattened-shift / row-stride logic
    H2, W2 = 12, 16
    out2 = jax.block_until_ready(decoder_forward(z, params, H2, W2))
    assert out2.shape == (B, 4, H2, W2), out2.shape
    ref2 = jax.block_until_ready(decoder_forward_ref(z, params, H2, W2))
    np.testing.assert_allclose(np.asarray(out2), np.asarray(ref2),
                               rtol=3e-2, atol=3e-2)

    print("KERNEL_OK")
</pallas_src>

<mosaic_0001>
module attributes {stable_mosaic.version = 11 : i64} {
  func.func @kernel(%arg0: i32, %arg1: memref<1x32x1xf32, #tpu.memory_space<vmem>>, %arg2: memref<32x640xf32, #tpu.memory_space<vmem>>, %arg3: memref<32x640xf32, #tpu.memory_space<vmem>>, %arg4: memref<4x32x288xbf16, #tpu.memory_space<vmem>>, %arg5: memref<4x32x1xf32, #tpu.memory_space<vmem>>, %arg6: memref<8x32xbf16, #tpu.memory_space<vmem>>, %arg7: memref<8x1xf32, #tpu.memory_space<vmem>>, %arg8: memref<1x8x640xf32, #tpu.memory_space<vmem>>, %arg9: memref<32x768xbf16, #tpu.memory_space<vmem>>, %arg10: memref<32x768xbf16, #tpu.memory_space<vmem>>, %arg11: memref<288x640xbf16, #tpu.memory_space<vmem>>) attributes {dimension_semantics = [#tpu.dimension_semantics<parallel>], iteration_bounds = array<i64: 2>, scalar_prefetch = 0 : i64, scratch_operands = 3 : i64, tpu.core_type = #tpu.core_type<tc>, window_params = [{transform_indices = @transform_0, window_bounds = array<i64: 1, 32, 1>}, {pipeline_mode = #tpu.pipeline_mode<synchronous>, transform_indices = @transform_1, window_bounds = array<i64: 32, 640>}, {pipeline_mode = #tpu.pipeline_mode<synchronous>, transform_indices = @transform_2, window_bounds = array<i64: 32, 640>}, {pipeline_mode = #tpu.pipeline_mode<synchronous>, transform_indices = @transform_3, window_bounds = array<i64: 4, 32, 288>}, {pipeline_mode = #tpu.pipeline_mode<synchronous>, transform_indices = @transform_4, window_bounds = array<i64: 4, 32, 1>}, {pipeline_mode = #tpu.pipeline_mode<synchronous>, transform_indices = @transform_5, window_bounds = array<i64: 8, 32>}, {pipeline_mode = #tpu.pipeline_mode<synchronous>, transform_indices = @transform_6, window_bounds = array<i64: 8, 1>}, {transform_indices = @transform_7, window_bounds = array<i64: 1, 8, 640>}]} {
    %c0 = arith.constant 0 : index
    %c0_0 = arith.constant 0 : index
    %0 = vector.load %arg2[%c0, %c0_0] : memref<32x640xf32, #tpu.memory_space<vmem>>, vector<32x640xf32>
    %c0_1 = arith.constant 0 : index
    %c0_2 = arith.constant 0 : index
    %1 = vector.load %arg3[%c0_1, %c0_2] : memref<32x640xf32, #tpu.memory_space<vmem>>, vector<32x640xf32>
    %c0_3 = arith.constant 0 : index
    %c0_4 = arith.constant 0 : index
    %c0_5 = arith.constant 0 : index
    %2 = vector.load %arg1[%c0_3, %c0_4, %c0_5] : memref<1x32x1xf32, #tpu.memory_space<vmem>>, vector<1x32x1xf32>
    %3 = vector.shape_cast %2 : vector<1x32x1xf32> to vector<32x1xf32>
    %4 = vector.broadcast %3 : vector<32x1xf32> to vector<32x640xf32>
    %5 = arith.mulf %4, %0 : vector<32x640xf32>
    %6 = arith.addf %5, %1 : vector<32x640xf32>
    %7 = arith.truncf %6 : vector<32x640xf32> to vector<32x640xbf16>
    %c0_6 = arith.constant 0 : index
    %c0_7 = arith.constant 0 : index
    %8 = vector.load %arg9[%c0_6, %c0_7] : memref<32x768xbf16, #tpu.memory_space<vmem>>, vector<32x640xbf16>
    tpu.vector_store %arg9[%c0_6, %c0_7], %7 {strides = array<i32>} : memref<32x768xbf16, #tpu.memory_space<vmem>>, vector<32x640xbf16>,
    %cst = arith.constant 0.000000e+00 : bf16
    %9 = vector.broadcast %cst : bf16 to vector<32x128xbf16>
    %c0_8 = arith.constant 0 : index
    %c640 = arith.constant 640 : index
    %10 = vector.load %arg9[%c0_8, %c640] : memref<32x768xbf16, #tpu.memory_space<vmem>>, vector<32x128xbf16>
    tpu.vector_store %arg9[%c0_8, %c640], %9 {strides = array<i32>} : memref<32x768xbf16, #tpu.memory_space<vmem>>, vector<32x128xbf16>,
    %c0_9 = arith.constant 0 : index
    %c640_10 = arith.constant 640 : index
    %11 = vector.load %arg10[%c0_9, %c640_10] : memref<32x768xbf16, #tpu.memory_space<vmem>>, vector<32x128xbf16>
    tpu.vector_store %arg10[%c0_9, %c640_10], %9 {strides = array<i32>} : memref<32x768xbf16, #tpu.memory_space<vmem>>, vector<32x128xbf16>,
    %c0_11 = arith.constant 0 : index
    %c0_12 = arith.constant 0 : index
    %12 = vector.load %arg9[%c0_11, %c0_12] : memref<32x768xbf16, #tpu.memory_space<vmem>>, vector<32x768xbf16>
    %13 = vector.extract_strided_slice %12 {offsets = [0, 0], sizes = [32, 640], strides = [1, 1]} : vector<32x768xbf16> to vector<32x640xbf16>
    %c0_13 = arith.constant 0 : index
    %c0_14 = arith.constant 0 : index
    %14 = vector.load %arg11[%c0_13, %c0_14] : memref<288x640xbf16, #tpu.memory_space<vmem>>, vector<32x640xbf16>
    tpu.vector_store %arg11[%c0_13, %c0_14], %13 {strides = array<i32>} : memref<288x640xbf16, #tpu.memory_space<vmem>>, vector<32x640xbf16>,
    %15 = vector.extract_strided_slice %12 {offsets = [0, 1], sizes = [32, 640], strides = [1, 1]} : vector<32x768xbf16> to vector<32x640xbf16>
    %c32 = arith.constant 32 : index
    %c0_15 = arith.constant 0 : index
    %16 = vector.load %arg11[%c32, %c0_15] : memref<288x640xbf16, #tpu.memory_space<vmem>>, vector<32x640xbf16>
    tpu.vector_store %arg11[%c32, %c0_15], %15 {strides = array<i32>} : memref<288x640xbf16, #tpu.memory_space<vmem>>, vector<32x640xbf16>,
    %17 = vector.extract_strided_slice %12 {offsets = [0, 2], sizes = [32, 640], strides = [1, 1]} : vector<32x768xbf16> to vector<32x640xbf16>
    %c64 = arith.constant 64 : index
    %c0_16 = arith.constant 0 : index
    %18 = vector.load %arg11[%c64, %c0_16] : memref<288x640xbf16, #tpu.memory_space<vmem>>, vector<32x640xbf16>
    tpu.vector_store %arg11[%c64, %c0_16], %17 {strides = array<i32>} : memref<288x640xbf16, #tpu.memory_space<vmem>>, vector<32x640xbf16>,
    %19 = vector.extract_strided_slice %12 {offsets = [0, 24], sizes = [32, 640], strides = [1, 1]} : vector<32x768xbf16> to vector<32x640xbf16>
    %c96 = arith.constant 96 : index
    %c0_17 = arith.constant 0 : index
    %20 = vector.load %arg11[%c96, %c0_17] : memref<288x640xbf16, #tpu.memory_space<vmem>>, vector<32x640xbf16>
    tpu.vector_store %arg11[%c96, %c0_17], %19 {strides = array<i32>} : memref<288x640xbf16, #tpu.memory_space<vmem>>, vector<32x640xbf16>,
    %21 = vector.extract_strided_slice %12 {offsets = [0, 25], sizes = [32, 640], strides = [1, 1]} : vector<32x768xbf16> to vector<32x640xbf16>
    %c128 = arith.constant 128 : index
    %c0_18 = arith.constant 0 : index
    %22 = vector.load %arg11[%c128, %c0_18] : memref<288x640xbf16, #tpu.memory_space<vmem>>, vector<32x640xbf16>
    tpu.vector_store %arg11[%c128, %c0_18], %21 {strides = array<i32>} : memref<288x640xbf16, #tpu.memory_space<vmem>>, vector<32x640xbf16>,
    %23 = vector.extract_strided_slice %12 {offsets = [0, 26], sizes = [32, 640], strides = [1, 1]} : vector<32x768xbf16> to vector<32x640xbf16>
    %c160 = arith.constant 160 : index
    %c0_19 = arith.constant 0 : index
    %24 = vector.load %arg11[%c160, %c0_19] : memref<288x640xbf16, #tpu.memory_space<vmem>>, vector<32x640xbf16>
    tpu.vector_store %arg11[%c160, %c0_19], %23 {strides = array<i32>} : memref<288x640xbf16, #tpu.memory_space<vmem>>, vector<32x640xbf16>,
    %25 = vector.extract_strided_slice %12 {offsets = [0, 48], sizes = [32, 640], strides = [1, 1]} : vector<32x768xbf16> to vector<32x640xbf16>
    %c192 = arith.constant 192 : index
    %c0_20 = arith.constant 0 : index
    %26 = vector.load %arg11[%c192, %c0_20] : memref<288x640xbf16, #tpu.memory_space<vmem>>, vector<32x640xbf16>
    tpu.vector_store %arg11[%c192, %c0_20], %25 {strides = array<i32>} : memref<288x640xbf16, #tpu.memory_space<vmem>>, vector<32x640xbf16>,
    %27 = vector.extract_strided_slice %12 {offsets = [0, 49], sizes = [32, 640], strides = [1, 1]} : vector<32x768xbf16> to vector<32x640xbf16>
    %c224 = arith.constant 224 : index
    %c0_21 = arith.constant 0 : index
    %28 = vector.load %arg11[%c224, %c0_21] : memref<288x640xbf16, #tpu.memory_space<vmem>>, vector<32x640xbf16>
    tpu.vector_store %arg11[%c224, %c0_21], %27 {strides = array<i32>} : memref<288x640xbf16, #tpu.memory_space<vmem>>, vector<32x640xbf16>,
    %29 = vector.extract_strided_slice %12 {offsets = [0, 50], sizes = [32, 640], strides = [1, 1]} : vector<32x768xbf16> to vector<32x640xbf16>
    %c256 = arith.constant 256 : index
    %c0_22 = arith.constant 0 : index
    %30 = vector.load %arg11[%c256, %c0_22] : memref<288x640xbf16, #tpu.memory_space<vmem>>, vector<32x640xbf16>
    tpu.vector_store %arg11[%c256, %c0_22], %29 {strides = array<i32>} : memref<288x640xbf16, #tpu.memory_space<vmem>>, vector<32x640xbf16>,
    %c0_23 = arith.constant 0 : index
    %c0_24 = arith.constant 0 : index
    %c0_25 = arith.constant 0 : index
    %31 = vector.load %arg4[%c0_23, %c0_24, %c0_25] : memref<4x32x288xbf16, #tpu.memory_space<vmem>>, vector<1x32x288xbf16>
    %32 = vector.shape_cast %31 : vector<1x32x288xbf16> to vector<32x288xbf16>
    %c0_26 = arith.constant 0 : index
    %c0_27 = arith.constant 0 : index
    %33 = vector.load %arg11[%c0_26, %c0_27] : memref<288x640xbf16, #tpu.memory_space<vmem>>, vector<288x640xbf16>
    %cst_28 = arith.constant dense<0.000000e+00> : vector<32x640xf32>
    %34 = tpu.matmul %32, %33, %cst_28 {dimension_numbers = #tpu.dot_dimension_numbers<[1], [0], [0], [1], [0, 0, 1, 1], [], []>} : vector<32x288xbf16>, vector<288x640xbf16>, vector<32x640xf32> -> vector<32x640xf32>
    %c0_29 = arith.constant 0 : index
    %c0_30 = arith.constant 0 : index
    %c0_31 = arith.constant 0 : index
    %35 = vector.load %arg5[%c0_29, %c0_30, %c0_31] : memref<4x32x1xf32, #tpu.memory_space<vmem>>, vector<1x32x1xf32>
    %36 = vector.shape_cast %35 : vector<1x32x1xf32> to vector<32x1xf32>
    %37 = vector.broadcast %36 : vector<32x1xf32> to vector<32x640xf32>
    %38 = arith.addf %34, %37 : vector<32x640xf32>
    %cst_32 = arith.constant 0.000000e+00 : f32
    %39 = vector.broadcast %cst_32 : f32 to vector<32x640xf32>
    %40 = arith.maximumf %38, %39 : vector<32x640xf32>
    %41 = arith.truncf %40 : vector<32x640xf32> to vector<32x640xbf16>
    %c0_33 = arith.constant 0 : index
    %c0_34 = arith.constant 0 : index
    %42 = vector.load %arg10[%c0_33, %c0_34] : memref<32x768xbf16, #tpu.memory_space<vmem>>, vector<32x640xbf16>
    tpu.vector_store %arg10[%c0_33, %c0_34], %41 {strides = array<i32>} : memref<32x768xbf16, #tpu.memory_space<vmem>>, vector<32x640xbf16>,
    %c0_35 = arith.constant 0 : index
    %c0_36 = arith.constant 0 : index
    %43 = vector.load %arg10[%c0_35, %c0_36] : memref<32x768xbf16, #tpu.memory_space<vmem>>, vector<32x768xbf16>
    %44 = vector.extract_strided_slice %43 {offsets = [0, 0], sizes = [32, 640], strides = [1, 1]} : vector<32x768xbf16> to vector<32x640xbf16>
    %c0_37 = arith.constant 0 : index
    %c0_38 = arith.constant 0 : index
    %45 = vector.load %arg11[%c0_37, %c0_38] : memref<288x640xbf16, #tpu.memory_space<vmem>>, vector<32x640xbf16>
    tpu.vector_store %arg11[%c0_37, %c0_38], %44 {strides = array<i32>} : memref<288x640xbf16, #tpu.memory_space<vmem>>, vector<32x640xbf16>,
    %46 = vector.extract_strided_slice %43 {offsets = [0, 1], sizes = [32, 640], strides = [1, 1]} : vector<32x768xbf16> to vector<32x640xbf16>
    %c32_39 = arith.constant 32 : index
    %c0_40 = arith.constant 0 : index
    %47 = vector.load %arg11[%c32_39, %c0_40] : memref<288x640xbf16, #tpu.memory_space<vmem>>, vector<32x640xbf16>
    tpu.vector_store %arg11[%c32_39, %c0_40], %46 {strides = array<i32>} : memref<288x640xbf16, #tpu.memory_space<vmem>>, vector<32x640xbf16>,
    %48 = vector.extract_strided_slice %43 {offsets = [0, 2], sizes = [32, 640], strides = [1, 1]} : vector<32x768xbf16> to vector<32x640xbf16>
    %c64_41 = arith.constant 64 : index
    %c0_42 = arith.constant 0 : index
    %49 = vector.load %arg11[%c64_41, %c0_42] : memref<288x640xbf16, #tpu.memory_space<vmem>>, vector<32x640xbf16>
    tpu.vector_store %arg11[%c64_41, %c0_42], %48 {strides = array<i32>} : memref<288x640xbf16, #tpu.memory_space<vmem>>, vector<32x640xbf16>,
    %50 = vector.extract_strided_slice %43 {offsets = [0, 24], sizes = [32, 640], strides = [1, 1]} : vector<32x768xbf16> to vector<32x640xbf16>
    %c96_43 = arith.constant 96 : index
    %c0_44 = arith.constant 0 : index
    %51 = vector.load %arg11[%c96_43, %c0_44] : memref<288x640xbf16, #tpu.memory_space<vmem>>, vector<32x640xbf16>
    tpu.vector_store %arg11[%c96_43, %c0_44], %50 {strides = array<i32>} : memref<288x640xbf16, #tpu.memory_space<vmem>>, vector<32x640xbf16>,
    %52 = vector.extract_strided_slice %43 {offsets = [0, 25], sizes = [32, 640], strides = [1, 1]} : vector<32x768xbf16> to vector<32x640xbf16>
    %c128_45 = arith.constant 128 : index
    %c0_46 = arith.constant 0 : index
    %53 = vector.load %arg11[%c128_45, %c0_46] : memref<288x640xbf16, #tpu.memory_space<vmem>>, vector<32x640xbf16>
    tpu.vector_store %arg11[%c128_45, %c0_46], %52 {strides = array<i32>} : memref<288x640xbf16, #tpu.memory_space<vmem>>, vector<32x640xbf16>,
    %54 = vector.extract_strided_slice %43 {offsets = [0, 26], sizes = [32, 640], strides = [1, 1]} : vector<32x768xbf16> to vector<32x640xbf16>
    %c160_47 = arith.constant 160 : index
    %c0_48 = arith.constant 0 : index
    %55 = vector.load %arg11[%c160_47, %c0_48] : memref<288x640xbf16, #tpu.memory_space<vmem>>, vector<32x640xbf16>
    tpu.vector_store %arg11[%c160_47, %c0_48], %54 {strides = array<i32>} : memref<288x640xbf16, #tpu.memory_space<vmem>>, vector<32x640xbf16>,
    %56 = vector.extract_strided_slice %43 {offsets = [0, 48], sizes = [32, 640], strides = [1, 1]} : vector<32x768xbf16> to vector<32x640xbf16>
    %c192_49 = arith.constant 192 : index
    %c0_50 = arith.constant 0 : index
    %57 = vector.load %arg11[%c192_49, %c0_50] : memref<288x640xbf16, #tpu.memory_space<vmem>>, vector<32x640xbf16>
    tpu.vector_store %arg11[%c192_49, %c0_50], %56 {strides = array<i32>} : memref<288x640xbf16, #tpu.memory_space<vmem>>, vector<32x640xbf16>,
    %58 = vector.extract_strided_slice %43 {offsets = [0, 49], sizes = [32, 640], strides = [1, 1]} : vector<32x768xbf16> to vector<32x640xbf16>
    %c224_51 = arith.constant 224 : index
    %c0_52 = arith.constant 0 : index
    %59 = vector.load %arg11[%c224_51, %c0_52] : memref<288x640xbf16, #tpu.memory_space<vmem>>, vector<32x640xbf16>
    tpu.vector_store %arg11[%c224_51, %c0_52], %58 {strides = array<i32>} : memref<288x640xbf16, #tpu.memory_space<vmem>>, vector<32x640xbf16>,
    %60 = vector.extract_strided_slice %43 {offsets = [0, 50], sizes = [32, 640], strides = [1, 1]} : vector<32x768xbf16> to vector<32x640xbf16>
    %c256_53 = arith.constant 256 : index
    %c0_54 = arith.constant 0 : index
    %61 = vector.load %arg11[%c256_53, %c0_54] : memref<288x640xbf16, #tpu.memory_space<vmem>>, vector<32x640xbf16>
    tpu.vector_store %arg11[%c256_53, %c0_54], %60 {strides = array<i32>} : memref<288x640xbf16, #tpu.memory_space<vmem>>, vector<32x640xbf16>,
    %c1 = arith.constant 1 : index
    %c0_55 = arith.constant 0 : index
    %c0_56 = arith.constant 0 : index
    %62 = vector.load %arg4[%c1, %c0_55, %c0_56] : memref<4x32x288xbf16, #tpu.memory_space<vmem>>, vector<1x32x288xbf16>
    %63 = vector.shape_cast %62 : vector<1x32x288xbf16> to vector<32x288xbf16>
    %c0_57 = arith.constant 0 : index
    %c0_58 = arith.constant 0 : index
    %64 = vector.load %arg11[%c0_57, %c0_58] : memref<288x640xbf16, #tpu.memory_space<vmem>>, vector<288x640xbf16>
    %cst_59 = arith.constant dense<0.000000e+00> : vector<32x640xf32>
    %65 = tpu.matmul %63, %64, %cst_59 {dimension_numbers = #tpu.dot_dimension_numbers<[1], [0], [0], [1], [0, 0, 1, 1], [], []>} : vector<32x288xbf16>, vector<288x640xbf16>, vector<32x640xf32> -> vector<32x640xf32>
    %c1_60 = arith.constant 1 : index
    %c0_61 = arith.constant 0 : index
    %c0_62 = arith.constant 0 : index
    %66 = vector.load %arg5[%c1_60, %c0_61, %c0_62] : memref<4x32x1xf32, #tpu.memory_space<vmem>>, vector<1x32x1xf32>
    %67 = vector.shape_cast %66 : vector<1x32x1xf32> to vector<32x1xf32>
    %68 = vector.broadcast %67 : vector<32x1xf32> to vector<32x640xf32>
    %69 = arith.addf %65, %68 : vector<32x640xf32>
    %cst_63 = arith.constant 0.000000e+00 : f32
    %70 = vector.broadcast %cst_63 : f32 to vector<32x640xf32>
    %71 = arith.maximumf %69, %70 : vector<32x640xf32>
    %72 = arith.truncf %71 : vector<32x640xf32> to vector<32x640xbf16>
    %c0_64 = arith.constant 0 : index
    %c0_65 = arith.constant 0 : index
    %73 = vector.load %arg9[%c0_64, %c0_65] : memref<32x768xbf16, #tpu.memory_space<vmem>>, vector<32x640xbf16>
    tpu.vector_store %arg9[%c0_64, %c0_65], %72 {strides = array<i32>} : memref<32x768xbf16, #tpu.memory_space<vmem>>, vector<32x640xbf16>,
    %c0_66 = arith.constant 0 : index
    %c0_67 = arith.constant 0 : index
    %74 = vector.load %arg9[%c0_66, %c0_67] : memref<32x768xbf16, #tpu.memory_space<vmem>>, vector<32x768xbf16>
    %75 = vector.extract_strided_slice %74 {offsets = [0, 0], sizes = [32, 640], strides = [1, 1]} : vector<32x768xbf16> to vector<32x640xbf16>
    %c0_68 = arith.constant 0 : index
    %c0_69 = arith.constant 0 : index
    %76 = vector.load %arg11[%c0_68, %c0_69] : memref<288x640xbf16, #tpu.memory_space<vmem>>, vector<32x640xbf16>
    tpu.vector_store %arg11[%c0_68, %c0_69], %75 {strides = array<i32>} : memref<288x640xbf16, #tpu.memory_space<vmem>>, vector<32x640xbf16>,
    %77 = vector.extract_strided_slice %74 {offsets = [0, 1], sizes = [32, 640], strides = [1, 1]} : vector<32x768xbf16> to vector<32x640xbf16>
    %c32_70 = arith.constant 32 : index
    %c0_71 = arith.constant 0 : index
    %78 = vector.load %arg11[%c32_70, %c0_71] : memref<288x640xbf16, #tpu.memory_space<vmem>>, vector<32x640xbf16>
    tpu.vector_store %arg11[%c32_70, %c0_71], %77 {strides = array<i32>} : memref<288x640xbf16, #tpu.memory_space<vmem>>, vector<32x640xbf16>,
    %79 = vector.extract_strided_slice %74 {offsets = [0, 2], sizes = [32, 640], strides = [1, 1]} : vector<32x768xbf16> to vector<32x640xbf16>
    %c64_72 = arith.constant 64 : index
    %c0_73 = arith.constant 0 : index
    %80 = vector.load %arg11[%c64_72, %c0_73] : memref<288x640xbf16, #tpu.memory_space<vmem>>, vector<32x640xbf16>
    tpu.vector_store %arg11[%c64_72, %c0_73], %79 {strides = array<i32>} : memref<288x640xbf16, #tpu.memory_space<vmem>>, vector<32x640xbf16>,
    %81 = vector.extract_strided_slice %74 {offsets = [0, 24], sizes = [32, 640], strides = [1, 1]} : vector<32x768xbf16> to vector<32x640xbf16>
    %c96_74 = arith.constant 96 : index
    %c0_75 = arith.constant 0 : index
    %82 = vector.load %arg11[%c96_74, %c0_75] : memref<288x640xbf16, #tpu.memory_space<vmem>>, vector<32x640xbf16>
    tpu.vector_store %arg11[%c96_74, %c0_75], %81 {strides = array<i32>} : memref<288x640xbf16, #tpu.memory_space<vmem>>, vector<32x640xbf16>,
    %83 = vector.extract_strided_slice %74 {offsets = [0, 25], sizes = [32, 640], strides = [1, 1]} : vector<32x768xbf16> to vector<32x640xbf16>
    %c128_76 = arith.constant 128 : index
    %c0_77 = arith.constant 0 : index
    %84 = vector.load %arg11[%c128_76, %c0_77] : memref<288x640xbf16, #tpu.memory_space<vmem>>, vector<32x640xbf16>
    tpu.vector_store %arg11[%c128_76, %c0_77], %83 {strides = array<i32>} : memref<288x640xbf16, #tpu.memory_space<vmem>>, vector<32x640xbf16>,
    %85 = vector.extract_strided_slice %74 {offsets = [0, 26], sizes = [32, 640], strides = [1, 1]} : vector<32x768xbf16> to vector<32x640xbf16>
    %c160_78 = arith.constant 160 : index
    %c0_79 = arith.constant 0 : index
    %86 = vector.load %arg11[%c160_78, %c0_79] : memref<288x640xbf16, #tpu.memory_space<vmem>>, vector<32x640xbf16>
    tpu.vector_store %arg11[%c160_78, %c0_79], %85 {strides = array<i32>} : memref<288x640xbf16, #tpu.memory_space<vmem>>, vector<32x640xbf16>,
    %87 = vector.extract_strided_slice %74 {offsets = [0, 48], sizes = [32, 640], strides = [1, 1]} : vector<32x768xbf16> to vector<32x640xbf16>
    %c192_80 = arith.constant 192 : index
    %c0_81 = arith.constant 0 : index
    %88 = vector.load %arg11[%c192_80, %c0_81] : memref<288x640xbf16, #tpu.memory_space<vmem>>, vector<32x640xbf16>
    tpu.vector_store %arg11[%c192_80, %c0_81], %87 {strides = array<i32>} : memref<288x640xbf16, #tpu.memory_space<vmem>>, vector<32x640xbf16>,
    %89 = vector.extract_strided_slice %74 {offsets = [0, 49], sizes = [32, 640], strides = [1, 1]} : vector<32x768xbf16> to vector<32x640xbf16>
    %c224_82 = arith.constant 224 : index
    %c0_83 = arith.constant 0 : index
    %90 = vector.load %arg11[%c224_82, %c0_83] : memref<288x640xbf16, #tpu.memory_space<vmem>>, vector<32x640xbf16>
    tpu.vector_store %arg11[%c224_82, %c0_83], %89 {strides = array<i32>} : memref<288x640xbf16, #tpu.memory_space<vmem>>, vector<32x640xbf16>,
    %91 = vector.extract_strided_slice %74 {offsets = [0, 50], sizes = [32, 640], strides = [1, 1]} : vector<32x768xbf16> to vector<32x640xbf16>
    %c256_84 = arith.constant 256 : index
    %c0_85 = arith.constant 0 : index
    %92 = vector.load %arg11[%c256_84, %c0_85] : memref<288x640xbf16, #tpu.memory_space<vmem>>, vector<32x640xbf16>
    tpu.vector_store %arg11[%c256_84, %c0_85], %91 {strides = array<i32>} : memref<288x640xbf16, #tpu.memory_space<vmem>>, vector<32x640xbf16>,
    %c2 = arith.constant 2 : index
    %c0_86 = arith.constant 0 : index
    %c0_87 = arith.constant 0 : index
    %93 = vector.load %arg4[%c2, %c0_86, %c0_87] : memref<4x32x288xbf16, #tpu.memory_space<vmem>>, vector<1x32x288xbf16>
    %94 = vector.shape_cast %93 : vector<1x32x288xbf16> to vector<32x288xbf16>
    %c0_88 = arith.constant 0 : index
    %c0_89 = arith.constant 0 : index
    %95 = vector.load %arg11[%c0_88, %c0_89] : memref<288x640xbf16, #tpu.memory_space<vmem>>, vector<288x640xbf16>
    %cst_90 = arith.constant dense<0.000000e+00> : vector<32x640xf32>
    %96 = tpu.matmul %94, %95, %cst_90 {dimension_numbers = #tpu.dot_dimension_numbers<[1], [0], [0], [1], [0, 0, 1, 1], [], []>} : vector<32x288xbf16>, vector<288x640xbf16>, vector<32x640xf32> -> vector<32x640xf32>
    %c2_91 = arith.constant 2 : index
    %c0_92 = arith.constant 0 : index
    %c0_93 = arith.constant 0 : index
    %97 = vector.load %arg5[%c2_91, %c0_92, %c0_93] : memref<4x32x1xf32, #tpu.memory_space<vmem>>, vector<1x32x1xf32>
    %98 = vector.shape_cast %97 : vector<1x32x1xf32> to vector<32x1xf32>
    %99 = vector.broadcast %98 : vector<32x1xf32> to vector<32x640xf32>
    %100 = arith.addf %96, %99 : vector<32x640xf32>
    %cst_94 = arith.constant 0.000000e+00 : f32
    %101 = vector.broadcast %cst_94 : f32 to vector<32x640xf32>
    %102 = arith.maximumf %100, %101 : vector<32x640xf32>
    %103 = arith.truncf %102 : vector<32x640xf32> to vector<32x640xbf16>
    %c0_95 = arith.constant 0 : index
    %c0_96 = arith.constant 0 : index
    %104 = vector.load %arg10[%c0_95, %c0_96] : memref<32x768xbf16, #tpu.memory_space<vmem>>, vector<32x640xbf16>
    tpu.vector_store %arg10[%c0_95, %c0_96], %103 {strides = array<i32>} : memref<32x768xbf16, #tpu.memory_space<vmem>>, vector<32x640xbf16>,
    %c0_97 = arith.constant 0 : index
    %c0_98 = arith.constant 0 : index
    %105 = vector.load %arg10[%c0_97, %c0_98] : memref<32x768xbf16, #tpu.memory_space<vmem>>, vector<32x768xbf16>
    %106 = vector.extract_strided_slice %105 {offsets = [0, 0], sizes = [32, 640], strides = [1, 1]} : vector<32x768xbf16> to vector<32x640xbf16>
    %c0_99 = arith.constant 0 : index
    %c0_100 = arith.constant 0 : index
    %107 = vector.load %arg11[%c0_99, %c0_100] : memref<288x640xbf16, #tpu.memory_space<vmem>>, vector<32x640xbf16>
    tpu.vector_store %arg11[%c0_99, %c0_100], %106 {strides = array<i32>} : memref<288x640xbf16, #tpu.memory_space<vmem>>, vector<32x640xbf16>,
    %108 = vector.extract_strided_slice %105 {offsets = [0, 1], sizes = [32, 640], strides = [1, 1]} : vector<32x768xbf16> to vector<32x640xbf16>
    %c32_101 = arith.constant 32 : index
    %c0_102 = arith.constant 0 : index
    %109 = vector.load %arg11[%c32_101, %c0_102] : memref<288x640xbf16, #tpu.memory_space<vmem>>, vector<32x640xbf16>
    tpu.vector_store %arg11[%c32_101, %c0_102], %108 {strides = array<i32>} : memref<288x640xbf16, #tpu.memory_space<vmem>>, vector<32x640xbf16>,
    %110 = vector.extract_strided_slice %105 {offsets = [0, 2], sizes = [32, 640], strides = [1, 1]} : vector<32x768xbf16> to vector<32x640xbf16>
    %c64_103 = arith.constant 64 : index
    %c0_104 = arith.constant 0 : index
    %111 = vector.load %arg11[%c64_103, %c0_104] : memref<288x640xbf16, #tpu.memory_space<vmem>>, vector<32x640xbf16>
    tpu.vector_store %arg11[%c64_103, %c0_104], %110 {strides = array<i32>} : memref<288x640xbf16, #tpu.memory_space<vmem>>, vector<32x640xbf16>,
    %112 = vector.extract_strided_slice %105 {offsets = [0, 24], sizes = [32, 640], strides = [1, 1]} : vector<32x768xbf16> to vector<32x640xbf16>
    %c96_105 = arith.constant 96 : index
    %c0_106 = arith.constant 0 : index
    %113 = vector.load %arg11[%c96_105, %c0_106] : memref<288x640xbf16, #tpu.memory_space<vmem>>, vector<32x640xbf16>
    tpu.vector_store %arg11[%c96_105, %c0_106], %112 {strides = array<i32>} : memref<288x640xbf16, #tpu.memory_space<vmem>>, vector<32x640xbf16>,
    %114 = vector.extract_strided_slice %105 {offsets = [0, 25], sizes = [32, 640], strides = [1, 1]} : vector<32x768xbf16> to vector<32x640xbf16>
    %c128_107 = arith.constant 128 : index
    %c0_108 = arith.constant 0 : index
    %115 = vector.load %arg11[%c128_107, %c0_108] : memref<288x640xbf16, #tpu.memory_space<vmem>>, vector<32x640xbf16>
    tpu.vector_store %arg11[%c128_107, %c0_108], %114 {strides = array<i32>} : memref<288x640xbf16, #tpu.memory_space<vmem>>, vector<32x640xbf16>,
    %116 = vector.extract_strided_slice %105 {offsets = [0, 26], sizes = [32, 640], strides = [1, 1]} : vector<32x768xbf16> to vector<32x640xbf16>
    %c160_109 = arith.constant 160 : index
    %c0_110 = arith.constant 0 : index
    %117 = vector.load %arg11[%c160_109, %c0_110] : memref<288x640xbf16, #tpu.memory_space<vmem>>, vector<32x640xbf16>
    tpu.vector_store %arg11[%c160_109, %c0_110], %116 {strides = array<i32>} : memref<288x640xbf16, #tpu.memory_space<vmem>>, vector<32x640xbf16>,
    %118 = vector.extract_strided_slice %105 {offsets = [0, 48], sizes = [32, 640], strides = [1, 1]} : vector<32x768xbf16> to vector<32x640xbf16>
    %c192_111 = arith.constant 192 : index
    %c0_112 = arith.constant 0 : index
    %119 = vector.load %arg11[%c192_111, %c0_112] : memref<288x640xbf16, #tpu.memory_space<vmem>>, vector<32x640xbf16>
    tpu.vector_store %arg11[%c192_111, %c0_112], %118 {strides = array<i32>} : memref<288x640xbf16, #tpu.memory_space<vmem>>, vector<32x640xbf16>,
    %120 = vector.extract_strided_slice %105 {offsets = [0, 49], sizes = [32, 640], strides = [1, 1]} : vector<32x768xbf16> to vector<32x640xbf16>
    %c224_113 = arith.constant 224 : index
    %c0_114 = arith.constant 0 : index
    %121 = vector.load %arg11[%c224_113, %c0_114] : memref<288x640xbf16, #tpu.memory_space<vmem>>, vector<32x640xbf16>
    tpu.vector_store %arg11[%c224_113, %c0_114], %120 {strides = array<i32>} : memref<288x640xbf16, #tpu.memory_space<vmem>>, vector<32x640xbf16>,
    %122 = vector.extract_strided_slice %105 {offsets = [0, 50], sizes = [32, 640], strides = [1, 1]} : vector<32x768xbf16> to vector<32x640xbf16>
    %c256_115 = arith.constant 256 : index
    %c0_116 = arith.constant 0 : index
    %123 = vector.load %arg11[%c256_115, %c0_116] : memref<288x640xbf16, #tpu.memory_space<vmem>>, vector<32x640xbf16>
    tpu.vector_store %arg11[%c256_115, %c0_116], %122 {strides = array<i32>} : memref<288x640xbf16, #tpu.memory_space<vmem>>, vector<32x640xbf16>,
    %c3 = arith.constant 3 : index
    %c0_117 = arith.constant 0 : index
    %c0_118 = arith.constant 0 : index
    %124 = vector.load %arg4[%c3, %c0_117, %c0_118] : memref<4x32x288xbf16, #tpu.memory_space<vmem>>, vector<1x32x288xbf16>
    %125 = vector.shape_cast %124 : vector<1x32x288xbf16> to vector<32x288xbf16>
    %c0_119 = arith.constant 0 : index
    %c0_120 = arith.constant 0 : index
    %126 = vector.load %arg11[%c0_119, %c0_120] : memref<288x640xbf16, #tpu.memory_space<vmem>>, vector<288x640xbf16>
    %cst_121 = arith.constant dense<0.000000e+00> : vector<32x640xf32>
    %127 = tpu.matmul %125, %126, %cst_121 {dimension_numbers = #tpu.dot_dimension_numbers<[1], [0], [0], [1], [0, 0, 1, 1], [], []>} : vector<32x288xbf16>, vector<288x640xbf16>, vector<32x640xf32> -> vector<32x640xf32>
    %c3_122 = arith.constant 3 : index
    %c0_123 = arith.constant 0 : index
    %c0_124 = arith.constant 0 : index
    %128 = vector.load %arg5[%c3_122, %c0_123, %c0_124] : memref<4x32x1xf32, #tpu.memory_space<vmem>>, vector<1x32x1xf32>
    %129 = vector.shape_cast %128 : vector<1x32x1xf32> to vector<32x1xf32>
    %130 = vector.broadcast %129 : vector<32x1xf32> to vector<32x640xf32>
    %131 = arith.addf %127, %130 : vector<32x640xf32>
    %cst_125 = arith.constant 0.000000e+00 : f32
    %132 = vector.broadcast %cst_125 : f32 to vector<32x640xf32>
    %133 = arith.maximumf %131, %132 : vector<32x640xf32>
    %134 = arith.truncf %133 : vector<32x640xf32> to vector<32x640xbf16>
    %c0_126 = arith.constant 0 : index
    %c0_127 = arith.constant 0 : index
    %135 = vector.load %arg9[%c0_126, %c0_127] : memref<32x768xbf16, #tpu.memory_space<vmem>>, vector<32x640xbf16>
    tpu.vector_store %arg9[%c0_126, %c0_127], %134 {strides = array<i32>} : memref<32x768xbf16, #tpu.memory_space<vmem>>, vector<32x640xbf16>,
    %c0_128 = arith.constant 0 : index
    %c0_129 = arith.constant 0 : index
    %136 = vector.load %arg6[%c0_128, %c0_129] : memref<8x32xbf16, #tpu.memory_space<vmem>>, vector<8x32xbf16>
    %c0_130 = arith.constant 0 : index
    %c0_131 = arith.constant 0 : index
    %137 = vector.load %arg9[%c0_130, %c0_131] : memref<32x768xbf16, #tpu.memory_space<vmem>>, vector<32x640xbf16>
    %cst_132 = arith.constant dense<0.000000e+00> : vector<8x640xf32>
    %138 = tpu.matmul %136, %137, %cst_132 {dimension_numbers = #tpu.dot_dimension_numbers<[1], [0], [0], [1], [0, 0, 1, 1], [], []>} : vector<8x32xbf16>, vector<32x640xbf16>, vector<8x640xf32> -> vector<8x640xf32>
    %c0_133 = arith.constant 0 : index
    %c0_134 = arith.constant 0 : index
    %139 = vector.load %arg7[%c0_133, %c0_134] : memref<8x1xf32, #tpu.memory_space<vmem>>, vector<8x1xf32>
    %140 = vector.broadcast %139 : vector<8x1xf32> to vector<8x640xf32>
    %141 = arith.addf %138, %140 : vector<8x640xf32>
    %c0_135 = arith.constant 0 : index
    %c0_136 = arith.constant 0 : index
    %c0_137 = arith.constant 0 : index
    %142 = vector.load %arg8[%c0_135, %c0_136, %c0_137] : memref<1x8x640xf32, #tpu.memory_space<vmem>>, vector<1x8x640xf32>
    %143 = vector.shape_cast %142 : vector<1x8x640xf32> to vector<8x640xf32>
    %144 = vector.shape_cast %141 : vector<8x640xf32> to vector<1x8x640xf32>
    tpu.vector_store %arg8[%c0_135, %c0_136, %c0_137], %144 {strides = array<i32>} : memref<1x8x640xf32, #tpu.memory_space<vmem>>, vector<1x8x640xf32>,
    return
  }
  func.func @transform_0(%arg0: i32) -> (i32, i32, i32) {
    %c0_i32 = arith.constant 0 : i32
    %c0_i32_0 = arith.constant 0 : i32
    %c0_i32_1 = arith.constant 0 : i32
    return %arg0, %c0_i32, %c0_i32_0 : i32, i32, i32
  }
  func.func @transform_1(%arg0: i32) -> (i32, i32) {
    %c0_i32 = arith.constant 0 : i32
    %c0_i32_0 = arith.constant 0 : i32
    %c0_i32_1 = arith.constant 0 : i32
    return %c0_i32, %c0_i32_0 : i32, i32
  }
  func.func @transform_2(%arg0: i32) -> (i32, i32) {
    %c0_i32 = arith.constant 0 : i32
    %c0_i32_0 = arith.constant 0 : i32
    %c0_i32_1 = arith.constant 0 : i32
    return %c0_i32, %c0_i32_0 : i32, i32
  }
  func.func @transform_3(%arg0: i32) -> (i32, i32, i32) {
    %c0_i32 = arith.constant 0 : i32
    %c0_i32_0 = arith.constant 0 : i32
    %c0_i32_1 = arith.constant 0 : i32
    %c0_i32_2 = arith.constant 0 : i32
    return %c0_i32, %c0_i32_0, %c0_i32_1 : i32, i32, i32
  }
  func.func @transform_4(%arg0: i32) -> (i32, i32, i32) {
    %c0_i32 = arith.constant 0 : i32
    %c0_i32_0 = arith.constant 0 : i32
    %c0_i32_1 = arith.constant 0 : i32
    %c0_i32_2 = arith.constant 0 : i32
    return %c0_i32, %c0_i32_0, %c0_i32_1 : i32, i32, i32
  }
  func.func @transform_5(%arg0: i32) -> (i32, i32) {
    %c0_i32 = arith.constant 0 : i32
    %c0_i32_0 = arith.constant 0 : i32
    %c0_i32_1 = arith.constant 0 : i32
    return %c0_i32, %c0_i32_0 : i32, i32
  }
  func.func @transform_6(%arg0: i32) -> (i32, i32) {
    %c0_i32 = arith.constant 0 : i32
    %c0_i32_0 = arith.constant 0 : i32
    %c0_i32_1 = arith.constant 0 : i32
    return %c0_i32, %c0_i32_0 : i32, i32
  }
  func.func @transform_7(%arg0: i32) -> (i32, i32, i32) {
    %c0_i32 = arith.constant 0 : i32
    %c0_i32_0 = arith.constant 0 : i32
    %c0_i32_1 = arith.constant 0 : i32
    return %arg0, %c0_i32, %c0_i32_0 : i32, i32, i32
  }
}

</mosaic_0001>

<bundles_post_ra>
// kernel: tpu_custom_call.1
= control target key start
LH: loop header
LB: loop body
LE: loop exit
PB: predicated region body
PF: predicated region fallthrough
CT: control target
= control target key end

     0   :  { %12 = vsyncpa [#allocation6], 0  ;;  %s13011_s0 = inlined_call_operand.vmem [shape: f32[2,32,1], index: 0, kind: input, shape index: {}]   ;;  %s13012_s1 = inlined_call_operand.hbm [shape: f32[32,640], index: 1, kind: input, shape index: {}]   ;;  %s13013_s2 = inlined_call_operand.hbm [shape: f32[32,640], index: 2, kind: input, shape index: {}]   ;;  %s13014_s3 = inlined_call_operand.vmem [shape: bf16[4,32,288], index: 3, kind: input, shape index: {}]   ;;  %s13015_s4 = inlined_call_operand.vmem [shape: f32[4,32,1], index: 4, kind: input, shape index: {}]   ;;  %s13016_s5 = inlined_call_operand.vmem [shape: bf16[8,32], index: 5, kind: input, shape index: {}]   ;;  %s13017_s6 = inlined_call_operand.vmem [shape: f32[8,1], index: 6, kind: input, shape index: {}]   ;;  %s13018_s7 = inlined_call_operand.hbm [shape: f32[2,8,640], index: 7, kind: output, shape index: {}]  }
   0x1   :  { %13 = vsyncpa [#allocation9], 0 }
   0x2   :  { %14 = vsyncpa [#allocation7], 0 }
   0x3   :  { %16 = vsyncpa [#allocation7 + $0x1], 0  ;;  %s8885_s24 = smov 0   ;;  %s8887_s25 = smov 0  }
   0x4   :  { %s8889_s26 = smov 0   ;;  %s8891_s27 = smov 0  }
   0x5 LB: > { %s8906_s28 = sadd.s32 4294967295, %s8827_s27   ;;  %s7713_s29 = sadd.s32 4294967294, %s8827_s27   ;;  %s8827_s27 = sphi %s8891_s27, %s13406_s27   ;;  %s8823_s26 = sphi %s8889_s26, %s13405_s26   ;;  %s8819_s25 = sphi %s8887_s25, %s13404_s25   ;;  %s8815_s24 = sphi %s8885_s24, %s13403_s24  }
   0x6   : > { %s8910_s30 = sadd.s32 1, %s8827_s27   ;;  %s181_s8 = sadd.s32 1, %s8823_s26 }
   0x7   : > { %s178_s9 = ssub.s32 %s8827_s27, %s8910_s30  ;;  %p191_p0 = scmp.ne.s32.totalorder %s8823_s26, %s8819_s25 }
   0x8   : > { %p179_p1 = scmp.eq.s32.totalorder %s178_s9, 0  ;;  %p192_p2 = scmp.eq.s32.totalorder %s8906_s28, 1 }
   0x9   : > { %p197_p3 = scmp.ne.s32.totalorder %s8819_s25, %s8815_s24  ;;  %p198_p4 = scmp.eq.s32.totalorder %s7713_s29, 1 }
   0xa   : > { %s8921_s10 = scalar_select %p179_p1, %s8823_s26, %s181_s8  }
   0xb   : > { %p8923_p5 = por %p192_p2, %p191_p0  ;;  %p8927_p6 = por %p198_p4, %p197_p3 }
   0xc   : > { %p7714_p7 = scmp.ge.s32.totalorder %s8827_s27, 1  ;;  %p205_p8 = scmp.lt.s32.totalorder %s8827_s27, 3 }
   0xd   : > { %s13175_s12 = scalar_select %p8927_p6, 1, 0 }
   0xe   : > { %p13019_p9 = scmp.eq.s32.totalorder %s8906_s28, 0  ;;  %p8934_p10 = pnand %p7714_p7, %p205_p8 }
   0xf   : > { %s8829_s14 = smov [#allocation5]   ;;  %s8830_s17 = smov [#allocation8]  }
  0x10   : > { %s217_s15 = sshll.u32 %s8829_s14, 4  ;;  %p8487_p11 = pneg %p8934_p10  ;;  %s218_s15 = int_to_ptr.vmem [resolvable:$true] %s217_s15 }
  0x11   : > { %s230_s18 = sshll.u32 %s8830_s17, 4  ;;  %s8718_s19 = scalar_lea.vmem %s218_s15, 2560  ;;  %s231_s18 = int_to_ptr.vmem [resolvable:$true] %s230_s18 }
  0x12   : > { %p8942_p12 = pnand %p13019_p9, %p8487_p11  ;;  %p8719_p0 = scmp.ne.s32.totalorder %s218_s15, %s8718_s19 }
  0x13   : > { %p8726_p3 = scmp.lt.s32.totalorder %s218_s15, %s218_s15  ;;  %p8727_p4 = scmp.lt.s32.totalorder %s8718_s19, %s8718_s19 }
  0x14   : > { %p8709_p13 = pneg %p8942_p12 }
  0x15   : > { %p8728_p7 = por %p8727_p4, %p8726_p3 }
  0x16   : > { %p8721_p1 = pnand %p8719_p0, %p8709_p13 }
  0x18   : > { %p8722_p2 = pneg %p8721_p1 }
  0x1a   : > { %p8729_p8 = pnand %p8728_p7, %p8722_p2 }
  0x1c   : > { %8732 = shalt.err (!%p8729_p8)
}
  0x1d   : > { %s8831_s20 = smov 640   ;;  %s8832_s21 = smov 40  }
  0x1e   : > { %8490 = dma.hbm_to_vmem [thread:$0]  (!%p8942_p12), %s13012_s1, 2560, %s218_s15, [#allocation6], %s8831_s20, %s8831_s20, %s8832_s21  }
  0x1f   : > { %s8744_s29 = scalar_lea.vmem %s231_s18, 2560  ;;  %p8752_p9 = scmp.lt.s32.totalorder %s231_s18, %s231_s18 }
  0x20   : > { %p8745_p11 = scmp.ne.s32.totalorder %s231_s18, %s8744_s29  ;;  %p8753_p6 = scmp.lt.s32.totalorder %s8744_s29, %s8744_s29 }
  0x22   : > { %p8747_p0 = pnand %p8745_p11, %p8709_p13  ;;  %p8754_p3 = por %p8753_p6, %p8752_p9 }
  0x24   : > { %p8748_p1 = pneg %p8747_p0 }
  0x26   : > { %p8755_p2 = pnand %p8754_p3, %p8748_p1 }
  0x28   : > { %8758 = shalt.err (!%p8755_p2)
}
  0x29   : > { %8493 = dma.hbm_to_vmem [thread:$0]  (!%p8942_p12), %s13013_s2, 2560, %s231_s18, [#allocation9], %s8831_s20, %s8831_s20, %s8832_s21  }
  0x2a   : > { %266 = sbr.rel (%p8934_p10) target bundleno = 2498 (0x9c2), region = 48 }
  0x2f   : > { %p13178_p4 = scmp.eq.s32.totalorder %s8906_s28, 0 }
  0x31   : > { %8802 = dma.done.wait (%p13178_p4), [#allocation6], 2560   ;;  %p13179_p13 = pmov %p13178_p4 }
  0x32   : > { %p13180_p7 = pmov %p13178_p4 }
  0x33   : > { %8804 = vsyncadd (%p13179_p13), [#allocation6], 4294964736 }
  0x34   : > { %8806 = dma.done.wait (%p13180_p7), [#allocation9], 2560   ;;  %p13181_p6 = pmov %p13178_p4 }
  0x35   : > { %p302_p9 = scmp.lt.s32.totalorder %s8906_s28, 1  ;;  %v13022_v0 = vmov 0   ;;  %v318_v5 = vld [vmem:[#allocation5 + $0x50] sm:$0xff]  ;;  %v319_v6 = vld [vmem:[#allocation5 + $0x58] sm:$0xff]  ;;  %v320_v7 = vld [vmem:[#allocation5 + $0x60] sm:$0xff]  ;;  %s8834_s18 = smov 104  }
  0x36   : > { %8808 = vsyncadd (%p13181_p6), [#allocation9], 4294964736  ;;  %8550 = vset.pattern.permute.xlu0 %v13022_v0  ;;  %488 = vst [vmem:[#allocation2 + $0x14] sm:$0xf] %v13022_v0  ;;  %8551 = vset.pattern.permute.xlu1 %v13022_v0  ;;  %v321_v8 = vld [vmem:[#allocation5 + $0x68] sm:$0xff]  ;;  %v322_v9 = vld [vmem:[#allocation5 + $0x70] sm:$0xff] }
  0x37   : > { %489 = vst [vmem:[#allocation2 + $0x2c] sm:$0xf] %v13022_v0  ;;  %490 = vst [vmem:[#allocation2 + $0x44] sm:$0xf] %v13022_v0  ;;  %s303_s13 = scalar_select %p302_p9, %s8906_s28, 1  ;;  %1911 = vmatprep.mubr.bf16.mxu1 %v13022_v0  ;;  %v338_v10 = vld [vmem:[#allocation8 + $0x50] sm:$0xff] }
  0x38   : > { %491 = vst [vmem:[#allocation2 + $0x5c] sm:$0xf] %v13022_v0  ;;  %492 = vst [vmem:[#allocation3 + $0x14] sm:$0xf] %v13022_v0  ;;  %v339_v11 = vld [vmem:[#allocation8 + $0x58] sm:$0xff]  ;;  %v340_v12 = vld [vmem:[#allocation8 + $0x60] sm:$0xff] }
  0x39   : > { %493 = vst [vmem:[#allocation3 + $0x2c] sm:$0xf] %v13022_v0  ;;  %494 = vst [vmem:[#allocation3 + $0x44] sm:$0xf] %v13022_v0  ;;  %s8243_s14 = sshll.u32 %s303_s13, 5  ;;  %v308_v13 = vld [vmem:[#allocation5] sm:$0xff] }
  0x3a   : > { %495 = vst [vmem:[#allocation3 + $0x5c] sm:$0xf] %v13022_v0  ;;  %s306_s17 = scalar_lea.vmem %s13011_s0, %s8243_s14  ;;  %v309_v14 = vld [vmem:[#allocation5 + $0x8] sm:$0xff]  ;;  %v310_v15 = vld [vmem:[#allocation5 + $0x10] sm:$0xff]  ;;  %v323_v19 = vld [vmem:[#allocation5 + $0x78] sm:$0xff]  ;;  %s8835_s19 = smov 78  }
  0x3b   : > { %v350_v1 = vld [vmem:[%s306_s17 + $0x10] sm:$0xff]  ;;  %v348_v2 = vld [vmem:[%s306_s17] sm:$0xff]  ;;  %v351_v3 = vld [vmem:[%s306_s17 + $0x18] sm:$0xff]  ;;  %s8836_s20 = smov 126   ;;  %s8837_s21 = smov 127   ;;  %vm568_vm0 = vcmask 1043456  }
  0x3c   : > { %364 = vperm.xlu0 %8550, %v350_v1   ;;  %354 = vperm.xlu1 %8551, %v348_v2   ;;  %v349_v4 = vld [vmem:[%s306_s17 + $0x8] sm:$0xff]  ;;  %v341_v17 = vld [vmem:[#allocation8 + $0x68] sm:$0xff]  ;;  %v342_v18 = vld [vmem:[#allocation8 + $0x70] sm:$0xff]  ;;  %s8838_s22 = smov 79   ;;  %s8839_s23 = smov 80   ;;  %vm732_vm1 = vcmask 850944  }
  0x3d   : > { %v311_v25 = vld [vmem:[#allocation5 + $0x18] sm:$0xff]  ;;  %v312_v26 = vld [vmem:[#allocation5 + $0x20] sm:$0xff]  ;;  %v325_v30 = vld [vmem:[#allocation5 + $0x88] sm:$0xff]  ;;  %s8840_s29 = smov 102   ;;  %vm1137_vm2 = vcmask 637952   ;;  %vm651_vm3 = vcmask 1031168  }
  0x3e   : > { %v328_v27 = vld [vmem:[#allocation8] sm:$0xff]  ;;  %v326_v31 = vld [vmem:[#allocation5 + $0x90] sm:$0xff]  ;;  %v327_v39 = vld [vmem:[#allocation5 + $0x98] sm:$0xff]  ;;  %s8841_s8 = smov 103   ;;  %vm1819_vm4 = vcmask 261120   ;;  %vm570_vm5 = vcmask 1039360  }
  0x3f   : > { %v324_v29 = vld [vmem:[#allocation5 + $0x80] sm:$0xff]  ;;  %v343_v40 = vld [vmem:[#allocation8 + $0x78] sm:$0xff]  ;;  %v345_v44 = vld [vmem:[#allocation8 + $0x88] sm:$0xff]  ;;  %vm1056_vm6 = vcmask 646144   ;;  %vm975_vm7 = vcmask 654336   ;;  %vm894_vm8 = vcmask 834560  }
  0x40   : > { %369 = vperm.xlu0 %8550, %v351_v3   ;;  %359 = vperm.xlu1 %8551, %v349_v4   ;;  %v344_v41 = vld [vmem:[#allocation8 + $0x80] sm:$0xff]  ;;  %v329_v45 = vld [vmem:[#allocation8 + $0x8] sm:$0xff]  ;;  %v330_v46 = vld [vmem:[#allocation8 + $0x10] sm:$0xff]  ;;  %vm813_vm9 = vcmask 842752   ;;  %vm8843_vm10 = vmmov 0   ;;  %s299_s14 = sand.u32 1, %s8819_s25  }
  0x41   : > { %v346_v52 = vld [vmem:[#allocation8 + $0x90] sm:$0xff]  ;;  %v347_v53 = vld [vmem:[#allocation8 + $0x98] sm:$0xff]  ;;  %v332_v61 = vld [vmem:[#allocation8 + $0x20] sm:$0xff]  ;;  %s8475_s15 = smul.u32 40, %s299_s14 }
  0x42   : > { %v331_v56 = vld [vmem:[#allocation8 + $0x18] sm:$0xff]  ;;  %v313_v4 = vld [vmem:[#allocation5 + $0x28] sm:$0xff]  ;;  %s8476_s16 = smul.u32 640, %s8906_s28  ;;  %s8844_s28 = smov [#allocation10]  }
  0x44   : > { %s12970_s17 = scalar_lea.hbm %s13018_s7, %s8476_s16 }
  0xb7   : > { %v365_v16 = vpop.permute.xlu0 %364  ;;  %v355_v24 = vpop.permute.xlu1 %354 }
  0xb8   : > { %v382_v20 = vmul.f32 %v365_v16, %v318_v5  ;;  %v383_v21 = vmul.f32 %v365_v16, %v319_v6  ;;  %v384_v22 = vmul.f32 %v365_v16, %v320_v7  ;;  %v385_v23 = vmul.f32 %v365_v16, %v321_v8  ;;  %v314_v5 = vld [vmem:[#allocation5 + $0x30] sm:$0xff] }
  0xb9   : > { %v386_v28 = vmul.f32 %v365_v16, %v322_v9  ;;  %v372_v32 = vmul.f32 %v355_v24, %v308_v13  ;;  %v373_v33 = vmul.f32 %v355_v24, %v309_v14  ;;  %v374_v34 = vmul.f32 %v355_v24, %v310_v15 }
  0xba   : > { %v8990_v35 = vadd.f32 %v382_v20, %v338_v10  ;;  %v8992_v36 = vadd.f32 %v383_v21, %v339_v11  ;;  %v8994_v37 = vadd.f32 %v384_v22, %v340_v12  ;;  %v8996_v38 = vadd.f32 %v385_v23, %v341_v17  ;;  %v315_v10 = vld [vmem:[#allocation5 + $0x38] sm:$0xff]  ;;  %v316_v11 = vld [vmem:[#allocation5 + $0x40] sm:$0xff]  ;;  %v317_v12 = vld [vmem:[#allocation5 + $0x48] sm:$0xff] }
  0xbb   : > { %v406_v42 = vadd.f32 %v386_v28, %v342_v18  ;;  %v370_v43 = vpop.permute.xlu0 %369  ;;  %v375_v47 = vmul.f32 %v355_v24, %v311_v25  ;;  %v376_v48 = vmul.f32 %v355_v24, %v312_v26  ;;  %v8998_v49 = vadd.f32 %v372_v32, %v328_v27  ;;  %v360_v3 = vpop.permute.xlu1 %359  ;;  %v333_v17 = vld [vmem:[#allocation8 + $0x28] sm:$0xff]  ;;  %v334_v22 = vld [vmem:[#allocation8 + $0x30] sm:$0xff]  ;;  %v335_v23 = vld [vmem:[#allocation8 + $0x38] sm:$0xff] }
  0xbc   : > { %v9002_v50 = vpack.c.bf16 %v8992_v36, %v8990_v35  ;;  %v9006_v51 = vpack.c.bf16 %v8996_v38, %v8994_v37  ;;  %v387_v54 = vmul.f32 %v370_v43, %v323_v19  ;;  %v388_v55 = vmul.f32 %v370_v43, %v324_v29  ;;  %v337_v18 = vld [vmem:[#allocation8 + $0x48] sm:$0xff]  ;;  %v336_v24 = vld [vmem:[#allocation8 + $0x40] sm:$0xff] }
  0xbd   : > { %v8252_v57 = vpack.c.bf16 %v406_v42, %v406_v42  ;;  %v389_v58 = vmul.f32 %v370_v43, %v325_v30  ;;  %v390_v59 = vmul.f32 %v370_v43, %v326_v31  ;;  %v391_v60 = vmul.f32 %v370_v43, %v327_v39 }
  0xbe   : > { %v9008_v62 = vadd.f32 %v387_v54, %v343_v40  ;;  %v9010_v63 = vadd.f32 %v388_v55, %v344_v41  ;;  %v9012_v1 = vadd.f32 %v373_v33, %v329_v45  ;;  %v9014_v2 = vadd.f32 %v374_v34, %v330_v46  ;;  %709 = vrot.lane.b32.xlu1 %v9006_v51, %s8834_s18 }
  0xbf   : > { %484 = vst [vmem:[#allocation2 + $0x40] sm:$0xf] %v8252_v57  ;;  %v9018_v6 = vadd.f32 %v389_v58, %v345_v44  ;;  %v9020_v7 = vadd.f32 %v390_v59, %v346_v52  ;;  %v411_v8 = vadd.f32 %v391_v60, %v347_v53  ;;  %v9022_v9 = vadd.f32 %v375_v47, %v331_v56 }
  0xc0   : > { %707 = vrot.lane.b32.xlu0 %v9002_v50, %s8834_s18  ;;  %v9028_v13 = vpack.c.bf16 %v9010_v63, %v9008_v62  ;;  %v396_v14 = vadd.f32 %v376_v48, %v332_v61  ;;  %v377_v19 = vmul.f32 %v360_v3, %v313_v4  ;;  %v378_v20 = vmul.f32 %v360_v3, %v314_v5 }
  0xc1   : > { %v9032_v15 = vpack.c.bf16 %v9020_v7, %v9018_v6  ;;  %v8255_v16 = vpack.c.bf16 %v411_v8, %v411_v8  ;;  %v379_v25 = vmul.f32 %v360_v3, %v315_v10  ;;  %v380_v26 = vmul.f32 %v360_v3, %v316_v11 }
  0xc2   : > { %v8246_v21 = vpack.c.bf16 %v396_v14, %v396_v14  ;;  %v381_v27 = vmul.f32 %v360_v3, %v317_v12  ;;  %v9036_v28 = vpack.c.bf16 %v9012_v1, %v8998_v49  ;;  %v9040_v29 = vpack.c.bf16 %v9022_v9, %v9014_v2 }
  0xc3   : > { %487 = vst [vmem:[#allocation2 + $0x58] sm:$0xf] %v8255_v16  ;;  %715 = vrot.lane.b32.xlu1 %v9032_v15, %s8834_s18  ;;  %v9046_v31 = vadd.f32 %v377_v19, %v333_v17  ;;  %v9048_v32 = vadd.f32 %v378_v20, %v334_v22  ;;  %v9050_v33 = vadd.f32 %v379_v25, %v335_v23 }
  0xc4   : > { %713 = vrot.lane.b32.xlu0 %v9028_v13, %s8834_s18  ;;  %478 = vst [vmem:[#allocation2 + $0x10] sm:$0xf] %v8246_v21  ;;  %v401_v30 = vadd.f32 %v381_v27, %v337_v18  ;;  %v9052_v34 = vadd.f32 %v380_v26, %v336_v24 }
  0xc5   : > { %v9063_v41 = vpack.c.bf16 %v9048_v32, %v9046_v31 }
  0xc6   : > { %v8249_v39 = vpack.c.bf16 %v401_v30, %v401_v30  ;;  %v9054_v40 = vld [vmem:[#allocation2 + $0x40] sm:$0xff]  ;;  %v9067_v42 = vpack.c.bf16 %v9052_v34, %v9050_v33 }
  0xc7   : > { %697 = vrot.lane.b32.xlu1 %v9040_v29, %s8834_s18  ;;  %516 = vst [vmem:[#allocation4 + $0x38] sm:$0xf] %v9054_v40 }
  0xc8   : > { %695 = vrot.lane.b32.xlu0 %v9036_v28, %s8834_s18  ;;  %481 = vst [vmem:[#allocation2 + $0x28] sm:$0xf] %v8249_v39 }
  0xca   : > { %v9069_v43 = vld [vmem:[#allocation2 + $0x58] sm:$0xff] }
  0xcb   : > { %703 = vrot.lane.b32.xlu1 %v9067_v42, %s8834_s18  ;;  %519 = vst [vmem:[#allocation4 + $0x4c] sm:$0xf] %v9069_v43  ;;  %v9076_v44 = vld [vmem:[#allocation2 + $0x10] sm:$0xff] }
  0xcc   : > { %701 = vrot.lane.b32.xlu0 %v9063_v41, %s8834_s18  ;;  %510 = vst [vmem:[#allocation4 + $0x10] sm:$0xf] %v9076_v44 }
  0xcf   : > { %1114 = vrot.lane.b32.xlu1 %v9006_v51, %s8835_s19  ;;  %v9083_v45 = vld [vmem:[#allocation2 + $0x28] sm:$0xff] }
  0xd0   : > { %1112 = vrot.lane.b32.xlu0 %v9002_v50, %s8835_s19  ;;  %513 = vst [vmem:[#allocation4 + $0x24] sm:$0xf] %v9083_v45 }
  0xd3   : > { %1120 = vrot.lane.b32.xlu1 %v9032_v15, %s8835_s19 }
  0xd4   : > { %1118 = vrot.lane.b32.xlu0 %v9028_v13, %s8835_s19 }
  0xd7   : > { %628 = vrot.lane.b32.xlu1 %v9006_v51, %s8836_s20 }
  0xd8   : > { %626 = vrot.lane.b32.xlu0 %v9002_v50, %s8836_s20 }
  0xdb   : > { %634 = vrot.lane.b32.xlu1 %v9032_v15, %s8836_s20 }
  0xdc   : > { %632 = vrot.lane.b32.xlu0 %v9028_v13, %s8836_s20 }
  0xdf   : > { %1102 = vrot.lane.b32.xlu1 %v9040_v29, %s8835_s19 }
  0xe0   : > { %1100 = vrot.lane.b32.xlu0 %v9036_v28, %s8835_s19 }
  0xe3   : > { %1108 = vrot.lane.b32.xlu1 %v9067_v42, %s8835_s19 }
  0xe4   : > { %1106 = vrot.lane.b32.xlu0 %v9063_v41, %s8835_s19 }
  0xe7   : > { %616 = vrot.lane.b32.xlu1 %v9040_v29, %s8836_s20 }
  0xe8   : > { %614 = vrot.lane.b32.xlu0 %v9036_v28, %s8836_s20 }
  0xeb   : > { %622 = vrot.lane.b32.xlu1 %v9067_v42, %s8836_s20 }
  0xec   : > { %620 = vrot.lane.b32.xlu0 %v9063_v41, %s8836_s20 }
  0xef   : > { %717 = vrot.lane.b32.xlu1 %v9069_v43, %s8834_s18 }
  0xf0   : > { %711 = vrot.lane.b32.xlu0 %v9054_v40, %s8834_s18 }
  0xf3   : > { %546 = vrot.lane.b32.xlu1 %v9006_v51, %s8837_s21 }
  0xf4   : > { %544 = vrot.lane.b32.xlu0 %v9002_v50, %s8837_s21 }
  0xf7   : > { %552 = vrot.lane.b32.xlu1 %v9032_v15, %s8837_s21 }
  0xf8   : > { %550 = vrot.lane.b32.xlu0 %v9028_v13, %s8837_s21 }
  0xfb   : > { %705 = vrot.lane.b32.xlu1 %v9083_v45, %s8834_s18 }
  0xfc   : > { %699 = vrot.lane.b32.xlu0 %v9076_v44, %s8834_s18 }
  0xff   : > { %534 = vrot.lane.b32.xlu1 %v9040_v29, %s8837_s21 }
 0x100   : > { %532 = vrot.lane.b32.xlu0 %v9036_v28, %s8837_s21 }
 0x103   : > { %540 = vrot.lane.b32.xlu1 %v9067_v42, %s8837_s21 }
 0x104   : > { %538 = vrot.lane.b32.xlu0 %v9063_v41, %s8837_s21 }
 0x107   : > { %636 = vrot.lane.b32.xlu1 %v9069_v43, %s8836_s20 }
 0x108   : > { %630 = vrot.lane.b32.xlu0 %v9054_v40, %s8836_s20 }
 0x10b   : > { %624 = vrot.lane.b32.xlu1 %v9083_v45, %s8836_s20 }
 0x10c   : > { %618 = vrot.lane.b32.xlu0 %v9076_v44, %s8836_s20 }
 0x10f   : > { %554 = vrot.lane.b32.xlu1 %v9069_v43, %s8837_s21 }
 0x110   : > { %548 = vrot.lane.b32.xlu0 %v9054_v40, %s8837_s21 }
 0x113   : > { %1033 = vrot.lane.b32.xlu1 %v9006_v51, %s8838_s22 }
 0x114   : > { %1031 = vrot.lane.b32.xlu0 %v9002_v50, %s8838_s22 }
 0x117   : > { %1039 = vrot.lane.b32.xlu1 %v9032_v15, %s8838_s22 }
 0x118   : > { %1037 = vrot.lane.b32.xlu0 %v9028_v13, %s8838_s22 }
 0x11b   : > { %542 = vrot.lane.b32.xlu1 %v9083_v45, %s8837_s21 }
 0x11c   : > { %536 = vrot.lane.b32.xlu0 %v9076_v44, %s8837_s21 }
 0x11f   : > { %1021 = vrot.lane.b32.xlu1 %v9040_v29, %s8838_s22 }
 0x120   : > { %1019 = vrot.lane.b32.xlu0 %v9036_v28, %s8838_s22 }
 0x123   : > { %1027 = vrot.lane.b32.xlu1 %v9067_v42, %s8838_s22 }
 0x124   : > { %1025 = vrot.lane.b32.xlu0 %v9063_v41, %s8838_s22 }
 0x127   : > { %952 = vrot.lane.b32.xlu1 %v9006_v51, %s8839_s23 }
 0x128   : > { %950 = vrot.lane.b32.xlu0 %v9002_v50, %s8839_s23 }
 0x12b   : > { %958 = vrot.lane.b32.xlu1 %v9032_v15, %s8839_s23 }
 0x12c   : > { %956 = vrot.lane.b32.xlu0 %v9028_v13, %s8839_s23 }
 0x12f   : > { %940 = vrot.lane.b32.xlu1 %v9040_v29, %s8839_s23 }
 0x130   : > { %938 = vrot.lane.b32.xlu0 %v9036_v28, %s8839_s23  ;;  %v9182_v46 = vpop.permute.xlu1 %709 }
 0x131   : > { %v726_v48 = vrot.slane %v9182_v46, 4 }
 0x132   : > { %v708_v47 = vpop.permute.xlu0 %707 }
 0x133   : > { %v725_v52 = vrot.slane %v708_v47, 4  ;;  %946 = vrot.lane.b32.xlu1 %v9067_v42, %s8839_s23 }
 0x134   : > { %944 = vrot.lane.b32.xlu0 %v9063_v41, %s8839_s23 }
 0x135   : > { %v9189_v53 = vpop.permute.xlu1 %715  ;;  %v742_v55 = vsel %vm568_vm0, %v725_v52, %v726_v48 }
 0x136   : > { %v714_v54 = vpop.permute.xlu0 %713  ;;  %v729_v56 = vrot.slane %v9189_v53, 4  ;;  %v743_v59 = vsel %vm732_vm1, %v708_v47, %v742_v55 }
 0x137   : > { %v728_v57 = vrot.slane %v714_v54, 4  ;;  %1041 = vrot.lane.b32.xlu1 %v9069_v43, %s8838_s22 }
 0x138   : > { %1035 = vrot.lane.b32.xlu0 %v9054_v40, %s8838_s22 }
 0x139   : > { %v747_v58 = vsel %vm568_vm0, %v728_v57, %v729_v56  ;;  %v9204_v61 = vpop.permute.xlu1 %697 }
 0x13a   : > { %v748_v60 = vsel %vm732_vm1, %v714_v54, %v747_v58  ;;  %v696_v3 = vpop.permute.xlu0 %695  ;;  %v720_v4 = vrot.slane %v9204_v61, 4 }
 0x13b   : > { %v719_v5 = vrot.slane %v696_v3, 4  ;;  %v7777_v8 = vcombine.high %v743_v59, %v748_v60  ;;  %v7776_v10 = vcombine.low %v743_v59, %v748_v60  ;;  %871 = vrot.lane.b32.xlu1 %v9006_v51, %s8840_s29 }
 0x13c   : > { %869 = vrot.lane.b32.xlu0 %v9002_v50, %s8840_s29 }
 0x13d   : > { %1826 = vmatprep.subr.bf16.mxu0 %v7777_v8  ;;  %v9211_v11 = vpop.permute.xlu1 %703  ;;  %v731_v14 = vsel %vm568_vm0, %v719_v5, %v720_v4 }
 0x13e   : > { %v702_v12 = vpop.permute.xlu0 %701  ;;  %1827 = vmatpush1.bf16.msra.mxu0 %v7776_v10  ;;  %v723_v16 = vrot.slane %v9211_v11, 4  ;;  %v733_v19 = vsel %vm732_vm1, %v696_v3, %v731_v14 }
 0x13f   : > { %v722_v17 = vrot.slane %v702_v12, 4  ;;  %877 = vrot.lane.b32.xlu1 %v9032_v15, %s8840_s29 }
 0x140   : > { %875 = vrot.lane.b32.xlu0 %v9028_v13, %s8840_s29 }
 0x141   : > { %v737_v18 = vsel %vm568_vm0, %v722_v17, %v723_v16  ;;  %v9226_v21 = vpop.permute.xlu1 %1114 }
 0x142   : > { %v738_v20 = vsel %vm732_vm1, %v702_v12, %v737_v18  ;;  %v1113_v22 = vpop.permute.xlu0 %1112  ;;  %v1131_v23 = vrot.slane %v9226_v21, 4 }
 0x143   : > { %v1130_v24 = vrot.slane %v1113_v22, 4  ;;  %v7772_v25 = vcombine.high %v733_v19, %v738_v20  ;;  %v7771_v26 = vcombine.low %v733_v19, %v738_v20  ;;  %1029 = vrot.lane.b32.xlu1 %v9083_v45, %s8838_s22 }
 0x144   : > { %1023 = vrot.lane.b32.xlu0 %v9076_v44, %s8838_s22 }
 0x145   : > { %1828 = vmatprep.subr.bf16.mxu0 %v7772_v25  ;;  %v9233_v27 = vpop.permute.xlu1 %1120  ;;  %v1147_v39 = vsel %vm568_vm0, %v1130_v24, %v1131_v23 }
 0x146   : > { %v1119_v30 = vpop.permute.xlu0 %1118  ;;  %1829 = vmatpush1.bf16.msra.mxu0 %v7771_v26  ;;  %v1134_v47 = vrot.slane %v9233_v27, 4  ;;  %v1148_v55 = vsel %vm1137_vm2, %v1113_v22, %v1147_v39 }
 0x147   : > { %v1133_v52 = vrot.slane %v1119_v30, 4  ;;  %859 = vrot.lane.b32.xlu1 %v9040_v29, %s8840_s29 }
 0x148   : > { %857 = vrot.lane.b32.xlu0 %v9036_v28, %s8840_s29 }
 0x149   : > { %v1152_v54 = vsel %vm568_vm0, %v1133_v52, %v1134_v47  ;;  %v9248_v58 = vpop.permute.xlu1 %628 }
 0x14a   : > { %v1153_v57 = vsel %vm1137_vm2, %v1119_v30, %v1152_v54  ;;  %v627_v59 = vpop.permute.xlu0 %626  ;;  %v645_v60 = vrot.slane %v9248_v58, 4 }
 0x14b   : > { %v644_v3 = vrot.slane %v627_v59, 4  ;;  %v7827_v5 = vcombine.high %v1148_v55, %v1153_v57  ;;  %v7826_v8 = vcombine.low %v1148_v55, %v1153_v57  ;;  %865 = vrot.lane.b32.xlu1 %v9067_v42, %s8840_s29 }
 0x14c   : > { %863 = vrot.lane.b32.xlu0 %v9063_v41, %s8840_s29 }
 0x14d   : > { %1891 = vmatprep.subr.bf16.mxu1 %v7827_v5  ;;  %v9255_v10 = vpop.permute.xlu1 %634  ;;  %v661_v14 = vsel %vm568_vm0, %v644_v3, %v645_v60 }
 0x14e   : > { %v633_v12 = vpop.permute.xlu0 %632  ;;  %1892 = vmatpush1.bf16.msra.mxu1 %v7826_v8  ;;  %v648_v17 = vrot.slane %v9255_v10, 4  ;;  %v662_v20 = vsel %vm651_vm3, %v627_v59, %v661_v14 }
 0x14f   : > { %v647_v18 = vrot.slane %v633_v12, 4  ;;  %960 = vrot.lane.b32.xlu1 %v9069_v43, %s8839_s23 }
 0x150   : > { %954 = vrot.lane.b32.xlu0 %v9054_v40, %s8839_s23 }
 0x151   : > { %v666_v19 = vsel %vm568_vm0, %v647_v18, %v648_v17  ;;  %v9270_v24 = vpop.permute.xlu1 %1102 }
 0x152   : > { %v667_v22 = vsel %vm651_vm3, %v633_v12, %v666_v19  ;;  %v1101_v25 = vpop.permute.xlu0 %1100  ;;  %v1125_v26 = vrot.slane %v9270_v24, 4 }
 0x153   : > { %v1124_v30 = vrot.slane %v1101_v25, 4  ;;  %v7767_v39 = vcombine.high %v662_v20, %v667_v22  ;;  %v7766_v52 = vcombine.low %v662_v20, %v667_v22  ;;  %790 = vrot.lane.b32.xlu1 %v9006_v51, %s8841_s8 }
 0x154   : > { %788 = vrot.lane.b32.xlu0 %v9002_v50, %s8841_s8 }
 0x155   : > { %1830 = vmatprep.subr.bf16.mxu0 %v7767_v39  ;;  %v9277_v54 = vpop.permute.xlu1 %1108  ;;  %v1136_v57 = vsel %vm568_vm0, %v1124_v30, %v1125_v26 }
 0x156   : > { %v1107_v55 = vpop.permute.xlu0 %1106  ;;  %1831 = vmatpush1.bf16.msra.mxu0 %v7766_v52  ;;  %v1128_v59 = vrot.slane %v9277_v54, 4  ;;  %v1138_v51 = vsel %vm1137_vm2, %v1101_v25, %v1136_v57  ;;  %v8553_v52 = vld [vmem:[%s13014_s3 + $0x4] ss:$12 sps:$4 sm:$0xff]  }
 0x157   : > { %v1127_v3 = vrot.slane %v1107_v55, 4  ;;  %796 = vrot.lane.b32.xlu1 %v9032_v15, %s8841_s8  ;;  %1858 = vmatprep.mubr.bf16.mxu0 %v8553_v52 }
 0x158   : > { %794 = vrot.lane.b32.xlu0 %v9028_v13, %s8841_s8  ;;  %v8552_v13 = vld [vmem:[%s13014_s3 + $0x8] ss:$12 sps:$4 sm:$0xff]  }
 0x159   : > { %v1142_v50 = vsel %vm568_vm0, %v1127_v3, %v1128_v59  ;;  %v9292_v8 = vpop.permute.xlu1 %616 }
 0x15a   : > { %v1143_v5 = vsel %vm1137_vm2, %v1107_v55, %v1142_v50  ;;  %v615_v12 = vpop.permute.xlu0 %614  ;;  %v639_v14 = vrot.slane %v9292_v8, 4 }
 0x15b   : > { %v638_v18 = vrot.slane %v615_v12, 4  ;;  %v7822_v19 = vcombine.high %v1138_v51, %v1143_v5  ;;  %v7821_v20 = vcombine.low %v1138_v51, %v1143_v5  ;;  %948 = vrot.lane.b32.xlu1 %v9083_v45, %s8839_s23 }
 0x15c   : > { %942 = vrot.lane.b32.xlu0 %v9076_v44, %s8839_s23 }
 0x15d   : > { %1893 = vmatprep.subr.bf16.mxu1 %v7822_v19  ;;  %v9302_v15 = vpop.permute.xlu1 %622  ;;  %v650_v25 = vsel %vm568_vm0, %v638_v18, %v639_v14 }
 0x15e   : > { %v621_v22 = vpop.permute.xlu0 %620  ;;  %1894 = vmatpush1.bf16.msra.mxu1 %v7821_v20  ;;  %v642_v30 = vrot.slane %v9302_v15, 4  ;;  %v652_v57 = vsel %vm651_vm3, %v615_v12, %v650_v25 }
 0x15f   : > { %v641_v39 = vrot.slane %v621_v22, 4  ;;  %778 = vrot.lane.b32.xlu1 %v9040_v29, %s8841_s8 }
 0x160   : > { %776 = vrot.lane.b32.xlu0 %v9036_v28, %s8841_s8 }
 0x161   : > { %v656_v55 = vsel %vm568_vm0, %v641_v39, %v642_v30  ;;  %7831 = vmatmul.mubr.msk.bf16.vlgmr.msra.gmra.mxu1 %vm1819_vm4, %v8552_v13  ;;  %v718_v50 = vpop.permute.xlu1 %717 }
 0x162   : > { %v657_v3 = vsel %vm651_vm3, %v621_v22, %v656_v55  ;;  %v712_v51 = vpop.permute.xlu0 %711  ;;  %1921 = vmatprep.mubr.bf16.mxu1 %v13022_v0  ;;  %v730_v28 = vrot.slane %v718_v50, 4 }
 0x163   : > { %v727_v29 = vrot.slane %v712_v51, 4  ;;  %v7762_v5 = vcombine.high %v652_v57, %v657_v3  ;;  %v7761_v18 = vcombine.low %v652_v57, %v657_v3  ;;  %784 = vrot.lane.b32.xlu1 %v9067_v42, %s8841_s8 }
 0x164   : > { %782 = vrot.lane.b32.xlu0 %v9063_v41, %s8841_s8  ;;  %v749_v12 = vsel %vm568_vm0, %v729_v56, %v730_v28  ;;  %v751_v19 = vsel %vm732_vm1, %v718_v50, %v730_v28 }
 0x165   : > { %v744_v20 = vsel %vm568_vm0, %v726_v48, %v727_v29  ;;  %v746_v13 = vsel %vm732_vm1, %v712_v51, %v727_v29  ;;  %1832 = vmatprep.subr.bf16.mxu0 %v7762_v5  ;;  %v750_v22 = vsel %vm732_vm1, %v9189_v53, %v749_v12  ;;  %775 = vst [vmem:[#allocation4 + $0x13c] sm:$0xf] %v751_v19  ;;  %v9338_v42 = vpop.permute.xlu1 %546 }
 0x166   : > { %v745_v41 = vsel %vm732_vm1, %v9182_v46, %v744_v20  ;;  %772 = vst [vmem:[#allocation4 + $0x128] sm:$0xf] %v746_v13  ;;  %v545_v56 = vpop.permute.xlu0 %544  ;;  %1833 = vmatpush1.bf16.msra.mxu0 %v7761_v18  ;;  %v563_v25 = vrot.slane %v9338_v42, 4  ;;  %v9348_v46 = vld [vmem:[%s13014_s3 + $0x20] ss:$12 sps:$4 sm:$0xff]  }
 0x167   : > { %v562_v39 = vrot.slane %v545_v56, 4  ;;  %v7779_v55 = vcombine.high %v745_v41, %v750_v22  ;;  %v7778_v48 = vcombine.low %v745_v41, %v750_v22  ;;  %879 = vrot.lane.b32.xlu1 %v9069_v43, %s8840_s29 }
 0x168   : > { %873 = vrot.lane.b32.xlu0 %v9054_v40, %s8840_s29 }
 0x169   : > { %1932 = vmatprep.subr.bf16.mxu1 %v7779_v55  ;;  %v9350_v53 = vpop.permute.xlu1 %552  ;;  %v580_v3 = vsel %vm568_vm0, %v562_v39, %v563_v25  ;;  %7832 = vmatmul.mubr.msk.bf16.gmra.mxu1 %vm1819_vm4, %v9348_v46 }
 0x16a   : > { %v551_v57 = vpop.permute.xlu0 %550  ;;  %1933 = vmatpush1.bf16.msra.mxu1 %v7778_v48  ;;  %v566_v50 = vrot.slane %v9350_v53, 4  ;;  %1964 = vmatprep.mubr.bf16.mxu1 %v8553_v52  ;;  %v581_v29 = vsel %vm570_vm5, %v545_v56, %v580_v3 }
 0x16b   : > { %v565_v51 = vrot.slane %v551_v57, 4  ;;  %867 = vrot.lane.b32.xlu1 %v9083_v45, %s8840_s29 }
 0x16c   : > { %861 = vrot.lane.b32.xlu0 %v9076_v44, %s8840_s29 }
 0x16d   : > { %v585_v28 = vsel %vm568_vm0, %v565_v51, %v566_v50  ;;  %v706_v18 = vpop.permute.xlu1 %705 }
 0x16e   : > { %v586_v5 = vsel %vm570_vm5, %v551_v57, %v585_v28  ;;  %v700_v12 = vpop.permute.xlu0 %699  ;;  %v724_v19 = vrot.slane %v706_v18, 4 }
 0x16f   : > { %v721_v20 = vrot.slane %v700_v12, 4  ;;  %v7757_v13 = vcombine.high %v581_v29, %v586_v5  ;;  %v7756_v22 = vcombine.low %v581_v29, %v586_v5  ;;  %798 = vrot.lane.b32.xlu1 %v9069_v43, %s8841_s8 }
 0x170   : > { %792 = vrot.lane.b32.xlu0 %v9054_v40, %s8841_s8  ;;  %v739_v52 = vsel %vm568_vm0, %v723_v16, %v724_v19  ;;  %v741_v41 = vsel %vm732_vm1, %v706_v18, %v724_v19 }
 0x171   : > { %v734_v56 = vsel %vm568_vm0, %v720_v4, %v721_v20  ;;  %v736_v39 = vsel %vm732_vm1, %v700_v12, %v721_v20  ;;  %1834 = vmatprep.subr.bf16.mxu0 %v7757_v13  ;;  %v740_v55 = vsel %vm732_vm1, %v9211_v11, %v739_v52  ;;  %769 = vst [vmem:[#allocation4 + $0x114] sm:$0xf] %v741_v41  ;;  %v9383_v57 = vpop.permute.xlu1 %534 }
 0x172   : > { %v735_v48 = vsel %vm732_vm1, %v9204_v61, %v734_v56  ;;  %766 = vst [vmem:[#allocation4 + $0x100] sm:$0xf] %v736_v39  ;;  %v533_v16 = vpop.permute.xlu0 %532  ;;  %1835 = vmatpush1.bf16.msra.mxu0 %v7756_v22  ;;  %v557_v3 = vrot.slane %v9383_v57, 4  ;;  %v8685_v56 = vpack.c.bf16 %v9010_v63, %v8992_v36  ;;  %v1299_v36 = vld [vmem:[%s13015_s4 + $0x10] sm:$0xff] }
 0x173   : > { %v556_v51 = vrot.slane %v533_v16, 4  ;;  %v7774_v28 = vcombine.high %v735_v48, %v740_v55  ;;  %v7773_v4 = vcombine.low %v735_v48, %v740_v55  ;;  %1122 = vrot.lane.b32.xlu1 %v9069_v43, %s8835_s19 }
 0x174   : > { %1116 = vrot.lane.b32.xlu0 %v9054_v40, %s8835_s19 }
 0x175   : > { %1934 = vmatprep.subr.bf16.mxu1 %v7774_v28  ;;  %v9390_v11 = vpop.permute.xlu1 %540  ;;  %v569_v29 = vsel %vm568_vm0, %v556_v51, %v557_v3 }
 0x176   : > { %v539_v61 = vpop.permute.xlu0 %538  ;;  %1935 = vmatpush1.bf16.msra.mxu1 %v7773_v4  ;;  %v560_v5 = vrot.slane %v9390_v11, 4  ;;  %v571_v43 = vsel %vm570_vm5, %v533_v16, %v569_v29  ;;  %v8686_v29 = vpack.c.bf16 %v9008_v62, %v8990_v35  ;;  %v1297_v35 = vld [vmem:[%s13015_s4] sm:$0xff] }
 0x177   : > { %v559_v18 = vrot.slane %v539_v61, 4  ;;  %786 = vrot.lane.b32.xlu1 %v9083_v45, %s8841_s8 }
 0x178   : > { %780 = vrot.lane.b32.xlu0 %v9076_v44, %s8841_s8 }
 0x179   : > { %v575_v40 = vsel %vm568_vm0, %v559_v18, %v560_v5  ;;  %v637_v19 = vpop.permute.xlu1 %636 }
 0x17a   : > { %v576_v12 = vsel %vm570_vm5, %v539_v61, %v575_v40  ;;  %v631_v20 = vpop.permute.xlu0 %630  ;;  %v649_v13 = vrot.slane %v637_v19, 4 }
 0x17b   : > { %v646_v22 = vrot.slane %v631_v20, 4  ;;  %v7752_v52 = vcombine.high %v571_v43, %v576_v12  ;;  %v7751_v41 = vcombine.low %v571_v43, %v576_v12  ;;  %1110 = vrot.lane.b32.xlu1 %v9083_v45, %s8835_s19  ;;  %v1300_v45 = vld [vmem:[%s13015_s4 + $0x18] sm:$0xff]  ;;  %v1298_v12 = vld [vmem:[%s13015_s4 + $0x8] sm:$0xff] }
 0x17c   : > { %1104 = vrot.lane.b32.xlu0 %v9076_v44, %s8835_s19  ;;  %v668_v39 = vsel %vm568_vm0, %v648_v17, %v649_v13  ;;  %v670_v55 = vsel %vm651_vm3, %v637_v19, %v649_v13 }
 0x17d   : > { %v663_v48 = vsel %vm568_vm0, %v645_v60, %v646_v22  ;;  %v665_v16 = vsel %vm651_vm3, %v631_v20, %v646_v22  ;;  %1836 = vmatprep.subr.bf16.mxu0 %v7752_v52  ;;  %v669_v63 = vsel %vm651_vm3, %v9255_v10, %v668_v39  ;;  %694 = vst [vmem:[#allocation4 + $0xec] sm:$0xf] %v670_v55  ;;  %v625_v60 = vpop.permute.xlu1 %624 }
 0x17e   : > { %v664_v44 = vsel %vm651_vm3, %v9248_v58, %v663_v48  ;;  %691 = vst [vmem:[#allocation4 + $0xd8] sm:$0xf] %v665_v16  ;;  %v619_v17 = vpop.permute.xlu0 %618  ;;  %1837 = vmatpush1.bf16.msra.mxu0 %v7751_v41  ;;  %v643_v51 = vrot.slane %v625_v60, 4  ;;  %v8687_v10 = vpack.c.bf16 %v9048_v32, %v9012_v1  ;;  %v8688_v22 = vpack.c.bf16 %v9046_v31, %v8998_v49 }
 0x17f   : > { %v640_v28 = vrot.slane %v619_v17, 4  ;;  %1838 = vmatprep.subr.bf16.mxu0 %v8685_v56  ;;  %v7769_v4 = vcombine.high %v664_v44, %v669_v63  ;;  %v7768_v61 = vcombine.low %v664_v44, %v669_v63  ;;  %1318 = vperm.xlu1 %8551, %v1300_v45  }
 0x180   : > { %1313 = vperm.xlu0 %8550, %v1299_v36   ;;  %v658_v58 = vsel %vm568_vm0, %v642_v30, %v643_v51  ;;  %v660_v18 = vsel %vm651_vm3, %v625_v60, %v643_v51 }
 0x181   : > { %v653_v40 = vsel %vm568_vm0, %v639_v14, %v640_v28  ;;  %v655_v43 = vsel %vm651_vm3, %v619_v17, %v640_v28  ;;  %1936 = vmatprep.subr.bf16.mxu1 %v7769_v4  ;;  %v659_v62 = vsel %vm651_vm3, %v9302_v15, %v658_v58  ;;  %688 = vst [vmem:[#allocation4 + $0xc4] sm:$0xf] %v660_v18  ;;  %v555_v32 = vpop.permute.xlu1 %554 }
 0x182   : > { %v654_v1 = vsel %vm651_vm3, %v9292_v8, %v653_v40  ;;  %685 = vst [vmem:[#allocation4 + $0xb0] sm:$0xf] %v655_v43  ;;  %v549_v14 = vpop.permute.xlu0 %548  ;;  %1839 = vmatpush1.bf16.msra.mxu0 %v8686_v29  ;;  %1937 = vmatpush1.bf16.msra.mxu1 %v7768_v61  ;;  %v567_v30 = vrot.slane %v555_v32, 4 }
 0x183   : > { %v564_v19 = vrot.slane %v549_v14, 4  ;;  %1840 = vmatprep.subr.bf16.mxu0 %v8687_v10  ;;  %v7764_v20 = vcombine.high %v654_v1, %v659_v62  ;;  %v7763_v13 = vcombine.low %v654_v1, %v659_v62  ;;  %1308 = vperm.xlu1 %8551, %v1298_v12  }
 0x184   : > { %1303 = vperm.xlu0 %8550, %v1297_v35   ;;  %v587_v15 = vsel %vm568_vm0, %v566_v50, %v567_v30  ;;  %v589_v8 = vsel %vm570_vm5, %v555_v32, %v567_v30 }
 0x185   : > { %v582_v52 = vsel %vm568_vm0, %v563_v25, %v564_v19  ;;  %v584_v41 = vsel %vm570_vm5, %v549_v14, %v564_v19  ;;  %1938 = vmatprep.subr.bf16.mxu1 %v7764_v20  ;;  %v588_v56 = vsel %vm570_vm5, %v9350_v53, %v587_v15  ;;  %613 = vst [vmem:[#allocation4 + $0x9c] sm:$0xf] %v589_v8  ;;  %v9465_v31 = vpop.permute.xlu1 %1033 }
 0x186   : > { %v583_v49 = vsel %vm570_vm5, %v9338_v42, %v582_v52  ;;  %610 = vst [vmem:[#allocation4 + $0x88] sm:$0xf] %v584_v41  ;;  %v1032_v50 = vpop.permute.xlu0 %1031  ;;  %1939 = vmatpush1.bf16.msra.mxu1 %v7763_v13  ;;  %1841 = vmatpush1.bf16.msra.mxu0 %v8688_v22  ;;  %v1050_v39 = vrot.slane %v9465_v31, 4  ;;  %v8689_v14 = vpack.c.bf16 %v9020_v7, %v8996_v38 }
 0x187   : > { %v1049_v55 = vrot.slane %v1032_v50, 4  ;;  %v7759_v25 = vcombine.high %v583_v49, %v588_v56  ;;  %v7758_v48 = vcombine.low %v583_v49, %v588_v56  ;;  %v8690_v13 = vpack.c.bf16 %v9018_v6, %v8994_v37 }
 0x188   : > { %v8691_v38 = vpack.c.bf16 %v9052_v34, %v9022_v9  ;;  %v8692_v49 = vpack.c.bf16 %v9050_v33, %v9014_v2 }
 0x189   : > { %1940 = vmatprep.subr.bf16.mxu1 %v7759_v25  ;;  %v9468_v16 = vpop.permute.xlu1 %1039  ;;  %v1066_v42 = vsel %vm568_vm0, %v1049_v55, %v1050_v39 }
 0x18a   : > { %v1038_v45 = vpop.permute.xlu0 %1037  ;;  %1941 = vmatpush1.bf16.msra.mxu1 %v7758_v48  ;;  %v1053_v53 = vrot.slane %v9468_v16, 4  ;;  %v1067_v44 = vsel %vm1056_vm6, %v1032_v50, %v1066_v42 }
 0x18b   : > { %v1052_v36 = vrot.slane %v1038_v45, 4 }
 0x18d   : > { %v1071_v63 = vsel %vm568_vm0, %v1052_v36, %v1053_v53  ;;  %v543_v17 = vpop.permute.xlu1 %542 }
 0x18e   : > { %v1072_v60 = vsel %vm1056_vm6, %v1038_v45, %v1071_v63  ;;  %v537_v51 = vpop.permute.xlu0 %536  ;;  %v561_v28 = vrot.slane %v543_v17, 4 }
 0x18f   : > { %v558_v4 = vrot.slane %v537_v51, 4  ;;  %v7817_v61 = vcombine.high %v1067_v44, %v1072_v60  ;;  %v7816_v29 = vcombine.low %v1067_v44, %v1072_v60 }
 0x190   : > { %v577_v10 = vsel %vm568_vm0, %v560_v5, %v561_v28  ;;  %v579_v58 = vsel %vm570_vm5, %v543_v17, %v561_v28 }
 0x191   : > { %v572_v18 = vsel %vm568_vm0, %v557_v3, %v558_v4  ;;  %v574_v40 = vsel %vm570_vm5, %v537_v51, %v558_v4  ;;  %1842 = vmatprep.subr.bf16.mxu0 %v7817_v61  ;;  %v578_v43 = vsel %vm570_vm5, %v9390_v11, %v577_v10  ;;  %607 = vst [vmem:[#allocation4 + $0x74] sm:$0xf] %v579_v58  ;;  %v9491_v35 = vpop.permute.xlu1 %1021 }
 0x192   : > { %v573_v12 = vsel %vm570_vm5, %v9383_v57, %v572_v18  ;;  %604 = vst [vmem:[#allocation4 + $0x60] sm:$0xf] %v574_v40  ;;  %v1020_v5 = vpop.permute.xlu0 %1019  ;;  %1843 = vmatpush2.bf16.msra.mxu0 %v7816_v29  ;;  %v1044_v62 = vrot.slane %v9491_v35, 4 }
 0x193   : > { %v1043_v1 = vrot.slane %v1020_v5, 4  ;;  %v7754_v32 = vcombine.high %v573_v12, %v578_v43  ;;  %v7753_v3 = vcombine.low %v573_v12, %v578_v43 }
 0x195   : > { %1942 = vmatprep.subr.bf16.mxu1 %v7754_v32  ;;  %v9496_v30 = vpop.permute.xlu1 %1027  ;;  %v1055_v57 = vsel %vm568_vm0, %v1043_v1, %v1044_v62 }
 0x196   : > { %v1026_v11 = vpop.permute.xlu0 %1025  ;;  %1943 = vmatpush1.bf16.msra.mxu1 %v7753_v3  ;;  %v1047_v19 = vrot.slane %v9496_v30, 4  ;;  %v1057_v7 = vsel %vm1056_vm6, %v1020_v5, %v1055_v57 }
 0x197   : > { %v1046_v20 = vrot.slane %v1026_v11, 4  ;;  %1944 = vmatprep.subr.bf16.mxu1 %v8689_v14 }
 0x199   : > { %v1061_v22 = vsel %vm568_vm0, %v1046_v20, %v1047_v19  ;;  %v9511_v8 = vpop.permute.xlu1 %952 }
 0x19a   : > { %v1062_v15 = vsel %vm1056_vm6, %v1026_v11, %v1061_v22  ;;  %v951_v52 = vpop.permute.xlu0 %950  ;;  %1945 = vmatpush1.bf16.msra.mxu1 %v8690_v13  ;;  %v969_v41 = vrot.slane %v9511_v8, 4 }
 0x19b   : > { %v968_v56 = vrot.slane %v951_v52, 4  ;;  %1946 = vmatprep.subr.bf16.mxu1 %v8691_v38  ;;  %v7812_v37 = vcombine.high %v1057_v7, %v1062_v15  ;;  %v7811_v6 = vcombine.low %v1057_v7, %v1062_v15 }
 0x19d   : > { %1844 = vmatprep.subr.bf16.mxu0 %v7812_v37  ;;  %v9516_v50 = vpop.permute.xlu1 %958  ;;  %v985_v34 = vsel %vm568_vm0, %v968_v56, %v969_v41 }
 0x19e   : > { %v957_v9 = vpop.permute.xlu0 %956  ;;  %1947 = vmatpush1.bf16.msra.mxu1 %v8692_v49  ;;  %1845 = vmatpush2.bf16.msra.mxu0 %v7811_v6  ;;  %v972_v55 = vrot.slane %v9516_v50, 4  ;;  %v986_v2 = vsel %vm975_vm7, %v951_v52, %v985_v34 }
 0x19f   : > { %v971_v25 = vrot.slane %v957_v9, 4 }
 0x1a1   : > { %v990_v48 = vsel %vm568_vm0, %v971_v25, %v972_v55  ;;  %v9527_v45 = vpop.permute.xlu1 %940 }
 0x1a2   : > { %v991_v33 = vsel %vm975_vm7, %v957_v9, %v990_v48  ;;  %v939_v42 = vpop.permute.xlu0 %938  ;;  %v963_v36 = vrot.slane %v9527_v45, 4 }
 0x1a3   : > { %v962_v63 = vrot.slane %v939_v42, 4  ;;  %v7807_v44 = vcombine.high %v986_v2, %v991_v33  ;;  %v7806_v60 = vcombine.low %v986_v2, %v991_v33 }
 0x1a5   : > { %1846 = vmatprep.subr.bf16.mxu0 %v7807_v44  ;;  %v9530_v17 = vpop.permute.xlu1 %946  ;;  %v974_v28 = vsel %vm568_vm0, %v962_v63, %v963_v36 }
 0x1a6   : > { %v945_v51 = vpop.permute.xlu0 %944  ;;  %1847 = vmatpush2.bf16.msra.mxu0 %v7806_v60  ;;  %v966_v4 = vrot.slane %v9530_v17, 4  ;;  %v976_v10 = vsel %vm975_vm7, %v939_v42, %v974_v28 }
 0x1a7   : > { %v965_v61 = vrot.slane %v945_v51, 4 }
 0x1a9   : > { %v980_v29 = vsel %vm568_vm0, %v965_v61, %v966_v4  ;;  %v1042_v18 = vpop.permute.xlu1 %1041 }
 0x1aa   : > { %v981_v58 = vsel %vm975_vm7, %v945_v51, %v980_v29  ;;  %v1036_v40 = vpop.permute.xlu0 %1035  ;;  %v1054_v43 = vrot.slane %v1042_v18, 4 }
 0x1ab   : > { %v1051_v12 = vrot.slane %v1036_v40, 4  ;;  %v7802_v5 = vcombine.high %v976_v10, %v981_v58  ;;  %v7801_v1 = vcombine.low %v976_v10, %v981_v58 }
 0x1ac   : > { %v1073_v32 = vsel %vm568_vm0, %v1053_v53, %v1054_v43  ;;  %v1075_v3 = vsel %vm1056_vm6, %v1042_v18, %v1054_v43 }
 0x1ad   : > { %v1068_v14 = vsel %vm568_vm0, %v1050_v39, %v1051_v12  ;;  %v1070_v11 = vsel %vm1056_vm6, %v1036_v40, %v1051_v12  ;;  %1848 = vmatprep.subr.bf16.mxu0 %v7802_v5  ;;  %v1074_v57 = vsel %vm1056_vm6, %v9468_v16, %v1073_v32  ;;  %1099 = vst [vmem:[#allocation4 + $0x27c] sm:$0xf] %v1075_v3  ;;  %v9553_v13 = vpop.permute.xlu1 %871 }
 0x1ae   : > { %v1069_v20 = vsel %vm1056_vm6, %v9465_v31, %v1068_v14  ;;  %1096 = vst [vmem:[#allocation4 + $0x268] sm:$0xf] %v1070_v11  ;;  %v870_v53 = vpop.permute.xlu0 %869  ;;  %1849 = vmatpush2.bf16.msra.mxu0 %v7801_v1  ;;  %v888_v22 = vrot.slane %v9553_v13, 4 }
 0x1af   : > { %v887_v38 = vrot.slane %v870_v53, 4  ;;  %v7819_v7 = vcombine.high %v1069_v20, %v1074_v57  ;;  %v7818_v39 = vcombine.low %v1069_v20, %v1074_v57 }
 0x1b1   : > { %1948 = vmatprep.subr.bf16.mxu1 %v7819_v7  ;;  %v9556_v15 = vpop.permute.xlu1 %877  ;;  %v904_v31 = vsel %vm568_vm0, %v887_v38, %v888_v22 }
 0x1b2   : > { %v876_v52 = vpop.permute.xlu0 %875  ;;  %1949 = vmatpush2.bf16.msra.mxu1 %v7818_v39  ;;  %v891_v16 = vrot.slane %v9556_v15, 4  ;;  %v905_v6 = vsel %vm894_vm8, %v870_v53, %v904_v31 }
 0x1b3   : > { %v890_v56 = vrot.slane %v876_v52, 4 }
 0x1b5   : > { %v909_v37 = vsel %vm568_vm0, %v890_v56, %v891_v16  ;;  %v1030_v9 = vpop.permute.xlu1 %1029 }
 0x1b6   : > { %v910_v49 = vsel %vm894_vm8, %v876_v52, %v909_v37  ;;  %v1024_v34 = vpop.permute.xlu0 %1023  ;;  %v1048_v25 = vrot.slane %v1030_v9, 4 }
 0x1b7   : > { %v1045_v48 = vrot.slane %v1024_v34, 4  ;;  %v7797_v2 = vcombine.high %v905_v6, %v910_v49  ;;  %v7796_v33 = vcombine.low %v905_v6, %v910_v49 }
 0x1b8   : > { %v1063_v42 = vsel %vm568_vm0, %v1047_v19, %v1048_v25  ;;  %v1065_v63 = vsel %vm1056_vm6, %v1030_v9, %v1048_v25 }
 0x1b9   : > { %v1058_v44 = vsel %vm568_vm0, %v1044_v62, %v1045_v48  ;;  %v1060_v60 = vsel %vm1056_vm6, %v1024_v34, %v1045_v48  ;;  %1850 = vmatprep.subr.bf16.mxu0 %v7797_v2  ;;  %v1064_v51 = vsel %vm1056_vm6, %v9496_v30, %v1063_v42  ;;  %1093 = vst [vmem:[#allocation4 + $0x254] sm:$0xf] %v1065_v63  ;;  %v9579_v61 = vpop.permute.xlu1 %859 }
 0x1ba   : > { %v1059_v28 = vsel %vm1056_vm6, %v9491_v35, %v1058_v44  ;;  %1090 = vst [vmem:[#allocation4 + $0x240] sm:$0xf] %v1060_v60  ;;  %v858_v19 = vpop.permute.xlu0 %857  ;;  %1851 = vmatpush2.bf16.msra.mxu0 %v7796_v33  ;;  %v882_v29 = vrot.slane %v9579_v61, 4 }
 0x1bb   : > { %v881_v10 = vrot.slane %v858_v19, 4  ;;  %v7814_v58 = vcombine.high %v1059_v28, %v1064_v51  ;;  %v7813_v62 = vcombine.low %v1059_v28, %v1064_v51 }
 0x1bd   : > { %1950 = vmatprep.subr.bf16.mxu1 %v7814_v58  ;;  %v9582_v18 = vpop.permute.xlu1 %865  ;;  %v893_v30 = vsel %vm568_vm0, %v881_v10, %v882_v29 }
 0x1be   : > { %v864_v40 = vpop.permute.xlu0 %863  ;;  %1951 = vmatpush2.bf16.msra.mxu1 %v7813_v62  ;;  %v885_v35 = vrot.slane %v9582_v18, 4  ;;  %v895_v5 = vsel %vm894_vm8, %v858_v19, %v893_v30 }
 0x1bf   : > { %v884_v43 = vrot.slane %v864_v40, 4 }
 0x1c1   : > { %v899_v12 = vsel %vm568_vm0, %v884_v43, %v885_v35  ;;  %v961_v32 = vpop.permute.xlu1 %960 }
 0x1c2   : > { %v900_v1 = vsel %vm894_vm8, %v864_v40, %v899_v12  ;;  %v955_v3 = vpop.permute.xlu0 %954  ;;  %v973_v14 = vrot.slane %v961_v32, 4 }
 0x1c3   : > { %v970_v11 = vrot.slane %v955_v3, 4  ;;  %v7792_v57 = vcombine.high %v895_v5, %v900_v1  ;;  %v7791_v20 = vcombine.low %v895_v5, %v900_v1 }
 0x1c4   : > { %v992_v53 = vsel %vm568_vm0, %v972_v55, %v973_v14  ;;  %v994_v38 = vsel %vm975_vm7, %v961_v32, %v973_v14 }
 0x1c5   : > { %v987_v7 = vsel %vm568_vm0, %v969_v41, %v970_v11  ;;  %v989_v39 = vsel %vm975_vm7, %v955_v3, %v970_v11  ;;  %1852 = vmatprep.subr.bf16.mxu0 %v7792_v57  ;;  %v993_v52 = vsel %vm975_vm7, %v9516_v50, %v992_v53  ;;  %1018 = vst [vmem:[#allocation4 + $0x22c] sm:$0xf] %v994_v38  ;;  %v9605_v56 = vpop.permute.xlu1 %790 }
 0x1c6   : > { %v988_v31 = vsel %vm975_vm7, %v9511_v8, %v987_v7  ;;  %1015 = vst [vmem:[#allocation4 + $0x218] sm:$0xf] %v989_v39  ;;  %v789_v55 = vpop.permute.xlu0 %788  ;;  %1853 = vmatpush2.bf16.msra.mxu0 %v7791_v20  ;;  %v807_v37 = vrot.slane %v9605_v56, 4 }
 0x1c7   : > { %v806_v6 = vrot.slane %v789_v55, 4  ;;  %v7809_v49 = vcombine.high %v988_v31, %v993_v52  ;;  %v7808_v41 = vcombine.low %v988_v31, %v993_v52 }
 0x1c9   : > { %1952 = vmatprep.subr.bf16.mxu1 %v7809_v49  ;;  %v9608_v9 = vpop.permute.xlu1 %796  ;;  %v823_v8 = vsel %vm568_vm0, %v806_v6, %v807_v37 }
 0x1ca   : > { %v795_v34 = vpop.permute.xlu0 %794  ;;  %1953 = vmatpush2.bf16.msra.mxu1 %v7808_v41  ;;  %v810_v50 = vrot.slane %v9608_v9, 4  ;;  %v824_v2 = vsel %vm813_vm9, %v789_v55, %v823_v8 }
 0x1cb   : > { %v809_v25 = vrot.slane %v795_v34, 4 }
 0x1cd   : > { %v828_v48 = vsel %vm568_vm0, %v809_v25, %v810_v50  ;;  %v949_v42 = vpop.permute.xlu1 %948 }
 0x1ce   : > { %v829_v33 = vsel %vm813_vm9, %v795_v34, %v828_v48  ;;  %v943_v63 = vpop.permute.xlu0 %942  ;;  %v967_v44 = vrot.slane %v949_v42, 4  ;;  %v9656_v34 = vld [vmem:[%s13014_s3] ss:$12 sps:$4 sm:$0xff]  }
 0x1cf   : > { %v964_v60 = vrot.slane %v943_v63, 4  ;;  %v7787_v51 = vcombine.high %v824_v2, %v829_v33  ;;  %v7786_v28 = vcombine.low %v824_v2, %v829_v33 }
 0x1d0   : > { %v982_v19 = vsel %vm568_vm0, %v966_v4, %v967_v44  ;;  %v984_v10 = vsel %vm975_vm7, %v949_v42, %v967_v44 }
 0x1d1   : > { %v977_v58 = vsel %vm568_vm0, %v963_v36, %v964_v60  ;;  %v979_v62 = vsel %vm975_vm7, %v943_v63, %v964_v60  ;;  %1854 = vmatprep.subr.bf16.mxu0 %v7787_v51  ;;  %v983_v40 = vsel %vm975_vm7, %v9530_v17, %v982_v19  ;;  %1012 = vst [vmem:[#allocation4 + $0x204] sm:$0xf] %v984_v10  ;;  %v9631_v43 = vpop.permute.xlu1 %778 }
 0x1d2   : > { %v978_v30 = vsel %vm975_vm7, %v9527_v45, %v977_v58  ;;  %1009 = vst [vmem:[#allocation4 + $0x1f0] sm:$0xf] %v979_v62  ;;  %v777_v4 = vpop.permute.xlu0 %776  ;;  %1855 = vmatpush2.bf16.msra.mxu0 %v7786_v28  ;;  %v801_v12 = vrot.slane %v9631_v43, 4 }
 0x1d3   : > { %v800_v5 = vrot.slane %v777_v4, 4  ;;  %v7804_v1 = vcombine.high %v978_v30, %v983_v40  ;;  %v7803_v36 = vcombine.low %v978_v30, %v983_v40 }
 0x1d5   : > { %1954 = vmatprep.subr.bf16.mxu1 %v7804_v1  ;;  %v9634_v32 = vpop.permute.xlu1 %784  ;;  %v812_v17 = vsel %vm568_vm0, %v800_v5, %v801_v12 }
 0x1d6   : > { %v783_v3 = vpop.permute.xlu0 %782  ;;  %1955 = vmatpush2.bf16.msra.mxu1 %v7803_v36  ;;  %v804_v45 = vrot.slane %v9634_v32, 4  ;;  %v814_v57 = vsel %vm813_vm9, %v777_v4, %v812_v17  ;;  %v9692_v4 = vld [vmem:[%s13014_s3 + $0x18] ss:$12 sps:$4 sm:$0xff]  }
 0x1d7   : > { %v803_v14 = vrot.slane %v783_v3, 4 }
 0x1d9   : > { %v818_v11 = vsel %vm568_vm0, %v803_v14, %v804_v45  ;;  %v880_v53 = vpop.permute.xlu1 %879 }
 0x1da   : > { %v819_v20 = vsel %vm813_vm9, %v783_v3, %v818_v11  ;;  %v874_v38 = vpop.permute.xlu0 %873  ;;  %v892_v7 = vrot.slane %v880_v53, 4 }
 0x1db   : > { %v889_v39 = vrot.slane %v874_v38, 4  ;;  %v7782_v52 = vcombine.high %v814_v57, %v819_v20  ;;  %v7781_v31 = vcombine.low %v814_v57, %v819_v20 }
 0x1dc   : > { %v911_v55 = vsel %vm568_vm0, %v891_v16, %v892_v7  ;;  %v913_v6 = vsel %vm894_vm8, %v880_v53, %v892_v7 }
 0x1dd   : > { %v906_v49 = vsel %vm568_vm0, %v888_v22, %v889_v39  ;;  %v908_v41 = vsel %vm894_vm8, %v874_v38, %v889_v39  ;;  %1856 = vmatprep.subr.bf16.mxu0 %v7782_v52  ;;  %v912_v8 = vsel %vm894_vm8, %v9556_v15, %v911_v55  ;;  %937 = vst [vmem:[#allocation4 + $0x1dc] sm:$0xf] %v913_v6  ;;  %v868_v25 = vpop.permute.xlu1 %867  ;;  %v9665_v22 = vld [vmem:[%s13014_s3 + $0x1c] ss:$12 sps:$4 sm:$0xff]  }
 0x1de   : > { %v907_v16 = vsel %vm894_vm8, %v9553_v13, %v906_v49  ;;  %934 = vst [vmem:[#allocation4 + $0x1c8] sm:$0xf] %v908_v41  ;;  %v862_v48 = vpop.permute.xlu0 %861  ;;  %1857 = vmatpush2.bf16.msra.mxu0 %v7781_v31  ;;  %v886_v2 = vrot.slane %v868_v25, 4 }
 0x1df   : > { %v883_v33 = vrot.slane %v862_v48, 4  ;;  %v7799_v42 = vcombine.high %v907_v16, %v912_v8  ;;  %v7798_v63 = vcombine.low %v907_v16, %v912_v8 }
 0x1e0   : > { %v901_v15 = vsel %vm568_vm0, %v885_v35, %v886_v2  ;;  %v903_v44 = vsel %vm894_vm8, %v868_v25, %v886_v2 }
 0x1e1   : > { %v896_v13 = vsel %vm568_vm0, %v882_v29, %v883_v33  ;;  %v898_v60 = vsel %vm894_vm8, %v862_v48, %v883_v33  ;;  %1859 = vmatmul.mubr.bf16.vlgmr.msra.gmra.mxu0 %v9656_v34  ;;  %v902_v51 = vsel %vm894_vm8, %v9582_v18, %v901_v15  ;;  %931 = vst [vmem:[#allocation4 + $0x1b4] sm:$0xf] %v903_v44  ;;  %v799_v19 = vpop.permute.xlu1 %798  ;;  %v8560_v33 = vld [vmem:[#allocation4 + $0x268] ss:$20 sps:$4 sm:$0xff]  }
 0x1e2   : > { %v897_v28 = vsel %vm894_vm8, %v9579_v61, %v896_v13  ;;  %928 = vst [vmem:[#allocation4 + $0x1a0] sm:$0xf] %v898_v60  ;;  %v793_v35 = vpop.permute.xlu0 %792  ;;  %1956 = vmatprep.subr.bf16.mxu1 %v7799_v42  ;;  %1868 = vmatprep.mubr.bf16.mxu0 %v9665_v22  ;;  %v811_v10 = vrot.slane %v799_v19, 4  ;;  %v8561_v44 = vld [vmem:[#allocation4 + $0x128] ss:$20 sps:$4 sm:$0xff]  }
 0x1e3   : > { %v808_v58 = vrot.slane %v793_v35, 4  ;;  %1957 = vmatpush2.bf16.msra.mxu1 %v7798_v63  ;;  %v7794_v29 = vcombine.high %v897_v28, %v902_v51  ;;  %v7793_v62 = vcombine.low %v897_v28, %v902_v51  ;;  %v8562_v13 = vld [vmem:[#allocation4 + $0x240] ss:$20 sps:$4 sm:$0xff]   ;;  %v8565_v60 = vld [vmem:[#allocation4 + $0x218] ss:$20 sps:$4 sm:$0xff]  }
 0x1e4   : > { %v830_v40 = vsel %vm568_vm0, %v810_v50, %v811_v10  ;;  %v832_v18 = vsel %vm813_vm9, %v799_v19, %v811_v10  ;;  %v8567_v28 = vld [vmem:[#allocation4 + $0xd8] ss:$20 sps:$4 sm:$0xff]   ;;  %v8568_v19 = vld [vmem:[#allocation4 + $0x1f0] ss:$20 sps:$4 sm:$0xff]  }
 0x1e5   : > { %v825_v61 = vsel %vm568_vm0, %v807_v37, %v808_v58  ;;  %v827_v30 = vsel %vm813_vm9, %v793_v35, %v808_v58  ;;  %1958 = vmatprep.subr.bf16.mxu1 %v7794_v29  ;;  %v831_v5 = vsel %vm813_vm9, %v9608_v9, %v830_v40  ;;  %856 = vst [vmem:[#allocation4 + $0x18c] sm:$0xf] %v832_v18  ;;  %v1123_v1 = vpop.permute.xlu1 %1122  ;;  %v8680_v35 = vld [vmem:[%s13014_s3 + $0x4] ss:$12 sps:$4 sm:$0xff]   ;;  %v8570_v58 = vld [vmem:[#allocation4 + $0x1c8] ss:$20 sps:$4 sm:$0xff]  }
 0x1e6   : > { %v826_v50 = vsel %vm813_vm9, %v9605_v56, %v825_v61  ;;  %853 = vst [vmem:[#allocation4 + $0x178] sm:$0xf] %v827_v30  ;;  %v1117_v36 = vpop.permute.xlu0 %1116  ;;  %v1135_v3 = vrot.slane %v1123_v1, 4  ;;  %v8569_v10 = vld [vmem:[#allocation4 + $0xb0] ss:$20 sps:$4 sm:$0xff]  }
 0x1e7   : > { %v1132_v37 = vrot.slane %v1117_v36, 4  ;;  %1959 = vmatpush2.bf16.msra.mxu1 %v7793_v62  ;;  %v7789_v17 = vcombine.high %v826_v50, %v831_v5  ;;  %v7788_v14 = vcombine.low %v826_v50, %v831_v5  ;;  %v8571_v29 = vld [vmem:[#allocation4 + $0x88] ss:$20 sps:$4 sm:$0xff]   ;;  %v8573_v40 = vld [vmem:[#allocation4 + $0x60] ss:$20 sps:$4 sm:$0xff]  }
 0x1e8   : > { %v1154_v11 = vsel %vm568_vm0, %v1134_v47, %v1135_v3  ;;  %v1156_v57 = vsel %vm1137_vm2, %v1123_v1, %v1135_v3  ;;  %v8681_v61 = vld [vmem:[%s13014_s3 + $0x20] ss:$12 sps:$4 sm:$0xff]   ;;  %v8577_v5 = vld [vmem:[#allocation4 + $0x10] ss:$20 sps:$4 sm:$0xff]  }
 0x1e9   : > { %v1149_v9 = vsel %vm568_vm0, %v1131_v23, %v1132_v37  ;;  %v1151_v56 = vsel %vm1137_vm2, %v1117_v36, %v1132_v37  ;;  %1869 = vmatmul.mubr.bf16.gmra.mxu0 %v9692_v4  ;;  %v1155_v20 = vsel %vm1137_vm2, %v9233_v27, %v1154_v11  ;;  %1180 = vst [vmem:[#allocation4 + $0x2cc] sm:$0xf] %v1156_v57  ;;  %v787_v38 = vpop.permute.xlu1 %786  ;;  %v8572_v62 = vld [vmem:[#allocation4 + $0x1a0] ss:$20 sps:$4 sm:$0xff]  }
 0x1ea   : > { %v1150_v53 = vsel %vm1137_vm2, %v9226_v21, %v1149_v9  ;;  %1177 = vst [vmem:[#allocation4 + $0x2b8] sm:$0xf] %v1151_v56  ;;  %v781_v47 = vpop.permute.xlu0 %780  ;;  %1960 = vmatprep.subr.bf16.mxu1 %v7789_v17  ;;  %2017 = vmatprep.mubr.bf16.mxu0 %v13022_v0  ;;  %v805_v7 = vrot.slane %v787_v38, 4 }
 0x1eb   : > { %v802_v39 = vrot.slane %v781_v47, 4  ;;  %1961 = vmatpush2.bf16.msra.mxu1 %v7788_v14  ;;  %v7829_v23 = vcombine.high %v1150_v53, %v1155_v20  ;;  %v7828_v52 = vcombine.low %v1150_v53, %v1155_v20 }
 0x1ec   : > { %v820_v31 = vsel %vm568_vm0, %v804_v45, %v805_v7  ;;  %v822_v27 = vsel %vm813_vm9, %v787_v38, %v805_v7 }
 0x1ed   : > { %v815_v21 = vsel %vm568_vm0, %v801_v12, %v802_v39  ;;  %v817_v55 = vsel %vm813_vm9, %v781_v47, %v802_v39  ;;  %1997 = vmatprep.subr.bf16.mxu0 %v7829_v23  ;;  %v821_v6 = vsel %vm813_vm9, %v9634_v32, %v820_v31  ;;  %850 = vst [vmem:[#allocation4 + $0x164] sm:$0xf] %v822_v27  ;;  %v1111_v41 = vpop.permute.xlu1 %1110  ;;  %v8574_v18 = vld [vmem:[#allocation4 + $0x178] ss:$20 sps:$4 sm:$0xff]  }
 0x1ee   : > { %v816_v49 = vsel %vm813_vm9, %v9631_v43, %v815_v21  ;;  %847 = vst [vmem:[#allocation4 + $0x150] sm:$0xf] %v817_v55  ;;  %v1105_v8 = vpop.permute.xlu0 %1104  ;;  %1998 = vmatpush1.bf16.msra.mxu0 %v7828_v52  ;;  %v1129_v45 = vrot.slane %v1111_v41, 4 }
 0x1ef   : > { %v1126_v16 = vrot.slane %v1105_v8, 4  ;;  %v7784_v25 = vcombine.high %v816_v49, %v821_v6  ;;  %v7783_v48 = vcombine.low %v816_v49, %v821_v6 }
 0x1f0   : > { %v1144_v12 = vsel %vm568_vm0, %v1128_v59, %v1129_v45  ;;  %v1146_v2 = vsel %vm1137_vm2, %v1111_v41, %v1129_v45 }
 0x1f1   : > { %v1139_v32 = vsel %vm568_vm0, %v1125_v26, %v1126_v16  ;;  %v1141_v43 = vsel %vm1137_vm2, %v1105_v8, %v1126_v16  ;;  %1962 = vmatprep.subr.bf16.mxu1 %v7784_v25  ;;  %v1145_v42 = vsel %vm1137_vm2, %v9277_v54, %v1144_v12  ;;  %1174 = vst [vmem:[#allocation4 + $0x2a4] sm:$0xf] %v1146_v2  ;;  %v8563_v26 = vld [vmem:[#allocation4 + $0x2b8] ss:$20 sps:$4 sm:$0xff]   ;;  %v8564_v54 = vld [vmem:[#allocation4 + $0x100] ss:$20 sps:$4 sm:$0xff]  }
 0x1f2   : > { %v1140_v63 = vsel %vm1137_vm2, %v9270_v24, %v1139_v32  ;;  %1171 = vst [vmem:[#allocation4 + $0x290] sm:$0xf] %v1141_v43  ;;  %1963 = vmatpush2.bf16.msra.mxu1 %v7783_v48  ;;  %v8679_v24 = vld [vmem:[%s13014_s3 + $0x8] ss:$12 sps:$4 sm:$0xff]  }
 0x1f3   : > { %8304 = vmatprep.subr.bf16.mxu1 %v8560_v33  ;;  %v7824_v59 = vcombine.high %v1140_v63, %v1145_v42  ;;  %v7823_v15 = vcombine.low %v1140_v63, %v1145_v42 }
 0x1f5   : > { %1965 = vmatmul.mubr.bf16.vlgmr.msra.gmra.mxu1 %v9656_v34  ;;  %1999 = vmatprep.subr.bf16.mxu0 %v7824_v59  ;;  %v8576_v30 = vld [vmem:[#allocation4 + $0x150] ss:$20 sps:$4 sm:$0xff]  }
 0x1f6   : > { %2000 = vmatpush1.bf16.msra.mxu0 %v7823_v15  ;;  %8305 = vmatpush3.bf16.msra.mxu1 %v8561_v44 }
 0x1f7   : > { %8306 = vmatprep.subr.bf16.mxu1 %v8562_v13  ;;  %8435 = vmatprep.subr.bf16.mxu0 %v8563_v26 }
 0x1f8   : > { %1974 = vmatprep.mubr.bf16.mxu1 %v9665_v22 }
 0x1f9   : > { %7833 = vmatmul.mubr.msk.bf16.vlgmr.msra.gmra.mxu0 %vm1819_vm4, %v8679_v24  ;;  %v8566_v51 = vld [vmem:[#allocation4 + $0x290] ss:$20 sps:$4 sm:$0xff]  }
 0x1fa   : > { %8307 = vmatpush3.bf16.msra.mxu1 %v8564_v54  ;;  %8436 = vmatpush3.bf16.msra.mxu0 %v8563_v26  ;;  %v9774_v52 = vpop.permute.xlu1 %1318 }
 0x1fb   : > { %8308 = vmatprep.subr.bf16.mxu1 %v8565_v60  ;;  %8437 = vmatprep.subr.bf16.mxu0 %v8566_v51  ;;  %v9758_v1 = vpop.permute.xlu0 %1313 }
 0x1fc   : > { %2027 = vmatprep.mubr.bf16.mxu0 %v13022_v0 }
 0x1fd   : > { %1975 = vmatmul.mubr.bf16.gmra.mxu1 %v9692_v4 }
 0x1fe   : > { %8309 = vmatpush3.bf16.msra.mxu1 %v8567_v28  ;;  %8438 = vmatpush3.bf16.msra.mxu0 %v8566_v51  ;;  %v9797_v2 = vpop.permute.xlu1 %1308 }
 0x1ff   : > { %8310 = vmatprep.subr.bf16.mxu1 %v8568_v19  ;;  %2070 = vmatprep.mubr.bf16.mxu1 %v8680_v35  ;;  %v9760_v37 = vpop.permute.xlu0 %1303 }
 0x201   : > { %7834 = vmatmul.mubr.msk.bf16.gmra.mxu0 %vm1819_vm4, %v9348_v46  ;;  %v8575_v46 = vld [vmem:[#allocation4 + $0x38] ss:$20 sps:$4 sm:$0xff]  }
 0x202   : > { %8311 = vmatpush3.bf16.msra.mxu1 %v8569_v10  ;;  %8439 = vmatprep.mubr.msk.bf16.mxu0 %vm1819_vm4, %v8679_v24 }
 0x203   : > { %8312 = vmatprep.subr.bf16.mxu1 %v8570_v58 }
 0x206   : > { %8313 = vmatpush3.bf16.msra.mxu1 %v8571_v29 }
 0x207   : > { %8314 = vmatprep.subr.bf16.mxu1 %v8572_v62 }
 0x209   : > { %8440 = vmatmul.mubr.msk.bf16.vlgmr.msra.gmra.mxu0 %vm1819_vm4, %v8681_v61 }
 0x20a   : > { %8315 = vmatpush3.bf16.msra.mxu1 %v8573_v40 }
 0x20b   : > { %8316 = vmatprep.subr.bf16.mxu1 %v8574_v18 }
 0x20e   : > { %8317 = vmatpush3.bf16.msra.mxu1 %v8575_v46 }
 0x20f   : > { %8318 = vmatprep.subr.bf16.mxu1 %v8576_v30 }
 0x212   : > { %8319 = vmatpush3.bf16.msra.mxu1 %v8577_v5 }
 0x215   : > { %2071 = vmatmul.mubr.bf16.vlgmr.msra.gmra.mxu1 %v9656_v34 }
 0x216   : > { %2078 = vmatprep.mubr.bf16.mxu1 %v9665_v22 }
 0x21d   : > { %2079 = vmatmul.mubr.bf16.gmra.mxu1 %v9692_v4 }
 0x21e   : > { %3639 = vmatprep.mubr.bf16.mxu1 %v13022_v0 }
 0x221   : > { %v1913_v50 = vpop.f32.mrf.mxu1 }
 0x223   : > { %v1915_v36 = vpop.f32.mrf.mxu1 }
 0x225   : > { %v1917_v3 = vpop.f32.mrf.mxu1 }
 0x227   : > { %v1919_v11 = vpop.f32.mrf.mxu1 }
 0x229   : > { %v9764_v56 = vpop.f32.mrf.mxu1 }
 0x22b   : > { %v9768_v7 = vpop.f32.mrf.mxu1 }
 0x22d   : > { %v1927_v27 = vpop.f32.mrf.mxu1 }
 0x22f   : > { %v1929_v41 = vpop.f32.mrf.mxu1 }
 0x2a1   : > { %v1860_v17 = vpop.f32.mrf.mxu0 }
 0x2a2   : > { %v1861_v14 = vadd.f32 %v1860_v17, %v9760_v37 }
 0x2a3   : > { %v1862_v57 = vpop.f32.mrf.mxu0 }
 0x2a4   : > { %v1914_v9 = vadd.f32 %v1913_v50, %v1861_v14  ;;  %v1863_v34 = vadd.f32 %v1862_v57, %v9760_v37 }
 0x2a5   : > { %v1864_v22 = vpop.f32.mrf.mxu0 }
 0x2a6   : > { %v1916_v4 = vadd.f32 %v1915_v36, %v1863_v34  ;;  %v2136_v53 = vmax.f32 %v1914_v9, 0.0  ;;  %v1865_v15 = vadd.f32 %v1864_v22, %v9797_v2 }
 0x2a7   : > { %v1866_v20 = vpop.f32.mrf.mxu0 }
 0x2a8   : > { %v2137_v38 = vmax.f32 %v1916_v4, 0.0  ;;  %v1867_v43 = vadd.f32 %v1866_v20, %v9797_v2  ;;  %v1918_v58 = vadd.f32 %v1917_v3, %v1865_v15 }
 0x2a9   : > { %v9766_v47 = vpop.f32.mrf.mxu0 }
 0x2aa   : > { %v9770_v39 = vpack.c.bf16 %v2137_v38, %v2136_v53  ;;  %v1920_v60 = vadd.f32 %v1919_v11, %v1867_v43  ;;  %v2141_v3 = vmax.f32 %v1918_v58, 0.0 }
 0x2ab   : > { %v9772_v23 = vpop.f32.mrf.mxu0 }
 0x2ac   : > { %2428 = vrot.lane.b32.xlu0 %v9770_v39, %s8834_s18  ;;  %2244 = vst [vmem:[#allocation4] sm:$0xff] %v9770_v39  ;;  %v2142_v46 = vmax.f32 %v1920_v60, 0.0 }
 0x2ad   : > { %v1874_v31 = vpop.f32.mrf.mxu0 }
 0x2ae   : > { %v1875_v21 = vadd.f32 %v1874_v31, %v9774_v52  ;;  %v9823_v4 = vpack.c.bf16 %v2142_v46, %v2141_v3 }
 0x2af   : > { %v1876_v55 = vpop.f32.mrf.mxu0 }
 0x2b0   : > { %v9780_v6 = vadd.f32 %v1927_v27, %v1875_v21  ;;  %v1877_v49 = vadd.f32 %v1876_v55, %v9774_v52  ;;  %2348 = vrot.lane.b32.xlu0 %v9770_v39, %s8836_s20 }
 0x2b2   : > { %v9785_v8 = vadd.f32 %v1929_v41, %v1877_v49  ;;  %v13020_v45 = vmax.f32 %v9780_v6, 0.0 }
 0x2b4   : > { %v13024_v16 = vmax.f32 %v9785_v8, 0.0  ;;  %2268 = vrot.lane.b32.xlu0 %v9770_v39, %s8837_s21 }
 0x2b5   : > { %v1966_v25 = vpop.f32.mrf.mxu1 }
 0x2b6   : > { %v9795_v48 = vpack.c.bf16 %v13024_v16, %v13020_v45  ;;  %v1967_v32 = vadd.f32 %v1966_v25, %v9760_v37 }
 0x2b7   : > { %v1968_v12 = vpop.f32.mrf.mxu1 }
 0x2b8   : > { %2828 = vrot.lane.b32.xlu0 %v9770_v39, %s8835_s19  ;;  %v1969_v63 = vadd.f32 %v1968_v12, %v9760_v37 }
 0x2b9   : > { %v1970_v33 = vpop.f32.mrf.mxu1  ;;  %v2019_v42 = vpop.f32.mrf.mxu0 }
 0x2ba   : > { %v2020_v59 = vadd.f32 %v2019_v42, %v1967_v32  ;;  %v1971_v26 = vadd.f32 %v1970_v33, %v9797_v2  ;;  %v1873_v42 = vadd.f32 %v9772_v23, %v9758_v1 }
 0x2bb   : > { %v1972_v44 = vpop.f32.mrf.mxu1  ;;  %v2021_v13 = vpop.f32.mrf.mxu0 }
 0x2bc   : > { %v2022_v54 = vadd.f32 %v2021_v13, %v1969_v63  ;;  %2748 = vrot.lane.b32.xlu0 %v9770_v39, %s8838_s22  ;;  %v2138_v28 = vmax.f32 %v2020_v59, 0.0  ;;  %v1973_v19 = vadd.f32 %v1972_v44, %v9797_v2  ;;  %v1871_v59 = vadd.f32 %v9766_v47, %v9758_v1 }
 0x2bd   : > { %v1976_v24 = vpop.f32.mrf.mxu1  ;;  %v2023_v51 = vpop.f32.mrf.mxu0 }
 0x2be   : > { %v2139_v35 = vmax.f32 %v2022_v54, 0.0  ;;  %v2024_v10 = vadd.f32 %v2023_v51, %v1971_v26  ;;  %v1977_v18 = vadd.f32 %v1976_v24, %v9758_v1  ;;  %v9858_v26 = vadd.f32 %v9768_v7, %v1873_v42 }
 0x2bf   : > { %v1978_v29 = vpop.f32.mrf.mxu1  ;;  %v2025_v62 = vpop.f32.mrf.mxu0  ;;  %v9864_v60 = vadd.f32 %v9764_v56, %v1871_v59 }
 0x2c0   : > { %v9809_v40 = vpack.c.bf16 %v2139_v35, %v2138_v28  ;;  %v2026_v61 = vadd.f32 %v2025_v62, %v1973_v19  ;;  %2668 = vrot.lane.b32.xlu0 %v9770_v39, %s8839_s23  ;;  %v2143_v50 = vmax.f32 %v2024_v10, 0.0  ;;  %v1979_v36 = vadd.f32 %v1978_v29, %v9758_v1 }
 0x2c1   : > { %v1980_v30 = vpop.f32.mrf.mxu1  ;;  %v2029_v5 = vpop.f32.mrf.mxu0  ;;  %v13025_v19 = vmax.f32 %v9858_v26, 0.0  ;;  %v13021_v10 = vmax.f32 %v9864_v60, 0.0 }
 0x2c2   : > { %v2144_v17 = vmax.f32 %v2026_v61, 0.0  ;;  %v2030_v14 = vadd.f32 %v2029_v5, %v1977_v18  ;;  %2430 = vrot.lane.b32.xlu1 %v9809_v40, %s8834_s18  ;;  %2245 = vst [vmem:[#allocation4 + $0x8] sm:$0xff] %v9809_v40  ;;  %v1981_v34 = vadd.f32 %v1980_v30, %v9774_v52 }
 0x2c3   : > { %v1982_v11 = vpop.f32.mrf.mxu1  ;;  %v2031_v57 = vpop.f32.mrf.mxu0  ;;  %v8262_v18 = vpack.c.bf16 %v13025_v19, %v13021_v10 }
 0x2c4   : > { %v9818_v9 = vpack.c.bf16 %v2144_v17, %v2143_v50  ;;  %v2032_v22 = vadd.f32 %v2031_v57, %v1979_v36  ;;  %2588 = vrot.lane.b32.xlu0 %v9770_v39, %s8840_s29  ;;  %v2148_v53 = vmax.f32 %v2030_v14, 0.0  ;;  %v1983_v38 = vadd.f32 %v1982_v11, %v9774_v52 }
 0x2c5   : > { %v2033_v20 = vpop.f32.mrf.mxu0 }
 0x2c6   : > { %v2149_v31 = vmax.f32 %v2032_v22, 0.0  ;;  %v2034_v27 = vadd.f32 %v2033_v20, %v1981_v34  ;;  %2350 = vrot.lane.b32.xlu1 %v9809_v40, %s8836_s20  ;;  %2248 = vst [vmem:[#allocation4 + $0x1c] sm:$0xff] %v9818_v9 }
 0x2c7   : > { %v2035_v21 = vpop.f32.mrf.mxu0 }
 0x2c8   : > { %v9829_v55 = vpack.c.bf16 %v2149_v31, %v2148_v53  ;;  %v2036_v49 = vadd.f32 %v2035_v21, %v1983_v38  ;;  %2434 = vrot.lane.b32.xlu0 %v9823_v4, %s8834_s18  ;;  %v2153_v41 = vmax.f32 %v2034_v27, 0.0 }
 0x2c9   : > { %v8441_v32 = vpop.f32.mrf.mxu0 }
 0x2ca   : > { %v2154_v25 = vmax.f32 %v2036_v49, 0.0  ;;  %2270 = vrot.lane.b32.xlu1 %v9809_v40, %s8837_s21  ;;  %2251 = vst [vmem:[#allocation4 + $0x30] sm:$0xff] %v9829_v55 }
 0x2cb   : > { %v2121_v33 = vpop.f32.mrf.mxu0 }
 0x2cc   : > { %v9836_v12 = vpack.c.bf16 %v2154_v25, %v2153_v41  ;;  %2354 = vrot.lane.b32.xlu0 %v9823_v4, %s8836_s20 }
 0x2cd   : > { %v8442_v13 = vpop.f32.mrf.mxu0 }
 0x2ce   : > { %2830 = vrot.lane.b32.xlu1 %v9809_v40, %s8835_s19  ;;  %2254 = vst [vmem:[#allocation4 + $0x44] sm:$0xff] %v9836_v12 }
 0x2cf   : > { %v2124_v28 = vpop.f32.mrf.mxu0 }
 0x2d0   : > { %2274 = vrot.lane.b32.xlu0 %v9823_v4, %s8837_s21 }
 0x2d2   : > { %2750 = vrot.lane.b32.xlu1 %v9809_v40, %s8838_s22 }
 0x2d4   : > { %2834 = vrot.lane.b32.xlu0 %v9823_v4, %s8835_s19 }
 0x2d5   : > { %v8320_v43 = vpop.f32.mrf.mxu1 }
 0x2d6   : > { %2670 = vrot.lane.b32.xlu1 %v9809_v40, %s8839_s23 }
 0x2d7   : > { %v8321_v63 = vpop.f32.mrf.mxu1 }
 0x2d8   : > { %v8322_v15 = vadd.f32 %v8321_v63, %v8320_v43  ;;  %2754 = vrot.lane.b32.xlu0 %v9823_v4, %s8838_s22 }
 0x2d9   : > { %v8323_v44 = vpop.f32.mrf.mxu1 }
 0x2da   : > { %v2073_v54 = vadd.f32 %v8322_v15, %v9760_v37  ;;  %2590 = vrot.lane.b32.xlu1 %v9809_v40, %s8840_s29 }
 0x2db   : > { %v8324_v23 = vpop.f32.mrf.mxu1 }
 0x2dc   : > { %v8325_v24 = vadd.f32 %v8324_v23, %v8323_v44  ;;  %v2122_v47 = vadd.f32 %v2121_v33, %v2073_v54  ;;  %2674 = vrot.lane.b32.xlu0 %v9823_v4, %s8839_s23  ;;  %v10046_v54 = vld [vmem:[%s13014_s3 + $0x34] ss:$12 sps:$4 sm:$0xff]  }
 0x2dd   : > { %v8326_v51 = vpop.f32.mrf.mxu1  ;;  %3586 = vmatprep.mubr.bf16.mxu0 %v10046_v54 }
 0x2de   : > { %v2140_v7 = vmax.f32 %v2122_v47, 0.0  ;;  %v2076_v35 = vadd.f32 %v8325_v24, %v9797_v2  ;;  %2436 = vrot.lane.b32.xlu1 %v9818_v9, %s8834_s18 }
 0x2df   : > { %v8327_v37 = vpop.f32.mrf.mxu1 }
 0x2e0   : > { %v8258_v56 = vpack.c.bf16 %v2140_v7, %v2140_v7  ;;  %v8328_v58 = vadd.f32 %v8327_v37, %v8326_v51  ;;  %v2125_v29 = vadd.f32 %v2124_v28, %v2076_v35  ;;  %2594 = vrot.lane.b32.xlu0 %v9823_v4, %s8840_s29 }
 0x2e1   : > { %v8329_v62 = vpop.f32.mrf.mxu1 }
 0x2e2   : > { %2222 = vst [vmem:[#allocation3 + $0x10] sm:$0xf] %v8258_v56  ;;  %v2081_v2 = vadd.f32 %v8328_v58, %v9758_v1  ;;  %v2145_v61 = vmax.f32 %v2125_v29, 0.0  ;;  %2356 = vrot.lane.b32.xlu1 %v9818_v9, %s8836_s20  ;;  %v7859_v58 = vld [vmem:[%s13015_s4 + $0x30] sm:$0xff] }
 0x2e3   : > { %v8330_v46 = vpop.f32.mrf.mxu1 }
 0x2e4   : > { %v2130_v30 = vadd.f32 %v8441_v32, %v2081_v2  ;;  %v8261_v5 = vpack.c.bf16 %v2145_v61, %v2145_v61  ;;  %v8331_v50 = vadd.f32 %v8330_v46, %v8329_v62  ;;  %2440 = vrot.lane.b32.xlu0 %v8262_v18, %s8834_s18 }
 0x2e6   : > { %v2150_v36 = vmax.f32 %v2130_v30, 0.0  ;;  %2225 = vst [vmem:[#allocation3 + $0x28] sm:$0xf] %v8261_v5  ;;  %v2084_v17 = vadd.f32 %v8331_v50, %v9774_v52  ;;  %2276 = vrot.lane.b32.xlu1 %v9818_v9, %s8837_s21 }
 0x2e8   : > { %v8264_v14 = vpack.c.bf16 %v2150_v36, %v2150_v36  ;;  %v2133_v3 = vadd.f32 %v8442_v13, %v2084_v17  ;;  %2360 = vrot.lane.b32.xlu0 %v8262_v18, %s8836_s20 }
 0x2e9   : > { %v9887_v1 = vld [vmem:[#allocation3 + $0x10] sm:$0xff] }
 0x2ea   : > { %2228 = vst [vmem:[#allocation3 + $0x40] sm:$0xf] %v8264_v14  ;;  %v2155_v11 = vmax.f32 %v2133_v3, 0.0  ;;  %2836 = vrot.lane.b32.xlu1 %v9818_v9, %s8835_s19  ;;  %2246 = vst [vmem:[#allocation4 + $0x10] sm:$0xf] %v9887_v1  ;;  %v7860_v3 = vld [vmem:[%s13015_s4 + $0x38] sm:$0xff] }
 0x2ec   : > { %v8267_v57 = vpack.c.bf16 %v2155_v11, %v2155_v11  ;;  %2280 = vrot.lane.b32.xlu0 %v8262_v18, %s8837_s21 }
 0x2ed   : > { %v9893_v52 = vld [vmem:[#allocation3 + $0x28] sm:$0xff] }
 0x2ee   : > { %2231 = vst [vmem:[#allocation3 + $0x58] sm:$0xf] %v8267_v57  ;;  %2756 = vrot.lane.b32.xlu1 %v9818_v9, %s8838_s22  ;;  %2249 = vst [vmem:[#allocation4 + $0x24] sm:$0xf] %v9893_v52  ;;  %v7858_v57 = vld [vmem:[%s13015_s4 + $0x28] sm:$0xff] }
 0x2f0   : > { %2840 = vrot.lane.b32.xlu0 %v8262_v18, %s8835_s19 }
 0x2f1   : > { %v9899_v34 = vld [vmem:[#allocation3 + $0x40] sm:$0xff] }
 0x2f2   : > { %2676 = vrot.lane.b32.xlu1 %v9818_v9, %s8839_s23  ;;  %2252 = vst [vmem:[#allocation4 + $0x38] sm:$0xf] %v9899_v34 }
 0x2f4   : > { %2760 = vrot.lane.b32.xlu0 %v8262_v18, %s8838_s22 }
 0x2f5   : > { %v9905_v22 = vld [vmem:[#allocation3 + $0x58] sm:$0xff] }
 0x2f6   : > { %2596 = vrot.lane.b32.xlu1 %v9818_v9, %s8840_s29  ;;  %2255 = vst [vmem:[#allocation4 + $0x4c] sm:$0xf] %v9905_v22 }
 0x2f8   : > { %2680 = vrot.lane.b32.xlu0 %v8262_v18, %s8839_s23 }
 0x2fa   : > { %2442 = vrot.lane.b32.xlu1 %v9829_v55, %s8834_s18 }
 0x2fc   : > { %2600 = vrot.lane.b32.xlu0 %v8262_v18, %s8840_s29 }
 0x2fe   : > { %2362 = vrot.lane.b32.xlu1 %v9829_v55, %s8836_s20 }
 0x300   : > { %2520 = vrot.lane.b32.xlu0 %v8262_v18, %s8841_s8  ;;  %v7857_v18 = vld [vmem:[%s13015_s4 + $0x20] sm:$0xff] }
 0x302   : > { %2282 = vrot.lane.b32.xlu1 %v9829_v55, %s8837_s21 }
 0x304   : > { %2446 = vrot.lane.b32.xlu0 %v9795_v48, %s8834_s18 }
 0x306   : > { %2842 = vrot.lane.b32.xlu1 %v9829_v55, %s8835_s19 }
 0x308   : > { %2366 = vrot.lane.b32.xlu0 %v9795_v48, %s8836_s20 }
 0x30a   : > { %2762 = vrot.lane.b32.xlu1 %v9829_v55, %s8838_s22 }
 0x30c   : > { %2286 = vrot.lane.b32.xlu0 %v9795_v48, %s8837_s21 }
 0x30e   : > { %2682 = vrot.lane.b32.xlu1 %v9829_v55, %s8839_s23 }
 0x310   : > { %2846 = vrot.lane.b32.xlu0 %v9795_v48, %s8835_s19 }
 0x312   : > { %2602 = vrot.lane.b32.xlu1 %v9829_v55, %s8840_s29 }
 0x314   : > { %2766 = vrot.lane.b32.xlu0 %v9795_v48, %s8838_s22 }
 0x316   : > { %2522 = vrot.lane.b32.xlu1 %v9829_v55, %s8841_s8 }
 0x318   : > { %2686 = vrot.lane.b32.xlu0 %v9795_v48, %s8839_s23 }
 0x31a   : > { %2448 = vrot.lane.b32.xlu1 %v9836_v12, %s8834_s18 }
 0x31c   : > { %2606 = vrot.lane.b32.xlu0 %v9795_v48, %s8840_s29 }
 0x31e   : > { %2368 = vrot.lane.b32.xlu1 %v9836_v12, %s8836_s20  ;;  %v9947_v20 = vpop.permute.xlu0 %2428 }
 0x31f   : > { %v2452_v45 = vrot.slane %v9947_v20, 4 }
 0x320   : > { %2432 = vrot.lane.b32.xlu0 %v9887_v1, %s8834_s18 }
 0x322   : > { %2288 = vrot.lane.b32.xlu1 %v9836_v12, %s8837_s21  ;;  %v9953_v53 = vpop.permute.xlu0 %2348 }
 0x324   : > { %2352 = vrot.lane.b32.xlu0 %v9887_v1, %s8836_s20 }
 0x326   : > { %2848 = vrot.lane.b32.xlu1 %v9836_v12, %s8835_s19  ;;  %v9959_v38 = vpop.permute.xlu0 %2268 }
 0x328   : > { %2272 = vrot.lane.b32.xlu0 %v9887_v1, %s8837_s21 }
 0x32a   : > { %2768 = vrot.lane.b32.xlu1 %v9836_v12, %s8838_s22  ;;  %v9965_v31 = vpop.permute.xlu0 %2828 }
 0x32c   : > { %2444 = vrot.lane.b32.xlu0 %v9899_v34, %s8834_s18 }
 0x32e   : > { %2688 = vrot.lane.b32.xlu1 %v9836_v12, %s8839_s23  ;;  %v9971_v27 = vpop.permute.xlu0 %2748 }
 0x330   : > { %2526 = vrot.lane.b32.xlu0 %v9795_v48, %s8841_s8 }
 0x332   : > { %2608 = vrot.lane.b32.xlu1 %v9836_v12, %s8840_s29  ;;  %v9977_v21 = vpop.permute.xlu0 %2668 }
 0x334   : > { %v9979_v55 = vpop.permute.xlu1 %2430  ;;  %2364 = vrot.lane.b32.xlu0 %v9899_v34, %s8836_s20 }
 0x335   : > { %13182 = vst [vmem:[#allocation14_spill] sm:$0xff] %v9979_v55 }
 0x336   : > { %2438 = vrot.lane.b32.xlu1 %v9893_v52, %s8834_s18  ;;  %v9985_v49 = vpop.permute.xlu0 %2588 }
 0x338   : > { %v9987_v41 = vpop.permute.xlu1 %2350  ;;  %2284 = vrot.lane.b32.xlu0 %v9899_v34, %s8837_s21 }
 0x339   : > { %13183 = vst [vmem:[#allocation15_spill] sm:$0xff] %v9987_v41 }
 0x33a   : > { %2358 = vrot.lane.b32.xlu1 %v9893_v52, %s8836_s20  ;;  %v9993_v48 = vpop.permute.xlu0 %2434 }
 0x33b   : > { %v2455_v0 = vrot.slane %v9993_v48, 4 }
 0x33c   : > { %v9995_v25 = vpop.permute.xlu1 %2270  ;;  %2508 = vrot.lane.b32.xlu0 %v9770_v39, %s8841_s8 }
 0x33e   : > { %2278 = vrot.lane.b32.xlu1 %v9893_v52, %s8837_s21  ;;  %v10001_v32 = vpop.permute.xlu0 %2354 }
 0x340   : > { %v10003_v43 = vpop.permute.xlu1 %2830  ;;  %2514 = vrot.lane.b32.xlu0 %v9823_v4, %s8841_s8 }
 0x342   : > { %2450 = vrot.lane.b32.xlu1 %v9905_v22, %s8834_s18  ;;  %v10009_v33 = vpop.permute.xlu0 %2274 }
 0x344   : > { %v10011_v42 = vpop.permute.xlu1 %2750  ;;  %2764 = vrot.lane.b32.xlu0 %v9899_v34, %s8838_s22 }
 0x346   : > { %2528 = vrot.lane.b32.xlu1 %v9836_v12, %s8841_s8  ;;  %v10017_v39 = vpop.permute.xlu0 %2834 }
 0x348   : > { %v10019_v63 = vpop.permute.xlu1 %2670  ;;  %2752 = vrot.lane.b32.xlu0 %v9887_v1, %s8838_s22 }
 0x34a   : > { %2370 = vrot.lane.b32.xlu1 %v9905_v22, %s8836_s20  ;;  %v10025_v59 = vpop.permute.xlu0 %2754 }
 0x34c   : > { %v10027_v15 = vpop.permute.xlu1 %2590  ;;  %2844 = vrot.lane.b32.xlu0 %v9899_v34, %s8835_s19 }
 0x34d   : > { %13184 = vst [vmem:[#allocation16_spill] sm:$0xff] %v10027_v15 }
 0x34e   : > { %2510 = vrot.lane.b32.xlu1 %v9809_v40, %s8841_s8  ;;  %v10033_v12 = vpop.permute.xlu0 %2674 }
 0x350   : > { %v10035_v44 = vpop.permute.xlu1 %2436  ;;  %2684 = vrot.lane.b32.xlu0 %v9899_v34, %s8839_s23 }
 0x351   : > { %13185 = vst [vmem:[#allocation17_spill] sm:$0xff] %v10035_v44 }
 0x352   : > { %2290 = vrot.lane.b32.xlu1 %v9905_v22, %s8837_s21  ;;  %v10041_v13 = vpop.permute.xlu0 %2594 }
 0x353   : > { %13186 = vst [vmem:[#allocation18_spill] sm:$0xff] %v10041_v13 }
 0x354   : > { %v10048_v23 = vpop.permute.xlu1 %2356  ;;  %2832 = vrot.lane.b32.xlu0 %v9887_v1, %s8835_s19 }
 0x355   : > { %13187 = vst [vmem:[#allocation19_spill] sm:$0xff] %v10048_v23 }
 0x356   : > { %2516 = vrot.lane.b32.xlu1 %v9818_v9, %s8841_s8  ;;  %v10055_v40 = vpop.permute.xlu0 %2440 }
 0x357   : > { %v2458_v19 = vrot.slane %v10055_v40, 4 }
 0x358   : > { %v10057_v24 = vpop.permute.xlu1 %2276  ;;  %2672 = vrot.lane.b32.xlu0 %v9887_v1, %s8839_s23 }
 0x35a   : > { %2758 = vrot.lane.b32.xlu1 %v9893_v52, %s8838_s22  ;;  %v10063_v47 = vpop.permute.xlu0 %2360 }
 0x35c   : > { %v10065_v51 = vpop.permute.xlu1 %2836  ;;  %2604 = vrot.lane.b32.xlu0 %v9899_v34, %s8840_s29 }
 0x35e   : > { %2838 = vrot.lane.b32.xlu1 %v9893_v52, %s8835_s19  ;;  %v10071_v9 = vpop.permute.xlu0 %2280 }
 0x360   : > { %v10073_v28 = vpop.permute.xlu1 %2756  ;;  %2592 = vrot.lane.b32.xlu0 %v9887_v1, %s8840_s29 }
 0x362   : > { %2770 = vrot.lane.b32.xlu1 %v9905_v22, %s8838_s22  ;;  %v10079_v7 = vpop.permute.xlu0 %2840 }
 0x364   : > { %v10081_v35 = vpop.permute.xlu1 %2676  ;;  %2524 = vrot.lane.b32.xlu0 %v9899_v34, %s8841_s8 }
 0x366   : > { %2850 = vrot.lane.b32.xlu1 %v9905_v22, %s8835_s19  ;;  %v10087_v37 = vpop.permute.xlu0 %2760 }
 0x368   : > { %v10089_v56 = vpop.permute.xlu1 %2596  ;;  %2512 = vrot.lane.b32.xlu0 %v9887_v1, %s8841_s8 }
 0x369   : > { %13188 = vst [vmem:[#allocation20_spill] sm:$0xff] %v10089_v56 }
 0x36a   : > { %2690 = vrot.lane.b32.xlu1 %v9905_v22, %s8839_s23  ;;  %v10098_v29 = vpop.permute.xlu0 %2680 }
 0x36c   : > { %v10100_v62 = vpop.permute.xlu1 %2442  ;;  %3042 = vperm.xlu0 %8550, %v7859_v58   ;;  %v2372_v58 = vrot.slane %v9953_v53, 4 }
 0x36e   : > { %2678 = vrot.lane.b32.xlu1 %v9893_v52, %s8839_s23  ;;  %v10107_v2 = vpop.permute.xlu0 %2600 }
 0x36f   : > { %13189 = vst [vmem:[#allocation21_spill] sm:$0xff] %v10107_v2 }
 0x370   : > { %v10109_v61 = vpop.permute.xlu1 %2362  ;;  %3032 = vperm.xlu0 %8550, %v7857_v18  }
 0x372   : > { %2610 = vrot.lane.b32.xlu1 %v9905_v22, %s8840_s29  ;;  %v10113_v46 = vpop.permute.xlu0 %2520 }
 0x373   : > { %13190 = vst [vmem:[#allocation22_spill] sm:$0xff] %v10113_v46  ;;  %v13194_v46 = vrot.slane %v10035_v44, 4 }
 0x374   : > { %v10115_v30 = vpop.permute.xlu1 %2282 }
 0x376   : > { %2598 = vrot.lane.b32.xlu1 %v9893_v52, %s8840_s29  ;;  %v2447_v5 = vpop.permute.xlu0 %2446 }
 0x378   : > { %v10119_v50 = vpop.permute.xlu1 %2842 }
 0x379   : > { %13191 = vst [vmem:[#allocation23_spill] sm:$0xff] %v10119_v50 }
 0x37a   : > { %2530 = vrot.lane.b32.xlu1 %v9905_v22, %s8841_s8  ;;  %v2367_v36 = vpop.permute.xlu0 %2366 }
 0x37c   : > { %v10123_v17 = vpop.permute.xlu1 %2762 }
 0x37e   : > { %2518 = vrot.lane.b32.xlu1 %v9893_v52, %s8841_s8  ;;  %v10127_v14 = vpop.permute.xlu0 %2286  ;;  %v13031_v52 = vrot.slane %v9979_v55, 4 }
 0x380   : > { %v10132_v1 = vpop.permute.xlu1 %2682 }
 0x382   : > { %3047 = vperm.xlu1 %8551, %v7860_v3   ;;  %v10134_v11 = vpop.permute.xlu0 %2846  ;;  %v13037_v3 = vrot.slane %v10100_v62, 4 }
 0x384   : > { %v10139_v34 = vpop.permute.xlu1 %2602  ;;  %v2474_v10 = vsel %vm568_vm0, %v2458_v19, %v13037_v3  ;;  %v2375_v3 = vrot.slane %v10001_v32, 4 }
 0x385   : > { %13192 = vst [vmem:[#allocation24_spill] sm:$0xff] %v10139_v34  ;;  %v2461_v34 = vrot.slane %v2447_v5, 4 }
 0x386   : > { %3037 = vperm.xlu1 %8551, %v7858_v57   ;;  %v10141_v22 = vpop.permute.xlu0 %2766  ;;  %v2464_v57 = vsel %vm568_vm0, %v2452_v45, %v13031_v52  ;;  %v13196_v52 = vrot.slane %v9987_v41, 4  ;;  %v2852_v41 = vrot.slane %v9965_v31, 4 }
 0x387   : > { %v2465_v45 = vsel %vm732_vm1, %v9947_v20, %v2464_v57  ;;  %v2378_v20 = vrot.slane %v10063_v47, 4 }
 0x388   : > { %v10145_v18 = vpop.permute.xlu1 %2522  ;;  %v2384_v55 = vsel %vm568_vm0, %v2372_v58, %v13196_v52  ;;  %v2475_v52 = vsel %vm732_vm1, %v10055_v40, %v2474_v10  ;;  %v13199_v10 = vrot.slane %v10109_v61, 4 }
 0x389   : > { %13193 = vst [vmem:[#allocation25_spill] sm:$0xff] %v10145_v18  ;;  %v2469_v18 = vsel %vm568_vm0, %v2455_v0, %v13194_v46 }
 0x38a   : > { %v10151_v16 = vpop.permute.xlu0 %2686  ;;  %v2470_v0 = vsel %vm732_vm1, %v9993_v48, %v2469_v18  ;;  %v2381_v48 = vrot.slane %v2367_v36, 4  ;;  %v2394_v40 = vsel %vm568_vm0, %v2378_v20, %v13199_v10  ;;  %v2301_v20 = vrot.slane %v10127_v14, 4 }
 0x38c   : > { %v10161_v2 = vpop.permute.xlu1 %2448 }
 0x38d   : > { %13195 = vst [vmem:[#allocation26_spill] sm:$0xff] %v10161_v2  ;;  %v13042_v56 = vrot.slane %v10161_v2, 4 }
 0x38e   : > { %v10172_v13 = vpop.permute.xlu0 %2606 }
 0x38f   : > { %13197 = vst [vmem:[#allocation27_spill] sm:$0xff] %v10172_v13  ;;  %v2479_v19 = vsel %vm568_vm0, %v2461_v34, %v13042_v56  ;;  %v7898_v34 = vcombine.high %v2465_v45, %v2470_v0  ;;  %v13198_v56 = vrot.slane %v10048_v23, 4  ;;  %v13049_v23 = vrot.slane %v10119_v50, 4 }
 0x390   : > { %v2480_v58 = vsel %vm732_vm1, %v2447_v5, %v2479_v19  ;;  %v10186_v57 = vpop.permute.xlu1 %2368 }
 0x391   : > { %v13046_v18 = vrot.slane %v10186_v57, 4  ;;  %v7903_v46 = vcombine.high %v2475_v52, %v2480_v58  ;;  %v7902_v44 = vcombine.low %v2475_v52, %v2480_v58  ;;  %v2389_v13 = vsel %vm568_vm0, %v2375_v3, %v13198_v56 }
 0x392   : > { %v10190_v2 = vpop.permute.xlu0 %2432  ;;  %v10204_v52 = vsel %vm651_vm3, %v9953_v53, %v2384_v55  ;;  %v13048_v58 = vrot.slane %v10065_v51, 4  ;;  %v2390_v55 = vsel %vm651_vm3, %v10001_v32, %v2389_v13  ;;  %v2298_v13 = vrot.slane %v10071_v9, 4 }
 0x393   : > { %v2399_v5 = vsel %vm568_vm0, %v2381_v48, %v13046_v18  ;;  %v13047_v19 = vrot.slane %v10190_v2, 4  ;;  %3554 = vmatprep.subr.bf16.mxu0 %v7903_v46  ;;  %v2855_v48 = vrot.slane %v10017_v39, 4 }
 0x394   : > { %v2400_v56 = vsel %vm651_vm3, %v2367_v36, %v2399_v5  ;;  %v10209_v3 = vpop.permute.xlu1 %2288  ;;  %3555 = vmatpush1.bf16.msra.mxu0 %v7902_v44  ;;  %v2858_v36 = vrot.slane %v10079_v7, 4  ;;  %v2395_v44 = vsel %vm651_vm3, %v10063_v47, %v2394_v40  ;;  %v7897_v5 = vcombine.low %v2465_v45, %v2470_v0 }
 0x395   : > { %v2468_v46 = vsel %vm732_vm1, %v10190_v2, %v13047_v19  ;;  %3556 = vmatprep.subr.bf16.mxu0 %v7898_v34  ;;  %v7893_v53 = vcombine.high %v2395_v44, %v2400_v56  ;;  %v2869_v32 = vsel %vm568_vm0, %v2855_v48, %v13048_v58  ;;  %v2861_v0 = vrot.slane %v10134_v11, 4 }
 0x396   : > { %2498 = vst [vmem:[#allocation4 + $0x100] sm:$0xf] %v2468_v46  ;;  %v10223_v10 = vpop.permute.xlu0 %2352  ;;  %v2874_v47 = vsel %vm568_vm0, %v2858_v36, %v13049_v23  ;;  %v13200_v40 = vrot.slane %v10209_v3, 4  ;;  %v13201_v36 = vrot.slane %v10003_v43, 4  ;;  %v2295_v23 = vrot.slane %v10009_v33, 4 }
 0x397   : > { %v13052_v19 = vrot.slane %v10223_v10, 4  ;;  %v7888_v34 = vcombine.high %v10204_v52, %v2390_v55 }
 0x398   : > { %v10236_v45 = vpop.permute.xlu1 %2848  ;;  %3557 = vmatpush1.bf16.msra.mxu0 %v7897_v5  ;;  %v2319_v46 = vsel %vm568_vm0, %v2301_v20, %v13200_v40  ;;  %v2864_v5 = vsel %vm568_vm0, %v2852_v41, %v13201_v36  ;;  %v7892_v20 = vcombine.low %v2395_v44, %v2400_v56  ;;  %v13202_v40 = vrot.slane %v10115_v30, 4 }
 0x399   : > { %v2388_v48 = vsel %vm651_vm3, %v10223_v10, %v13052_v19  ;;  %v13053_v58 = vrot.slane %v10236_v45, 4  ;;  %3558 = vmatprep.subr.bf16.mxu0 %v7893_v53  ;;  %v2870_v41 = vsel %vm1137_vm2, %v10017_v39, %v2869_v32  ;;  %v2320_v56 = vsel %vm570_vm5, %v10127_v14, %v2319_v46 }
 0x39a   : > { %2418 = vst [vmem:[#allocation4 + $0xb0] sm:$0xf] %v2388_v48  ;;  %v10252_v18 = vpop.permute.xlu0 %2272  ;;  %v2314_v50 = vsel %vm568_vm0, %v2298_v13, %v13202_v40  ;;  %v2875_v48 = vsel %vm1137_vm2, %v10079_v7, %v2874_v47  ;;  %v13203_v36 = vrot.slane %v10057_v24, 4  ;;  %v2865_v14 = vsel %vm1137_vm2, %v9965_v31, %v2864_v5 }
 0x39b   : > { %v2879_v53 = vsel %vm568_vm0, %v2861_v0, %v13053_v58  ;;  %v13058_v19 = vrot.slane %v10252_v18, 4  ;;  %v2292_v0 = vrot.slane %v9959_v38, 4  ;;  %v7887_v47 = vcombine.low %v10204_v52, %v2390_v55 }
 0x39c   : > { %v2880_v44 = vsel %vm1137_vm2, %v10134_v11, %v2879_v53  ;;  %v10270_v13 = vpop.permute.xlu1 %2768  ;;  %3559 = vmatpush1.bf16.msra.mxu0 %v7892_v20  ;;  %v2309_v40 = vsel %vm568_vm0, %v2295_v23, %v13203_v36  ;;  %v2315_v11 = vsel %vm570_vm5, %v10071_v9, %v2314_v50  ;;  %v13204_v23 = vrot.slane %v9995_v25, 4 }
 0x39d   : > { %v2308_v39 = vsel %vm570_vm5, %v10252_v18, %v13058_v19  ;;  %3560 = vmatprep.subr.bf16.mxu0 %v7888_v34  ;;  %v7953_v7 = vcombine.high %v2875_v48, %v2880_v44  ;;  %v7952_v46 = vcombine.low %v2875_v48, %v2880_v44  ;;  %v7883_v34 = vcombine.high %v2315_v11, %v2320_v56  ;;  %v10306_v44 = vld [vmem:[%s13014_s3 + $0x38] ss:$12 sps:$4 sm:$0xff]  }
 0x39e   : > { %2338 = vst [vmem:[#allocation4 + $0x60] sm:$0xf] %v2308_v39  ;;  %v10284_v32 = vpop.permute.xlu0 %2444  ;;  %v2304_v20 = vsel %vm568_vm0, %v2292_v0, %v13204_v23  ;;  %v7948_v36 = vcombine.high %v2865_v14, %v2870_v41  ;;  %v2310_v31 = vsel %vm570_vm5, %v10009_v33, %v2309_v40  ;;  %v7882_v55 = vcombine.low %v2315_v11, %v2320_v56  ;;  %v2917_v39 = vld [vmem:[#allocation4] sm:$0xff] }
 0x39f   : > { %v2460_v53 = vrot.slane %v10284_v32, 4  ;;  %3619 = vmatprep.subr.bf16.mxu1 %v7953_v7  ;;  %v2305_v50 = vsel %vm570_vm5, %v9959_v38, %v2304_v20  ;;  %v7947_v48 = vcombine.low %v2865_v14, %v2870_v41  ;;  %v13054_v40 = vrot.slane %v10270_v13, 4 }
 0x3a0   : > { %v10293_v5 = vpop.permute.xlu1 %2688  ;;  %3561 = vmatpush1.bf16.msra.mxu0 %v7887_v47  ;;  %3620 = vmatpush1.bf16.msra.mxu1 %v7952_v46  ;;  %v7878_v33 = vcombine.high %v2305_v50, %v2310_v31  ;;  %v7877_v7 = vcombine.low %v2305_v50, %v2310_v31  ;;  %v13055_v56 = vrot.slane %v10123_v17, 4  ;;  %v2781_v41 = vrot.slane %v10141_v22, 4 }
 0x3a1   : > { %v2478_v9 = vsel %vm732_vm1, %v10284_v32, %v2460_v53  ;;  %3562 = vmatprep.subr.bf16.mxu0 %v7883_v34  ;;  %3621 = vmatprep.subr.bf16.mxu1 %v7948_v36  ;;  %v13205_v11 = vmax.f32 %v9858_v26, 0.0  ;;  %v13206_v47 = vmax.f32 %v9785_v8, 0.0  ;;  %v13056_v23 = vrot.slane %v10011_v42, 4  ;;  %v13218_v32 = vld [vmem:[#allocation27_spill] sm:$0xff] }
 0x3a2   : > { %2504 = vst [vmem:[#allocation4 + $0x128] sm:$0xf] %v2478_v9  ;;  %v10301_v52 = vpop.permute.xlu0 %2526  ;;  %v13057_v20 = vrot.slane %v10073_v28, 4  ;;  %v7868_v36 = vcombine.high %v2917_v39, %v9823_v4  ;;  %v13207_v31 = vmov 0   ;;  %v2778_v9 = vrot.slane %v10087_v37, 4 }
 0x3a3   : > { %v8693_v46 = vpack.c.bf16 %v13206_v47, %v13205_v11  ;;  %v2799_v8 = vsel %vm568_vm0, %v2781_v41, %v13054_v40  ;;  %v13208_v11 = vmax.f32 %v9864_v60, 0.0  ;;  %v13209_v41 = vmax.f32 %v9780_v6, 0.0  ;;  %v10358_v60 = vld [vmem:[%s13014_s3 + $0x50] ss:$12 sps:$4 sm:$0xff]  }
 0x3a4   : > { %v10308_v0 = vpop.permute.xlu1 %2608  ;;  %3563 = vmatpush1.bf16.msra.mxu0 %v7882_v55  ;;  %3622 = vmatpush1.bf16.msra.mxu1 %v7947_v48  ;;  %v2772_v55 = vrot.slane %v9971_v27, 4  ;;  %v13059_v48 = vrot.slane %v10019_v63, 4  ;;  %v2794_v58 = vsel %vm568_vm0, %v2778_v9, %v13055_v56  ;;  %13210 = vst [vmem:[#allocation28_spill] sm:$0xff] %v10358_v60  ;;  %v2692_v6 = vrot.slane %v9977_v21, 4 }
 0x3a5   : > { %3564 = vmatprep.subr.bf16.mxu0 %v7878_v33  ;;  %v2775_v33 = vrot.slane %v10025_v59, 4  ;;  %v8694_v47 = vpack.c.bf16 %v13209_v41, %v13208_v11  ;;  %v2800_v41 = vsel %vm1056_vm6, %v10141_v22, %v2799_v8  ;;  %v13065_v56 = vrot.slane %v10293_v5, 4 }
 0x3a6   : > { %v10311_v38 = vpop.permute.xlu0 %2364  ;;  %v2784_v9 = vsel %vm568_vm0, %v2772_v55, %v13056_v23  ;;  %v2704_v22 = vsel %vm568_vm0, %v2692_v6, %v13059_v48  ;;  %v13063_v8 = vrot.slane %v10027_v15, 4  ;;  %v2701_v19 = vrot.slane %v10151_v16, 4 }
 0x3a7   : > { %v13062_v14 = vrot.slane %v10311_v38, 4  ;;  %7957 = vmatmul.mubr.msk.bf16.vlgmr.msra.gmra.mxu1 %vm1819_vm4, %v10306_v44  ;;  %v2789_v11 = vsel %vm568_vm0, %v2775_v33, %v13057_v20  ;;  %v2695_v33 = vrot.slane %v10033_v12, 4  ;;  %v13066_v20 = vrot.slane %v10132_v1, 4 }
 0x3a8   : > { %v10324_v34 = vpop.permute.xlu1 %2438  ;;  %3565 = vmatpush1.bf16.msra.mxu0 %v7877_v7  ;;  %3649 = vmatprep.mubr.bf16.mxu1 %v13207_v31  ;;  %v2612_v48 = vrot.slane %v9985_v49, 4 }
 0x3a9   : > { %v2398_v26 = vsel %vm651_vm3, %v10311_v38, %v13062_v14  ;;  %v2457_v50 = vrot.slane %v10324_v34, 4  ;;  %3566 = vmatprep.subr.bf16.mxu0 %v8693_v46  ;;  %v2719_v14 = vsel %vm568_vm0, %v2701_v19, %v13065_v56  ;;  %v13219_v56 = vrot.slane %v10190_v2, 4 }
 0x3aa   : > { %2424 = vst [vmem:[#allocation4 + $0xd8] sm:$0xf] %v2398_v26  ;;  %v10340_v7 = vpop.permute.xlu0 %2284  ;;  %v7867_v26 = vcombine.low %v2917_v39, %v9823_v4  ;;  %v13064_v39 = vrot.slane %v10081_v35, 4 }
 0x3ab   : > { %v2473_v46 = vsel %vm732_vm1, %v10324_v34, %v2457_v50  ;;  %v13060_v40 = vrot.slane %v10340_v7, 4 }
 0x3ac   : > { %2501 = vst [vmem:[#allocation4 + $0x114] sm:$0xf] %v2473_v46  ;;  %v10369_v4 = vpop.permute.xlu1 %2358  ;;  %3567 = vmatpush1.bf16.msra.mxu0 %v8694_v47  ;;  %v2795_v47 = vsel %vm1056_vm6, %v10087_v37, %v2794_v58  ;;  %v2785_v37 = vsel %vm1056_vm6, %v9971_v27, %v2784_v9  ;;  %v2790_v58 = vsel %vm1056_vm6, %v10025_v59, %v2789_v11 }
 0x3ad   : > { %v2318_v55 = vsel %vm570_vm5, %v10340_v7, %v13060_v40  ;;  %v13061_v23 = vrot.slane %v10369_v4, 4  ;;  %3568 = vmatprep.subr.bf16.mxu0 %v7868_v36  ;;  %v7943_v6 = vcombine.high %v2795_v47, %v2800_v41  ;;  %v2709_v40 = vsel %vm568_vm0, %v2695_v33, %v13064_v39  ;;  %v13213_v39 = vld [vmem:[#allocation24_spill] sm:$0xff] }
 0x3ae   : > { %2344 = vst [vmem:[#allocation4 + $0x88] sm:$0xf] %v2318_v55  ;;  %v10385_v46 = vpop.permute.xlu0 %2508  ;;  %v10413_v59 = vsel %vm975_vm7, %v9977_v21, %v2704_v22  ;;  %v7942_v33 = vcombine.low %v2795_v47, %v2800_v41  ;;  %v7938_v22 = vcombine.high %v2785_v37, %v2790_v58  ;;  %v2720_v41 = vsel %vm975_vm7, %v10151_v16, %v2719_v14  ;;  %v13217_v16 = vld [vmem:[#allocation21_spill] sm:$0xff] }
 0x3af   : > { %v2393_v36 = vsel %vm651_vm3, %v10369_v4, %v13061_v23  ;;  %7958 = vmatmul.mubr.msk.bf16.gmra.mxu1 %vm1819_vm4, %v10358_v60  ;;  %v2698_v23 = vrot.slane %v10098_v29, 4  ;;  %v13214_v47 = vrot.slane %v10100_v62, 4  ;;  %v2618_v14 = vrot.slane %v13217_v16, 4 }
 0x3b0   : > { %2421 = vst [vmem:[#allocation4 + $0xc4] sm:$0xf] %v2393_v36  ;;  %v10400_v55 = vpop.permute.xlu1 %2278  ;;  %3569 = vmatpush1.bf16.msra.mxu0 %v7867_v26  ;;  %3692 = vmatprep.mubr.bf16.mxu1 %v10046_v54  ;;  %v10418_v54 = vsel %vm568_vm0, %v2612_v48, %v13063_v8  ;;  %v13211_v26 = vld [vmem:[#allocation18_spill] sm:$0xff]  ;;  %v7937_v36 = vcombine.low %v2785_v37, %v2790_v58 }
 0x3b1   : > { %v13067_v27 = vrot.slane %v10400_v55, 4  ;;  %3570 = vmatprep.subr.bf16.mxu0 %v7943_v6  ;;  %v2615_v9 = vrot.slane %v13211_v26, 4  ;;  %v2714_v19 = vsel %vm568_vm0, %v2698_v23, %v13066_v20  ;;  %v10432_v48 = vsel %vm975_vm7, %v10033_v12, %v2709_v40  ;;  %v13212_v6 = vld [vmem:[#allocation20_spill] sm:$0xff]  ;;  %v13215_v12 = vld [vmem:[#allocation17_spill] sm:$0xff]  ;;  %v13222_v8 = vld [vmem:[#allocation26_spill] sm:$0xff] }
 0x3b2   : > { %v10421_v11 = vpop.permute.xlu0 %2514  ;;  %v2476_v37 = vsel %vm568_vm0, %v13214_v47, %v2460_v53  ;;  %v13216_v40 = vrot.slane %v13215_v12, 4  ;;  %v13220_v53 = vld [vmem:[#allocation14_spill] sm:$0xff]  ;;  %v13223_v60 = vrot.slane %v13222_v8, 4 }
 0x3b3   : > { %v2313_v21 = vsel %vm570_vm5, %v10400_v55, %v13067_v27  ;;  %v13221_v47 = vrot.slane %v13220_v53, 4  ;;  %v2477_v2 = vsel %vm732_vm1, %v10100_v62, %v2476_v37 }
 0x3b4   : > { %2341 = vst [vmem:[#allocation4 + $0x74] sm:$0xf] %v2313_v21  ;;  %v2451_v23 = vpop.permute.xlu1 %2450  ;;  %3571 = vmatpush2.bf16.msra.mxu0 %v7942_v33  ;;  %v2471_v20 = vsel %vm568_vm0, %v13216_v40, %v2457_v50  ;;  %v2715_v33 = vsel %vm975_vm7, %v10098_v29, %v2714_v19  ;;  %v2621_v21 = vrot.slane %v13218_v32, 4  ;;  %v13224_v29 = vrot.slane %v13212_v6, 4 }
 0x3b5   : > { %v2463_v27 = vrot.slane %v2451_v23, 4  ;;  %3572 = vmatprep.subr.bf16.mxu0 %v7938_v22  ;;  %v2466_v58 = vsel %vm568_vm0, %v13221_v47, %v13219_v56  ;;  %v7933_v15 = vcombine.high %v2715_v33, %v2720_v41  ;;  %v2472_v56 = vsel %vm732_vm1, %v13215_v12, %v2471_v20 }
 0x3b6   : > { %v10458_v34 = vpop.permute.xlu0 %2764  ;;  %v2629_v19 = vsel %vm568_vm0, %v2615_v9, %v13224_v29  ;;  %v13226_v40 = vrot.slane %v10308_v0, 4  ;;  %v7932_v12 = vcombine.low %v2715_v33, %v2720_v41  ;;  %v13228_v33 = vrot.slane %v10311_v38, 4 }
 0x3b7   : > { %v2481_v50 = vsel %vm568_vm0, %v13223_v60, %v2463_v27  ;;  %v2483_v22 = vsel %vm732_vm1, %v2451_v23, %v2463_v27  ;;  %v13225_v27 = vrot.slane %v13213_v39, 4  ;;  %v13227_v62 = vrot.slane %v10458_v34, 4 }
 0x3b8   : > { %v2482_v47 = vsel %vm732_vm1, %v13222_v8, %v2481_v50  ;;  %2507 = vst [vmem:[#allocation4 + $0x13c] sm:$0xf] %v2483_v22  ;;  %v10474_v60 = vpop.permute.xlu1 %2528  ;;  %3573 = vmatpush2.bf16.msra.mxu0 %v7937_v36  ;;  %v2639_v9 = vsel %vm568_vm0, %v2621_v21, %v13226_v40  ;;  %v2467_v8 = vsel %vm732_vm1, %v13220_v53, %v2466_v58  ;;  %v13229_v53 = vrot.slane %v10109_v61, 4 }
 0x3b9   : > { %v2634_v23 = vsel %vm568_vm0, %v2618_v14, %v13225_v27  ;;  %v2798_v20 = vsel %vm1056_vm6, %v10458_v34, %v13227_v62  ;;  %3574 = vmatprep.subr.bf16.mxu0 %v7933_v15  ;;  %v7905_v37 = vcombine.high %v2477_v2, %v2482_v47  ;;  %v7904_v50 = vcombine.low %v2477_v2, %v2482_v47  ;;  %v13231_v2 = vld [vmem:[#allocation19_spill] sm:$0xff] }
 0x3ba   : > { %2824 = vst [vmem:[#allocation4 + $0x268] sm:$0xf] %v2798_v20  ;;  %v10488_v36 = vpop.permute.xlu0 %2752  ;;  %v7928_v14 = vcombine.high %v10413_v59, %v10432_v48  ;;  %v10494_v21 = vsel %vm894_vm8, %v13211_v26, %v2629_v19  ;;  %v7900_v15 = vcombine.high %v2467_v8, %v2472_v56  ;;  %v7927_v40 = vcombine.low %v10413_v59, %v10432_v48 }
 0x3bb   : > { %v2774_v22 = vrot.slane %v10488_v36, 4  ;;  %3660 = vmatprep.subr.bf16.mxu1 %v7905_v37  ;;  %v2635_v58 = vsel %vm894_vm8, %v13217_v16, %v2634_v23  ;;  %v2640_v41 = vsel %vm894_vm8, %v13218_v32, %v2639_v9  ;;  %v2396_v26 = vsel %vm568_vm0, %v13229_v53, %v13228_v33  ;;  %v13233_v32 = vld [vmem:[#allocation25_spill] sm:$0xff]  ;;  %v13235_v9 = vld [vmem:[#allocation15_spill] sm:$0xff] }
 0x3bc   : > { %v2371_v29 = vpop.permute.xlu1 %2370  ;;  %3575 = vmatpush2.bf16.msra.mxu0 %v7932_v12  ;;  %3661 = vmatpush1.bf16.msra.mxu1 %v7904_v50  ;;  %v13230_v19 = vrot.slane %v10369_v4, 4  ;;  %v13232_v47 = vrot.slane %v13231_v2, 4  ;;  %v2542_v48 = vrot.slane %v10474_v60, 4  ;;  %v2539_v27 = vrot.slane %v13233_v32, 4 }
 0x3bd   : > { %v2788_v38 = vsel %vm1056_vm6, %v10488_v36, %v2774_v22  ;;  %v2383_v16 = vrot.slane %v2371_v29, 4  ;;  %3576 = vmatprep.subr.bf16.mxu0 %v7928_v14  ;;  %3662 = vmatprep.subr.bf16.mxu1 %v7900_v15  ;;  %v13234_v23 = vrot.slane %v10223_v10, 4  ;;  %v13236_v4 = vrot.slane %v13235_v9, 4 }
 0x3be   : > { %v2391_v59 = vsel %vm568_vm0, %v13232_v47, %v13230_v19  ;;  %v2541_v20 = vrot.slane %v10301_v52, 4  ;;  %2818 = vst [vmem:[#allocation4 + $0x240] sm:$0xf] %v2788_v38  ;;  %v10525_v37 = vpop.permute.xlu0 %2844  ;;  %v7899_v12 = vcombine.low %v2467_v8, %v2472_v56  ;;  %v13237_v50 = vrot.slane %v10186_v57, 4  ;;  %v13238_v8 = vld [vmem:[#allocation22_spill] sm:$0xff] }
 0x3bf   : > { %v2386_v62 = vsel %vm568_vm0, %v13236_v4, %v13234_v23  ;;  %v2403_v14 = vsel %vm651_vm3, %v2371_v29, %v2383_v16  ;;  %v2860_v15 = vrot.slane %v10525_v37, 4  ;;  %v7923_v53 = vcombine.high %v2635_v58, %v2640_v41 }
 0x3c0   : > { %v2401_v33 = vsel %vm568_vm0, %v13237_v50, %v2383_v16  ;;  %v2397_v10 = vsel %vm651_vm3, %v10109_v61, %v2396_v26  ;;  %v2392_v19 = vsel %vm651_vm3, %v13231_v2, %v2391_v59  ;;  %2427 = vst [vmem:[#allocation4 + $0xec] sm:$0xf] %v2403_v14  ;;  %v10538_v56 = vpop.permute.xlu1 %2510  ;;  %3577 = vmatpush2.bf16.msra.mxu0 %v7927_v40  ;;  %v2538_v38 = vrot.slane %v13238_v8, 4 }
 0x3c1   : > { %v2402_v47 = vsel %vm651_vm3, %v10186_v57, %v2401_v33  ;;  %3663 = vmatpush1.bf16.msra.mxu1 %v7899_v12  ;;  %v2559_v29 = vsel %vm568_vm0, %v2541_v20, %v2542_v48  ;;  %v2878_v61 = vsel %vm1137_vm2, %v10525_v37, %v2860_v15  ;;  %3578 = vmatprep.subr.bf16.mxu0 %v7923_v53  ;;  %v13241_v50 = vrot.slane %v10400_v55, 4 }
 0x3c2   : > { %v7895_v26 = vcombine.high %v2397_v10, %v2402_v47  ;;  %v2625_v57 = vsel %vm894_vm8, %v9985_v49, %v10418_v54  ;;  %v2387_v40 = vsel %vm651_vm3, %v13235_v9, %v2386_v62  ;;  %2904 = vst [vmem:[#allocation4 + $0x2b8] sm:$0xf] %v2878_v61  ;;  %v10553_v2 = vpop.permute.xlu0 %2684  ;;  %v7922_v59 = vcombine.low %v2635_v58, %v2640_v41 }
 0x3c3   : > { %v7894_v16 = vcombine.low %v2397_v10, %v2402_v47  ;;  %v2554_v23 = vsel %vm568_vm0, %v2538_v38, %v2539_v27  ;;  %v2700_v4 = vrot.slane %v10553_v2, 4  ;;  %v7918_v20 = vcombine.high %v2625_v57, %v10494_v21 }
 0x3c4   : > { %3664 = vmatprep.subr.bf16.mxu1 %v7895_v26  ;;  %v7890_v12 = vcombine.high %v2387_v40, %v2392_v19  ;;  %v13239_v49 = vrot.slane %v10340_v7, 4  ;;  %v13240_v54 = vrot.slane %v10115_v30, 4  ;;  %v2560_v58 = vsel %vm813_vm9, %v10301_v52, %v2559_v29  ;;  %v2291_v41 = vpop.permute.xlu1 %2290  ;;  %3579 = vmatpush2.bf16.msra.mxu0 %v7922_v59 }
 0x3c5   : > { %3665 = vmatpush1.bf16.msra.mxu1 %v7894_v16  ;;  %v7917_v62 = vcombine.low %v2625_v57, %v10494_v21  ;;  %v13242_v33 = vrot.slane %v10057_v24, 4  ;;  %v2533_v7 = vrot.slane %v10538_v56, 4  ;;  %v2718_v53 = vsel %vm975_vm7, %v10553_v2, %v2700_v4  ;;  %3580 = vmatprep.subr.bf16.mxu0 %v7918_v20 }
 0x3c6   : > { %v2316_v9 = vsel %vm568_vm0, %v13240_v54, %v13239_v49  ;;  %v2303_v10 = vrot.slane %v2291_v41, 4  ;;  %3666 = vmatprep.subr.bf16.mxu1 %v7890_v12  ;;  %v2555_v52 = vsel %vm813_vm9, %v13238_v8, %v2554_v23  ;;  %v13243_v21 = vrot.slane %v10252_v18, 4  ;;  %2744 = vst [vmem:[#allocation4 + $0x218] sm:$0xf] %v2718_v53  ;;  %v2833_v29 = vpop.permute.xlu0 %2832 }
 0x3c7   : > { %v2311_v14 = vsel %vm568_vm0, %v13242_v33, %v13241_v50  ;;  %v13244_v55 = vrot.slane %v9995_v25, 4  ;;  %v2532_v38 = vrot.slane %v10385_v46, 4  ;;  %v7889_v61 = vcombine.low %v2387_v40, %v2392_v19 }
 0x3c8   : > { %v13245_v26 = vrot.slane %v10209_v3, 4  ;;  %v2323_v59 = vsel %vm570_vm5, %v2291_v41, %v2303_v10  ;;  %v2854_v16 = vrot.slane %v2833_v29, 4  ;;  %v7913_v20 = vcombine.high %v2555_v52, %v2560_v58  ;;  %v10597_v19 = vpop.permute.xlu1 %2516  ;;  %3581 = vmatpush2.bf16.msra.mxu0 %v7917_v62 }
 0x3c9   : > { %v2306_v47 = vsel %vm568_vm0, %v13244_v55, %v13243_v21  ;;  %v2317_v18 = vsel %vm570_vm5, %v10115_v30, %v2316_v9  ;;  %v2312_v8 = vsel %vm570_vm5, %v10057_v24, %v2311_v14  ;;  %v2535_v23 = vrot.slane %v10421_v11, 4  ;;  %2347 = vst [vmem:[#allocation4 + $0x9c] sm:$0xf] %v2323_v59  ;;  %3667 = vmatpush1.bf16.msra.mxu1 %v7889_v61 }
 0x3ca   : > { %v2321_v57 = vsel %vm568_vm0, %v13245_v26, %v2303_v10  ;;  %v2544_v40 = vsel %vm568_vm0, %v2532_v38, %v2533_v7  ;;  %v2868_v49 = vsel %vm1137_vm2, %v2833_v29, %v2854_v16  ;;  %v2536_v30 = vrot.slane %v10597_v19, 4  ;;  %3582 = vmatprep.subr.bf16.mxu0 %v7913_v20  ;;  %v10627_v29 = vld [vmem:[%s13014_s3 + $0x30] ss:$12 sps:$4 sm:$0xff]   ;;  %v10632_v26 = vld [vmem:[%s13014_s3 + $0x4c] ss:$12 sps:$4 sm:$0xff]  }
 0x3cb   : > { %v2322_v12 = vsel %vm570_vm5, %v10209_v3, %v2321_v57  ;;  %v2307_v54 = vsel %vm570_vm5, %v9995_v25, %v2306_v47  ;;  %2898 = vst [vmem:[#allocation4 + $0x290] sm:$0xf] %v2868_v49  ;;  %v10606_v3 = vpop.permute.xlu0 %2672  ;;  %v7912_v9 = vcombine.low %v2555_v52, %v2560_v58  ;;  %v2545_v14 = vsel %vm813_vm9, %v10385_v46, %v2544_v40  ;;  %v8579_v46 = vld [vmem:[#allocation4 + $0x34] ss:$20 sps:$4 sm:$0xff]  }
 0x3cc   : > { %v7885_v24 = vcombine.high %v2317_v18, %v2322_v12  ;;  %v7884_v41 = vcombine.low %v2317_v18, %v2322_v12  ;;  %v2549_v62 = vsel %vm568_vm0, %v2535_v23, %v2536_v30  ;;  %v2694_v50 = vrot.slane %v10606_v3, 4  ;;  %v2759_v25 = vpop.permute.xlu1 %2758  ;;  %v8584_v23 = vld [vmem:[#allocation4 + $0x30] ss:$20 sps:$4 sm:$0xff]  }
 0x3cd   : > { %v7880_v33 = vcombine.high %v2307_v54, %v2312_v8  ;;  %v2550_v53 = vsel %vm813_vm9, %v10421_v11, %v2549_v62  ;;  %3583 = vmatpush2.bf16.msra.mxu0 %v7912_v9  ;;  %v2777_v10 = vrot.slane %v2759_v25, 4  ;;  %v7879_v47 = vcombine.low %v2307_v54, %v2312_v8 }
 0x3ce   : > { %3668 = vmatprep.subr.bf16.mxu1 %v7885_v24  ;;  %v2708_v58 = vsel %vm975_vm7, %v10606_v3, %v2694_v50  ;;  %v7908_v52 = vcombine.high %v2545_v14, %v2550_v53  ;;  %v7907_v55 = vcombine.low %v2545_v14, %v2550_v53  ;;  %v13246_v57 = vrot.slane %v10003_v43, 4 }
 0x3cf   : > { %3669 = vmatpush1.bf16.msra.mxu1 %v7884_v41  ;;  %2738 = vst [vmem:[#allocation4 + $0x1f0] sm:$0xf] %v2708_v58  ;;  %v10620_v21 = vpop.permute.xlu0 %2604  ;;  %v2793_v38 = vsel %vm1056_vm6, %v2759_v25, %v2777_v10  ;;  %v13247_v12 = vrot.slane %v10065_v51, 4  ;;  %v13248_v54 = vrot.slane %v10458_v34, 4  ;;  %v13249_v9 = vrot.slane %v10123_v17, 4 }
 0x3d0   : > { %3670 = vmatprep.subr.bf16.mxu1 %v7880_v33  ;;  %v2620_v11 = vrot.slane %v10620_v21, 4  ;;  %3584 = vmatprep.subr.bf16.mxu0 %v7908_v52  ;;  %2821 = vst [vmem:[#allocation4 + $0x254] sm:$0xf] %v2793_v38  ;;  %v2839_v61 = vpop.permute.xlu1 %2838  ;;  %v2866_v59 = vsel %vm568_vm0, %v13246_v57, %v2854_v16  ;;  %v8585_v16 = vld [vmem:[#allocation4 + $0xc] ss:$20 sps:$4 sm:$0xff]   ;;  %v13250_v53 = vrot.slane %v10073_v28, 4 }
 0x3d1   : > { %3585 = vmatpush2.bf16.msra.mxu0 %v7907_v55  ;;  %v2857_v18 = vrot.slane %v2839_v61, 4  ;;  %v2796_v41 = vsel %vm568_vm0, %v13249_v9, %v13248_v54  ;;  %v10656_v62 = vsel %vm1137_vm2, %v10003_v43, %v2866_v59  ;;  %v8587_v52 = vld [vmem:[#allocation4 + $0x8] ss:$20 sps:$4 sm:$0xff]   ;;  %v13255_v37 = vrot.slane %v10236_v45, 4 }
 0x3d2   : > { %v2638_v20 = vsel %vm894_vm8, %v10620_v21, %v2620_v11  ;;  %v2791_v34 = vsel %vm568_vm0, %v13250_v53, %v2777_v10  ;;  %v13251_v10 = vrot.slane %v10011_v42, 4  ;;  %v10689_v59 = vld [vmem:[%s13014_s3 + $0x48] ss:$12 sps:$4 sm:$0xff]   ;;  %v2797_v36 = vsel %vm1056_vm6, %v10123_v17, %v2796_v41 }
 0x3d3   : > { %3671 = vmatpush1.bf16.msra.mxu1 %v7879_v47  ;;  %2664 = vst [vmem:[#allocation4 + $0x1c8] sm:$0xf] %v2638_v20  ;;  %v10641_v8 = vpop.permute.xlu0 %2592  ;;  %v2871_v40 = vsel %vm568_vm0, %v13247_v12, %v2857_v18  ;;  %v2873_v49 = vsel %vm1137_vm2, %v2839_v61, %v2857_v18  ;;  %v2792_v20 = vsel %vm1056_vm6, %v10073_v28, %v2791_v34  ;;  %v13256_v53 = vrot.slane %v10132_v1, 4 }
 0x3d4   : > { %3672 = vmatprep.subr.bf16.mxu1 %v8579_v46  ;;  %v2614_v24 = vrot.slane %v10641_v8, 4  ;;  %3587 = vmatmul.mubr.bf16.vlgmr.msra.gmra.mxu0 %v10627_v29  ;;  %v10660_v33 = vsel %vm1137_vm2, %v10065_v51, %v2871_v40  ;;  %2901 = vst [vmem:[#allocation4 + $0x2a4] sm:$0xf] %v2873_v49  ;;  %v2771_v14 = vpop.permute.xlu1 %2770  ;;  %v2786_v47 = vsel %vm568_vm0, %v13251_v10, %v2774_v22  ;;  %v13252_v46 = vrot.slane %v10270_v13, 4 }
 0x3d5   : > { %3596 = vmatprep.mubr.bf16.mxu0 %v10632_v26  ;;  %v2783_v43 = vrot.slane %v2771_v14, 4  ;;  %v7950_v51 = vcombine.high %v10656_v62, %v10660_v33  ;;  %v7949_v55 = vcombine.low %v10656_v62, %v10660_v33  ;;  %v2787_v28 = vsel %vm1056_vm6, %v10011_v42, %v2786_v47 }
 0x3d6   : > { %v2628_v25 = vsel %vm894_vm8, %v10641_v8, %v2614_v24  ;;  %v7940_v62 = vcombine.high %v2787_v28, %v2792_v20  ;;  %v2716_v34 = vsel %vm568_vm0, %v13256_v53, %v2700_v4  ;;  %v13257_v47 = vrot.slane %v10293_v5, 4 }
 0x3d7   : > { %3673 = vmatpush1.bf16.msra.mxu1 %v8584_v23  ;;  %2658 = vst [vmem:[#allocation4 + $0x1a0] sm:$0xf] %v2628_v25  ;;  %v10672_v58 = vpop.permute.xlu0 %2524  ;;  %v2801_v38 = vsel %vm568_vm0, %v13252_v46, %v2783_v43  ;;  %v2803_v61 = vsel %vm1056_vm6, %v2771_v14, %v2783_v43  ;;  %v13253_v23 = vld [vmem:[#allocation23_spill] sm:$0xff]  ;;  %v2717_v4 = vsel %vm975_vm7, %v10132_v1, %v2716_v34  ;;  %v8594_v21 = vld [vmem:[#allocation4 + $0x240] ss:$20 sps:$4 sm:$0xff]  }
 0x3d8   : > { %3674 = vmatprep.subr.bf16.mxu1 %v8585_v16  ;;  %v2540_v57 = vrot.slane %v10672_v58, 4  ;;  %v2802_v22 = vsel %vm1056_vm6, %v10270_v13, %v2801_v38  ;;  %2827 = vst [vmem:[#allocation4 + $0x27c] sm:$0xf] %v2803_v61  ;;  %v2851_v18 = vpop.permute.xlu1 %2850  ;;  %v13254_v12 = vrot.slane %v13253_v23, 4 }
 0x3d9   : > { %v2863_v49 = vrot.slane %v2851_v18, 4  ;;  %v7945_v16 = vcombine.high %v2797_v36, %v2802_v22  ;;  %v7944_v54 = vcombine.low %v2797_v36, %v2802_v22  ;;  %v13258_v36 = vrot.slane %v10019_v63, 4 }
 0x3da   : > { %v2876_v40 = vsel %vm568_vm0, %v13254_v12, %v2860_v15  ;;  %v2558_v17 = vsel %vm813_vm9, %v10672_v58, %v2540_v57  ;;  %v13259_v12 = vrot.slane %v10081_v35, 4 }
 0x3db   : > { %3675 = vmatpush1.bf16.msra.mxu1 %v8587_v52  ;;  %2584 = vst [vmem:[#allocation4 + $0x178] sm:$0xf] %v2558_v17  ;;  %v10708_v13 = vpop.permute.xlu0 %2512  ;;  %v2881_v9 = vsel %vm568_vm0, %v13255_v37, %v2863_v49  ;;  %v2883_v15 = vsel %vm1137_vm2, %v2851_v18, %v2863_v49  ;;  %v2877_v33 = vsel %vm1137_vm2, %v13253_v23, %v2876_v40  ;;  %v8593_v37 = vld [vmem:[#allocation4 + $0x128] ss:$20 sps:$4 sm:$0xff]  }
 0x3dc   : > { %v2534_v41 = vrot.slane %v10708_v13, 4  ;;  %3597 = vmatmul.mubr.bf16.gmra.mxu0 %v10689_v59  ;;  %3676 = vmatprep.subr.bf16.mxu1 %v7945_v16  ;;  %v2882_v42 = vsel %vm1137_vm2, %v10236_v45, %v2881_v9  ;;  %2907 = vst [vmem:[#allocation4 + $0x2cc] sm:$0xf] %v2883_v15  ;;  %v2691_v14 = vpop.permute.xlu1 %2690  ;;  %v7939_v45 = vcombine.low %v2787_v28, %v2792_v20 }
 0x3dd   : > { %3745 = vmatprep.mubr.bf16.mxu0 %v13207_v31  ;;  %v2703_v43 = vrot.slane %v2691_v14, 4  ;;  %v7955_v52 = vcombine.high %v2877_v33, %v2882_v42  ;;  %v7954_v10 = vcombine.low %v2877_v33, %v2882_v42  ;;  %v2706_v20 = vsel %vm568_vm0, %v13258_v36, %v2694_v50  ;;  %v13265_v36 = vld [vmem:[#allocation28_spill] sm:$0xff] }
 0x3de   : > { %v2548_v25 = vsel %vm813_vm9, %v10708_v13, %v2534_v41  ;;  %v2707_v17 = vsel %vm975_vm7, %v10019_v63, %v2706_v20  ;;  %v13261_v63 = vrot.slane %v10308_v0, 4 }
 0x3df   : > { %3677 = vmatpush2.bf16.msra.mxu1 %v7944_v54  ;;  %2578 = vst [vmem:[#allocation4 + $0x150] sm:$0xf] %v2548_v25  ;;  %v2721_v46 = vsel %vm568_vm0, %v13257_v47, %v2703_v43  ;;  %v2723_v2 = vsel %vm975_vm7, %v2691_v14, %v2703_v43  ;;  %3725 = vmatprep.subr.bf16.mxu0 %v7955_v52  ;;  %v8592_v40 = vld [vmem:[#allocation4 + $0x268] ss:$20 sps:$4 sm:$0xff]   ;;  %v13264_v25 = vrot.slane %v13212_v6, 4 }
 0x3e0   : > { %3678 = vmatprep.subr.bf16.mxu1 %v7940_v62  ;;  %v2722_v38 = vsel %vm975_vm7, %v10293_v5, %v2721_v46  ;;  %2747 = vst [vmem:[#allocation4 + $0x22c] sm:$0xf] %v2723_v2  ;;  %v2679_v61 = vpop.permute.xlu1 %2678  ;;  %3726 = vmatpush1.bf16.msra.mxu0 %v7954_v10  ;;  %v13262_v62 = vld [vmem:[#allocation16_spill] sm:$0xff]  ;;  %v2556_v10 = vsel %vm568_vm0, %v2539_v27, %v2540_v57 }
 0x3e1   : > { %v2697_v22 = vrot.slane %v2679_v61, 4  ;;  %3727 = vmatprep.subr.bf16.mxu0 %v7950_v51  ;;  %v7935_v18 = vcombine.high %v2717_v4, %v2722_v38  ;;  %v7934_v23 = vcombine.low %v2717_v4, %v2722_v38  ;;  %v13260_v51 = vrot.slane %v13213_v39, 4  ;;  %v8597_v4 = vld [vmem:[#allocation4 + $0xd8] ss:$20 sps:$4 sm:$0xff]  }
 0x3e2   : > { %v13263_v33 = vrot.slane %v13262_v62, 4  ;;  %v2557_v58 = vsel %vm813_vm9, %v13233_v32, %v2556_v10  ;;  %v8682_v32 = vld [vmem:[%s13014_s3 + $0x34] ss:$12 sps:$4 sm:$0xff]  }
 0x3e3   : > { %3679 = vmatpush2.bf16.msra.mxu1 %v7939_v45  ;;  %v2711_v1 = vsel %vm568_vm0, %v13259_v12, %v2697_v22  ;;  %v2713_v5 = vsel %vm975_vm7, %v2679_v61, %v2697_v22  ;;  %v2636_v49 = vsel %vm568_vm0, %v13260_v51, %v2620_v11 }
 0x3e4   : > { %3680 = vmatprep.subr.bf16.mxu1 %v7935_v18  ;;  %v2712_v3 = vsel %vm975_vm7, %v10081_v35, %v2711_v1  ;;  %2741 = vst [vmem:[#allocation4 + $0x204] sm:$0xf] %v2713_v5  ;;  %v2611_v50 = vpop.permute.xlu1 %2610  ;;  %3728 = vmatpush1.bf16.msra.mxu0 %v7949_v55  ;;  %v2637_v55 = vsel %vm894_vm8, %v13213_v39, %v2636_v49  ;;  %v8595_v39 = vld [vmem:[#allocation4 + $0x100] ss:$20 sps:$4 sm:$0xff]   ;;  %v8609_v49 = vld [vmem:[#allocation4 + $0x10] ss:$20 sps:$4 sm:$0xff]  }
 0x3e5   : > { %v2623_v16 = vrot.slane %v2611_v50, 4  ;;  %8336 = vmatprep.subr.bf16.mxu0 %v8592_v40  ;;  %v7930_v28 = vcombine.high %v2707_v17, %v2712_v3  ;;  %v7929_v54 = vcombine.low %v2707_v17, %v2712_v3  ;;  %v2626_v42 = vsel %vm568_vm0, %v13263_v33, %v2614_v24  ;;  %v8601_v40 = vld [vmem:[#allocation4 + $0x88] ss:$20 sps:$4 sm:$0xff]   ;;  %v8604_v3 = vld [vmem:[#allocation4 + $0x60] ss:$20 sps:$4 sm:$0xff]  }
 0x3e6   : > { %v2627_v8 = vsel %vm894_vm8, %v13262_v62, %v2626_v42 }
 0x3e7   : > { %3681 = vmatpush2.bf16.msra.mxu1 %v7934_v23  ;;  %v2641_v9 = vsel %vm568_vm0, %v13261_v63, %v2623_v16  ;;  %v2643_v35 = vsel %vm894_vm8, %v2611_v50, %v2623_v16  ;;  %7959 = vmatmul.mubr.msk.bf16.vlgmr.msra.gmra.mxu0 %vm1819_vm4, %v10306_v44  ;;  %v8596_v52 = vld [vmem:[#allocation4 + $0x218] ss:$20 sps:$4 sm:$0xff]   ;;  %v8606_v50 = vld [vmem:[#allocation4 + $0x290] ss:$20 sps:$4 sm:$0xff]   ;;  %v10822_v16 = vpop.permute.xlu0 %3042 }
 0x3e8   : > { %3682 = vmatprep.subr.bf16.mxu1 %v7930_v28  ;;  %v2642_v11 = vsel %vm894_vm8, %v10308_v0, %v2641_v9  ;;  %2667 = vst [vmem:[#allocation4 + $0x1dc] sm:$0xf] %v2643_v35  ;;  %v2599_v15 = vpop.permute.xlu1 %2598  ;;  %8337 = vmatpush3.bf16.msra.mxu0 %v8593_v37 }
 0x3e9   : > { %v2617_v14 = vrot.slane %v2599_v15, 4  ;;  %8338 = vmatprep.subr.bf16.mxu0 %v8594_v21  ;;  %v7925_v53 = vcombine.high %v2637_v55, %v2642_v11  ;;  %v7924_v34 = vcombine.low %v2637_v55, %v2642_v11  ;;  %3755 = vmatprep.mubr.bf16.mxu0 %v13207_v31 }
 0x3eb   : > { %3683 = vmatpush2.bf16.msra.mxu1 %v7929_v54  ;;  %v2631_v0 = vsel %vm568_vm0, %v13264_v25, %v2617_v14  ;;  %v2633_v43 = vsel %vm894_vm8, %v2599_v15, %v2617_v14  ;;  %v8598_v61 = vld [vmem:[#allocation4 + $0x1f0] ss:$20 sps:$4 sm:$0xff]   ;;  %v10826_v37 = vpop.permute.xlu0 %3032 }
 0x3ec   : > { %3684 = vmatprep.subr.bf16.mxu1 %v7925_v53  ;;  %v2632_v24 = vsel %vm894_vm8, %v13212_v6, %v2631_v0  ;;  %2661 = vst [vmem:[#allocation4 + $0x1b4] sm:$0xf] %v2633_v43  ;;  %v2531_v45 = vpop.permute.xlu1 %2530  ;;  %8339 = vmatpush3.bf16.msra.mxu0 %v8595_v39 }
 0x3ed   : > { %v2543_v47 = vrot.slane %v2531_v45, 4  ;;  %8340 = vmatprep.subr.bf16.mxu0 %v8596_v52  ;;  %v7920_v46 = vcombine.high %v2627_v8, %v2632_v24  ;;  %v7919_v2 = vcombine.low %v2627_v8, %v2632_v24 }
 0x3ef   : > { %3685 = vmatpush2.bf16.msra.mxu1 %v7924_v34  ;;  %v2561_v38 = vsel %vm568_vm0, %v2542_v48, %v2543_v47  ;;  %v2563_v6 = vsel %vm813_vm9, %v2531_v45, %v2543_v47  ;;  %7960 = vmatmul.mubr.msk.bf16.gmra.mxu0 %vm1819_vm4, %v13265_v36  ;;  %v2546_v48 = vsel %vm568_vm0, %v2533_v7, %v2534_v41  ;;  %v8600_v12 = vld [vmem:[#allocation4 + $0x1c8] ss:$20 sps:$4 sm:$0xff]  }
 0x3f0   : > { %3686 = vmatprep.subr.bf16.mxu1 %v7920_v46  ;;  %v2562_v27 = vsel %vm813_vm9, %v10474_v60, %v2561_v38  ;;  %2587 = vst [vmem:[#allocation4 + $0x18c] sm:$0xf] %v2563_v6  ;;  %v2519_v57 = vpop.permute.xlu1 %2518  ;;  %8341 = vmatpush3.bf16.msra.mxu0 %v8597_v4  ;;  %v8599_v60 = vld [vmem:[#allocation4 + $0xb0] ss:$20 sps:$4 sm:$0xff]   ;;  %v2547_v7 = vsel %vm813_vm9, %v10538_v56, %v2546_v48 }
 0x3f1   : > { %v2537_v20 = vrot.slane %v2519_v57, 4  ;;  %8342 = vmatprep.subr.bf16.mxu0 %v8598_v61  ;;  %v7915_v22 = vcombine.high %v2557_v58, %v2562_v27  ;;  %v7914_v18 = vcombine.low %v2557_v58, %v2562_v27  ;;  %3798 = vmatprep.mubr.bf16.mxu0 %v8682_v32 }
 0x3f3   : > { %3687 = vmatpush2.bf16.msra.mxu1 %v7919_v2  ;;  %v2551_v23 = vsel %vm568_vm0, %v2536_v30, %v2537_v20  ;;  %v2553_v13 = vsel %vm813_vm9, %v2519_v57, %v2537_v20  ;;  %v8602_v17 = vld [vmem:[#allocation4 + $0x1a0] ss:$20 sps:$4 sm:$0xff]   ;;  %v8603_v30 = vld [vmem:[#allocation4 + $0x2b8] ss:$20 sps:$4 sm:$0xff]  }
 0x3f4   : > { %3688 = vmatprep.subr.bf16.mxu1 %v7915_v22  ;;  %v2552_v41 = vsel %vm813_vm9, %v10597_v19, %v2551_v23  ;;  %2581 = vst [vmem:[#allocation4 + $0x164] sm:$0xf] %v2553_v13  ;;  %8343 = vmatpush3.bf16.msra.mxu0 %v8599_v60  ;;  %v8607_v19 = vld [vmem:[#allocation4 + $0x38] ss:$20 sps:$4 sm:$0xff]  }
 0x3f5   : > { %8344 = vmatprep.subr.bf16.mxu0 %v8600_v12  ;;  %v7910_v1 = vcombine.high %v2547_v7, %v2552_v41  ;;  %v7909_v5 = vcombine.low %v2547_v7, %v2552_v41 }
 0x3f7   : > { %3689 = vmatpush2.bf16.msra.mxu1 %v7914_v18  ;;  %v8605_v56 = vld [vmem:[#allocation4 + $0x178] ss:$20 sps:$4 sm:$0xff]  }
 0x3f8   : > { %3690 = vmatprep.subr.bf16.mxu1 %v7910_v1  ;;  %8345 = vmatpush3.bf16.msra.mxu0 %v8601_v40 }
 0x3f9   : > { %8346 = vmatprep.subr.bf16.mxu0 %v8602_v17 }
 0x3fb   : > { %3691 = vmatpush2.bf16.msra.mxu1 %v7909_v5  ;;  %v8608_v51 = vld [vmem:[#allocation4 + $0x150] ss:$20 sps:$4 sm:$0xff]  }
 0x3fc   : > { %8443 = vmatprep.subr.bf16.mxu1 %v8603_v30  ;;  %8347 = vmatpush3.bf16.msra.mxu0 %v8604_v3 }
 0x3fd   : > { %8348 = vmatprep.subr.bf16.mxu0 %v8605_v56  ;;  %v10824_v54 = vpop.permute.xlu1 %3047 }
 0x3fe   : > { %3693 = vmatmul.mubr.bf16.vlgmr.msra.gmra.mxu1 %v10627_v29 }
 0x3ff   : > { %8444 = vmatpush3.bf16.msra.mxu1 %v8603_v30  ;;  %3702 = vmatprep.mubr.bf16.mxu1 %v10632_v26 }
 0x400   : > { %8445 = vmatprep.subr.bf16.mxu1 %v8606_v50  ;;  %8349 = vmatpush3.bf16.msra.mxu0 %v8607_v19 }
 0x401   : > { %8350 = vmatprep.subr.bf16.mxu0 %v8608_v51 }
 0x403   : > { %8446 = vmatpush3.bf16.msra.mxu1 %v8606_v50 }
 0x404   : > { %8351 = vmatpush3.bf16.msra.mxu0 %v8609_v49 }
 0x406   : > { %3703 = vmatmul.mubr.bf16.gmra.mxu1 %v10689_v59 }
 0x407   : > { %8447 = vmatprep.mubr.msk.bf16.mxu1 %vm1819_vm4, %v10306_v44  ;;  %3799 = vmatmul.mubr.bf16.vlgmr.msra.gmra.mxu0 %v10627_v29 }
 0x408   : > { %3806 = vmatprep.mubr.bf16.mxu0 %v10632_v26  ;;  %v10829_v26 = vpop.permute.xlu1 %3037 }
 0x40e   : > { %8448 = vmatmul.mubr.msk.bf16.vlgmr.msra.gmra.mxu1 %vm1819_vm4, %v13265_v36 }
 0x40f   : > { %3807 = vmatmul.mubr.bf16.gmra.mxu0 %v10689_v59 }
 0x410   : > { %5367 = vmatprep.mubr.bf16.mxu0 %v13207_v31 }
 0x467   : > { %v3641_v28 = vpop.f32.mrf.mxu1 }
 0x469   : > { %v3643_v63 = vpop.f32.mrf.mxu1 }
 0x46b   : > { %v3645_v59 = vpop.f32.mrf.mxu1 }
 0x46d   : > { %v3647_v34 = vpop.f32.mrf.mxu1 }
 0x46f   : > { %v3651_v2 = vpop.f32.mrf.mxu1 }
 0x471   : > { %v3653_v38 = vpop.f32.mrf.mxu1 }
 0x473   : > { %v10856_v61 = vpop.f32.mrf.mxu1 }
 0x475   : > { %v10860_v58 = vpop.f32.mrf.mxu1 }
 0x494   : > { %v3588_v44 = vpop.f32.mrf.mxu0 }
 0x495   : > { %v3589_v29 = vadd.f32 %v3588_v44, %v10826_v37 }
 0x496   : > { %v3590_v9 = vpop.f32.mrf.mxu0 }
 0x497   : > { %v3642_v35 = vadd.f32 %v3641_v28, %v3589_v29  ;;  %v3591_v21 = vadd.f32 %v3590_v9, %v10826_v37 }
 0x498   : > { %v3592_v55 = vpop.f32.mrf.mxu0 }
 0x499   : > { %v3644_v11 = vadd.f32 %v3643_v63, %v3591_v21  ;;  %v3593_v15 = vadd.f32 %v3592_v55, %v10829_v26  ;;  %v3864_v33 = vmax.f32 %v3642_v35, 0.0 }
 0x49a   : > { %v3594_v62 = vpop.f32.mrf.mxu0 }
 0x49b   : > { %v3865_v42 = vmax.f32 %v3644_v11, 0.0  ;;  %v3646_v14 = vadd.f32 %v3645_v59, %v3593_v15  ;;  %v3595_v53 = vadd.f32 %v3594_v62, %v10829_v26 }
 0x49c   : > { %v3598_v39 = vpop.f32.mrf.mxu0 }
 0x49d   : > { %v10834_v25 = vpack.c.bf16 %v3865_v42, %v3864_v33  ;;  %v3648_v0 = vadd.f32 %v3647_v34, %v3595_v53  ;;  %v3869_v52 = vmax.f32 %v3646_v14, 0.0  ;;  %v3599_v19 = vadd.f32 %v3598_v39, %v10822_v16 }
 0x49e   : > { %v3600_v43 = vpop.f32.mrf.mxu0 }
 0x49f   : > { %v3870_v8 = vmax.f32 %v3648_v0, 0.0  ;;  %4156 = vrot.lane.b32.xlu0 %v10834_v25, %s8834_s18  ;;  %3972 = vst [vmem:[#allocation4] sm:$0xff] %v10834_v25  ;;  %v3601_v30 = vadd.f32 %v3600_v43, %v10822_v16  ;;  %v10888_v11 = vadd.f32 %v3651_v2, %v3599_v19 }
 0x4a0   : > { %v10841_v45 = vpop.f32.mrf.mxu0 }
 0x4a1   : > { %v10839_v24 = vpack.c.bf16 %v3870_v8, %v3869_v52  ;;  %v10883_v35 = vadd.f32 %v3653_v38, %v3601_v30 }
 0x4a2   : > { %v10846_v10 = vpop.f32.mrf.mxu0 }
 0x4a3   : > { %4556 = vrot.lane.b32.xlu0 %v10834_v25, %s8835_s19  ;;  %3975 = vst [vmem:[#allocation4 + $0x14] sm:$0xff] %v10839_v24  ;;  %v13076_v43 = vmax.f32 %v10883_v35, 0.0 }
 0x4a7   : > { %4076 = vrot.lane.b32.xlu0 %v10834_v25, %s8836_s20  ;;  %v3747_v47 = vpop.f32.mrf.mxu0 }
 0x4a9   : > { %v3749_v46 = vpop.f32.mrf.mxu0 }
 0x4ab   : > { %3996 = vrot.lane.b32.xlu0 %v10834_v25, %s8837_s21  ;;  %v3751_v4 = vpop.f32.mrf.mxu0 }
 0x4ad   : > { %v3753_v6 = vpop.f32.mrf.mxu0 }
 0x4af   : > { %4476 = vrot.lane.b32.xlu0 %v10834_v25, %s8838_s22  ;;  %v3757_v36 = vpop.f32.mrf.mxu0 }
 0x4b1   : > { %v3759_v57 = vpop.f32.mrf.mxu0 }
 0x4b3   : > { %4396 = vrot.lane.b32.xlu0 %v10834_v25, %s8839_s23  ;;  %v3761_v60 = vpop.f32.mrf.mxu0 }
 0x4b5   : > { %v3763_v17 = vpop.f32.mrf.mxu0 }
 0x4b7   : > { %4316 = vrot.lane.b32.xlu0 %v10834_v25, %s8840_s29 }
 0x4bb   : > { %4162 = vrot.lane.b32.xlu0 %v10839_v24, %s8834_s18 }
 0x4be   : > { %v3694_v27 = vpop.f32.mrf.mxu1 }
 0x4bf   : > { %v3695_v48 = vadd.f32 %v3694_v27, %v10826_v37  ;;  %4562 = vrot.lane.b32.xlu0 %v10839_v24, %s8835_s19 }
 0x4c0   : > { %v3696_v20 = vpop.f32.mrf.mxu1 }
 0x4c1   : > { %v3748_v22 = vadd.f32 %v3747_v47, %v3695_v48  ;;  %v3697_v18 = vadd.f32 %v3696_v20, %v10826_v37 }
 0x4c2   : > { %v3698_v32 = vpop.f32.mrf.mxu1 }
 0x4c3   : > { %v3750_v23 = vadd.f32 %v3749_v46, %v3697_v18  ;;  %v3699_v13 = vadd.f32 %v3698_v32, %v10829_v26  ;;  %v3866_v7 = vmax.f32 %v3748_v22, 0.0  ;;  %4082 = vrot.lane.b32.xlu0 %v10839_v24, %s8836_s20  ;;  %v13074_v46 = vmax.f32 %v10888_v11, 0.0 }
 0x4c4   : > { %v3700_v12 = vpop.f32.mrf.mxu1 }
 0x4c5   : > { %v3867_v41 = vmax.f32 %v3750_v23, 0.0  ;;  %v3752_v1 = vadd.f32 %v3751_v4, %v3699_v13  ;;  %v3701_v5 = vadd.f32 %v3700_v12, %v10829_v26 }
 0x4c6   : > { %v3704_v40 = vpop.f32.mrf.mxu1 }
 0x4c7   : > { %v10873_v3 = vpack.c.bf16 %v3867_v41, %v3866_v7  ;;  %v3754_v56 = vadd.f32 %v3753_v6, %v3701_v5  ;;  %v3705_v50 = vadd.f32 %v3704_v40, %v10822_v16  ;;  %v3871_v49 = vmax.f32 %v3752_v1, 0.0  ;;  %4002 = vrot.lane.b32.xlu0 %v10839_v24, %s8837_s21  ;;  %v8352_v9 = vpop.f32.mrf.mxu0 }
 0x4c8   : > { %v3706_v51 = vpop.f32.mrf.mxu1 }
 0x4c9   : > { %v3872_v28 = vmax.f32 %v3754_v56, 0.0  ;;  %v3758_v63 = vadd.f32 %v3757_v36, %v3705_v50  ;;  %v3707_v44 = vadd.f32 %v3706_v51, %v10822_v16  ;;  %4158 = vrot.lane.b32.xlu1 %v10873_v3, %s8834_s18  ;;  %3973 = vst [vmem:[#allocation4 + $0x8] sm:$0xff] %v10873_v3  ;;  %v8353_v33 = vpop.f32.mrf.mxu0 }
 0x4ca   : > { %v3708_v29 = vpop.f32.mrf.mxu1  ;;  %v8354_v34 = vadd.f32 %v8353_v33, %v8352_v9 }
 0x4cb   : > { %v10885_v21 = vpack.c.bf16 %v3872_v28, %v3871_v49  ;;  %v3760_v59 = vadd.f32 %v3759_v57, %v3707_v44  ;;  %v3709_v55 = vadd.f32 %v3708_v29, %v10824_v54  ;;  %v3876_v15 = vmax.f32 %v3758_v63, 0.0  ;;  %4482 = vrot.lane.b32.xlu0 %v10839_v24, %s8838_s22  ;;  %v8355_v39 = vpop.f32.mrf.mxu0 }
 0x4cc   : > { %v3710_v62 = vpop.f32.mrf.mxu1  ;;  %v3801_v47 = vadd.f32 %v8354_v34, %v10826_v37  ;;  %v10910_v37 = vpack.c.bf16 %v13076_v43, %v13074_v46  ;;  %v3605_v63 = vadd.f32 %v10846_v10, %v10824_v54  ;;  %v3603_v44 = vadd.f32 %v10841_v45, %v10824_v54 }
 0x4cd   : > { %v3877_v42 = vmax.f32 %v3760_v59, 0.0  ;;  %v3762_v14 = vadd.f32 %v3761_v60, %v3709_v55  ;;  %v3711_v53 = vadd.f32 %v3710_v62, %v10824_v54  ;;  %4558 = vrot.lane.b32.xlu1 %v10873_v3, %s8835_s19  ;;  %3976 = vst [vmem:[#allocation4 + $0x1c] sm:$0xff] %v10885_v21  ;;  %v8356_v2 = vpop.f32.mrf.mxu0 }
 0x4ce   : > { %v8449_v0 = vpop.f32.mrf.mxu1  ;;  %v8357_v36 = vadd.f32 %v8356_v2, %v8355_v39  ;;  %v10951_v9 = vadd.f32 %v10860_v58, %v3605_v63  ;;  %v10955_v10 = vadd.f32 %v10856_v61, %v3603_v44 }
 0x4cf   : > { %v10897_v52 = vpack.c.bf16 %v3877_v42, %v3876_v15  ;;  %v3764_v8 = vadd.f32 %v3763_v17, %v3711_v53  ;;  %v3881_v38 = vmax.f32 %v3762_v14, 0.0  ;;  %4402 = vrot.lane.b32.xlu0 %v10839_v24, %s8839_s23  ;;  %v8358_v57 = vpop.f32.mrf.mxu0 }
 0x4d0   : > { %v3849_v4 = vpop.f32.mrf.mxu1  ;;  %v3804_v18 = vadd.f32 %v8357_v36, %v10829_v26  ;;  %v13075_v45 = vmax.f32 %v10951_v9, 0.0  ;;  %v13073_v58 = vmax.f32 %v10955_v10, 0.0 }
 0x4d1   : > { %v3882_v6 = vmax.f32 %v3764_v8, 0.0  ;;  %v3850_v27 = vadd.f32 %v3849_v4, %v3801_v47  ;;  %4078 = vrot.lane.b32.xlu1 %v10873_v3, %s8836_s20  ;;  %3979 = vst [vmem:[#allocation4 + $0x30] sm:$0xff] %v10897_v52  ;;  %v8359_v32 = vpop.f32.mrf.mxu0 }
 0x4d2   : > { %v8450_v48 = vpop.f32.mrf.mxu1  ;;  %v8360_v13 = vadd.f32 %v8359_v32, %v8358_v57  ;;  %v8277_v61 = vpack.c.bf16 %v13075_v45, %v13073_v58 }
 0x4d3   : > { %v10912_v20 = vpack.c.bf16 %v3882_v6, %v3881_v38  ;;  %v3868_v22 = vmax.f32 %v3850_v27, 0.0  ;;  %4168 = vrot.lane.b32.xlu0 %v10910_v37, %s8834_s18  ;;  %v8361_v7 = vpop.f32.mrf.mxu0 }
 0x4d4   : > { %v3852_v60 = vpop.f32.mrf.mxu1  ;;  %v3809_v41 = vadd.f32 %v8360_v13, %v10822_v16  ;;  %v7983_v13 = vld [vmem:[%s13015_s4 + $0x40] sm:$0xff] }
 0x4d5   : > { %v8270_v23 = vpack.c.bf16 %v3868_v22, %v3868_v22  ;;  %v3853_v12 = vadd.f32 %v3852_v60, %v3804_v18  ;;  %3998 = vrot.lane.b32.xlu1 %v10873_v3, %s8837_s21  ;;  %3982 = vst [vmem:[#allocation4 + $0x44] sm:$0xff] %v10912_v20  ;;  %v8362_v5 = vpop.f32.mrf.mxu0  ;;  %v7985_v60 = vld [vmem:[%s13015_s4 + $0x50] sm:$0xff] }
 0x4d6   : > { %v3858_v26 = vadd.f32 %v8449_v0, %v3809_v41  ;;  %v8363_v17 = vadd.f32 %v8362_v5, %v8361_v7  ;;  %v11155_v41 = vld [vmem:[%s13014_s3 + $0x64] ss:$12 sps:$4 sm:$0xff]  }
 0x4d7   : > { %3950 = vst [vmem:[#allocation2 + $0x10] sm:$0xf] %v8270_v23  ;;  %v3873_v1 = vmax.f32 %v3853_v12, 0.0  ;;  %4568 = vrot.lane.b32.xlu0 %v10910_v37, %s8835_s19  ;;  %5314 = vmatprep.mubr.bf16.mxu1 %v11155_v41 }
 0x4d8   : > { %v3878_v30 = vmax.f32 %v3858_v26, 0.0  ;;  %v3812_v56 = vadd.f32 %v8363_v17, %v10824_v54 }
 0x4d9   : > { %v8273_v40 = vpack.c.bf16 %v3873_v1, %v3873_v1  ;;  %4478 = vrot.lane.b32.xlu1 %v10873_v3, %s8838_s22 }
 0x4da   : > { %v8276_v50 = vpack.c.bf16 %v3878_v30, %v3878_v30  ;;  %v3861_v19 = vadd.f32 %v8450_v48, %v3812_v56 }
 0x4db   : > { %3953 = vst [vmem:[#allocation2 + $0x28] sm:$0xf] %v8273_v40  ;;  %4088 = vrot.lane.b32.xlu0 %v10910_v37, %s8836_s20 }
 0x4dc   : > { %3956 = vst [vmem:[#allocation2 + $0x40] sm:$0xf] %v8276_v50  ;;  %v3883_v51 = vmax.f32 %v3861_v19, 0.0 }
 0x4dd   : > { %4398 = vrot.lane.b32.xlu1 %v10873_v3, %s8839_s23 }
 0x4de   : > { %v10930_v16 = vld [vmem:[#allocation2 + $0x10] sm:$0xff]  ;;  %v8279_v49 = vpack.c.bf16 %v3883_v51, %v3883_v51 }
 0x4df   : > { %3974 = vst [vmem:[#allocation4 + $0x10] sm:$0xf] %v10930_v16  ;;  %4008 = vrot.lane.b32.xlu0 %v10910_v37, %s8837_s21 }
 0x4e0   : > { %3959 = vst [vmem:[#allocation2 + $0x58] sm:$0xf] %v8279_v49 }
 0x4e1   : > { %4318 = vrot.lane.b32.xlu1 %v10873_v3, %s8840_s29 }
 0x4e2   : > { %v10937_v28 = vld [vmem:[#allocation2 + $0x28] sm:$0xff] }
 0x4e3   : > { %3977 = vst [vmem:[#allocation4 + $0x24] sm:$0xf] %v10937_v28  ;;  %4488 = vrot.lane.b32.xlu0 %v10910_v37, %s8838_s22  ;;  %v10948_v29 = vld [vmem:[#allocation2 + $0x40] sm:$0xff] }
 0x4e4   : > { %3980 = vst [vmem:[#allocation4 + $0x38] sm:$0xf] %v10948_v29 }
 0x4e5   : > { %4164 = vrot.lane.b32.xlu1 %v10885_v21, %s8834_s18 }
 0x4e7   : > { %4408 = vrot.lane.b32.xlu0 %v10910_v37, %s8839_s23  ;;  %v10961_v54 = vld [vmem:[#allocation2 + $0x58] sm:$0xff] }
 0x4e8   : > { %3983 = vst [vmem:[#allocation4 + $0x4c] sm:$0xf] %v10961_v54 }
 0x4e9   : > { %4564 = vrot.lane.b32.xlu1 %v10885_v21, %s8835_s19 }
 0x4eb   : > { %4328 = vrot.lane.b32.xlu0 %v10910_v37, %s8840_s29 }
 0x4ed   : > { %4084 = vrot.lane.b32.xlu1 %v10885_v21, %s8836_s20 }
 0x4ef   : > { %4174 = vrot.lane.b32.xlu0 %v8277_v61, %s8834_s18 }
 0x4f1   : > { %4004 = vrot.lane.b32.xlu1 %v10885_v21, %s8837_s21 }
 0x4f3   : > { %4574 = vrot.lane.b32.xlu0 %v8277_v61, %s8835_s19 }
 0x4f5   : > { %4484 = vrot.lane.b32.xlu1 %v10885_v21, %s8838_s22 }
 0x4f7   : > { %4094 = vrot.lane.b32.xlu0 %v8277_v61, %s8836_s20 }
 0x4f9   : > { %4404 = vrot.lane.b32.xlu1 %v10885_v21, %s8839_s23 }
 0x4fb   : > { %4014 = vrot.lane.b32.xlu0 %v8277_v61, %s8837_s21 }
 0x4fd   : > { %4170 = vrot.lane.b32.xlu1 %v10897_v52, %s8834_s18 }
 0x4ff   : > { %4494 = vrot.lane.b32.xlu0 %v8277_v61, %s8838_s22 }
 0x501   : > { %4570 = vrot.lane.b32.xlu1 %v10897_v52, %s8835_s19 }
 0x503   : > { %4414 = vrot.lane.b32.xlu0 %v8277_v61, %s8839_s23 }
 0x505   : > { %4090 = vrot.lane.b32.xlu1 %v10897_v52, %s8836_s20 }
 0x507   : > { %4334 = vrot.lane.b32.xlu0 %v8277_v61, %s8840_s29 }
 0x509   : > { %4010 = vrot.lane.b32.xlu1 %v10897_v52, %s8837_s21 }
 0x50b   : > { %4160 = vrot.lane.b32.xlu0 %v10930_v16, %s8834_s18 }
 0x50d   : > { %4490 = vrot.lane.b32.xlu1 %v10897_v52, %s8838_s22 }
 0x50f   : > { %4080 = vrot.lane.b32.xlu0 %v10930_v16, %s8836_s20 }
 0x511   : > { %4410 = vrot.lane.b32.xlu1 %v10897_v52, %s8839_s23  ;;  %v11003_v59 = vpop.permute.xlu0 %4156 }
 0x513   : > { %4000 = vrot.lane.b32.xlu0 %v10930_v16, %s8837_s21 }
 0x515   : > { %4330 = vrot.lane.b32.xlu1 %v10897_v52, %s8840_s29  ;;  %v11009_v55 = vpop.permute.xlu0 %4556 }
 0x517   : > { %4480 = vrot.lane.b32.xlu0 %v10930_v16, %s8838_s22 }
 0x519   : > { %4176 = vrot.lane.b32.xlu1 %v10912_v20, %s8834_s18  ;;  %v11015_v15 = vpop.permute.xlu0 %4076 }
 0x51b   : > { %4172 = vrot.lane.b32.xlu0 %v10948_v29, %s8834_s18 }
 0x51d   : > { %4576 = vrot.lane.b32.xlu1 %v10912_v20, %s8835_s19  ;;  %v11021_v62 = vpop.permute.xlu0 %3996 }
 0x51f   : > { %4322 = vrot.lane.b32.xlu0 %v10839_v24, %s8840_s29 }
 0x521   : > { %4096 = vrot.lane.b32.xlu1 %v10912_v20, %s8836_s20  ;;  %v11027_v33 = vpop.permute.xlu0 %4476 }
 0x523   : > { %4092 = vrot.lane.b32.xlu0 %v10948_v29, %s8836_s20 }
 0x525   : > { %4016 = vrot.lane.b32.xlu1 %v10912_v20, %s8837_s21  ;;  %v11033_v42 = vpop.permute.xlu0 %4396 }
 0x526   : > { %13266 = vst [vmem:[#allocation18_spill] sm:$0xff] %v11033_v42 }
 0x527   : > { %4012 = vrot.lane.b32.xlu0 %v10948_v29, %s8837_s21 }
 0x529   : > { %4496 = vrot.lane.b32.xlu1 %v10912_v20, %s8838_s22  ;;  %v11039_v14 = vpop.permute.xlu0 %4316 }
 0x52a   : > { %13267 = vst [vmem:[#allocation20_spill] sm:$0xff] %v11039_v14 }
 0x52b   : > { %4492 = vrot.lane.b32.xlu0 %v10948_v29, %s8838_s22 }
 0x52d   : > { %4416 = vrot.lane.b32.xlu1 %v10912_v20, %s8839_s23  ;;  %v11045_v53 = vpop.permute.xlu0 %4162 }
 0x52f   : > { %4412 = vrot.lane.b32.xlu0 %v10948_v29, %s8839_s23 }
 0x531   : > { %4336 = vrot.lane.b32.xlu1 %v10912_v20, %s8840_s29  ;;  %v11051_v34 = vpop.permute.xlu0 %4562 }
 0x533   : > { %4248 = vrot.lane.b32.xlu0 %v10910_v37, %s8841_s8 }
 0x535   : > { %4166 = vrot.lane.b32.xlu1 %v10937_v28, %s8834_s18  ;;  %v11057_v39 = vpop.permute.xlu0 %4082 }
 0x537   : > { %4254 = vrot.lane.b32.xlu0 %v8277_v61, %s8841_s8 }
 0x539   : > { %4086 = vrot.lane.b32.xlu1 %v10937_v28, %s8836_s20  ;;  %v11064_v8 = vpop.permute.xlu0 %4002 }
 0x53b   : > { %v11062_v0 = vpop.permute.xlu1 %4158  ;;  %4400 = vrot.lane.b32.xlu0 %v10930_v16, %s8839_s23 }
 0x53c   : > { %13268 = vst [vmem:[#allocation24_spill] sm:$0xff] %v11062_v0  ;;  %v13283_v14 = vrot.slane %v11062_v0, 4 }
 0x53d   : > { %4006 = vrot.lane.b32.xlu1 %v10937_v28, %s8837_s21  ;;  %v11072_v2 = vpop.permute.xlu0 %4482 }
 0x53f   : > { %v11070_v47 = vpop.permute.xlu1 %4558  ;;  %4236 = vrot.lane.b32.xlu0 %v10834_v25, %s8841_s8 }
 0x540   : > { %13269 = vst [vmem:[#allocation17_spill] sm:$0xff] %v11070_v47 }
 0x541   : > { %4486 = vrot.lane.b32.xlu1 %v10937_v28, %s8838_s22  ;;  %v11080_v38 = vpop.permute.xlu0 %4402 }
 0x543   : > { %v11078_v4 = vpop.permute.xlu1 %4078  ;;  %4242 = vrot.lane.b32.xlu0 %v10839_v24, %s8841_s8 }
 0x545   : > { %4178 = vrot.lane.b32.xlu1 %v10961_v54, %s8834_s18  ;;  %v11088_v36 = vpop.permute.xlu0 %4168 }
 0x547   : > { %v11086_v6 = vpop.permute.xlu1 %3998  ;;  %4332 = vrot.lane.b32.xlu0 %v10948_v29, %s8840_s29 }
 0x549   : > { %4324 = vrot.lane.b32.xlu1 %v10885_v21, %s8840_s29  ;;  %v11096_v27 = vpop.permute.xlu0 %4568 }
 0x54b   : > { %v11094_v25 = vpop.permute.xlu1 %4478  ;;  %4320 = vrot.lane.b32.xlu0 %v10930_v16, %s8840_s29 }
 0x54d   : > { %4098 = vrot.lane.b32.xlu1 %v10961_v54, %s8836_s20  ;;  %v11104_v57 = vpop.permute.xlu0 %4088 }
 0x54f   : > { %v11102_v24 = vpop.permute.xlu1 %4398  ;;  %4252 = vrot.lane.b32.xlu0 %v10948_v29, %s8841_s8 }
 0x551   : > { %4250 = vrot.lane.b32.xlu1 %v10897_v52, %s8841_s8  ;;  %v11112_v37 = vpop.permute.xlu0 %4008 }
 0x553   : > { %v11110_v48 = vpop.permute.xlu1 %4318  ;;  %4572 = vrot.lane.b32.xlu0 %v10948_v29, %s8835_s19 }
 0x554   : > { %13270 = vst [vmem:[#allocation21_spill] sm:$0xff] %v11110_v48 }
 0x555   : > { %4018 = vrot.lane.b32.xlu1 %v10961_v54, %s8837_s21  ;;  %v11120_v18 = vpop.permute.xlu0 %4488 }
 0x557   : > { %v11118_v22 = vpop.permute.xlu1 %4164  ;;  %4240 = vrot.lane.b32.xlu0 %v10930_v16, %s8841_s8 }
 0x558   : > { %13271 = vst [vmem:[#allocation27_spill] sm:$0xff] %v11118_v22 }
 0x559   : > { %4256 = vrot.lane.b32.xlu1 %v10912_v20, %s8841_s8  ;;  %v11128_v32 = vpop.permute.xlu0 %4408 }
 0x55a   : > { %13273 = vst [vmem:[#allocation26_spill] sm:$0xff] %v11128_v32 }
 0x55b   : > { %v11126_v52 = vpop.permute.xlu1 %4564  ;;  %4560 = vrot.lane.b32.xlu0 %v10930_v16, %s8835_s19 }
 0x55c   : > { %13272 = vst [vmem:[#allocation14_spill] sm:$0xff] %v11126_v52 }
 0x55d   : > { %4406 = vrot.lane.b32.xlu1 %v10937_v28, %s8839_s23  ;;  %v11139_v20 = vpop.permute.xlu0 %4328 }
 0x55e   : > { %13274 = vst [vmem:[#allocation19_spill] sm:$0xff] %v11139_v20  ;;  %v7984_v20 = vld [vmem:[%s13015_s4 + $0x48] sm:$0xff] }
 0x55f   : > { %v11137_v23 = vpop.permute.xlu1 %4084  ;;  %4770 = vperm.xlu0 %8550, %v7985_v60  }
 0x561   : > { %4238 = vrot.lane.b32.xlu1 %v10873_v3, %s8841_s8  ;;  %v11148_v7 = vpop.permute.xlu0 %4174 }
 0x563   : > { %v11146_v12 = vpop.permute.xlu1 %4004  ;;  %4760 = vperm.xlu0 %8550, %v7983_v13   ;;  %v4180_v13 = vrot.slane %v11003_v59, 4 }
 0x565   : > { %4498 = vrot.lane.b32.xlu1 %v10961_v54, %s8838_s22  ;;  %v11159_v3 = vpop.permute.xlu0 %4574 }
 0x567   : > { %v11157_v1 = vpop.permute.xlu1 %4484 }
 0x569   : > { %4244 = vrot.lane.b32.xlu1 %v10885_v21, %s8841_s8  ;;  %v11166_v26 = vpop.permute.xlu0 %4094 }
 0x56b   : > { %v11164_v5 = vpop.permute.xlu1 %4404 }
 0x56d   : > { %4418 = vrot.lane.b32.xlu1 %v10961_v54, %s8839_s23  ;;  %v11172_v17 = vpop.permute.xlu0 %4014 }
 0x56f   : > { %v11170_v40 = vpop.permute.xlu1 %4170 }
 0x570   : > { %13275 = vst [vmem:[#allocation25_spill] sm:$0xff] %v11170_v40 }
 0x571   : > { %4326 = vrot.lane.b32.xlu1 %v10937_v28, %s8840_s29  ;;  %v11178_v56 = vpop.permute.xlu0 %4494 }
 0x573   : > { %v11176_v30 = vpop.permute.xlu1 %4570 }
 0x574   : > { %13276 = vst [vmem:[#allocation15_spill] sm:$0xff] %v11176_v30 }
 0x575   : > { %4338 = vrot.lane.b32.xlu1 %v10961_v54, %s8840_s29  ;;  %v11184_v50 = vpop.permute.xlu0 %4414 }
 0x577   : > { %v11182_v21 = vpop.permute.xlu1 %4090 }
 0x579   : > { %4246 = vrot.lane.b32.xlu1 %v10937_v28, %s8841_s8  ;;  %v11190_v16 = vpop.permute.xlu0 %4334 }
 0x57a   : > { %13277 = vst [vmem:[#allocation22_spill] sm:$0xff] %v11190_v16 }
 0x57b   : > { %v11188_v19 = vpop.permute.xlu1 %4010 }
 0x57d   : > { %4258 = vrot.lane.b32.xlu1 %v10961_v54, %s8841_s8  ;;  %v11196_v49 = vpop.permute.xlu0 %4160 }
 0x57e   : > { %13278 = vst [vmem:[#allocation23_spill] sm:$0xff] %v11196_v49  ;;  %v13072_v63 = vrot.slane %v11196_v49, 4 }
 0x57f   : > { %v11194_v51 = vpop.permute.xlu1 %4490 }
 0x580   : > { %v4196_v44 = vsel %vm732_vm1, %v11196_v49, %v13072_v63  ;;  %v4100_v63 = vrot.slane %v11015_v15, 4  ;;  %v13282_v49 = vrot.slane %v11118_v22, 4 }
 0x581   : > { %4578 = vrot.lane.b32.xlu1 %v10961_v54, %s8835_s19  ;;  %4226 = vst [vmem:[#allocation4 + $0x100] sm:$0xf] %v4196_v44  ;;  %v11207_v61 = vpop.permute.xlu0 %4080  ;;  %v7986_v44 = vld [vmem:[%s13015_s4 + $0x58] sm:$0xff] }
 0x582   : > { %13279 = vst [vmem:[#allocation16_spill] sm:$0xff] %v11207_v61  ;;  %v13077_v60 = vrot.slane %v11207_v61, 4 }
 0x583   : > { %v11205_v29 = vpop.permute.xlu1 %4410 }
 0x584   : > { %v4116_v54 = vsel %vm651_vm3, %v11207_v61, %v13077_v60  ;;  %v4580_v60 = vrot.slane %v11009_v55, 4  ;;  %v4583_v61 = vrot.slane %v11051_v34, 4 }
 0x585   : > { %4566 = vrot.lane.b32.xlu1 %v10937_v28, %s8835_s19  ;;  %4146 = vst [vmem:[#allocation4 + $0xb0] sm:$0xf] %v4116_v54  ;;  %v11223_v46 = vpop.permute.xlu0 %4000  ;;  %v4183_v28 = vrot.slane %v11045_v53, 4  ;;  %v4186_v54 = vrot.slane %v11088_v36, 4 }
 0x586   : > { %13281 = vst [vmem:[#allocation29_spill] sm:$0xff] %v11223_v46  ;;  %v13086_v43 = vrot.slane %v11223_v46, 4 }
 0x587   : > { %v11221_v58 = vpop.permute.xlu1 %4330  ;;  %v4197_v48 = vsel %vm568_vm0, %v4183_v28, %v13282_v49 }
 0x588   : > { %13280 = vst [vmem:[#allocation28_spill] sm:$0xff] %v11221_v58  ;;  %v4036_v45 = vsel %vm570_vm5, %v11223_v46, %v13086_v43  ;;  %v4192_v58 = vsel %vm568_vm0, %v4180_v13, %v13283_v14  ;;  %v4189_v43 = vrot.slane %v11148_v7, 4  ;;  %v13284_v46 = vrot.slane %v11170_v40, 4 }
 0x589   : > { %4775 = vperm.xlu1 %8551, %v7986_v44   ;;  %v4103_v44 = vrot.slane %v11057_v39, 4  ;;  %4066 = vst [vmem:[#allocation4 + $0x60] sm:$0xf] %v4036_v45  ;;  %v11251_v28 = vpop.permute.xlu0 %4480  ;;  %v4586_v14 = vrot.slane %v11096_v27, 4  ;;  %v4198_v45 = vsel %vm732_vm1, %v11045_v53, %v4197_v48  ;;  %v13285_v13 = vrot.slane %v11126_v52, 4 }
 0x58a   : > { %v4202_v16 = vsel %vm568_vm0, %v4186_v54, %v13284_v46  ;;  %v13096_v32 = vrot.slane %v11251_v28, 4  ;;  %v4589_v46 = vrot.slane %v11159_v3, 4  ;;  %v13286_v48 = vrot.slane %v11176_v30, 4 }
 0x58b   : > { %v11249_v49 = vpop.permute.xlu1 %4176  ;;  %v4597_v22 = vsel %vm568_vm0, %v4583_v61, %v13285_v13  ;;  %v4203_v53 = vsel %vm732_vm1, %v11088_v36, %v4202_v16  ;;  %v4193_v16 = vsel %vm732_vm1, %v11003_v59, %v4192_v58 }
 0x58c   : > { %v13095_v42 = vrot.slane %v11249_v49, 4  ;;  %v4516_v0 = vsel %vm1056_vm6, %v11251_v28, %v13096_v32  ;;  %v8024_v59 = vcombine.high %v4193_v16, %v4198_v45 }
 0x58d   : > { %4765 = vperm.xlu1 %8551, %v7984_v20   ;;  %v4602_v20 = vsel %vm568_vm0, %v4586_v14, %v13286_v48  ;;  %4546 = vst [vmem:[#allocation4 + $0x240] sm:$0xf] %v4516_v0  ;;  %v13288_v14 = vrot.slane %v11070_v47, 4  ;;  %v4106_v0 = vrot.slane %v11104_v57, 4  ;;  %v13311_v47 = vld [vmem:[#allocation24_spill] sm:$0xff] }
 0x58e   : > { %v4207_v54 = vsel %vm568_vm0, %v4189_v43, %v13095_v42  ;;  %v11285_v43 = vpop.permute.xlu0 %4172 }
 0x58f   : > { %v4208_v13 = vsel %vm732_vm1, %v11148_v7, %v4207_v54  ;;  %v11283_v40 = vpop.permute.xlu1 %4576  ;;  %v13100_v32 = vrot.slane %v11285_v43, 4  ;;  %v4592_v48 = vsel %vm568_vm0, %v4580_v60, %v13288_v14  ;;  %v13113_v7 = vrot.slane %v11078_v4, 4 }
 0x590   : > { %13287 = vst [vmem:[#allocation30_spill] sm:$0xff] %v11283_v40  ;;  %v13099_v42 = vrot.slane %v11283_v40, 4  ;;  %v8029_v52 = vcombine.high %v4203_v53, %v4208_v13  ;;  %v8028_v36 = vcombine.low %v4203_v53, %v4208_v13  ;;  %v4598_v54 = vsel %vm1137_vm2, %v11051_v34, %v4597_v22 }
 0x591   : > { %v4206_v58 = vsel %vm732_vm1, %v11285_v43, %v13100_v32  ;;  %v13289_v60 = vrot.slane %v11137_v23, 4  ;;  %v4109_v13 = vrot.slane %v11166_v26, 4  ;;  %v4603_v34 = vsel %vm1137_vm2, %v11096_v27, %v4602_v20 }
 0x592   : > { %v4607_v61 = vsel %vm568_vm0, %v4589_v46, %v13099_v42  ;;  %5282 = vmatprep.subr.bf16.mxu1 %v8029_v52  ;;  %4232 = vst [vmem:[#allocation4 + $0x128] sm:$0xf] %v4206_v58  ;;  %v11315_v14 = vpop.permute.xlu0 %4322  ;;  %v13290_v52 = vrot.slane %v11182_v21, 4  ;;  %v4593_v27 = vsel %vm1137_vm2, %v11009_v55, %v4592_v48  ;;  %v4026_v20 = vrot.slane %v11112_v37, 4 }
 0x593   : > { %v4117_v53 = vsel %vm568_vm0, %v4103_v44, %v13289_v60  ;;  %v4608_v22 = vsel %vm1137_vm2, %v11159_v3, %v4607_v61  ;;  %v11313_v46 = vpop.permute.xlu1 %4096  ;;  %5283 = vmatpush1.bf16.msra.mxu1 %v8028_v36  ;;  %v4112_v3 = vsel %vm568_vm0, %v4100_v63, %v13113_v7  ;;  %v8023_v61 = vcombine.low %v4193_v16, %v4198_v45 }
 0x594   : > { %v4122_v42 = vsel %vm568_vm0, %v4106_v0, %v13290_v52  ;;  %v13112_v44 = vrot.slane %v11313_v46, 4  ;;  %5284 = vmatprep.subr.bf16.mxu1 %v8024_v59  ;;  %v8079_v60 = vcombine.high %v4603_v34, %v4608_v22  ;;  %v8078_v32 = vcombine.low %v4603_v34, %v4608_v22 }
 0x595   : > { %v4118_v36 = vsel %vm651_vm3, %v11057_v39, %v4117_v53  ;;  %v13110_v0 = vrot.slane %v11188_v19, 4  ;;  %v8074_v59 = vcombine.high %v4593_v27, %v4598_v54  ;;  %v13109_v55 = vrot.slane %v11146_v12, 4 }
 0x596   : > { %v4127_v58 = vsel %vm568_vm0, %v4109_v13, %v13112_v44  ;;  %5347 = vmatprep.subr.bf16.mxu0 %v8079_v60  ;;  %v4029_v48 = vrot.slane %v11172_v17, 4  ;;  %v4123_v63 = vsel %vm651_vm3, %v11104_v57, %v4122_v42  ;;  %v11341_v39 = vpop.permute.xlu0 %4092  ;;  %v4023_v52 = vrot.slane %v11064_v8, 4 }
 0x597   : > { %v4128_v45 = vsel %vm651_vm3, %v11166_v26, %v4127_v58  ;;  %v11339_v16 = vpop.permute.xlu1 %4016  ;;  %5285 = vmatpush1.bf16.msra.mxu1 %v8023_v61  ;;  %5348 = vmatpush1.bf16.msra.mxu0 %v8078_v32  ;;  %v13121_v13 = vrot.slane %v11341_v39, 4  ;;  %v4113_v42 = vsel %vm651_vm3, %v11015_v15, %v4112_v3  ;;  %v13108_v57 = vrot.slane %v11086_v6, 4  ;;  %v11362_v15 = vld [vmem:[%s13014_s3 + $0x68] ss:$12 sps:$4 sm:$0xff]  }
 0x598   : > { %v13103_v53 = vrot.slane %v11339_v16, 4  ;;  %5349 = vmatprep.subr.bf16.mxu0 %v8074_v59  ;;  %v8019_v34 = vcombine.high %v4123_v63, %v4128_v45  ;;  %v8018_v22 = vcombine.low %v4123_v63, %v4128_v45  ;;  %v8073_v26 = vcombine.low %v4593_v27, %v4598_v54  ;;  %13291 = vst [vmem:[#allocation31_spill] sm:$0xff] %v11362_v15 }
 0x599   : > { %v4042_v60 = vsel %vm568_vm0, %v4026_v20, %v13110_v0  ;;  %v4126_v61 = vsel %vm651_vm3, %v11341_v39, %v13121_v13  ;;  %v8014_v58 = vcombine.high %v4113_v42, %v4118_v36  ;;  %v4020_v20 = vrot.slane %v11021_v62, 4  ;;  %v13305_v13 = vld [vmem:[#allocation19_spill] sm:$0xff] }
 0x59a   : > { %v4047_v32 = vsel %vm568_vm0, %v4029_v48, %v13103_v53  ;;  %5286 = vmatprep.subr.bf16.mxu1 %v8019_v34  ;;  %4152 = vst [vmem:[#allocation4 + $0xd8] sm:$0xf] %v4126_v61  ;;  %v11368_v3 = vpop.permute.xlu0 %4012  ;;  %v4037_v59 = vsel %vm568_vm0, %v4023_v52, %v13109_v55  ;;  %v4043_v63 = vsel %vm570_vm5, %v11112_v37, %v4042_v60  ;;  %v11403_v61 = vld [vmem:[%s13014_s3 + $0x80] ss:$12 sps:$4 sm:$0xff]  }
 0x59b   : > { %v4048_v54 = vsel %vm570_vm5, %v11172_v17, %v4047_v32  ;;  %v11366_v27 = vpop.permute.xlu1 %4496  ;;  %5287 = vmatpush1.bf16.msra.mxu1 %v8018_v22  ;;  %5350 = vmatpush1.bf16.msra.mxu0 %v8073_v26  ;;  %v13111_v48 = vrot.slane %v11368_v3, 4  ;;  %v8013_v17 = vcombine.low %v4113_v42, %v4118_v36  ;;  %v4032_v45 = vsel %vm568_vm0, %v4020_v20, %v13108_v57 }
 0x59c   : > { %5288 = vmatprep.subr.bf16.mxu1 %v8014_v58  ;;  %v8009_v22 = vcombine.high %v4043_v63, %v4048_v54  ;;  %v4038_v52 = vsel %vm570_vm5, %v11064_v8, %v4037_v59  ;;  %v4033_v42 = vsel %vm570_vm5, %v11021_v62, %v4032_v45  ;;  %v8008_v60 = vcombine.low %v4043_v63, %v4048_v54 }
 0x59d   : > { %v4046_v34 = vsel %vm570_vm5, %v11368_v3, %v13111_v48  ;;  %v8004_v32 = vcombine.high %v4033_v42, %v4038_v52  ;;  %13292 = vst [vmem:[#allocation32_spill] sm:$0xff] %v11403_v61  ;;  %v13104_v62 = vrot.slane %v11366_v27, 4  ;;  %v8003_v59 = vcombine.low %v4033_v42, %v4038_v52 }
 0x59e   : > { %8083 = vmatmul.mubr.msk.bf16.vlgmr.msra.gmra.mxu0 %vm1819_vm4, %v11362_v15  ;;  %4072 = vst [vmem:[#allocation4 + $0x88] sm:$0xf] %v4046_v34  ;;  %v11390_v37 = vpop.permute.xlu0 %4492  ;;  %v13293_v63 = vmax.f32 %v10883_v35, 0.0  ;;  %v13105_v34 = vrot.slane %v11157_v1, 4  ;;  %v4503_v52 = vrot.slane %v11072_v2, 4  ;;  %v13106_v42 = vrot.slane %v11094_v25, 4 }
 0x59f   : > { %v11388_v26 = vpop.permute.xlu1 %4416  ;;  %5289 = vmatpush1.bf16.msra.mxu1 %v8013_v17  ;;  %5377 = vmatprep.mubr.bf16.mxu0 %v13207_v31  ;;  %v13102_v36 = vrot.slane %v11390_v37, 4  ;;  %v13294_v17 = vmax.f32 %v10951_v9, 0.0 }
 0x5a0   : > { %5290 = vmatprep.subr.bf16.mxu1 %v8009_v22  ;;  %v4509_v22 = vrot.slane %v11178_v56, 4 }
 0x5a1   : > { %v4526_v8 = vsel %vm1056_vm6, %v11390_v37, %v13102_v36  ;;  %v8695_v45 = vpack.c.bf16 %v13294_v17, %v13293_v63 }
 0x5a2   : > { %4552 = vst [vmem:[#allocation4 + $0x268] sm:$0xf] %v4526_v8  ;;  %v11407_v20 = vpop.permute.xlu0 %4412  ;;  %v13107_v8 = vrot.slane %v11194_v51, 4  ;;  %v4527_v63 = vsel %vm568_vm0, %v4509_v22, %v13104_v62  ;;  %v8610_v22 = vld [vmem:[#allocation4 + $0x4] ss:$20 sps:$4 sm:$0xff]  }
 0x5a3   : > { %v11405_v58 = vpop.permute.xlu1 %4336  ;;  %5291 = vmatpush1.bf16.msra.mxu1 %v8008_v60  ;;  %v13101_v54 = vrot.slane %v11407_v20, 4 }
 0x5a4   : > { %5292 = vmatprep.subr.bf16.mxu1 %v8004_v32  ;;  %v4506_v32 = vrot.slane %v11120_v18, 4 }
 0x5a5   : > { %v4446_v60 = vsel %vm975_vm7, %v11407_v20, %v13101_v54  ;;  %v13296_v54 = vmax.f32 %v10955_v10, 0.0 }
 0x5a6   : > { %8084 = vmatmul.mubr.msk.bf16.gmra.mxu0 %vm1819_vm4, %v11403_v61  ;;  %4472 = vst [vmem:[#allocation4 + $0x218] sm:$0xf] %v4446_v60  ;;  %v11427_v9 = vpop.permute.xlu0 %4248  ;;  %v13295_v60 = vmax.f32 %v10888_v11, 0.0  ;;  %v4522_v53 = vsel %vm568_vm0, %v4506_v32, %v13107_v8  ;;  %v4528_v11 = vsel %vm1056_vm6, %v11178_v56, %v4527_v63  ;;  %v13114_v32 = vrot.slane %v11388_v26, 4  ;;  %v13297_v8 = vld [vmem:[#allocation26_spill] sm:$0xff] }
 0x5a7   : > { %v11425_v35 = vpop.permute.xlu1 %4166  ;;  %5293 = vmatpush1.bf16.msra.mxu1 %v8003_v59  ;;  %5420 = vmatprep.mubr.bf16.mxu0 %v11155_v41  ;;  %v4500_v59 = vrot.slane %v11027_v33, 4  ;;  %v4517_v41 = vsel %vm568_vm0, %v4503_v52, %v13105_v34  ;;  %v13115_v56 = vrot.slane %v11164_v5, 4  ;;  %v4523_v63 = vsel %vm1056_vm6, %v11120_v18, %v4522_v53 }
 0x5a8   : > { %v4185_v17 = vrot.slane %v11425_v35, 4  ;;  %5294 = vmatprep.subr.bf16.mxu1 %v8695_v45  ;;  %v8696_v36 = vpack.c.bf16 %v13296_v54, %v13295_v60  ;;  %v4518_v62 = vsel %vm1056_vm6, %v11072_v2, %v4517_v41  ;;  %v13117_v34 = vrot.slane %v11205_v29, 4 }
 0x5a9   : > { %v4512_v52 = vsel %vm568_vm0, %v4500_v59, %v13106_v42  ;;  %v8069_v42 = vcombine.high %v4523_v63, %v4528_v11  ;;  %v13118_v41 = vrot.slane %v11102_v24, 4  ;;  %v4426_v57 = vrot.slane %v13297_v8, 4 }
 0x5aa   : > { %v4201_v45 = vsel %vm732_vm1, %v11425_v35, %v4185_v17  ;;  %v11455_v54 = vpop.permute.xlu0 %4254  ;;  %v4513_v2 = vsel %vm1056_vm6, %v11027_v33, %v4512_v52  ;;  %v13298_v33 = vld [vmem:[#allocation18_spill] sm:$0xff]  ;;  %v8068_v44 = vcombine.low %v4523_v63, %v4528_v11 }
 0x5ab   : > { %4229 = vst [vmem:[#allocation4 + $0x114] sm:$0xf] %v4201_v45  ;;  %v11453_v10 = vpop.permute.xlu1 %4086  ;;  %5295 = vmatpush1.bf16.msra.mxu1 %v8696_v36  ;;  %v8612_v45 = vld [vmem:[#allocation4] ss:$20 sps:$4 sm:$0xff]   ;;  %v4429_v36 = vrot.slane %v11184_v50, 4  ;;  %v4420_v52 = vrot.slane %v13298_v33, 4 }
 0x5ac   : > { %v13120_v60 = vrot.slane %v11453_v10, 4  ;;  %5296 = vmatprep.subr.bf16.mxu1 %v8610_v22  ;;  %v4423_v22 = vrot.slane %v11080_v38, 4 }
 0x5ad   : > { %v4447_v55 = vsel %vm568_vm0, %v4429_v36, %v13114_v32  ;;  %v13134_v32 = vrot.slane %v11405_v58, 4 }
 0x5ae   : > { %v4121_v59 = vsel %vm651_vm3, %v11453_v10, %v13120_v60  ;;  %v11479_v53 = vpop.permute.xlu0 %4400  ;;  %v4437_v7 = vsel %vm568_vm0, %v4423_v22, %v13115_v56  ;;  %v4448_v11 = vsel %vm975_vm7, %v11184_v50, %v4447_v55  ;;  %v8063_v55 = vcombine.low %v4513_v2, %v4518_v62 }
 0x5af   : > { %4149 = vst [vmem:[#allocation4 + $0xc4] sm:$0xf] %v4121_v59  ;;  %v11477_v18 = vpop.permute.xlu1 %4006  ;;  %5297 = vmatpush1.bf16.msra.mxu1 %v8612_v45  ;;  %v13116_v48 = vrot.slane %v11479_v53, 4  ;;  %v8064_v59 = vcombine.high %v4513_v2, %v4518_v62  ;;  %v4442_v45 = vsel %vm568_vm0, %v4426_v57, %v13117_v34  ;;  %v4432_v57 = vsel %vm568_vm0, %v4420_v52, %v13118_v41  ;;  %v13300_v34 = vld [vmem:[#allocation28_spill] sm:$0xff] }
 0x5b0   : > { %v13119_v0 = vrot.slane %v11477_v18, 4  ;;  %5298 = vmatprep.subr.bf16.mxu1 %v8069_v42  ;;  %v4443_v50 = vsel %vm975_vm7, %v13297_v8, %v4442_v45 }
 0x5b1   : > { %v4436_v42 = vsel %vm975_vm7, %v11479_v53, %v13116_v48  ;;  %v4438_v48 = vsel %vm975_vm7, %v11080_v38, %v4437_v7  ;;  %v8059_v41 = vcombine.high %v4443_v50, %v4448_v11  ;;  %v13302_v38 = vrot.slane %v11285_v43, 4  ;;  %v13303_v7 = vld [vmem:[#allocation25_spill] sm:$0xff] }
 0x5b2   : > { %v4041_v36 = vsel %vm570_vm5, %v11477_v18, %v13119_v0  ;;  %4466 = vst [vmem:[#allocation4 + $0x1f0] sm:$0xf] %v4436_v42  ;;  %v11506_v22 = vpop.permute.xlu0 %4236  ;;  %v13301_v0 = vld [vmem:[#allocation20_spill] sm:$0xff]  ;;  %v13304_v8 = vrot.slane %v13303_v7, 4  ;;  %v8058_v30 = vcombine.low %v4443_v50, %v4448_v11 }
 0x5b3   : > { %4069 = vst [vmem:[#allocation4 + $0x74] sm:$0xf] %v4041_v36  ;;  %v11504_v63 = vpop.permute.xlu1 %4486  ;;  %5299 = vmatpush2.bf16.msra.mxu1 %v8068_v44  ;;  %v13299_v36 = vld [vmem:[#allocation22_spill] sm:$0xff]  ;;  %v4340_v60 = vrot.slane %v13301_v0, 4  ;;  %v4346_v44 = vrot.slane %v13305_v13, 4 }
 0x5b4   : > { %v13122_v56 = vrot.slane %v11504_v63, 4  ;;  %5300 = vmatprep.subr.bf16.mxu1 %v8064_v59  ;;  %v4349_v42 = vrot.slane %v13299_v36, 4  ;;  %v4433_v59 = vsel %vm975_vm7, %v13298_v33, %v4432_v57  ;;  %v4204_v62 = vsel %vm568_vm0, %v13304_v8, %v13302_v38  ;;  %v13306_v33 = vld [vmem:[#allocation27_spill] sm:$0xff]  ;;  %v13308_v38 = vld [vmem:[#allocation21_spill] sm:$0xff] }
 0x5b5   : > { %v13307_v57 = vrot.slane %v13306_v33, 4  ;;  %v13309_v8 = vld [vmem:[#allocation23_spill] sm:$0xff]  ;;  %v8054_v31 = vcombine.high %v4433_v59, %v4438_v48 }
 0x5b6   : > { %v4521_v52 = vsel %vm1056_vm6, %v11504_v63, %v13122_v56  ;;  %v11531_v45 = vpop.permute.xlu0 %4242  ;;  %v4367_v56 = vsel %vm568_vm0, %v4349_v42, %v13134_v32  ;;  %v13310_v15 = vrot.slane %v13309_v8, 4  ;;  %v13313_v42 = vrot.slane %v13300_v34, 4 }
 0x5b7   : > { %4549 = vst [vmem:[#allocation4 + $0x254] sm:$0xf] %v4521_v52  ;;  %v4179_v2 = vpop.permute.xlu1 %4178  ;;  %5301 = vmatpush2.bf16.msra.mxu1 %v8063_v55  ;;  %v4199_v43 = vsel %vm568_vm0, %v13307_v57, %v4185_v17  ;;  %v4341_v52 = vrot.slane %v13308_v38, 4  ;;  %v13312_v55 = vrot.slane %v13311_v47, 4  ;;  %v4205_v32 = vsel %vm732_vm1, %v13303_v7, %v4204_v62 }
 0x5b8   : > { %v4191_v61 = vrot.slane %v4179_v2, 4  ;;  %5302 = vmatprep.subr.bf16.mxu1 %v8059_v41  ;;  %v4362_v35 = vsel %vm568_vm0, %v4346_v44, %v13313_v42  ;;  %v13314_v17 = vrot.slane %v11249_v49, 4  ;;  %v4343_v8 = vrot.slane %v11315_v14, 4 }
 0x5b9   : > { %v4194_v40 = vsel %vm568_vm0, %v13312_v55, %v13310_v15  ;;  %v4368_v15 = vsel %vm894_vm8, %v13299_v36, %v4367_v56  ;;  %v4200_v11 = vsel %vm732_vm1, %v13306_v33, %v4199_v43  ;;  %v4352_v56 = vsel %vm568_vm0, %v4340_v60, %v4341_v52 }
 0x5ba   : > { %v4209_v41 = vsel %vm568_vm0, %v13314_v17, %v4191_v61  ;;  %v4211_v57 = vsel %vm732_vm1, %v4179_v2, %v4191_v61  ;;  %v11566_v7 = vpop.permute.xlu0 %4332  ;;  %v4363_v36 = vsel %vm894_vm8, %v13305_v13, %v4362_v35  ;;  %v8053_v33 = vcombine.low %v4433_v59, %v4438_v48 }
 0x5bb   : > { %v4210_v50 = vsel %vm732_vm1, %v11249_v49, %v4209_v41  ;;  %4235 = vst [vmem:[#allocation4 + $0x13c] sm:$0xf] %v4211_v57  ;;  %v11564_v44 = vpop.permute.xlu1 %4324  ;;  %5303 = vmatpush2.bf16.msra.mxu1 %v8058_v30  ;;  %v4348_v61 = vrot.slane %v11566_v7, 4  ;;  %v4195_v49 = vsel %vm732_vm1, %v13311_v47, %v4194_v40  ;;  %v13315_v13 = vrot.slane %v11341_v39, 4 }
 0x5bc   : > { %v4344_v62 = vrot.slane %v11564_v44, 4  ;;  %5304 = vmatprep.subr.bf16.mxu1 %v8054_v31  ;;  %v8031_v2 = vcombine.high %v4205_v32, %v4210_v50  ;;  %v8030_v55 = vcombine.low %v4205_v32, %v4210_v50  ;;  %v8049_v32 = vcombine.high %v4363_v36, %v4368_v15 }
 0x5bd   : > { %v4366_v31 = vsel %vm894_vm8, %v11566_v7, %v4348_v61  ;;  %v8026_v43 = vcombine.high %v4195_v49, %v4200_v11  ;;  %v13316_v48 = vrot.slane %v11182_v21, 4  ;;  %v13317_v42 = vrot.slane %v11453_v10, 4 }
 0x5be   : > { %v4357_v30 = vsel %vm568_vm0, %v4343_v8, %v4344_v62  ;;  %5388 = vmatprep.subr.bf16.mxu0 %v8031_v2  ;;  %4392 = vst [vmem:[#allocation4 + $0x1c8] sm:$0xf] %v4366_v31  ;;  %v11586_v40 = vpop.permute.xlu0 %4320  ;;  %v13318_v35 = vrot.slane %v11137_v23, 4  ;;  %v4353_v57 = vsel %vm894_vm8, %v13301_v0, %v4352_v56  ;;  %v13319_v8 = vld [vmem:[#allocation16_spill] sm:$0xff]  ;;  %v13321_v50 = vrot.slane %v11078_v4, 4 }
 0x5bf   : > { %v4358_v60 = vsel %vm894_vm8, %v11315_v14, %v4357_v30  ;;  %v4099_v47 = vpop.permute.xlu1 %4098  ;;  %5389 = vmatpush1.bf16.msra.mxu0 %v8030_v55  ;;  %5305 = vmatpush2.bf16.msra.mxu1 %v8053_v33  ;;  %v4124_v59 = vsel %vm568_vm0, %v13316_v48, %v13315_v13  ;;  %v4342_v14 = vrot.slane %v11586_v40, 4  ;;  %v13320_v39 = vrot.slane %v13319_v8, 4 }
 0x5c0   : > { %v4119_v17 = vsel %vm568_vm0, %v13318_v35, %v13317_v42  ;;  %v4111_v41 = vrot.slane %v4099_v47, 4  ;;  %5306 = vmatprep.subr.bf16.mxu1 %v8049_v32  ;;  %5390 = vmatprep.subr.bf16.mxu0 %v8026_v43  ;;  %v8025_v55 = vcombine.low %v4195_v49, %v4200_v11  ;;  %v8048_v10 = vcombine.low %v4363_v36, %v4368_v15 }
 0x5c1   : > { %v4114_v2 = vsel %vm568_vm0, %v13321_v50, %v13320_v39  ;;  %v13322_v33 = vrot.slane %v11313_v46, 4  ;;  %v4356_v32 = vsel %vm894_vm8, %v11586_v40, %v4342_v14  ;;  %v8044_v0 = vcombine.high %v4353_v57, %v4358_v60  ;;  %v13327_v50 = vld [vmem:[#allocation29_spill] sm:$0xff] }
 0x5c2   : > { %v4131_v31 = vsel %vm651_vm3, %v4099_v47, %v4111_v41  ;;  %v4125_v56 = vsel %vm651_vm3, %v11182_v21, %v4124_v59  ;;  %v4120_v43 = vsel %vm651_vm3, %v11137_v23, %v4119_v17  ;;  %4386 = vst [vmem:[#allocation4 + $0x1a0] sm:$0xf] %v4356_v32  ;;  %v11622_v49 = vpop.permute.xlu0 %4252  ;;  %v4115_v21 = vsel %vm651_vm3, %v11078_v4, %v4114_v2 }
 0x5c3   : > { %v4129_v30 = vsel %vm568_vm0, %v13322_v33, %v4111_v41  ;;  %4155 = vst [vmem:[#allocation4 + $0xec] sm:$0xf] %v4131_v31  ;;  %v11620_v11 = vpop.permute.xlu1 %4250  ;;  %5391 = vmatpush1.bf16.msra.mxu0 %v8025_v55  ;;  %5307 = vmatpush2.bf16.msra.mxu1 %v8048_v10  ;;  %v4268_v36 = vrot.slane %v11622_v49, 4  ;;  %v8043_v23 = vcombine.low %v4353_v57, %v4358_v60  ;;  %v13323_v59 = vrot.slane %v11368_v3, 4 }
 0x5c4   : > { %v4130_v15 = vsel %vm651_vm3, %v11313_v46, %v4129_v30  ;;  %5308 = vmatprep.subr.bf16.mxu1 %v8044_v0  ;;  %v8016_v48 = vcombine.high %v4115_v21, %v4120_v43  ;;  %v13324_v42 = vrot.slane %v11188_v19, 4  ;;  %v4267_v17 = vrot.slane %v11620_v11, 4 }
 0x5c5   : > { %v8021_v47 = vcombine.high %v4125_v56, %v4130_v15  ;;  %v8020_v13 = vcombine.low %v4125_v56, %v4130_v15  ;;  %v4286_v46 = vsel %vm813_vm9, %v11622_v49, %v4268_v36  ;;  %v13325_v4 = vrot.slane %v11477_v18, 4 }
 0x5c6   : > { %v4044_v35 = vsel %vm568_vm0, %v13324_v42, %v13323_v59  ;;  %4312 = vst [vmem:[#allocation4 + $0x178] sm:$0xf] %v4286_v46  ;;  %v11637_v8 = vpop.permute.xlu0 %4572  ;;  %v13326_v60 = vrot.slane %v11146_v12, 4  ;;  %v13328_v2 = vrot.slane %v13327_v50, 4  ;;  %v13329_v55 = vrot.slane %v11086_v6, 4 }
 0x5c7   : > { %5392 = vmatprep.subr.bf16.mxu0 %v8021_v47  ;;  %v4019_v41 = vpop.permute.xlu1 %4018  ;;  %5309 = vmatpush2.bf16.msra.mxu1 %v8043_v23  ;;  %v4588_v3 = vrot.slane %v11637_v8, 4  ;;  %v4266_v33 = vrot.slane %v11427_v9, 4  ;;  %v8015_v30 = vcombine.low %v4115_v21, %v4120_v43  ;;  %v4045_v18 = vsel %vm570_vm5, %v11188_v19, %v4044_v35 }
 0x5c8   : > { %5393 = vmatpush1.bf16.msra.mxu0 %v8020_v13  ;;  %v4039_v57 = vsel %vm568_vm0, %v13326_v60, %v13325_v4  ;;  %v4031_v39 = vrot.slane %v4019_v41, 4  ;;  %v4034_v10 = vsel %vm568_vm0, %v13329_v55, %v13328_v2  ;;  %v13330_v31 = vrot.slane %v11339_v16, 4 }
 0x5c9   : > { %5394 = vmatprep.subr.bf16.mxu0 %v8016_v48  ;;  %v4606_v56 = vsel %vm1137_vm2, %v11637_v8, %v4588_v3  ;;  %v4269_v15 = vrot.slane %v11455_v54, 4  ;;  %v4040_v47 = vsel %vm570_vm5, %v11146_v12, %v4039_v57  ;;  %v4282_v19 = vsel %vm568_vm0, %v4266_v33, %v4267_v17 }
 0x5ca   : > { %v4049_v32 = vsel %vm568_vm0, %v13330_v31, %v4031_v39  ;;  %v4051_v0 = vsel %vm570_vm5, %v4019_v41, %v4031_v39  ;;  %4632 = vst [vmem:[#allocation4 + $0x2b8] sm:$0xf] %v4606_v56  ;;  %v11671_v21 = vpop.permute.xlu0 %4240  ;;  %v4035_v59 = vsel %vm570_vm5, %v11086_v6, %v4034_v10  ;;  %v4283_v41 = vsel %vm813_vm9, %v11427_v9, %v4282_v19 }
 0x5cb   : > { %v4050_v43 = vsel %vm570_vm5, %v11339_v16, %v4049_v32  ;;  %4075 = vst [vmem:[#allocation4 + $0x9c] sm:$0xf] %v4051_v0  ;;  %v11669_v13 = vpop.permute.xlu1 %4256  ;;  %v4262_v46 = vrot.slane %v11671_v21, 4  ;;  %v8006_v35 = vcombine.high %v4035_v59, %v4040_v47  ;;  %v8005_v55 = vcombine.low %v4035_v59, %v4040_v47 }
 0x5cc   : > { %5395 = vmatpush1.bf16.msra.mxu0 %v8015_v30  ;;  %v4270_v23 = vrot.slane %v11669_v13, 4  ;;  %v8011_v48 = vcombine.high %v4045_v18, %v4050_v43  ;;  %v8010_v12 = vcombine.low %v4045_v18, %v4050_v43  ;;  %v8616_v30 = vld [vmem:[#allocation4 + $0x30] ss:$20 sps:$4 sm:$0xff]   ;;  %v8617_v18 = vld [vmem:[#allocation4 + $0xc] ss:$20 sps:$4 sm:$0xff]   ;;  %v13331_v32 = vrot.slane %v11390_v37, 4 }
 0x5cd   : > { %v4276_v42 = vsel %vm813_vm9, %v11671_v21, %v4262_v46  ;;  %v13332_v0 = vrot.slane %v11194_v51, 4  ;;  %v13334_v47 = vrot.slane %v11157_v1, 4  ;;  %v13335_v59 = vrot.slane %v11251_v28, 4 }
 0x5ce   : > { %v4287_v16 = vsel %vm568_vm0, %v4269_v15, %v4270_v23  ;;  %5396 = vmatprep.subr.bf16.mxu0 %v8011_v48  ;;  %4306 = vst [vmem:[#allocation4 + $0x150] sm:$0xf] %v4276_v42  ;;  %v11688_v6 = vpop.permute.xlu0 %4560  ;;  %v13333_v15 = vrot.slane %v11504_v63, 4  ;;  %v4260_v42 = vrot.slane %v11506_v22, 4  ;;  %v4263_v28 = vrot.slane %v11531_v45, 4 }
 0x5cf   : > { %v4288_v4 = vsel %vm813_vm9, %v11455_v54, %v4287_v16  ;;  %v4407_v60 = vpop.permute.xlu1 %4406  ;;  %v4582_v39 = vrot.slane %v11688_v6, 4  ;;  %v8614_v54 = vld [vmem:[#allocation4 + $0x34] ss:$20 sps:$4 sm:$0xff]   ;;  %v4524_v56 = vsel %vm568_vm0, %v13332_v0, %v13331_v32  ;;  %v13336_v16 = vrot.slane %v11094_v25, 4 }
 0x5d0   : > { %5397 = vmatpush1.bf16.msra.mxu0 %v8010_v12  ;;  %v4425_v57 = vrot.slane %v4407_v60, 4  ;;  %v8039_v50 = vcombine.high %v4283_v41, %v4288_v4  ;;  %v8038_v2 = vcombine.low %v4283_v41, %v4288_v4  ;;  %v4519_v19 = vsel %vm568_vm0, %v13334_v47, %v13333_v15  ;;  %v8619_v12 = vld [vmem:[#allocation4 + $0x8] ss:$20 sps:$4 sm:$0xff]  }
 0x5d1   : > { %5398 = vmatprep.subr.bf16.mxu0 %v8006_v35  ;;  %v4596_v9 = vsel %vm1137_vm2, %v11688_v6, %v4582_v39  ;;  %v4514_v37 = vsel %vm568_vm0, %v13336_v16, %v13335_v59  ;;  %v13337_v35 = vrot.slane %v11366_v27, 4  ;;  %v4525_v4 = vsel %vm1056_vm6, %v11194_v51, %v4524_v56 }
 0x5d2   : > { %v4441_v10 = vsel %vm975_vm7, %v4407_v60, %v4425_v57  ;;  %5310 = vmatprep.subr.bf16.mxu1 %v8039_v50  ;;  %4626 = vst [vmem:[#allocation4 + $0x290] sm:$0xf] %v4596_v9  ;;  %v4520_v60 = vsel %vm1056_vm6, %v11157_v1, %v4519_v19  ;;  %v4515_v1 = vsel %vm1056_vm6, %v11094_v25, %v4514_v37  ;;  %v13340_v25 = vrot.slane %v11164_v5, 4 }
 0x5d3   : > { %4469 = vst [vmem:[#allocation4 + $0x204] sm:$0xf] %v4441_v10  ;;  %v11696_v33 = vpop.permute.xlu1 %4238  ;;  %5311 = vmatpush2.bf16.msra.mxu1 %v8038_v2  ;;  %v13342_v59 = vrot.slane %v11102_v24, 4  ;;  %v13343_v16 = vrot.slane %v11388_v26, 4 }
 0x5d4   : > { %5399 = vmatpush1.bf16.msra.mxu0 %v8005_v55  ;;  %v4261_v43 = vrot.slane %v11696_v33, 4  ;;  %v4439_v15 = vsel %vm568_vm0, %v13340_v25, %v4425_v57  ;;  %v11761_v57 = vld [vmem:[%s13014_s3 + $0x60] ss:$12 sps:$4 sm:$0xff]   ;;  %v13346_v25 = vmov 0  }
 0x5d5   : > { %5400 = vmatprep.subr.bf16.mxu0 %v8614_v54 }
 0x5d6   : > { %v4272_v55 = vsel %vm568_vm0, %v4260_v42, %v4261_v43 }
 0x5d7   : > { %v4499_v31 = vpop.permute.xlu1 %4498  ;;  %v4273_v32 = vsel %vm813_vm9, %v11506_v22, %v4272_v55  ;;  %v13344_v55 = vrot.slane %v13300_v34, 4 }
 0x5d8   : > { %5401 = vmatpush1.bf16.msra.mxu0 %v8616_v30  ;;  %v4511_v48 = vrot.slane %v4499_v31, 4  ;;  %v13338_v30 = vrot.slane %v11407_v20, 4 }
 0x5d9   : > { %5402 = vmatprep.subr.bf16.mxu0 %v8617_v18  ;;  %v13339_v18 = vrot.slane %v11205_v29, 4 }
 0x5da   : > { %v4529_v63 = vsel %vm568_vm0, %v13337_v35, %v4511_v48  ;;  %v4531_v41 = vsel %vm1056_vm6, %v4499_v31, %v4511_v48  ;;  %v8065_v48 = vcombine.low %v4515_v1, %v4520_v60 }
 0x5db   : > { %v4530_v50 = vsel %vm1056_vm6, %v11366_v27, %v4529_v63  ;;  %4555 = vst [vmem:[#allocation4 + $0x27c] sm:$0xf] %v4531_v41  ;;  %v11726_v2 = vpop.permute.xlu1 %4244  ;;  %v8066_v27 = vcombine.high %v4515_v1, %v4520_v60  ;;  %v4444_v31 = vsel %vm568_vm0, %v13339_v18, %v13338_v30  ;;  %v11772_v41 = vld [vmem:[%s13014_s3 + $0x7c] ss:$12 sps:$4 sm:$0xff]  }
 0x5dc   : > { %5403 = vmatpush1.bf16.msra.mxu0 %v8619_v12  ;;  %v4264_v10 = vrot.slane %v11726_v2, 4  ;;  %v8071_v9 = vcombine.high %v4525_v4, %v4530_v50  ;;  %v8070_v51 = vcombine.low %v4525_v4, %v4530_v50  ;;  %v13341_v12 = vrot.slane %v11479_v53, 4 }
 0x5dd   : > { %v4445_v42 = vsel %vm975_vm7, %v11205_v29, %v4444_v31  ;;  %v4440_v53 = vsel %vm975_vm7, %v11164_v5, %v4439_v15 }
 0x5de   : > { %v4277_v54 = vsel %vm568_vm0, %v4263_v28, %v4264_v10  ;;  %5404 = vmatprep.subr.bf16.mxu0 %v8071_v9  ;;  %v4434_v22 = vsel %vm568_vm0, %v13342_v59, %v13341_v12  ;;  %v4364_v9 = vsel %vm568_vm0, %v13344_v55, %v4348_v61  ;;  %v11799_v61 = vld [vmem:[%s13014_s3 + $0x78] ss:$12 sps:$4 sm:$0xff]  }
 0x5df   : > { %v4278_v0 = vsel %vm813_vm9, %v11531_v45, %v4277_v54  ;;  %v4419_v56 = vpop.permute.xlu1 %4418  ;;  %v4435_v29 = vsel %vm975_vm7, %v11102_v24, %v4434_v22  ;;  %v4354_v54 = vsel %vm568_vm0, %v4341_v52, %v4342_v14  ;;  %v13349_v22 = vld [vmem:[#allocation30_spill] sm:$0xff] }
 0x5e0   : > { %5405 = vmatpush2.bf16.msra.mxu0 %v8070_v51  ;;  %v4431_v47 = vrot.slane %v4419_v56, 4  ;;  %v8034_v19 = vcombine.high %v4273_v32, %v4278_v0  ;;  %v8033_v20 = vcombine.low %v4273_v32, %v4278_v0  ;;  %v8055_v1 = vcombine.low %v4435_v29, %v4440_v53 }
 0x5e1   : > { %5406 = vmatprep.subr.bf16.mxu0 %v8066_v27  ;;  %v13345_v27 = vrot.slane %v11405_v58, 4  ;;  %v4355_v0 = vsel %vm894_vm8, %v13308_v38, %v4354_v54  ;;  %v13355_v54 = vld [vmem:[#allocation31_spill] sm:$0xff] }
 0x5e2   : > { %v4449_v45 = vsel %vm568_vm0, %v13343_v16, %v4431_v47  ;;  %v4451_v37 = vsel %vm975_vm7, %v4419_v56, %v4431_v47  ;;  %5312 = vmatprep.subr.bf16.mxu1 %v8034_v19  ;;  %v4274_v19 = vsel %vm568_vm0, %v4261_v43, %v4262_v46  ;;  %v13347_v46 = vld [vmem:[#allocation15_spill] sm:$0xff] }
 0x5e3   : > { %v4450_v35 = vsel %vm975_vm7, %v11388_v26, %v4449_v45  ;;  %4475 = vst [vmem:[#allocation4 + $0x22c] sm:$0xf] %v4451_v37  ;;  %v4327_v63 = vpop.permute.xlu1 %4326  ;;  %5313 = vmatpush2.bf16.msra.mxu1 %v8033_v20  ;;  %v8056_v26 = vcombine.high %v4435_v29, %v4440_v53  ;;  %v13348_v43 = vrot.slane %v13347_v46, 4 }
 0x5e4   : > { %5407 = vmatpush2.bf16.msra.mxu0 %v8065_v48  ;;  %v4345_v4 = vrot.slane %v4327_v63, 4  ;;  %v8061_v60 = vcombine.high %v4445_v42, %v4450_v35  ;;  %v8060_v28 = vcombine.low %v4445_v42, %v4450_v35 }
 0x5e6   : > { %v4361_v5 = vsel %vm894_vm8, %v4327_v63, %v4345_v4  ;;  %5315 = vmatmul.mubr.bf16.vlgmr.msra.gmra.mxu1 %v11761_v57  ;;  %5408 = vmatprep.subr.bf16.mxu0 %v8061_v60  ;;  %v4359_v24 = vsel %vm568_vm0, %v4344_v62, %v4345_v4  ;;  %v4365_v62 = vsel %vm894_vm8, %v13300_v34, %v4364_v9 }
 0x5e7   : > { %4389 = vst [vmem:[#allocation4 + $0x1b4] sm:$0xf] %v4361_v5  ;;  %v4339_v50 = vpop.permute.xlu1 %4338  ;;  %5324 = vmatprep.mubr.bf16.mxu1 %v11772_v41  ;;  %v4360_v40 = vsel %vm894_vm8, %v11564_v44, %v4359_v24  ;;  %v8628_v24 = vld [vmem:[#allocation4 + $0x268] ss:$20 sps:$4 sm:$0xff]  }
 0x5e8   : > { %5409 = vmatpush2.bf16.msra.mxu0 %v8060_v28  ;;  %v4351_v51 = vrot.slane %v4339_v50, 4  ;;  %v8046_v34 = vcombine.high %v4355_v0, %v4360_v40  ;;  %v8045_v47 = vcombine.low %v4355_v0, %v4360_v40  ;;  %v13353_v28 = vld [vmem:[#allocation14_spill] sm:$0xff]  ;;  %v13356_v40 = vld [vmem:[#allocation32_spill] sm:$0xff] }
 0x5e9   : > { %5410 = vmatprep.subr.bf16.mxu0 %v8056_v26  ;;  %v13354_v29 = vrot.slane %v13353_v28, 4 }
 0x5ea   : > { %v4369_v7 = vsel %vm568_vm0, %v13345_v27, %v4351_v51  ;;  %v4371_v30 = vsel %vm894_vm8, %v4339_v50, %v4351_v51  ;;  %v8630_v51 = vld [vmem:[#allocation4 + $0x128] ss:$20 sps:$4 sm:$0xff]   ;;  %v8631_v27 = vld [vmem:[#allocation4 + $0x240] ss:$20 sps:$4 sm:$0xff]  }
 0x5eb   : > { %v4370_v52 = vsel %vm894_vm8, %v11405_v58, %v4369_v7  ;;  %4395 = vst [vmem:[#allocation4 + $0x1dc] sm:$0xf] %v4371_v30  ;;  %v4247_v14 = vpop.permute.xlu1 %4246  ;;  %v4284_v58 = vsel %vm568_vm0, %v4267_v17, %v4268_v36  ;;  %v8632_v7 = vld [vmem:[#allocation4 + $0x100] ss:$20 sps:$4 sm:$0xff]   ;;  %v8633_v30 = vld [vmem:[#allocation4 + $0x218] ss:$20 sps:$4 sm:$0xff]  }
 0x5ec   : > { %5411 = vmatpush2.bf16.msra.mxu0 %v8055_v1  ;;  %v4265_v18 = vrot.slane %v4247_v14, 4  ;;  %v8051_v31 = vcombine.high %v4365_v62, %v4370_v52  ;;  %v8050_v32 = vcombine.low %v4365_v62, %v4370_v52  ;;  %v4285_v36 = vsel %vm813_vm9, %v11620_v11, %v4284_v58  ;;  %v8634_v62 = vld [vmem:[#allocation4 + $0xd8] ss:$20 sps:$4 sm:$0xff]   ;;  %v8635_v52 = vld [vmem:[#allocation4 + $0x1f0] ss:$20 sps:$4 sm:$0xff]  }
 0x5ed   : > { %v4275_v11 = vsel %vm813_vm9, %v11696_v33, %v4274_v19  ;;  %v13351_v33 = vld [vmem:[#allocation17_spill] sm:$0xff]  ;;  %v11882_v19 = vpop.permute.xlu0 %4770 }
 0x5ee   : > { %v4281_v56 = vsel %vm813_vm9, %v4247_v14, %v4265_v18  ;;  %5325 = vmatmul.mubr.bf16.gmra.mxu1 %v11799_v61  ;;  %5412 = vmatprep.subr.bf16.mxu0 %v8051_v31  ;;  %v4279_v38 = vsel %vm568_vm0, %v4264_v10, %v4265_v18  ;;  %v13352_v42 = vrot.slane %v13351_v33, 4  ;;  %v8683_v14 = vld [vmem:[%s13014_s3 + $0x64] ss:$12 sps:$4 sm:$0xff]   ;;  %v8639_v0 = vld [vmem:[#allocation4 + $0x1a0] ss:$20 sps:$4 sm:$0xff]  }
 0x5ef   : > { %4309 = vst [vmem:[#allocation4 + $0x164] sm:$0xf] %v4281_v56  ;;  %v4259_v44 = vpop.permute.xlu1 %4258  ;;  %5473 = vmatprep.mubr.bf16.mxu1 %v13346_v25  ;;  %v4280_v17 = vsel %vm813_vm9, %v11726_v2, %v4279_v38  ;;  %v13350_v2 = vrot.slane %v13349_v22, 4  ;;  %v8636_v18 = vld [vmem:[#allocation4 + $0xb0] ss:$20 sps:$4 sm:$0xff]  }
 0x5f0   : > { %5413 = vmatpush2.bf16.msra.mxu0 %v8050_v32  ;;  %v4271_v15 = vrot.slane %v4259_v44, 4  ;;  %v8036_v45 = vcombine.high %v4275_v11, %v4280_v17  ;;  %v4594_v53 = vsel %vm568_vm0, %v13352_v42, %v4582_v39  ;;  %v8035_v60 = vcombine.low %v4275_v11, %v4280_v17  ;;  %v8638_v32 = vld [vmem:[#allocation4 + $0x88] ss:$20 sps:$4 sm:$0xff]   ;;  %v8640_v56 = vld [vmem:[#allocation4 + $0x60] ss:$20 sps:$4 sm:$0xff]  }
 0x5f1   : > { %5414 = vmatprep.subr.bf16.mxu0 %v8046_v34  ;;  %v4595_v50 = vsel %vm1137_vm2, %v13351_v33, %v4594_v53  ;;  %v8644_v38 = vld [vmem:[#allocation4 + $0x10] ss:$20 sps:$4 sm:$0xff]  }
 0x5f2   : > { %v4289_v49 = vsel %vm568_vm0, %v4270_v23, %v4271_v15  ;;  %v4291_v20 = vsel %vm813_vm9, %v4259_v44, %v4271_v15  ;;  %v4604_v23 = vsel %vm568_vm0, %v13348_v43, %v4588_v3  ;;  %v8637_v31 = vld [vmem:[#allocation4 + $0x1c8] ss:$20 sps:$4 sm:$0xff]   ;;  %v8642_v44 = vld [vmem:[#allocation4 + $0x38] ss:$20 sps:$4 sm:$0xff]  }
 0x5f3   : > { %v4290_v10 = vsel %vm813_vm9, %v11669_v13, %v4289_v49  ;;  %4315 = vst [vmem:[#allocation4 + $0x18c] sm:$0xf] %v4291_v20  ;;  %v4579_v21 = vpop.permute.xlu1 %4578  ;;  %v4605_v8 = vsel %vm1137_vm2, %v13347_v46, %v4604_v23 }
 0x5f4   : > { %5415 = vmatpush2.bf16.msra.mxu0 %v8045_v47  ;;  %v4591_v48 = vrot.slane %v4579_v21, 4  ;;  %v8041_v12 = vcombine.high %v4285_v36, %v4290_v10  ;;  %v8040_v59 = vcombine.low %v4285_v36, %v4290_v10  ;;  %v11886_v36 = vpop.permute.xlu0 %4760 }
 0x5f6   : > { %v4609_v16 = vsel %vm568_vm0, %v13350_v2, %v4591_v48  ;;  %v4611_v13 = vsel %vm1137_vm2, %v4579_v21, %v4591_v48  ;;  %5416 = vmatprep.subr.bf16.mxu0 %v8041_v12  ;;  %v8643_v58 = vld [vmem:[#allocation4 + $0x150] ss:$20 sps:$4 sm:$0xff]  }
 0x5f7   : > { %v4610_v3 = vsel %vm1137_vm2, %v13349_v22, %v4609_v16  ;;  %4635 = vst [vmem:[#allocation4 + $0x2cc] sm:$0xf] %v4611_v13  ;;  %v4567_v37 = vpop.permute.xlu1 %4566 }
 0x5f8   : > { %5417 = vmatpush2.bf16.msra.mxu0 %v8040_v59  ;;  %v4585_v35 = vrot.slane %v4567_v37, 4  ;;  %v8081_v63 = vcombine.high %v4605_v8, %v4610_v3  ;;  %v8080_v4 = vcombine.low %v4605_v8, %v4610_v3 }
 0x5f9   : > { %5418 = vmatprep.subr.bf16.mxu0 %v8036_v45 }
 0x5fa   : > { %v4599_v5 = vsel %vm568_vm0, %v13354_v29, %v4585_v35  ;;  %v4601_v26 = vsel %vm1137_vm2, %v4567_v37, %v4585_v35  ;;  %5453 = vmatprep.subr.bf16.mxu1 %v8081_v63  ;;  %v8641_v34 = vld [vmem:[#allocation4 + $0x178] ss:$20 sps:$4 sm:$0xff]  }
 0x5fb   : > { %v4600_v6 = vsel %vm1137_vm2, %v13353_v28, %v4599_v5  ;;  %4629 = vst [vmem:[#allocation4 + $0x2a4] sm:$0xf] %v4601_v26  ;;  %5454 = vmatpush1.bf16.msra.mxu1 %v8080_v4 }
 0x5fc   : > { %5419 = vmatpush2.bf16.msra.mxu0 %v8035_v60  ;;  %v8076_v39 = vcombine.high %v4595_v50, %v4600_v6  ;;  %v8075_v55 = vcombine.low %v4595_v50, %v4600_v6 }
 0x5fe   : > { %v8627_v9 = vld [vmem:[#allocation4 + $0x2b8] ss:$20 sps:$4 sm:$0xff]   ;;  %5455 = vmatprep.subr.bf16.mxu1 %v8076_v39 }
 0x5ff   : > { %5421 = vmatmul.mubr.bf16.vlgmr.msra.gmra.mxu0 %v11761_v57  ;;  %5456 = vmatpush1.bf16.msra.mxu1 %v8075_v55 }
 0x600   : > { %5430 = vmatprep.mubr.bf16.mxu0 %v11772_v41  ;;  %8451 = vmatprep.subr.bf16.mxu0 %v8627_v9 }
 0x601   : > { %8368 = vmatprep.subr.bf16.mxu1 %v8628_v24  ;;  %8452 = vmatpush3.bf16.msra.mxu0 %v8627_v9 }
 0x602   : > { %v8629_v1 = vld [vmem:[#allocation4 + $0x290] ss:$20 sps:$4 sm:$0xff]   ;;  %8085 = vmatmul.mubr.msk.bf16.vlgmr.msra.gmra.mxu1 %vm1819_vm4, %v13355_v54 }
 0x603   : > { %8369 = vmatpush3.bf16.msra.mxu1 %v8630_v51  ;;  %5483 = vmatprep.mubr.bf16.mxu1 %v13346_v25 }
 0x604   : > { %8453 = vmatprep.subr.bf16.mxu0 %v8629_v1  ;;  %8370 = vmatprep.subr.bf16.mxu1 %v8631_v27  ;;  %v11884_v20 = vpop.permute.xlu1 %4775 }
 0x605   : > { %8454 = vmatpush3.bf16.msra.mxu0 %v8629_v1 }
 0x607   : > { %5431 = vmatmul.mubr.bf16.gmra.mxu0 %v11799_v61  ;;  %8371 = vmatpush3.bf16.msra.mxu1 %v8632_v7 }
 0x608   : > { %8455 = vmatprep.mubr.msk.bf16.mxu0 %vm1819_vm4, %v13355_v54  ;;  %8372 = vmatprep.subr.bf16.mxu1 %v8633_v30  ;;  %v11890_v43 = vpop.permute.xlu1 %4765 }
 0x60a   : > { %8086 = vmatmul.mubr.msk.bf16.gmra.mxu1 %vm1819_vm4, %v13356_v40 }
 0x60b   : > { %8373 = vmatpush3.bf16.msra.mxu1 %v8634_v62  ;;  %5526 = vmatprep.mubr.bf16.mxu1 %v8683_v14 }
 0x60c   : > { %8374 = vmatprep.subr.bf16.mxu1 %v8635_v52 }
 0x60f   : > { %8456 = vmatmul.mubr.msk.bf16.vlgmr.msra.gmra.mxu0 %vm1819_vm4, %v13356_v40  ;;  %8375 = vmatpush3.bf16.msra.mxu1 %v8636_v18 }
 0x610   : > { %8376 = vmatprep.subr.bf16.mxu1 %v8637_v31 }
 0x613   : > { %8377 = vmatpush3.bf16.msra.mxu1 %v8638_v32 }
 0x614   : > { %8378 = vmatprep.subr.bf16.mxu1 %v8639_v0 }
 0x617   : > { %8379 = vmatpush3.bf16.msra.mxu1 %v8640_v56 }
 0x618   : > { %8380 = vmatprep.subr.bf16.mxu1 %v8641_v34 }
 0x61b   : > { %8381 = vmatpush3.bf16.msra.mxu1 %v8642_v44 }
 0x61c   : > { %8382 = vmatprep.subr.bf16.mxu1 %v8643_v58 }
 0x61f   : > { %8383 = vmatpush3.bf16.msra.mxu1 %v8644_v38 }
 0x622   : > { %5527 = vmatmul.mubr.bf16.vlgmr.msra.gmra.mxu1 %v11761_v57 }
 0x623   : > { %5534 = vmatprep.mubr.bf16.mxu1 %v11772_v41 }
 0x62a   : > { %5535 = vmatmul.mubr.bf16.gmra.mxu1 %v11799_v61 }
 0x62b   : > { %7095 = vmatprep.mubr.bf16.mxu1 %v13346_v25 }
 0x65e   : > { %v5369_v15 = vpop.f32.mrf.mxu0 }
 0x660   : > { %v5371_v47 = vpop.f32.mrf.mxu0 }
 0x662   : > { %v5373_v49 = vpop.f32.mrf.mxu0 }
 0x664   : > { %v5375_v17 = vpop.f32.mrf.mxu0 }
 0x666   : > { %v5379_v46 = vpop.f32.mrf.mxu0 }
 0x668   : > { %v5381_v11 = vpop.f32.mrf.mxu0 }
 0x66a   : > { %v5383_v42 = vpop.f32.mrf.mxu0 }
 0x66c   : > { %v5385_v50 = vpop.f32.mrf.mxu0 }
 0x6a6   : > { %v5316_v10 = vpop.f32.mrf.mxu1 }
 0x6a7   : > { %v5317_v21 = vadd.f32 %v5316_v10, %v11886_v36 }
 0x6a8   : > { %v5318_v57 = vpop.f32.mrf.mxu1 }
 0x6a9   : > { %v5370_v41 = vadd.f32 %v5369_v15, %v5317_v21  ;;  %v5319_v61 = vadd.f32 %v5318_v57, %v11886_v36 }
 0x6aa   : > { %v5320_v23 = vpop.f32.mrf.mxu1 }
 0x6ab   : > { %v5372_v48 = vadd.f32 %v5371_v47, %v5319_v61  ;;  %v5321_v12 = vadd.f32 %v5320_v23, %v11890_v43  ;;  %v5592_v22 = vmax.f32 %v5370_v41, 0.0 }
 0x6ac   : > { %v5322_v59 = vpop.f32.mrf.mxu1 }
 0x6ad   : > { %v5593_v2 = vmax.f32 %v5372_v48, 0.0  ;;  %v5374_v16 = vadd.f32 %v5373_v49, %v5321_v12  ;;  %v5323_v13 = vadd.f32 %v5322_v59, %v11890_v43 }
 0x6ae   : > { %v5326_v45 = vpop.f32.mrf.mxu1 }
 0x6af   : > { %v11894_v8 = vpack.c.bf16 %v5593_v2, %v5592_v22  ;;  %v5376_v3 = vadd.f32 %v5375_v17, %v5323_v13  ;;  %v5327_v37 = vadd.f32 %v5326_v45, %v11882_v19  ;;  %v5597_v53 = vmax.f32 %v5374_v16, 0.0 }
 0x6b0   : > { %v5328_v33 = vpop.f32.mrf.mxu1 }
 0x6b1   : > { %v5598_v35 = vmax.f32 %v5376_v3, 0.0  ;;  %v5329_v63 = vadd.f32 %v5328_v33, %v11882_v19  ;;  %v11898_v4 = vadd.f32 %v5379_v46, %v5327_v37  ;;  %5884 = vrot.lane.b32.xlu0 %v11894_v8, %s8834_s18  ;;  %5700 = vst [vmem:[#allocation4] sm:$0xff] %v11894_v8 }
 0x6b2   : > { %v5330_v60 = vpop.f32.mrf.mxu1 }
 0x6b3   : > { %v11903_v28 = vpack.c.bf16 %v5598_v35, %v5597_v53  ;;  %v5331_v29 = vadd.f32 %v5330_v60, %v11884_v20  ;;  %v11906_v5 = vadd.f32 %v5381_v11, %v5329_v63  ;;  %v13149_v6 = vmax.f32 %v11898_v4, 0.0 }
 0x6b4   : > { %v5332_v26 = vpop.f32.mrf.mxu1 }
 0x6b5   : > { %v13153_v39 = vmax.f32 %v11906_v5, 0.0  ;;  %v5333_v55 = vadd.f32 %v5332_v26, %v11884_v20  ;;  %v11911_v9 = vadd.f32 %v5383_v42, %v5331_v29  ;;  %5804 = vrot.lane.b32.xlu0 %v11894_v8, %s8836_s20  ;;  %5703 = vst [vmem:[#allocation4 + $0x14] sm:$0xff] %v11903_v28 }
 0x6b7   : > { %v11920_v24 = vpack.c.bf16 %v13153_v39, %v13149_v6  ;;  %v11922_v51 = vadd.f32 %v5385_v50, %v5333_v55  ;;  %v13147_v1 = vmax.f32 %v11911_v9, 0.0 }
 0x6b9   : > { %v13151_v54 = vmax.f32 %v11922_v51, 0.0  ;;  %5724 = vrot.lane.b32.xlu0 %v11894_v8, %s8837_s21 }
 0x6bb   : > { %v11932_v27 = vpack.c.bf16 %v13151_v54, %v13147_v1 }
 0x6bd   : > { %6204 = vrot.lane.b32.xlu0 %v11894_v8, %s8838_s22 }
 0x6bf   : > { %v5422_v7 = vpop.f32.mrf.mxu0 }
 0x6c0   : > { %v5423_v62 = vadd.f32 %v5422_v7, %v11886_v36 }
 0x6c1   : > { %v5424_v30 = vpop.f32.mrf.mxu0  ;;  %6284 = vrot.lane.b32.xlu0 %v11894_v8, %s8835_s19 }
 0x6c2   : > { %v5475_v52 = vpop.f32.mrf.mxu1  ;;  %v5425_v14 = vadd.f32 %v5424_v30, %v11886_v36 }
 0x6c3   : > { %v5426_v40 = vpop.f32.mrf.mxu0  ;;  %v5476_v18 = vadd.f32 %v5475_v52, %v5423_v62 }
 0x6c4   : > { %v5477_v32 = vpop.f32.mrf.mxu1  ;;  %v5427_v0 = vadd.f32 %v5426_v40, %v11890_v43 }
 0x6c5   : > { %v5428_v31 = vpop.f32.mrf.mxu0  ;;  %v5478_v56 = vadd.f32 %v5477_v32, %v5425_v14  ;;  %6124 = vrot.lane.b32.xlu0 %v11894_v8, %s8839_s23  ;;  %v5594_v58 = vmax.f32 %v5476_v18, 0.0 }
 0x6c6   : > { %v5479_v44 = vpop.f32.mrf.mxu1  ;;  %v5429_v38 = vadd.f32 %v5428_v31, %v11890_v43 }
 0x6c7   : > { %v5432_v34 = vpop.f32.mrf.mxu0  ;;  %v5595_v15 = vmax.f32 %v5478_v56, 0.0  ;;  %v5480_v47 = vadd.f32 %v5479_v44, %v5427_v0 }
 0x6c8   : > { %v5481_v17 = vpop.f32.mrf.mxu1  ;;  %v5433_v21 = vadd.f32 %v5432_v34, %v11882_v19 }
 0x6c9   : > { %v5434_v49 = vpop.f32.mrf.mxu0  ;;  %v11944_v10 = vpack.c.bf16 %v5595_v15, %v5594_v58  ;;  %v5482_v57 = vadd.f32 %v5481_v17, %v5429_v38  ;;  %6044 = vrot.lane.b32.xlu0 %v11894_v8, %s8840_s29  ;;  %v5599_v61 = vmax.f32 %v5480_v47, 0.0 }
 0x6ca   : > { %v5485_v41 = vpop.f32.mrf.mxu1  ;;  %v5435_v23 = vadd.f32 %v5434_v49, %v11882_v19 }
 0x6cb   : > { %v5436_v46 = vpop.f32.mrf.mxu0  ;;  %v5600_v48 = vmax.f32 %v5482_v57, 0.0  ;;  %v5486_v12 = vadd.f32 %v5485_v41, %v5433_v21  ;;  %5886 = vrot.lane.b32.xlu1 %v11944_v10, %s8834_s18  ;;  %5701 = vst [vmem:[#allocation4 + $0x8] sm:$0xff] %v11944_v10 }
 0x6cc   : > { %v5487_v11 = vpop.f32.mrf.mxu1  ;;  %v5437_v2 = vadd.f32 %v5436_v46, %v11884_v20 }
 0x6cd   : > { %v5438_v59 = vpop.f32.mrf.mxu0  ;;  %v11953_v22 = vpack.c.bf16 %v5600_v48, %v5599_v61  ;;  %v5488_v16 = vadd.f32 %v5487_v11, %v5435_v23  ;;  %5890 = vrot.lane.b32.xlu0 %v11903_v28, %s8834_s18  ;;  %v5604_v45 = vmax.f32 %v5486_v12, 0.0 }
 0x6ce   : > { %v5489_v13 = vpop.f32.mrf.mxu1  ;;  %v5439_v3 = vadd.f32 %v5438_v59, %v11884_v20 }
 0x6cf   : > { %v5605_v37 = vmax.f32 %v5488_v16, 0.0  ;;  %v5490_v33 = vadd.f32 %v5489_v13, %v5437_v2  ;;  %5806 = vrot.lane.b32.xlu1 %v11944_v10, %s8836_s20  ;;  %5704 = vst [vmem:[#allocation4 + $0x1c] sm:$0xff] %v11953_v22  ;;  %v8457_v26 = vpop.f32.mrf.mxu0 }
 0x6d0   : > { %v5491_v42 = vpop.f32.mrf.mxu1 }
 0x6d1   : > { %v11962_v53 = vpack.c.bf16 %v5605_v37, %v5604_v45  ;;  %v5492_v35 = vadd.f32 %v5491_v42, %v5439_v3  ;;  %5810 = vrot.lane.b32.xlu0 %v11903_v28, %s8836_s20  ;;  %v5609_v63 = vmax.f32 %v5490_v33, 0.0  ;;  %v5577_v55 = vpop.f32.mrf.mxu0 }
 0x6d3   : > { %v5610_v60 = vmax.f32 %v5492_v35, 0.0  ;;  %5726 = vrot.lane.b32.xlu1 %v11944_v10, %s8837_s21  ;;  %5707 = vst [vmem:[#allocation4 + $0x30] sm:$0xff] %v11962_v53  ;;  %v8458_v40 = vpop.f32.mrf.mxu0 }
 0x6d5   : > { %v11969_v29 = vpack.c.bf16 %v5610_v60, %v5609_v63  ;;  %5730 = vrot.lane.b32.xlu0 %v11903_v28, %s8837_s21  ;;  %v5580_v0 = vpop.f32.mrf.mxu0 }
 0x6d7   : > { %6206 = vrot.lane.b32.xlu1 %v11944_v10, %s8838_s22  ;;  %5710 = vst [vmem:[#allocation4 + $0x44] sm:$0xff] %v11969_v29 }
 0x6d9   : > { %6210 = vrot.lane.b32.xlu0 %v11903_v28, %s8838_s22 }
 0x6db   : > { %6286 = vrot.lane.b32.xlu1 %v11944_v10, %s8835_s19 }
 0x6dd   : > { %6290 = vrot.lane.b32.xlu0 %v11903_v28, %s8835_s19 }
 0x6df   : > { %6126 = vrot.lane.b32.xlu1 %v11944_v10, %s8839_s23 }
 0x6e1   : > { %6130 = vrot.lane.b32.xlu0 %v11903_v28, %s8839_s23 }
 0x6e2   : > { %v8384_v50 = vpop.f32.mrf.mxu1 }
 0x6e3   : > { %6046 = vrot.lane.b32.xlu1 %v11944_v10, %s8840_s29 }
 0x6e4   : > { %v8385_v7 = vpop.f32.mrf.mxu1 }
 0x6e5   : > { %v8386_v30 = vadd.f32 %v8385_v7, %v8384_v50  ;;  %5896 = vrot.lane.b32.xlu0 %v11920_v24, %s8834_s18 }
 0x6e6   : > { %v8387_v62 = vpop.f32.mrf.mxu1 }
 0x6e7   : > { %v5529_v52 = vadd.f32 %v8386_v30, %v11886_v36  ;;  %5892 = vrot.lane.b32.xlu1 %v11953_v22, %s8834_s18 }
 0x6e8   : > { %v8388_v14 = vpop.f32.mrf.mxu1 }
 0x6e9   : > { %v8389_v18 = vadd.f32 %v8388_v14, %v8387_v62  ;;  %v5578_v31 = vadd.f32 %v5577_v55, %v5529_v52  ;;  %5816 = vrot.lane.b32.xlu0 %v11920_v24, %s8836_s20 }
 0x6ea   : > { %v8390_v32 = vpop.f32.mrf.mxu1 }
 0x6eb   : > { %v5596_v56 = vmax.f32 %v5578_v31, 0.0  ;;  %v5532_v34 = vadd.f32 %v8389_v18, %v11890_v43  ;;  %5812 = vrot.lane.b32.xlu1 %v11953_v22, %s8836_s20 }
 0x6ec   : > { %v8391_v44 = vpop.f32.mrf.mxu1 }
 0x6ed   : > { %v8282_v58 = vpack.c.bf16 %v5596_v56, %v5596_v56  ;;  %v8392_v36 = vadd.f32 %v8391_v44, %v8390_v32  ;;  %v5581_v38 = vadd.f32 %v5580_v0, %v5532_v34  ;;  %5736 = vrot.lane.b32.xlu0 %v11920_v24, %s8837_s21 }
 0x6ee   : > { %v8393_v15 = vpop.f32.mrf.mxu1 }
 0x6ef   : > { %5678 = vst [vmem:[#allocation3 + $0x10] sm:$0xf] %v8282_v58  ;;  %v5537_v47 = vadd.f32 %v8392_v36, %v11882_v19  ;;  %v5601_v49 = vmax.f32 %v5581_v38, 0.0  ;;  %5732 = vrot.lane.b32.xlu1 %v11953_v22, %s8837_s21 }
 0x6f0   : > { %v8394_v17 = vpop.f32.mrf.mxu1 }
 0x6f1   : > { %v5586_v43 = vadd.f32 %v8457_v26, %v5537_v47  ;;  %v8285_v21 = vpack.c.bf16 %v5601_v49, %v5601_v49  ;;  %v8395_v57 = vadd.f32 %v8394_v17, %v8393_v15  ;;  %6216 = vrot.lane.b32.xlu0 %v11920_v24, %s8838_s22 }
 0x6f3   : > { %v5606_v46 = vmax.f32 %v5586_v43, 0.0  ;;  %5681 = vst [vmem:[#allocation3 + $0x28] sm:$0xf] %v8285_v21  ;;  %v5540_v41 = vadd.f32 %v8395_v57, %v11884_v20  ;;  %6212 = vrot.lane.b32.xlu1 %v11953_v22, %s8838_s22  ;;  %v12171_v21 = vld [vmem:[%s13014_s3 + $0x94] ss:$12 sps:$4 sm:$0xff]  }
 0x6f4   : > { %7042 = vmatprep.mubr.bf16.mxu0 %v12171_v21 }
 0x6f5   : > { %v8288_v61 = vpack.c.bf16 %v5606_v46, %v5606_v46  ;;  %v5589_v19 = vadd.f32 %v8458_v40, %v5540_v41  ;;  %6296 = vrot.lane.b32.xlu0 %v11920_v24, %s8835_s19 }
 0x6f6   : > { %v12010_v23 = vld [vmem:[#allocation3 + $0x10] sm:$0xff] }
 0x6f7   : > { %5684 = vst [vmem:[#allocation3 + $0x40] sm:$0xf] %v8288_v61  ;;  %v5611_v48 = vmax.f32 %v5589_v19, 0.0  ;;  %6292 = vrot.lane.b32.xlu1 %v11953_v22, %s8835_s19  ;;  %5702 = vst [vmem:[#allocation4 + $0x10] sm:$0xf] %v12010_v23 }
 0x6f9   : > { %v8291_v12 = vpack.c.bf16 %v5611_v48, %v5611_v48  ;;  %6136 = vrot.lane.b32.xlu0 %v11920_v24, %s8839_s23 }
 0x6fa   : > { %v12017_v20 = vld [vmem:[#allocation3 + $0x28] sm:$0xff] }
 0x6fb   : > { %5687 = vst [vmem:[#allocation3 + $0x58] sm:$0xf] %v8291_v12  ;;  %6132 = vrot.lane.b32.xlu1 %v11953_v22, %s8839_s23  ;;  %5705 = vst [vmem:[#allocation4 + $0x24] sm:$0xf] %v12017_v20 }
 0x6fd   : > { %6056 = vrot.lane.b32.xlu0 %v11920_v24, %s8840_s29 }
 0x6fe   : > { %v12024_v59 = vld [vmem:[#allocation3 + $0x40] sm:$0xff] }
 0x6ff   : > { %5898 = vrot.lane.b32.xlu1 %v11962_v53, %s8834_s18  ;;  %5708 = vst [vmem:[#allocation4 + $0x38] sm:$0xf] %v12024_v59 }
 0x701   : > { %5902 = vrot.lane.b32.xlu0 %v11932_v27, %s8834_s18 }
 0x702   : > { %v12031_v11 = vld [vmem:[#allocation3 + $0x58] sm:$0xff] }
 0x703   : > { %5818 = vrot.lane.b32.xlu1 %v11962_v53, %s8836_s20  ;;  %5711 = vst [vmem:[#allocation4 + $0x4c] sm:$0xf] %v12031_v11 }
 0x705   : > { %6050 = vrot.lane.b32.xlu0 %v11903_v28, %s8840_s29 }
 0x707   : > { %5738 = vrot.lane.b32.xlu1 %v11962_v53, %s8837_s21 }
 0x709   : > { %5822 = vrot.lane.b32.xlu0 %v11932_v27, %s8836_s20 }
 0x70b   : > { %6218 = vrot.lane.b32.xlu1 %v11962_v53, %s8838_s22 }
 0x70d   : > { %5742 = vrot.lane.b32.xlu0 %v11932_v27, %s8837_s21 }
 0x70f   : > { %6298 = vrot.lane.b32.xlu1 %v11962_v53, %s8835_s19 }
 0x711   : > { %6222 = vrot.lane.b32.xlu0 %v11932_v27, %s8838_s22 }
 0x713   : > { %6138 = vrot.lane.b32.xlu1 %v11962_v53, %s8839_s23 }
 0x715   : > { %6302 = vrot.lane.b32.xlu0 %v11932_v27, %s8835_s19 }
 0x717   : > { %6058 = vrot.lane.b32.xlu1 %v11962_v53, %s8840_s29 }
 0x719   : > { %6142 = vrot.lane.b32.xlu0 %v11932_v27, %s8839_s23 }
 0x71b   : > { %5904 = vrot.lane.b32.xlu1 %v11969_v29, %s8834_s18 }
 0x71d   : > { %6062 = vrot.lane.b32.xlu0 %v11932_v27, %s8840_s29 }
 0x71f   : > { %6052 = vrot.lane.b32.xlu1 %v11953_v22, %s8840_s29 }
 0x721   : > { %5976 = vrot.lane.b32.xlu0 %v11920_v24, %s8841_s8 }
 0x723   : > { %5824 = vrot.lane.b32.xlu1 %v11969_v29, %s8836_s20  ;;  %v5885_v2 = vpop.permute.xlu0 %5884 }
 0x724   : > { %v5908_v33 = vrot.slane %v5885_v2, 4 }
 0x725   : > { %5982 = vrot.lane.b32.xlu0 %v11932_v27, %s8841_s8 }
 0x727   : > { %5978 = vrot.lane.b32.xlu1 %v11962_v53, %s8841_s8  ;;  %v5805_v16 = vpop.permute.xlu0 %5804 }
 0x728   : > { %v5828_v60 = vrot.slane %v5805_v16, 4 }
 0x729   : > { %5888 = vrot.lane.b32.xlu0 %v12010_v23, %s8834_s18 }
 0x72b   : > { %5744 = vrot.lane.b32.xlu1 %v11969_v29, %s8837_s21  ;;  %v5725_v13 = vpop.permute.xlu0 %5724 }
 0x72c   : > { %v5748_v30 = vrot.slane %v5725_v13, 4 }
 0x72d   : > { %5808 = vrot.lane.b32.xlu0 %v12010_v23, %s8836_s20 }
 0x72f   : > { %6224 = vrot.lane.b32.xlu1 %v11969_v29, %s8838_s22  ;;  %v6205_v24 = vpop.permute.xlu0 %6204 }
 0x730   : > { %v6228_v31 = vrot.slane %v6205_v24, 4 }
 0x731   : > { %5900 = vrot.lane.b32.xlu0 %v12024_v59, %s8834_s18 }
 0x733   : > { %6304 = vrot.lane.b32.xlu1 %v11969_v29, %s8835_s19  ;;  %v6285_v27 = vpop.permute.xlu0 %6284 }
 0x734   : > { %v6308_v58 = vrot.slane %v6285_v27, 4 }
 0x735   : > { %5964 = vrot.lane.b32.xlu0 %v11894_v8, %s8841_s8 }
 0x737   : > { %6144 = vrot.lane.b32.xlu1 %v11969_v29, %s8839_s23  ;;  %v6125_v45 = vpop.permute.xlu0 %6124 }
 0x738   : > { %v6148_v17 = vrot.slane %v6125_v45, 4 }
 0x739   : > { %5820 = vrot.lane.b32.xlu0 %v12024_v59, %s8836_s20 }
 0x73b   : > { %6064 = vrot.lane.b32.xlu1 %v11969_v29, %s8840_s29  ;;  %v6045_v3 = vpop.permute.xlu0 %6044 }
 0x73c   : > { %v6068_v61 = vrot.slane %v6045_v3, 4 }
 0x73d   : > { %v12092_v37 = vpop.permute.xlu1 %5886  ;;  %5970 = vrot.lane.b32.xlu0 %v11903_v28, %s8841_s8 }
 0x73e   : > { %v13157_v42 = vrot.slane %v12092_v37, 4 }
 0x73f   : > { %5984 = vrot.lane.b32.xlu1 %v11969_v29, %s8841_s8  ;;  %v5891_v8 = vpop.permute.xlu0 %5890 }
 0x740   : > { %v5920_v53 = vsel %vm568_vm0, %v5908_v33, %v13157_v42 }
 0x741   : > { %v12103_v35 = vsel %vm732_vm1, %v5885_v2, %v5920_v53  ;;  %v12105_v63 = vpop.permute.xlu1 %5806  ;;  %5740 = vrot.lane.b32.xlu0 %v12024_v59, %s8837_s21 }
 0x742   : > { %v13156_v26 = vrot.slane %v12105_v63, 4 }
 0x743   : > { %5894 = vrot.lane.b32.xlu1 %v12017_v20, %s8834_s18  ;;  %v5811_v29 = vpop.permute.xlu0 %5810 }
 0x744   : > { %v5840_v50 = vsel %vm568_vm0, %v5828_v60, %v13156_v26  ;;  %v5831_v33 = vrot.slane %v5811_v29, 4 }
 0x745   : > { %v12116_v55 = vsel %vm651_vm3, %v5805_v16, %v5840_v50  ;;  %v12118_v7 = vpop.permute.xlu1 %5726  ;;  %5728 = vrot.lane.b32.xlu0 %v12010_v23, %s8837_s21 }
 0x746   : > { %v13144_v62 = vrot.slane %v12118_v7, 4 }
 0x747   : > { %5814 = vrot.lane.b32.xlu1 %v12017_v20, %s8836_s20  ;;  %v5731_v40 = vpop.permute.xlu0 %5730 }
 0x748   : > { %v5760_v52 = vsel %vm568_vm0, %v5748_v30, %v13144_v62 }
 0x749   : > { %v12129_v14 = vsel %vm570_vm5, %v5725_v13, %v5760_v52  ;;  %v12131_v18 = vpop.permute.xlu1 %6206  ;;  %6300 = vrot.lane.b32.xlu0 %v12024_v59, %s8835_s19  ;;  %v5911_v13 = vrot.slane %v5891_v8, 4  ;;  %v5751_v52 = vrot.slane %v5731_v40, 4 }
 0x74a   : > { %v13140_v32 = vrot.slane %v12131_v18, 4 }
 0x74b   : > { %5906 = vrot.lane.b32.xlu1 %v12031_v11, %s8834_s18  ;;  %v6211_v0 = vpop.permute.xlu0 %6210  ;;  %s301_s18 = scalar_lea.vmem [#allocation10], %s8475_s15 }
 0x74c   : > { %v6240_v56 = vsel %vm568_vm0, %v6228_v31, %v13140_v32 }
 0x74d   : > { %v12142_v34 = vsel %vm1056_vm6, %v6205_v24, %v6240_v56  ;;  %v12144_v44 = vpop.permute.xlu1 %6286  ;;  %6288 = vrot.lane.b32.xlu0 %v12010_v23, %s8835_s19 }
 0x74e   : > { %v13141_v36 = vrot.slane %v12144_v44, 4 }
 0x74f   : > { %5966 = vrot.lane.b32.xlu1 %v11944_v10, %s8841_s8  ;;  %v12151_v38 = vpop.permute.xlu0 %6290 }
 0x750   : > { %v6320_v15 = vsel %vm568_vm0, %v6308_v58, %v13141_v36  ;;  %v8109_v36 = vld [vmem:[%s13015_s4 + $0x60] sm:$0xff] }
 0x751   : > { %v12157_v47 = vsel %vm1137_vm2, %v6285_v27, %v6320_v15  ;;  %v12159_v49 = vpop.permute.xlu1 %6126  ;;  %6220 = vrot.lane.b32.xlu0 %v12024_v59, %s8838_s22 }
 0x752   : > { %v13139_v43 = vrot.slane %v12159_v49, 4 }
 0x753   : > { %5826 = vrot.lane.b32.xlu1 %v12031_v11, %s8836_s20  ;;  %v12166_v10 = vpop.permute.xlu0 %6130 }
 0x754   : > { %v6160_v57 = vsel %vm568_vm0, %v6148_v17, %v13139_v43  ;;  %v6231_v17 = vrot.slane %v6211_v0, 4 }
 0x755   : > { %v12177_v46 = vsel %vm975_vm7, %v6125_v45, %v6160_v57  ;;  %v12179_v41 = vpop.permute.xlu1 %6046  ;;  %6208 = vrot.lane.b32.xlu0 %v12010_v23, %s8838_s22 }
 0x756   : > { %13357 = vst [vmem:[#allocation26_spill] sm:$0xff] %v12179_v41  ;;  %v13136_v19 = vrot.slane %v12179_v41, 4 }
 0x757   : > { %5972 = vrot.lane.b32.xlu1 %v11953_v22, %s8841_s8  ;;  %v12187_v48 = vpop.permute.xlu0 %5896 }
 0x758   : > { %v6080_v12 = vsel %vm568_vm0, %v6068_v61, %v13136_v19  ;;  %v5914_v43 = vrot.slane %v12187_v48, 4 }
 0x759   : > { %v12193_v2 = vsel %vm894_vm8, %v6045_v3, %v6080_v12  ;;  %v12195_v16 = vpop.permute.xlu1 %5892  ;;  %6140 = vrot.lane.b32.xlu0 %v12024_v59, %s8839_s23 }
 0x75a   : > { %v13145_v24 = vrot.slane %v12195_v16, 4 }
 0x75b   : > { %5746 = vrot.lane.b32.xlu1 %v12031_v11, %s8837_s21  ;;  %v12202_v22 = vpop.permute.xlu0 %5816 }
 0x75c   : > { %v5925_v27 = vsel %vm568_vm0, %v5911_v13, %v13145_v24 }
 0x75d   : > { %v12208_v45 = vsel %vm732_vm1, %v5891_v8, %v5925_v27  ;;  %v12210_v3 = vpop.permute.xlu1 %5812  ;;  %6128 = vrot.lane.b32.xlu0 %v12010_v23, %s8839_s23 }
 0x75e   : > { %v13142_v53 = vrot.slane %v12210_v3, 4 }
 0x75f   : > { %5734 = vrot.lane.b32.xlu1 %v12017_v20, %s8837_s21  ;;  %v12217_v60 = vpop.permute.xlu0 %5736 }
 0x760   : > { %v5845_v50 = vsel %vm568_vm0, %v5831_v33, %v13142_v53  ;;  %v6311_v33 = vrot.slane %v12151_v38, 4  ;;  %v5834_v53 = vrot.slane %v12202_v22, 4 }
 0x761   : > { %v12223_v8 = vsel %vm651_vm3, %v5811_v29, %v5845_v50  ;;  %v12225_v30 = vpop.permute.xlu1 %5732  ;;  %6060 = vrot.lane.b32.xlu0 %v12024_v59, %s8840_s29 }
 0x762   : > { %v13137_v31 = vrot.slane %v12225_v30, 4 }
 0x763   : > { %6306 = vrot.lane.b32.xlu1 %v12031_v11, %s8835_s19  ;;  %v12232_v56 = vpop.permute.xlu0 %6216 }
 0x764   : > { %v5765_v58 = vsel %vm568_vm0, %v5751_v52, %v13137_v31  ;;  %v8111_v31 = vld [vmem:[%s13015_s4 + $0x70] sm:$0xff] }
 0x765   : > { %v12238_v29 = vsel %vm570_vm5, %v5731_v40, %v5765_v58  ;;  %v12240_v15 = vpop.permute.xlu1 %6212  ;;  %6048 = vrot.lane.b32.xlu0 %v12010_v23, %s8840_s29 }
 0x766   : > { %13358 = vst [vmem:[#allocation18_spill] sm:$0xff] %v12240_v15  ;;  %v13135_v57 = vrot.slane %v12240_v15, 4 }
 0x767   : > { %6294 = vrot.lane.b32.xlu1 %v12017_v20, %s8835_s19  ;;  %v12249_v12 = vpop.permute.xlu0 %6296  ;;  %s7632_s19 = sshll.u32 %s301_s18, 4  ;;  %s12972_s19 = int_to_ptr.vmem [resolvable:$true] %s7632_s19 }
 0x768   : > { %v6245_v40 = vsel %vm568_vm0, %v6231_v17, %v13135_v57  ;;  %v6151_v57 = vrot.slane %v12166_v10, 4  ;;  %s8759_s9 = scalar_lea.vmem %s12972_s19, 640 }
 0x769   : > { %v12255_v13 = vsel %vm1056_vm6, %v6211_v0, %v6245_v40  ;;  %v12257_v27 = vpop.permute.xlu1 %6292  ;;  %5980 = vrot.lane.b32.xlu0 %v12024_v59, %s8841_s8  ;;  %p8760_p10 = scmp.ne.s32.totalorder %s12972_s19, %s8759_s9 }
 0x76a   : > { %13359 = vst [vmem:[#allocation22_spill] sm:$0xff] %v12257_v27  ;;  %v13138_v50 = vrot.slane %v12257_v27, 4 }
 0x76b   : > { %6226 = vrot.lane.b32.xlu1 %v12031_v11, %s8838_s22  ;;  %v12269_v0 = vpop.permute.xlu0 %6136  ;;  %p8761_p12 = pnand %p8760_p10, %p8923_p5 }
 0x76c   : > { %v6325_v17 = vsel %vm568_vm0, %v6311_v33, %v13138_v50 }
 0x76d   : > { %v12276_v59 = vsel %vm1137_vm2, %v12151_v38, %v6325_v17  ;;  %v12278_v40 = vpop.permute.xlu1 %6132  ;;  %5968 = vrot.lane.b32.xlu0 %v12010_v23, %s8841_s8  ;;  %p8762_p8 = pneg %p8761_p12 }
 0x76e   : > { %13360 = vst [vmem:[#allocation28_spill] sm:$0xff] %v12278_v40  ;;  %v13143_v19 = vrot.slane %v12278_v40, 4 }
 0x76f   : > { %6214 = vrot.lane.b32.xlu1 %v12017_v20, %s8838_s22  ;;  %v6057_v38 = vpop.permute.xlu0 %6056  ;;  %s7618_s22 = scalar_lea.sflag [#allocation7], %s299_s14 }
 0x770   : > { %v6165_v17 = vsel %vm568_vm0, %v6151_v57, %v13143_v19  ;;  %v7429_v57 = vld [vmem:[%s13017_s6] sm:$0xff] }
 0x771   : > { %v12296_v23 = vsel %vm975_vm7, %v12166_v10, %v6165_v17  ;;  %v12298_v50 = vpop.permute.xlu1 %5898  ;;  %6498 = vperm.xlu0 %8550, %v8111_v31  }
 0x772   : > { %v13155_v32 = vrot.slane %v12298_v50, 4 }
 0x773   : > { %6146 = vrot.lane.b32.xlu1 %v12031_v11, %s8839_s23  ;;  %v5903_v10 = vpop.permute.xlu0 %5902 }
 0x774   : > { %v5930_v31 = vsel %vm568_vm0, %v5914_v43, %v13155_v32 }
 0x775   : > { %v12316_v17 = vsel %vm732_vm1, %v12187_v48, %v5930_v31  ;;  %v12318_v19 = vpop.permute.xlu1 %5818  ;;  %6488 = vperm.xlu0 %8550, %v8109_v36   ;;  %v5754_v31 = vrot.slane %v12217_v60, 4 }
 0x776   : > { %v13146_v52 = vrot.slane %v12318_v19, 4 }
 0x777   : > { %6134 = vrot.lane.b32.xlu1 %v12017_v20, %s8839_s23  ;;  %v6051_v62 = vpop.permute.xlu0 %6050  ;;  %s8763_s23 = sshll.u32 %s8844_s28, 4  ;;  %s8764_s23 = int_to_ptr.vmem [resolvable:$false] %s8763_s23 }
 0x778   : > { %v5850_v43 = vsel %vm568_vm0, %v5834_v53, %v13146_v52  ;;  %v6071_v40 = vrot.slane %v6051_v62, 4  ;;  %p8766_p11 = scmp.lt.s32.totalorder %s12972_s19, %s8764_s23 }
 0x779   : > { %v12332_v48 = vsel %vm651_vm3, %v12202_v22, %v5850_v43  ;;  %v12334_v36 = vpop.permute.xlu1 %5738  ;;  %7432 = vperm.xlu0 %8550, %v7429_v57   ;;  %v6234_v57 = vrot.slane %v12232_v56, 4 }
 0x77a   : > { %v13148_v24 = vrot.slane %v12334_v36, 4 }
 0x77b   : > { %6066 = vrot.lane.b32.xlu1 %v12031_v11, %s8840_s29  ;;  %v5823_v58 = vpop.permute.xlu0 %5822 }
 0x77c   : > { %v5770_v33 = vsel %vm568_vm0, %v5754_v31, %v13148_v24 }
 0x77d   : > { %v12345_v53 = vsel %vm570_vm5, %v12217_v60, %v5770_v33  ;;  %v12347_v22 = vpop.permute.xlu1 %6218  ;;  %v6314_v33 = vrot.slane %v12249_v12, 4 }
 0x77e   : > { %v13150_v43 = vrot.slane %v12347_v22, 4 }
 0x77f   : > { %6054 = vrot.lane.b32.xlu1 %v12017_v20, %s8840_s29  ;;  %v12353_v52 = vpop.permute.xlu0 %5742  ;;  %s8765_s29 = scalar_lea.vmem %s8764_s23, 1280 }
 0x780   : > { %v6250_v1 = vsel %vm568_vm0, %v6234_v57, %v13150_v43  ;;  %p8767_p0 = scmp.lt.s32.totalorder %s8765_s29, %s8759_s9 }
 0x781   : > { %v12360_v31 = vsel %vm1056_vm6, %v12232_v56, %v6250_v1  ;;  %v12362_v60 = vpop.permute.xlu1 %6298  ;;  %v6154_v56 = vrot.slane %v12269_v0, 4 }
 0x782   : > { %v13152_v24 = vrot.slane %v12362_v60, 4  ;;  %p8768_p1 = por %p8767_p0, %p8766_p11 }
 0x783   : > { %5986 = vrot.lane.b32.xlu1 %v12031_v11, %s8841_s8  ;;  %v12368_v6 = vpop.permute.xlu0 %6222 }
 0x784   : > { %v6330_v61 = vsel %vm568_vm0, %v6314_v33, %v13152_v24  ;;  %v6074_v24 = vrot.slane %v6057_v38, 4  ;;  %p8769_p3 = pnand %p8768_p1, %p8762_p8 }
 0x785   : > { %v12375_v57 = vsel %vm1137_vm2, %v12249_v12, %v6330_v61  ;;  %v12377_v1 = vpop.permute.xlu1 %6138  ;;  %v8112_v61 = vld [vmem:[%s13015_s4 + $0x78] sm:$0xff] }
 0x786   : > { %v13154_v43 = vrot.slane %v12377_v1, 4 }
 0x787   : > { %5974 = vrot.lane.b32.xlu1 %v12017_v20, %s8841_s8  ;;  %v12383_v11 = vpop.permute.xlu0 %6302 }
 0x788   : > { %v6170_v54 = vsel %vm568_vm0, %v6154_v56, %v13154_v43  ;;  %v8110_v43 = vld [vmem:[%s13015_s4 + $0x68] sm:$0xff] }
 0x789   : > { %v12393_v12 = vsel %vm975_vm7, %v12269_v0, %v6170_v54  ;;  %v12395_v33 = vpop.permute.xlu1 %6058  ;;  %v5917_v0 = vrot.slane %v5903_v10, 4 }
 0x78a   : > { %v13158_v39 = vrot.slane %v12395_v33, 4 }
 0x78b   : > { %6503 = vperm.xlu1 %8551, %v8112_v61   ;;  %v12398_v20 = vpop.permute.xlu0 %6142 }
 0x78c   : > { %v6090_v56 = vsel %vm568_vm0, %v6074_v24, %v13158_v39 }
 0x78d   : > { %v12407_v32 = vsel %vm894_vm8, %v6057_v38, %v6090_v56  ;;  %v12409_v54 = vpop.permute.xlu1 %5904 }
 0x78e   : > { %v13165_v26 = vrot.slane %v12409_v54, 4 }
 0x78f   : > { %6493 = vperm.xlu1 %8551, %v8110_v43   ;;  %v12412_v61 = vpop.permute.xlu0 %6062 }
 0x790   : > { %v5935_v42 = vsel %vm568_vm0, %v5917_v0, %v13165_v26  ;;  %v8150_v0 = vcombine.high %v12103_v35, %v12208_v45  ;;  %v5837_v26 = vrot.slane %v5823_v58, 4 }
 0x791   : > { %v5936_v24 = vsel %vm732_vm1, %v5903_v10, %v5935_v42  ;;  %v12418_v39 = vpop.permute.xlu1 %6052 }
 0x792   : > { %13361 = vst [vmem:[#allocation20_spill] sm:$0xff] %v12418_v39  ;;  %v13168_v38 = vrot.slane %v12418_v39, 4  ;;  %v8154_v56 = vcombine.low %v12316_v17, %v5936_v24  ;;  %v8155_v15 = vcombine.high %v12316_v17, %v5936_v24  ;;  %v8149_v24 = vcombine.low %v12103_v35, %v12208_v45 }
 0x793   : > { %v5977_v27 = vpop.permute.xlu0 %5976 }
 0x794   : > { %v6085_v43 = vsel %vm568_vm0, %v6071_v40, %v13168_v38  ;;  %7010 = vmatprep.subr.bf16.mxu0 %v8155_v15 }
 0x795   : > { %v12429_v42 = vsel %vm894_vm8, %v6051_v62, %v6085_v43  ;;  %v12431_v10 = vpop.permute.xlu1 %5824  ;;  %7011 = vmatpush1.bf16.msra.mxu0 %v8154_v56  ;;  %v5994_v43 = vrot.slane %v5977_v27, 4 }
 0x796   : > { %v13171_v41 = vrot.slane %v12431_v10, 4  ;;  %7012 = vmatprep.subr.bf16.mxu0 %v8150_v0 }
 0x797   : > { %v12434_v17 = vpop.permute.xlu0 %5982 }
 0x798   : > { %v5855_v15 = vsel %vm568_vm0, %v5837_v26, %v13171_v41  ;;  %v8140_v26 = vcombine.high %v12116_v55, %v12223_v8 }
 0x799   : > { %v5856_v40 = vsel %vm651_vm3, %v5823_v58, %v5855_v15  ;;  %v12442_v62 = vpop.permute.xlu1 %5978  ;;  %7013 = vmatpush1.bf16.msra.mxu0 %v8149_v24  ;;  %v5757_v15 = vrot.slane %v12353_v52, 4 }
 0x79a   : > { %v13172_v56 = vrot.slane %v12442_v62, 4  ;;  %v8144_v38 = vcombine.low %v12332_v48, %v5856_v40  ;;  %v8145_v0 = vcombine.high %v12332_v48, %v5856_v40  ;;  %v13362_v48 = vrot.slane %v12092_v37, 4 }
 0x79b   : > { %v5889_v39 = vpop.permute.xlu0 %5888 }
 0x79c   : > { %v6010_v35 = vsel %vm568_vm0, %v5994_v43, %v13172_v56  ;;  %v5910_v45 = vrot.slane %v5889_v39, 4  ;;  %7014 = vmatprep.subr.bf16.mxu0 %v8145_v0 }
 0x79d   : > { %v12453_v58 = vsel %vm813_vm9, %v5977_v27, %v6010_v35  ;;  %v12455_v24 = vpop.permute.xlu1 %5744  ;;  %7015 = vmatpush1.bf16.msra.mxu0 %v8144_v38  ;;  %v8139_v38 = vcombine.low %v12116_v55, %v12223_v8 }
 0x79e   : > { %v5922_v40 = vsel %vm568_vm0, %v13362_v48, %v5910_v45  ;;  %v5924_v41 = vsel %vm732_vm1, %v5889_v39, %v5910_v45  ;;  %v5758_v43 = vrot.slane %v12455_v24, 4  ;;  %7016 = vmatprep.subr.bf16.mxu0 %v8140_v26  ;;  %v6237_v48 = vrot.slane %v12368_v6, 4 }
 0x79f   : > { %v12465_v0 = vsel %vm732_vm1, %v12092_v37, %v5922_v40  ;;  %5954 = vst [vmem:[#allocation4 + $0x100] sm:$0xf] %v5924_v41  ;;  %v5809_v27 = vpop.permute.xlu0 %5808  ;;  %v13363_v37 = vrot.slane %v12105_v63, 4 }
 0x7a0   : > { %v5775_v35 = vsel %vm568_vm0, %v5757_v15, %v5758_v43  ;;  %v5830_v56 = vrot.slane %v5809_v27, 4 }
 0x7a1   : > { %v5776_v39 = vsel %vm570_vm5, %v12353_v52, %v5775_v35  ;;  %v12475_v45 = vpop.permute.xlu1 %6224  ;;  %7017 = vmatpush1.bf16.msra.mxu0 %v8139_v38 }
 0x7a2   : > { %v5842_v41 = vsel %vm568_vm0, %v13363_v37, %v5830_v56  ;;  %v5844_v26 = vsel %vm651_vm3, %v5809_v27, %v5830_v56  ;;  %v13173_v55 = vrot.slane %v12475_v45, 4  ;;  %v8134_v8 = vcombine.low %v12345_v53, %v5776_v39 }
 0x7a3   : > { %v12485_v15 = vsel %vm651_vm3, %v12105_v63, %v5842_v41  ;;  %5874 = vst [vmem:[#allocation4 + $0xb0] sm:$0xf] %v5844_v26  ;;  %v5901_v40 = vpop.permute.xlu0 %5900  ;;  %v8135_v52 = vcombine.high %v12345_v53, %v5776_v39  ;;  %v8130_v63 = vcombine.high %v12129_v14, %v12238_v29  ;;  %v6317_v37 = vrot.slane %v12383_v11, 4 }
 0x7a4   : > { %v6255_v38 = vsel %vm568_vm0, %v6237_v48, %v13173_v55  ;;  %v5916_v35 = vrot.slane %v5901_v40, 4  ;;  %v13364_v41 = vrot.slane %v12298_v50, 4 }
 0x7a5   : > { %v12493_v56 = vsel %vm1056_vm6, %v12368_v6, %v6255_v38  ;;  %v12495_v27 = vpop.permute.xlu1 %6304  ;;  %7018 = vmatprep.subr.bf16.mxu0 %v8135_v52 }
 0x7a6   : > { %v5932_v53 = vsel %vm568_vm0, %v13364_v41, %v5916_v35  ;;  %v5934_v39 = vsel %vm732_vm1, %v5901_v40, %v5916_v35  ;;  %v6318_v48 = vrot.slane %v12495_v27, 4  ;;  %7019 = vmatpush1.bf16.msra.mxu0 %v8134_v8  ;;  %v13365_v40 = vmax.f32 %v11906_v5, 0.0 }
 0x7a7   : > { %v12507_v6 = vsel %vm732_vm1, %v12298_v50, %v5932_v53  ;;  %5960 = vst [vmem:[#allocation4 + $0x128] sm:$0xf] %v5934_v39  ;;  %v12509_v26 = vpop.permute.xlu0 %5964  ;;  %7020 = vmatprep.subr.bf16.mxu0 %v8130_v63  ;;  %v13366_v8 = vmax.f32 %v11922_v51, 0.0  ;;  %v6157_v50 = vrot.slane %v12398_v20, 4  ;;  %v13367_v63 = vcombine.low %v12129_v14, %v12238_v29 }
 0x7a8   : > { %v6335_v52 = vsel %vm568_vm0, %v6317_v37, %v6318_v48  ;;  %v8200_v14 = vcombine.high %v12157_v47, %v12276_v59 }
 0x7a9   : > { %v6336_v38 = vsel %vm1137_vm2, %v12383_v11, %v6335_v52  ;;  %v12516_v41 = vpop.permute.xlu1 %6144  ;;  %v8697_v35 = vpack.c.bf16 %v13366_v8, %v13365_v40  ;;  %v6373_v11 = vld [vmem:[#allocation4] sm:$0xff]  ;;  %v13368_v40 = vmax.f32 %v11898_v4, 0.0  ;;  %v13369_v8 = vmax.f32 %v11911_v9, 0.0 }
 0x7aa   : > { %v6158_v53 = vrot.slane %v12516_v41, 4  ;;  %7021 = vmatpush1.bf16.msra.mxu0 %v13367_v63  ;;  %v8204_v37 = vcombine.low %v12375_v57, %v6336_v38  ;;  %v8205_v39 = vcombine.high %v12375_v57, %v6336_v38  ;;  %v8120_v38 = vcombine.high %v6373_v11, %v11903_v28 }
 0x7ab   : > { %v5821_v52 = vpop.permute.xlu0 %5820  ;;  %7022 = vmatprep.subr.bf16.mxu0 %v8697_v35  ;;  %v8698_v55 = vpack.c.bf16 %v13369_v8, %v13368_v40  ;;  %v6077_v35 = vrot.slane %v12412_v61, 4  ;;  %v13370_v4 = vrot.slane %v12318_v19, 4  ;;  %v8195_v40 = vcombine.high %v12360_v31, %v12493_v56 }
 0x7ac   : > { %v6175_v5 = vsel %vm568_vm0, %v6157_v50, %v6158_v53  ;;  %v5836_v51 = vrot.slane %v5821_v52, 4  ;;  %7075 = vmatprep.subr.bf16.mxu1 %v8205_v39 }
 0x7ad   : > { %v12540_v29 = vsel %vm975_vm7, %v12398_v20, %v6175_v5  ;;  %v12542_v57 = vpop.permute.xlu1 %6064  ;;  %7076 = vmatpush1.bf16.msra.mxu1 %v8204_v37  ;;  %v8119_v5 = vcombine.low %v6373_v11, %v11903_v28  ;;  %v5997_v28 = vrot.slane %v12434_v17, 4 }
 0x7ae   : > { %v5852_v9 = vsel %vm568_vm0, %v13370_v4, %v5836_v51  ;;  %v5854_v50 = vsel %vm651_vm3, %v5821_v52, %v5836_v51  ;;  %v6078_v63 = vrot.slane %v12542_v57, 4  ;;  %7023 = vmatpush1.bf16.msra.mxu0 %v8698_v55  ;;  %7077 = vmatprep.subr.bf16.mxu1 %v8200_v14  ;;  %v12564_v52 = vld [vmem:[%s13014_s3 + $0x98] ss:$12 sps:$4 sm:$0xff]   ;;  %v13371_v51 = vcombine.low %v12157_v47, %v12276_v59 }
 0x7af   : > { %v12553_v20 = vsel %vm651_vm3, %v12318_v19, %v5852_v9  ;;  %5880 = vst [vmem:[#allocation4 + $0xd8] sm:$0xf] %v5854_v50  ;;  %v12555_v37 = vpop.permute.xlu0 %5970  ;;  %7024 = vmatprep.subr.bf16.mxu0 %v8120_v38  ;;  %v8194_v38 = vcombine.low %v12360_v31, %v12493_v56 }
 0x7b0   : > { %v6095_v39 = vsel %vm568_vm0, %v6077_v35, %v6078_v63  ;;  %v13372_v35 = vrot.slane %v12334_v36, 4 }
 0x7b1   : > { %v12568_v55 = vsel %vm894_vm8, %v12412_v61, %v6095_v39  ;;  %v12570_v19 = vpop.permute.xlu1 %5984  ;;  %7078 = vmatpush1.bf16.msra.mxu1 %v13371_v51  ;;  %v13374_v39 = vrot.slane %v12195_v16, 4 }
 0x7b2   : > { %v5998_v11 = vrot.slane %v12570_v19, 4  ;;  %7025 = vmatpush1.bf16.msra.mxu0 %v8119_v5 }
 0x7b3   : > { %v5741_v8 = vpop.permute.xlu0 %5740  ;;  %7026 = vmatprep.subr.bf16.mxu0 %v8195_v40 }
 0x7b4   : > { %v6015_v61 = vsel %vm568_vm0, %v5997_v28, %v5998_v11  ;;  %v5756_v14 = vrot.slane %v5741_v8, 4  ;;  %8209 = vmatmul.mubr.msk.bf16.vlgmr.msra.gmra.mxu1 %vm1819_vm4, %v12564_v52  ;;  %v12609_v28 = vld [vmem:[%s13014_s3 + $0xb0] ss:$12 sps:$4 sm:$0xff]  }
 0x7b5   : > { %v12588_v47 = vsel %vm813_vm9, %v12434_v17, %v6015_v61  ;;  %v5895_v59 = vpop.permute.xlu1 %5894  ;;  %7105 = vmatprep.mubr.bf16.mxu1 %v13346_v25  ;;  %v13373_v17 = vcombine.high %v12142_v34, %v12255_v13  ;;  %v8185_v61 = vcombine.high %v12393_v12, %v12540_v29 }
 0x7b6   : > { %v5772_v4 = vsel %vm568_vm0, %v13372_v35, %v5756_v14  ;;  %v5774_v9 = vsel %vm570_vm5, %v5741_v8, %v5756_v14  ;;  %v5913_v50 = vrot.slane %v5895_v59, 4  ;;  %7027 = vmatpush2.bf16.msra.mxu0 %v8194_v38  ;;  %v13375_v14 = vrot.slane %v12118_v7, 4 }
 0x7b7   : > { %v12597_v31 = vsel %vm570_vm5, %v12334_v36, %v5772_v4  ;;  %5800 = vst [vmem:[#allocation4 + $0x88] sm:$0xf] %v5774_v9  ;;  %v5729_v56 = vpop.permute.xlu0 %5728  ;;  %7028 = vmatprep.subr.bf16.mxu0 %v13373_v17  ;;  %v13376_v4 = vcombine.low %v12142_v34, %v12255_v13  ;;  %v13378_v13 = vrot.slane %v12362_v60, 4 }
 0x7b8   : > { %v5927_v5 = vsel %vm568_vm0, %v13374_v39, %v5913_v50  ;;  %v5929_v51 = vsel %vm732_vm1, %v5895_v59, %v5913_v50  ;;  %v5750_v40 = vrot.slane %v5729_v56, 4  ;;  %v13377_v50 = vrot.slane %v12210_v3, 4 }
 0x7b9   : > { %v12613_v36 = vsel %vm732_vm1, %v12195_v16, %v5927_v5  ;;  %5957 = vst [vmem:[#allocation4 + $0x114] sm:$0xf] %v5929_v51  ;;  %v5815_v8 = vpop.permute.xlu1 %5814 }
 0x7ba   : > { %v5762_v38 = vsel %vm568_vm0, %v13375_v14, %v5750_v40  ;;  %v5764_v59 = vsel %vm570_vm5, %v5729_v56, %v5750_v40  ;;  %v5833_v35 = vrot.slane %v5815_v8, 4  ;;  %7029 = vmatpush2.bf16.msra.mxu0 %v13376_v4  ;;  %v8184_v56 = vcombine.low %v12393_v12, %v12540_v29 }
 0x7bb   : > { %v12626_v16 = vsel %vm570_vm5, %v12118_v7, %v5762_v38  ;;  %5794 = vst [vmem:[#allocation4 + $0x60] sm:$0xf] %v5764_v59  ;;  %v6301_v9 = vpop.permute.xlu0 %6300  ;;  %7030 = vmatprep.subr.bf16.mxu0 %v8185_v61  ;;  %v5988_v59 = vrot.slane %v12509_v26, 4  ;;  %v8175_v4 = vcombine.high %v12407_v32, %v12568_v55 }
 0x7bc   : > { %v5847_v17 = vsel %vm568_vm0, %v13377_v50, %v5833_v35  ;;  %v5849_v39 = vsel %vm651_vm3, %v5815_v8, %v5833_v35  ;;  %v6316_v5 = vrot.slane %v6301_v9, 4  ;;  %8210 = vmatmul.mubr.msk.bf16.gmra.mxu1 %vm1819_vm4, %v12609_v28 }
 0x7bd   : > { %v12638_v7 = vsel %vm651_vm3, %v12210_v3, %v5847_v17  ;;  %5877 = vst [vmem:[#allocation4 + $0xc4] sm:$0xf] %v5849_v39  ;;  %v5907_v34 = vpop.permute.xlu1 %5906  ;;  %7148 = vmatprep.mubr.bf16.mxu1 %v12171_v21  ;;  %v13379_v3 = vcombine.high %v12177_v46, %v12296_v23  ;;  %v13380_v21 = vrot.slane %v12409_v54, 4 }
 0x7be   : > { %v6332_v51 = vsel %vm568_vm0, %v13378_v13, %v6316_v5  ;;  %v6334_v40 = vsel %vm1137_vm2, %v6301_v9, %v6316_v5  ;;  %v5919_v8 = vrot.slane %v5907_v34, 4  ;;  %7031 = vmatpush2.bf16.msra.mxu0 %v8184_v56  ;;  %v13381_v9 = vrot.slane %v12144_v44, 4 }
 0x7bf   : > { %v12647_v12 = vsel %vm1137_vm2, %v12362_v60, %v6332_v51  ;;  %6360 = vst [vmem:[#allocation4 + $0x2b8] sm:$0xf] %v6334_v40  ;;  %v6289_v29 = vpop.permute.xlu0 %6288  ;;  %7032 = vmatprep.subr.bf16.mxu0 %v13379_v3  ;;  %v13382_v5 = vcombine.low %v12177_v46, %v12296_v23  ;;  %v8174_v46 = vcombine.low %v12407_v32, %v12568_v55 }
 0x7c0   : > { %v5937_v61 = vsel %vm568_vm0, %v13380_v21, %v5919_v8  ;;  %v5939_v14 = vsel %vm732_vm1, %v5907_v34, %v5919_v8  ;;  %v6310_v38 = vrot.slane %v6289_v29, 4  ;;  %v8169_v55 = vcombine.low %v12193_v2, %v12429_v42 }
 0x7c1   : > { %v5938_v35 = vsel %vm732_vm1, %v12409_v54, %v5937_v61  ;;  %5963 = vst [vmem:[#allocation4 + $0x13c] sm:$0xf] %v5939_v14  ;;  %v12659_v60 = vpop.permute.xlu1 %5966  ;;  %v13384_v14 = vrot.slane %v12431_v10, 4 }
 0x7c2   : > { %v6322_v50 = vsel %vm568_vm0, %v13381_v9, %v6310_v38  ;;  %v6324_v17 = vsel %vm1137_vm2, %v6289_v29, %v6310_v38  ;;  %v5989_v39 = vrot.slane %v12659_v60, 4  ;;  %7033 = vmatpush2.bf16.msra.mxu0 %v13382_v5  ;;  %v8156_v54 = vcombine.low %v12507_v6, %v5938_v35 }
 0x7c3   : > { %v12674_v56 = vsel %vm1137_vm2, %v12144_v44, %v6322_v50  ;;  %6354 = vst [vmem:[#allocation4 + $0x290] sm:$0xf] %v6324_v17  ;;  %v6221_v34 = vpop.permute.xlu0 %6220  ;;  %7034 = vmatprep.subr.bf16.mxu0 %v8175_v4  ;;  %v8157_v13 = vcombine.high %v12507_v6, %v5938_v35  ;;  %v8170_v44 = vcombine.high %v12193_v2, %v12429_v42  ;;  %v13383_v29 = vrot.slane %v12347_v22, 4 }
 0x7c4   : > { %v6000_v51 = vsel %vm568_vm0, %v5988_v59, %v5989_v39  ;;  %v6236_v40 = vrot.slane %v6221_v34, 4  ;;  %v8152_v6 = vcombine.high %v12465_v0, %v12613_v36  ;;  %v8151_v4 = vcombine.low %v12465_v0, %v12613_v36 }
 0x7c5   : > { %v12684_v23 = vsel %vm813_vm9, %v12509_v26, %v6000_v51  ;;  %v5827_v8 = vpop.permute.xlu1 %5826  ;;  %7116 = vmatprep.subr.bf16.mxu1 %v8157_v13  ;;  %v8165_v2 = vcombine.high %v12453_v58, %v12588_v47  ;;  %v13385_v42 = vrot.slane %v12131_v18, 4 }
 0x7c6   : > { %v6252_v3 = vsel %vm568_vm0, %v13383_v29, %v6236_v40  ;;  %v6254_v21 = vsel %vm1056_vm6, %v6221_v34, %v6236_v40  ;;  %v5839_v61 = vrot.slane %v5827_v8, 4  ;;  %7035 = vmatpush2.bf16.msra.mxu0 %v8174_v46  ;;  %7117 = vmatpush1.bf16.msra.mxu1 %v8156_v54  ;;  %v8164_v40 = vcombine.low %v12453_v58, %v12588_v47 }
 0x7c7   : > { %v12696_v32 = vsel %vm1056_vm6, %v12347_v22, %v6252_v3  ;;  %6280 = vst [vmem:[#allocation4 + $0x268] sm:$0xf] %v6254_v21  ;;  %v6209_v26 = vpop.permute.xlu0 %6208  ;;  %7036 = vmatprep.subr.bf16.mxu0 %v8170_v44  ;;  %7118 = vmatprep.subr.bf16.mxu1 %v8152_v6  ;;  %v5991_v22 = vrot.slane %v12555_v37, 4  ;;  %v13386_v44 = vrot.slane %v12377_v1, 4 }
 0x7c8   : > { %v5857_v38 = vsel %vm568_vm0, %v13384_v14, %v5839_v61  ;;  %v5859_v59 = vsel %vm651_vm3, %v5827_v8, %v5839_v61  ;;  %v6230_v35 = vrot.slane %v6209_v26, 4 }
 0x7c9   : > { %v5858_v9 = vsel %vm651_vm3, %v12431_v10, %v5857_v38  ;;  %5883 = vst [vmem:[#allocation4 + $0xec] sm:$0xf] %v5859_v59  ;;  %v12709_v50 = vpop.permute.xlu1 %5972  ;;  %v13387_v38 = vrot.slane %v12159_v49, 4 }
 0x7ca   : > { %v6242_v17 = vsel %vm568_vm0, %v13385_v42, %v6230_v35  ;;  %v6244_v5 = vsel %vm1056_vm6, %v6209_v26, %v6230_v35  ;;  %v5992_v54 = vrot.slane %v12709_v50, 4  ;;  %7037 = vmatpush2.bf16.msra.mxu0 %v8169_v55  ;;  %7119 = vmatpush1.bf16.msra.mxu1 %v8151_v4  ;;  %v8146_v0 = vcombine.low %v12553_v20, %v5858_v9 }
 0x7cb   : > { %v12721_v10 = vsel %vm1056_vm6, %v12131_v18, %v6242_v17  ;;  %6274 = vst [vmem:[#allocation4 + $0x240] sm:$0xf] %v6244_v5  ;;  %v6141_v36 = vpop.permute.xlu0 %6140  ;;  %7038 = vmatprep.subr.bf16.mxu0 %v8165_v2  ;;  %v8147_v34 = vcombine.high %v12553_v20, %v5858_v9  ;;  %v8142_v18 = vcombine.high %v12485_v15, %v12638_v7  ;;  %v13388_v9 = vrot.slane %v12225_v30, 4 }
 0x7cc   : > { %v6005_v13 = vsel %vm568_vm0, %v5991_v22, %v5992_v54  ;;  %v6156_v51 = vrot.slane %v6141_v36, 4  ;;  %v8141_v55 = vcombine.low %v12485_v15, %v12638_v7 }
 0x7cd   : > { %v6006_v46 = vsel %vm813_vm9, %v12555_v37, %v6005_v13  ;;  %v5747_v8 = vpop.permute.xlu1 %5746  ;;  %7120 = vmatprep.subr.bf16.mxu1 %v8147_v34 }
 0x7ce   : > { %v6172_v20 = vsel %vm568_vm0, %v13386_v44, %v6156_v51  ;;  %v6174_v6 = vsel %vm975_vm7, %v6141_v36, %v6156_v51  ;;  %v5759_v29 = vrot.slane %v5747_v8, 4  ;;  %7039 = vmatpush2.bf16.msra.mxu0 %v8164_v40  ;;  %7121 = vmatpush1.bf16.msra.mxu1 %v8146_v0  ;;  %v8159_v3 = vcombine.low %v12684_v23, %v6006_v46 }
 0x7cf   : > { %v12740_v58 = vsel %vm975_vm7, %v12377_v1, %v6172_v20  ;;  %6200 = vst [vmem:[#allocation4 + $0x218] sm:$0xf] %v6174_v6  ;;  %v6129_v37 = vpop.permute.xlu0 %6128  ;;  %7122 = vmatprep.subr.bf16.mxu1 %v8142_v18  ;;  %v8160_v47 = vcombine.high %v12684_v23, %v6006_v46  ;;  %v12754_v23 = vld [vmem:[%s13014_s3 + $0x90] ss:$12 sps:$4 sm:$0xff]   ;;  %v8651_v6 = vld [vmem:[#allocation4 + $0x34] ss:$20 sps:$4 sm:$0xff]  }
 0x7d0   : > { %v5777_v21 = vsel %vm568_vm0, %v5758_v43, %v5759_v29  ;;  %v5779_v61 = vsel %vm570_vm5, %v5747_v8, %v5759_v29  ;;  %v6150_v26 = vrot.slane %v6129_v37, 4 }
 0x7d1   : > { %v5778_v14 = vsel %vm570_vm5, %v12455_v24, %v5777_v21  ;;  %5803 = vst [vmem:[#allocation4 + $0x9c] sm:$0xf] %v5779_v61  ;;  %v5735_v1 = vpop.permute.xlu1 %5734  ;;  %7040 = vmatprep.subr.bf16.mxu0 %v8160_v47  ;;  %v12764_v24 = vld [vmem:[%s13014_s3 + $0xac] ss:$12 sps:$4 sm:$0xff]  }
 0x7d2   : > { %v6162_v43 = vsel %vm568_vm0, %v13387_v38, %v6150_v26  ;;  %v6164_v59 = vsel %vm975_vm7, %v6129_v37, %v6150_v26  ;;  %v5753_v35 = vrot.slane %v5735_v1, 4  ;;  %7041 = vmatpush2.bf16.msra.mxu0 %v8159_v3  ;;  %7123 = vmatpush1.bf16.msra.mxu1 %v8141_v55  ;;  %v8136_v15 = vcombine.low %v12597_v31, %v5778_v14  ;;  %v13392_v26 = vld [vmem:[#allocation22_spill] sm:$0xff] }
 0x7d3   : > { %v12768_v7 = vsel %vm975_vm7, %v12159_v49, %v6162_v43  ;;  %6194 = vst [vmem:[#allocation4 + $0x1f0] sm:$0xf] %v6164_v59  ;;  %v6061_v4 = vpop.permute.xlu0 %6060  ;;  %v8137_v22 = vcombine.high %v12597_v31, %v5778_v14  ;;  %v13389_v49 = vrot.slane %v12395_v33, 4  ;;  %v13393_v55 = vrot.slane %v13392_v26, 4  ;;  %v8649_v43 = vld [vmem:[#allocation4 + $0x30] ss:$20 sps:$4 sm:$0xff]  }
 0x7d4   : > { %v5767_v2 = vsel %vm568_vm0, %v13388_v9, %v5753_v35  ;;  %v5769_v42 = vsel %vm570_vm5, %v5735_v1, %v5753_v35  ;;  %v6076_v17 = vrot.slane %v6061_v4, 4 }
 0x7d5   : > { %v5768_v5 = vsel %vm570_vm5, %v12225_v30, %v5767_v2  ;;  %5797 = vst [vmem:[#allocation4 + $0x74] sm:$0xf] %v5769_v42  ;;  %v6307_v0 = vpop.permute.xlu1 %6306  ;;  %7043 = vmatmul.mubr.bf16.vlgmr.msra.gmra.mxu0 %v12754_v23  ;;  %7124 = vmatprep.subr.bf16.mxu1 %v8137_v22 }
 0x7d6   : > { %v6092_v36 = vsel %vm568_vm0, %v13389_v49, %v6076_v17  ;;  %v6094_v31 = vsel %vm894_vm8, %v6061_v4, %v6076_v17  ;;  %v6319_v34 = vrot.slane %v6307_v0, 4  ;;  %7125 = vmatpush1.bf16.msra.mxu1 %v8136_v15  ;;  %v8131_v13 = vcombine.low %v12626_v16, %v5768_v5  ;;  %7052 = vmatprep.mubr.bf16.mxu0 %v12764_v24  ;;  %v8658_v15 = vld [vmem:[#allocation4 + $0xc] ss:$20 sps:$4 sm:$0xff]  }
 0x7d7   : > { %v12786_v30 = vsel %vm894_vm8, %v12395_v33, %v6092_v36  ;;  %6120 = vst [vmem:[#allocation4 + $0x1c8] sm:$0xf] %v6094_v31  ;;  %v6049_v51 = vpop.permute.xlu0 %6048  ;;  %v8132_v40 = vcombine.high %v12626_v16, %v5768_v5  ;;  %v12798_v33 = vld [vmem:[%s13014_s3 + $0xa8] ss:$12 sps:$4 sm:$0xff]   ;;  %v13390_v16 = vld [vmem:[#allocation26_spill] sm:$0xff]  ;;  %v13394_v4 = vrot.slane %v12442_v62, 4 }
 0x7d8   : > { %v6337_v46 = vsel %vm568_vm0, %v6318_v48, %v6319_v34  ;;  %v6339_v8 = vsel %vm1137_vm2, %v6307_v0, %v6319_v34  ;;  %v6070_v18 = vrot.slane %v6049_v51, 4  ;;  %v13391_v29 = vrot.slane %v13390_v16, 4  ;;  %v8656_v34 = vld [vmem:[#allocation4 + $0x8] ss:$20 sps:$4 sm:$0xff]  }
 0x7d9   : > { %v6338_v44 = vsel %vm1137_vm2, %v12495_v27, %v6337_v46  ;;  %6363 = vst [vmem:[#allocation4 + $0x2cc] sm:$0xf] %v6339_v8  ;;  %v6295_v20 = vpop.permute.xlu1 %6294  ;;  %7126 = vmatprep.subr.bf16.mxu1 %v8132_v40  ;;  %v13395_v0 = vrot.slane %v12475_v45, 4 }
 0x7da   : > { %v6082_v3 = vsel %vm568_vm0, %v13391_v29, %v6070_v18  ;;  %v6084_v48 = vsel %vm894_vm8, %v6049_v51, %v6070_v18  ;;  %v6313_v37 = vrot.slane %v6295_v20, 4  ;;  %7127 = vmatpush1.bf16.msra.mxu1 %v8131_v13  ;;  %v8206_v47 = vcombine.low %v12647_v12, %v6338_v44  ;;  %v13396_v18 = vld [vmem:[#allocation18_spill] sm:$0xff] }
 0x7db   : > { %v12807_v27 = vsel %vm894_vm8, %v13390_v16, %v6082_v3  ;;  %6114 = vst [vmem:[#allocation4 + $0x1a0] sm:$0xf] %v6084_v48  ;;  %v5981_v21 = vpop.permute.xlu0 %5980  ;;  %7128 = vmatprep.subr.bf16.mxu1 %v8651_v6  ;;  %v8207_v61 = vcombine.high %v12647_v12, %v6338_v44  ;;  %v13397_v44 = vrot.slane %v13396_v18, 4 }
 0x7dc   : > { %v6327_v14 = vsel %vm568_vm0, %v13393_v55, %v6313_v37  ;;  %v6329_v1 = vsel %vm1137_vm2, %v6295_v20, %v6313_v37  ;;  %v5996_v38 = vrot.slane %v5981_v21, 4 }
 0x7dd   : > { %v6328_v59 = vsel %vm1137_vm2, %v13392_v26, %v6327_v14  ;;  %6357 = vst [vmem:[#allocation4 + $0x2a4] sm:$0xf] %v6329_v1  ;;  %v6227_v35 = vpop.permute.xlu1 %6226  ;;  %7053 = vmatmul.mubr.bf16.gmra.mxu0 %v12798_v33  ;;  %7181 = vmatprep.subr.bf16.mxu0 %v8207_v61  ;;  %v8660_v61 = vld [vmem:[#allocation4 + $0x128] ss:$20 sps:$4 sm:$0xff]   ;;  %v13398_v14 = vld [vmem:[#allocation28_spill] sm:$0xff] }
 0x7de   : > { %v6012_v12 = vsel %vm568_vm0, %v13394_v4, %v5996_v38  ;;  %v6014_v22 = vsel %vm813_vm9, %v5981_v21, %v5996_v38  ;;  %v6239_v9 = vrot.slane %v6227_v35, 4  ;;  %7129 = vmatpush1.bf16.msra.mxu1 %v8649_v43  ;;  %7182 = vmatpush1.bf16.msra.mxu0 %v8206_v47  ;;  %v8201_v2 = vcombine.low %v12674_v56, %v6328_v59 }
 0x7df   : > { %v12824_v42 = vsel %vm813_vm9, %v12442_v62, %v6012_v12  ;;  %6040 = vst [vmem:[#allocation4 + $0x178] sm:$0xf] %v6014_v22  ;;  %v5969_v17 = vpop.permute.xlu0 %5968  ;;  %7130 = vmatprep.subr.bf16.mxu1 %v8658_v15  ;;  %v8202_v5 = vcombine.high %v12674_v56, %v6328_v59  ;;  %7201 = vmatprep.mubr.bf16.mxu0 %v13346_v25  ;;  %v8684_v12 = vld [vmem:[%s13014_s3 + $0x94] ss:$12 sps:$4 sm:$0xff]  }
 0x7e0   : > { %v6257_v49 = vsel %vm568_vm0, %v13395_v0, %v6239_v9  ;;  %v6259_v36 = vsel %vm1056_vm6, %v6227_v35, %v6239_v9  ;;  %v5990_v31 = vrot.slane %v5969_v17, 4  ;;  %v8662_v35 = vld [vmem:[#allocation4 + $0x100] ss:$20 sps:$4 sm:$0xff]  }
 0x7e1   : > { %v6258_v13 = vsel %vm1056_vm6, %v12475_v45, %v6257_v49  ;;  %6283 = vst [vmem:[#allocation4 + $0x27c] sm:$0xf] %v6259_v36  ;;  %v6215_v62 = vpop.permute.xlu1 %6214  ;;  %7183 = vmatprep.subr.bf16.mxu0 %v8202_v5 }
 0x7e2   : > { %v6002_v56 = vsel %vm568_vm0, %v5989_v39, %v5990_v31  ;;  %v6004_v51 = vsel %vm813_vm9, %v5969_v17, %v5990_v31  ;;  %v6233_v40 = vrot.slane %v6215_v62, 4  ;;  %7131 = vmatpush1.bf16.msra.mxu1 %v8656_v34  ;;  %7184 = vmatpush1.bf16.msra.mxu0 %v8201_v2  ;;  %v8196_v46 = vcombine.low %v12696_v32, %v6258_v13  ;;  %v13400_v31 = vld [vmem:[#allocation20_spill] sm:$0xff] }
 0x7e3   : > { %v12841_v8 = vsel %vm813_vm9, %v12659_v60, %v6002_v56  ;;  %6034 = vst [vmem:[#allocation4 + $0x150] sm:$0xf] %v6004_v51  ;;  %v8197_v45 = vcombine.high %v12696_v32, %v6258_v13  ;;  %v8666_v51 = vld [vmem:[#allocation4 + $0xb0] ss:$20 sps:$4 sm:$0xff]  }
 0x7e4   : > { %v6247_v20 = vsel %vm568_vm0, %v13397_v44, %v6233_v40  ;;  %v6249_v39 = vsel %vm1056_vm6, %v6215_v62, %v6233_v40 }
 0x7e5   : > { %v6248_v6 = vsel %vm1056_vm6, %v13396_v18, %v6247_v20  ;;  %6277 = vst [vmem:[#allocation4 + $0x254] sm:$0xf] %v6249_v39  ;;  %v6147_v16 = vpop.permute.xlu1 %6146  ;;  %7132 = vmatprep.subr.bf16.mxu1 %v8197_v45  ;;  %8211 = vmatmul.mubr.msk.bf16.vlgmr.msra.gmra.mxu0 %vm1819_vm4, %v12564_v52 }
 0x7e6   : > { %v6159_v60 = vrot.slane %v6147_v16, 4  ;;  %7133 = vmatpush2.bf16.msra.mxu1 %v8196_v46  ;;  %v8191_v29 = vcombine.low %v12721_v10, %v6248_v6  ;;  %v8192_v32 = vcombine.high %v12721_v10, %v6248_v6  ;;  %7211 = vmatprep.mubr.bf16.mxu0 %v13346_v25  ;;  %v8668_v6 = vld [vmem:[#allocation4 + $0x88] ss:$20 sps:$4 sm:$0xff]  }
 0x7e8   : > { %v6177_v3 = vsel %vm568_vm0, %v6158_v53, %v6159_v60  ;;  %v6179_v48 = vsel %vm975_vm7, %v6147_v16, %v6159_v60  ;;  %v8659_v37 = vld [vmem:[#allocation4 + $0x268] ss:$20 sps:$4 sm:$0xff]   ;;  %7134 = vmatprep.subr.bf16.mxu1 %v8192_v32  ;;  %v13399_v53 = vrot.slane %v13398_v14, 4 }
 0x7e9   : > { %v6178_v47 = vsel %vm975_vm7, %v12516_v41, %v6177_v3  ;;  %6203 = vst [vmem:[#allocation4 + $0x22c] sm:$0xf] %v6179_v48  ;;  %v6135_v21 = vpop.permute.xlu1 %6134  ;;  %8400 = vmatprep.subr.bf16.mxu0 %v8659_v37  ;;  %v8670_v3 = vld [vmem:[#allocation4 + $0x60] ss:$20 sps:$4 sm:$0xff]  }
 0x7ea   : > { %v6153_v26 = vrot.slane %v6135_v21, 4  ;;  %7135 = vmatpush2.bf16.msra.mxu1 %v8191_v29  ;;  %v8186_v10 = vcombine.low %v12740_v58, %v6178_v47  ;;  %v8187_v55 = vcombine.high %v12740_v58, %v6178_v47  ;;  %8401 = vmatpush3.bf16.msra.mxu0 %v8660_v61  ;;  %v8672_v47 = vld [vmem:[#allocation4 + $0x38] ss:$20 sps:$4 sm:$0xff]   ;;  %v8674_v61 = vld [vmem:[#allocation4 + $0x10] ss:$20 sps:$4 sm:$0xff]  }
 0x7ec   : > { %v6167_v1 = vsel %vm568_vm0, %v13399_v53, %v6153_v26  ;;  %v6169_v38 = vsel %vm975_vm7, %v6135_v21, %v6153_v26  ;;  %v8661_v43 = vld [vmem:[#allocation4 + $0x240] ss:$20 sps:$4 sm:$0xff]   ;;  %7136 = vmatprep.subr.bf16.mxu1 %v8187_v55  ;;  %v12921_v26 = vpop.permute.xlu0 %6498 }
 0x7ed   : > { %v6168_v41 = vsel %vm975_vm7, %v13398_v14, %v6167_v1  ;;  %6197 = vst [vmem:[#allocation4 + $0x204] sm:$0xf] %v6169_v38  ;;  %v6067_v59 = vpop.permute.xlu1 %6066  ;;  %8212 = vmatmul.mubr.msk.bf16.gmra.mxu0 %vm1819_vm4, %v12609_v28  ;;  %8402 = vmatprep.subr.bf16.mxu0 %v8661_v43 }
 0x7ee   : > { %v6079_v15 = vrot.slane %v6067_v59, 4  ;;  %7137 = vmatpush2.bf16.msra.mxu1 %v8186_v10  ;;  %v8181_v58 = vcombine.low %v12768_v7, %v6168_v41  ;;  %v8182_v4 = vcombine.high %v12768_v7, %v6168_v41  ;;  %8403 = vmatpush3.bf16.msra.mxu0 %v8662_v35  ;;  %v8664_v7 = vld [vmem:[#allocation4 + $0xd8] ss:$20 sps:$4 sm:$0xff]  }
 0x7ef   : > { %7254 = vmatprep.mubr.bf16.mxu0 %v8684_v12 }
 0x7f0   : > { %v6097_v22 = vsel %vm568_vm0, %v6078_v63, %v6079_v15  ;;  %v6099_v9 = vsel %vm894_vm8, %v6067_v59, %v6079_v15  ;;  %v8663_v2 = vld [vmem:[#allocation4 + $0x218] ss:$20 sps:$4 sm:$0xff]   ;;  %7138 = vmatprep.subr.bf16.mxu1 %v8182_v4  ;;  %v13401_v63 = vrot.slane %v13400_v31, 4 }
 0x7f1   : > { %v6098_v17 = vsel %vm894_vm8, %v12542_v57, %v6097_v22  ;;  %6123 = vst [vmem:[#allocation4 + $0x1dc] sm:$0xf] %v6099_v9  ;;  %v6055_v5 = vpop.permute.xlu1 %6054  ;;  %8404 = vmatprep.subr.bf16.mxu0 %v8663_v2 }
 0x7f2   : > { %v6073_v0 = vrot.slane %v6055_v5, 4  ;;  %7139 = vmatpush2.bf16.msra.mxu1 %v8181_v58  ;;  %v8176_v49 = vcombine.low %v12786_v30, %v6098_v17  ;;  %v8177_v36 = vcombine.high %v12786_v30, %v6098_v17  ;;  %8405 = vmatpush3.bf16.msra.mxu0 %v8664_v7 }
 0x7f4   : > { %v6087_v34 = vsel %vm568_vm0, %v13401_v63, %v6073_v0  ;;  %v6089_v13 = vsel %vm894_vm8, %v6055_v5, %v6073_v0  ;;  %v8665_v62 = vld [vmem:[#allocation4 + $0x1f0] ss:$20 sps:$4 sm:$0xff]   ;;  %7140 = vmatprep.subr.bf16.mxu1 %v8177_v36 }
 0x7f5   : > { %v6088_v57 = vsel %vm894_vm8, %v13400_v31, %v6087_v34  ;;  %6117 = vst [vmem:[#allocation4 + $0x1b4] sm:$0xf] %v6089_v13  ;;  %v5987_v56 = vpop.permute.xlu1 %5986  ;;  %8406 = vmatprep.subr.bf16.mxu0 %v8665_v62 }
 0x7f6   : > { %v5999_v40 = vrot.slane %v5987_v56, 4  ;;  %7141 = vmatpush2.bf16.msra.mxu1 %v8176_v49  ;;  %v8171_v30 = vcombine.low %v12807_v27, %v6088_v57  ;;  %v8172_v46 = vcombine.high %v12807_v27, %v6088_v57  ;;  %8407 = vmatpush3.bf16.msra.mxu0 %v8666_v51 }
 0x7f8   : > { %v6017_v45 = vsel %vm568_vm0, %v5998_v11, %v5999_v40  ;;  %v6019_v18 = vsel %vm813_vm9, %v5987_v56, %v5999_v40  ;;  %v8667_v44 = vld [vmem:[#allocation4 + $0x1c8] ss:$20 sps:$4 sm:$0xff]   ;;  %7142 = vmatprep.subr.bf16.mxu1 %v8172_v46 }
 0x7f9   : > { %v6018_v20 = vsel %vm813_vm9, %v12570_v19, %v6017_v45  ;;  %6043 = vst [vmem:[#allocation4 + $0x18c] sm:$0xf] %v6019_v18  ;;  %v5975_v39 = vpop.permute.xlu1 %5974  ;;  %8408 = vmatprep.subr.bf16.mxu0 %v8667_v44 }
 0x7fa   : > { %v5993_v16 = vrot.slane %v5975_v39, 4  ;;  %7143 = vmatpush2.bf16.msra.mxu1 %v8171_v30  ;;  %v8166_v27 = vcombine.low %v12824_v42, %v6018_v20  ;;  %v8167_v60 = vcombine.high %v12824_v42, %v6018_v20  ;;  %8409 = vmatpush3.bf16.msra.mxu0 %v8668_v6 }
 0x7fc   : > { %v6007_v11 = vsel %vm568_vm0, %v5992_v54, %v5993_v16  ;;  %v6009_v29 = vsel %vm813_vm9, %v5975_v39, %v5993_v16  ;;  %v8669_v32 = vld [vmem:[#allocation4 + $0x1a0] ss:$20 sps:$4 sm:$0xff]   ;;  %7144 = vmatprep.subr.bf16.mxu1 %v8167_v60  ;;  %v8675_v54 = vld [vmem:[#allocation4 + $0x2b8] ss:$20 sps:$4 sm:$0xff]  }
 0x7fd   : > { %v6008_v19 = vsel %vm813_vm9, %v12709_v50, %v6007_v11  ;;  %6037 = vst [vmem:[#allocation4 + $0x164] sm:$0xf] %v6009_v29  ;;  %8410 = vmatprep.subr.bf16.mxu0 %v8669_v32  ;;  %v8676_v50 = vld [vmem:[#allocation4 + $0x290] ss:$20 sps:$4 sm:$0xff]   ;;  %v12940_v29 = vld [vmem:[%s13016_s5] sm:$0xf] }
 0x7fe   : > { %7145 = vmatpush2.bf16.msra.mxu1 %v8166_v27  ;;  %v8161_v48 = vcombine.low %v12841_v8, %v6008_v19  ;;  %v8162_v42 = vcombine.high %v12841_v8, %v6008_v19  ;;  %8411 = vmatpush3.bf16.msra.mxu0 %v8670_v3  ;;  %v8842_v8 = vmov 0.0  }
 0x800   : > { %v8671_v37 = vld [vmem:[#allocation4 + $0x178] ss:$20 sps:$4 sm:$0xff]   ;;  %7146 = vmatprep.subr.bf16.mxu1 %v8162_v42 }
 0x801   : > { %8412 = vmatprep.subr.bf16.mxu0 %v8671_v37 }
 0x802   : > { %7147 = vmatpush2.bf16.msra.mxu1 %v8161_v48  ;;  %8413 = vmatpush3.bf16.msra.mxu0 %v8672_v47 }
 0x803   : > { %8459 = vmatprep.subr.bf16.mxu1 %v8675_v54 }
 0x804   : > { %v8673_v21 = vld [vmem:[#allocation4 + $0x150] ss:$20 sps:$4 sm:$0xff]  }
 0x805   : > { %7149 = vmatmul.mubr.bf16.vlgmr.msra.gmra.mxu1 %v12754_v23  ;;  %8414 = vmatprep.subr.bf16.mxu0 %v8673_v21 }
 0x806   : > { %8460 = vmatpush3.bf16.msra.mxu1 %v8675_v54  ;;  %8415 = vmatpush3.bf16.msra.mxu0 %v8674_v61  ;;  %v12923_v55 = vpop.permute.xlu1 %6503 }
 0x807   : > { %8461 = vmatprep.subr.bf16.mxu1 %v8676_v50  ;;  %7158 = vmatprep.mubr.bf16.mxu1 %v12764_v24 }
 0x808   : > { %8467 = vmatprep.subr.bf16.mxu0 %v8842_v8 }
 0x809   : > { %7255 = vmatmul.mubr.bf16.vlgmr.msra.gmra.mxu0 %v12754_v23 }
 0x80a   : > { %8462 = vmatpush3.bf16.msra.mxu1 %v8676_v50  ;;  %7262 = vmatprep.mubr.bf16.mxu0 %v12764_v24  ;;  %v12929_v41 = vpop.permute.xlu1 %6493 }
 0x80d   : > { %7159 = vmatmul.mubr.bf16.gmra.mxu1 %v12798_v33 }
 0x80e   : > { %8463 = vmatprep.mubr.msk.bf16.mxu1 %vm1819_vm4, %v12564_v52  ;;  %v12925_v52 = vpop.permute.xlu0 %6488 }
 0x811   : > { %7263 = vmatmul.mubr.bf16.gmra.mxu0 %v12798_v33 }
 0x812   : > { %8471 = vmatprep.mubr.msk.bf16.mxu0 %vm8843_vm10, %v8842_v8 }
 0x815   : > { %8464 = vmatmul.mubr.msk.bf16.vlgmr.msra.gmra.mxu1 %vm1819_vm4, %v12609_v28 }
 0x816   : > { %7522 = vmatprep.mubr.bf16.mxu1 %v13346_v25 }
 0x874   : > { %v7097_v23 = vpop.f32.mrf.mxu1 }
 0x876   : > { %v7099_v24 = vpop.f32.mrf.mxu1 }
 0x878   : > { %v7101_v10 = vpop.f32.mrf.mxu1 }
 0x87a   : > { %v7103_v33 = vpop.f32.mrf.mxu1 }
 0x87c   : > { %v7107_v1 = vpop.f32.mrf.mxu1 }
 0x87e   : > { %v7109_v4 = vpop.f32.mrf.mxu1 }
 0x880   : > { %v7111_v49 = vpop.f32.mrf.mxu1 }
 0x882   : > { %v7113_v51 = vpop.f32.mrf.mxu1 }
 0x895   : > { %v7044_v14 = vpop.f32.mrf.mxu0 }
 0x896   : > { %v7045_v28 = vadd.f32 %v7044_v14, %v12925_v52 }
 0x897   : > { %v7046_v53 = vpop.f32.mrf.mxu0 }
 0x898   : > { %v7098_v38 = vadd.f32 %v7097_v23, %v7045_v28  ;;  %v7047_v43 = vadd.f32 %v7046_v53, %v12925_v52 }
 0x899   : > { %v7048_v59 = vpop.f32.mrf.mxu0 }
 0x89a   : > { %v7100_v35 = vadd.f32 %v7099_v24, %v7047_v43  ;;  %v7049_v15 = vadd.f32 %v7048_v59, %v12929_v41  ;;  %v7320_v12 = vmax.f32 %v7098_v38, 0.0 }
 0x89b   : > { %v7050_v58 = vpop.f32.mrf.mxu0 }
 0x89c   : > { %v7321_v22 = vmax.f32 %v7100_v35, 0.0  ;;  %v7102_v9 = vadd.f32 %v7101_v10, %v7049_v15  ;;  %v7051_v2 = vadd.f32 %v7050_v58, %v12929_v41 }
 0x89d   : > { %v7054_v17 = vpop.f32.mrf.mxu0 }
 0x89e   : > { %v7104_v5 = vadd.f32 %v7103_v33, %v7051_v2  ;;  %v7055_v7 = vadd.f32 %v7054_v17, %v12921_v26  ;;  %v7325_v36 = vmax.f32 %v7102_v9, 0.0 }
 0x89f   : > { %v7056_v0 = vpop.f32.mrf.mxu0 }
 0x8a0   : > { %v7326_v31 = vmax.f32 %v7104_v5, 0.0  ;;  %v7057_v63 = vadd.f32 %v7056_v0, %v12921_v26  ;;  %v7108_v34 = vadd.f32 %v7107_v1, %v7055_v7  ;;  %v8702_v60 = vpack.c.bf16 %v7325_v36, %v7320_v12 }
 0x8a1   : > { %v7058_v13 = vpop.f32.mrf.mxu0 }
 0x8a2   : > { %v7059_v62 = vadd.f32 %v7058_v13, %v12923_v55  ;;  %v7110_v57 = vadd.f32 %v7109_v4, %v7057_v63  ;;  %v7330_v40 = vmax.f32 %v7108_v34, 0.0  ;;  %v8701_v27 = vpack.c.bf16 %v7326_v31, %v7321_v22 }
 0x8a3   : > { %v7060_v56 = vpop.f32.mrf.mxu0 }
 0x8a4   : > { %v7331_v30 = vmax.f32 %v7110_v57, 0.0  ;;  %v7061_v46 = vadd.f32 %v7060_v56, %v12923_v55  ;;  %v7112_v45 = vadd.f32 %v7111_v49, %v7059_v62 }
 0x8a5   : > { %v7203_v16 = vpop.f32.mrf.mxu0 }
 0x8a6   : > { %v7114_v18 = vadd.f32 %v7113_v51, %v7061_v46  ;;  %v7335_v44 = vmax.f32 %v7112_v45, 0.0 }
 0x8a7   : > { %v7205_v11 = vpop.f32.mrf.mxu0 }
 0x8a8   : > { %v7336_v20 = vmax.f32 %v7114_v18, 0.0  ;;  %v8699_v39 = vpack.c.bf16 %v7335_v44, %v7330_v40 }
 0x8a9   : > { %v7207_v32 = vpop.f32.mrf.mxu0 }
 0x8aa   : > { %v8700_v6 = vpack.c.bf16 %v7336_v20, %v7331_v30 }
 0x8ab   : > { %v7209_v19 = vpop.f32.mrf.mxu0 }
 0x8ac   : > { %7502 = vmatprep.subr.bf16.mxu1 %v8700_v6 }
 0x8ad   : > { %7503 = vmatpush1.bf16.msra.mxu1 %v8699_v39  ;;  %v7213_v3 = vpop.f32.mrf.mxu0 }
 0x8ae   : > { %7504 = vmatprep.subr.bf16.mxu1 %v8701_v27 }
 0x8af   : > { %v7215_v48 = vpop.f32.mrf.mxu0 }
 0x8b1   : > { %7505 = vmatpush1.bf16.msra.mxu1 %v8702_v60  ;;  %v7217_v42 = vpop.f32.mrf.mxu0 }
 0x8b3   : > { %v7219_v21 = vpop.f32.mrf.mxu0 }
 0x8b4   : > { %8237 = vmatmul.mubr.msk.bf16.vlgmr.msra.gmra.mxu1 %vm1819_vm4, %v12940_v29 }
 0x8b5   : > { %7563 = vmatprep.mubr.bf16.mxu1 %v13346_v25 }
 0x8c5   : > { %v7150_v37 = vpop.f32.mrf.mxu1 }
 0x8c6   : > { %v7151_v47 = vadd.f32 %v7150_v37, %v12925_v52 }
 0x8c7   : > { %v7152_v54 = vpop.f32.mrf.mxu1 }
 0x8c8   : > { %v12946_v61 = vadd.f32 %v7203_v16, %v7151_v47  ;;  %v7153_v50 = vadd.f32 %v7152_v54, %v12925_v52 }
 0x8c9   : > { %v7154_v23 = vpop.f32.mrf.mxu1  ;;  %v8416_v24 = vpop.f32.mrf.mxu0 }
 0x8ca   : > { %v7206_v10 = vadd.f32 %v7205_v11, %v7153_v50  ;;  %v7155_v33 = vadd.f32 %v7154_v23, %v12929_v41  ;;  %v7322_v25 = vmax.f32 %v12946_v61, 0.0 }
 0x8cb   : > { %v7156_v14 = vpop.f32.mrf.mxu1  ;;  %v8417_v53 = vpop.f32.mrf.mxu0 }
 0x8cc   : > { %v7323_v28 = vmax.f32 %v7206_v10, 0.0  ;;  %v7208_v1 = vadd.f32 %v7207_v32, %v7155_v33  ;;  %v7157_v38 = vadd.f32 %v7156_v14, %v12929_v41  ;;  %v8418_v5 = vadd.f32 %v8417_v53, %v8416_v24  ;;  %v7433_v33 = vpop.permute.xlu0 %7432 }
 0x8cd   : > { %v7160_v43 = vpop.f32.mrf.mxu1  ;;  %v8419_v59 = vpop.f32.mrf.mxu0 }
 0x8ce   : > { %v7210_v35 = vadd.f32 %v7209_v19, %v7157_v38  ;;  %v7161_v15 = vadd.f32 %v7160_v43, %v12921_v26  ;;  %v7327_v4 = vmax.f32 %v7208_v1, 0.0  ;;  %v7257_v46 = vadd.f32 %v8418_v5, %v12925_v52 }
 0x8cf   : > { %v7162_v58 = vpop.f32.mrf.mxu1  ;;  %v8420_v22 = vpop.f32.mrf.mxu0 }
 0x8d0   : > { %v7328_v12 = vmax.f32 %v7210_v35, 0.0  ;;  %v7214_v9 = vadd.f32 %v7213_v3, %v7161_v15  ;;  %v7163_v2 = vadd.f32 %v7162_v58, %v12921_v26  ;;  %v8421_v51 = vadd.f32 %v8420_v22, %v8419_v59 }
 0x8d1   : > { %v7164_v17 = vpop.f32.mrf.mxu1  ;;  %v8422_v7 = vpop.f32.mrf.mxu0  ;;  %v8706_v24 = vpack.c.bf16 %v7327_v4, %v7322_v25 }
 0x8d2   : > { %v7216_v0 = vadd.f32 %v7215_v48, %v7163_v2  ;;  %v7165_v49 = vadd.f32 %v7164_v17, %v12923_v55  ;;  %v7332_v31 = vmax.f32 %v7214_v9, 0.0  ;;  %v7260_v32 = vadd.f32 %v8421_v51, %v12929_v41 }
 0x8d3   : > { %v7166_v36 = vpop.f32.mrf.mxu1  ;;  %v8423_v34 = vpop.f32.mrf.mxu0  ;;  %v8705_v61 = vpack.c.bf16 %v7328_v12, %v7323_v28 }
 0x8d4   : > { %v7333_v63 = vmax.f32 %v7216_v0, 0.0  ;;  %v7218_v13 = vadd.f32 %v7217_v42, %v7165_v49  ;;  %v7167_v62 = vadd.f32 %v7166_v36, %v12923_v55  ;;  %v8424_v57 = vadd.f32 %v8423_v34, %v8422_v7 }
 0x8d5   : > { %v8465_v56 = vpop.f32.mrf.mxu1  ;;  %v8425_v40 = vpop.f32.mrf.mxu0 }
 0x8d6   : > { %v7220_v30 = vadd.f32 %v7219_v21, %v7167_v62  ;;  %v7265_v45 = vadd.f32 %v8424_v57, %v12921_v26  ;;  %v7337_v44 = vmax.f32 %v7218_v13, 0.0 }
 0x8d7   : > { %v7305_v18 = vpop.f32.mrf.mxu1  ;;  %v8426_v39 = vpop.f32.mrf.mxu0 }
 0x8d8   : > { %v7338_v20 = vmax.f32 %v7220_v30, 0.0  ;;  %v7306_v6 = vadd.f32 %v7305_v18, %v7257_v46  ;;  %v8427_v16 = vadd.f32 %v8426_v39, %v8425_v40  ;;  %v7314_v27 = vadd.f32 %v8465_v56, %v7265_v45 }
 0x8d9   : > { %v8466_v60 = vpop.f32.mrf.mxu1  ;;  %v8703_v52 = vpack.c.bf16 %v7337_v44, %v7332_v31 }
 0x8da   : > { %v7324_v11 = vmax.f32 %v7306_v6, 0.0  ;;  %v7334_v19 = vmax.f32 %v7314_v27, 0.0  ;;  %v7268_v3 = vadd.f32 %v8427_v16, %v12923_v55  ;;  %v8704_v47 = vpack.c.bf16 %v7338_v20, %v7333_v63 }
 0x8db   : > { %v7308_v48 = vpop.f32.mrf.mxu1 }
 0x8dc   : > { %v8294_v42 = vpack.c.bf16 %v7324_v11, %v7324_v11  ;;  %v7309_v37 = vadd.f32 %v7308_v48, %v7260_v32  ;;  %v8300_v26 = vpack.c.bf16 %v7334_v19, %v7334_v19  ;;  %v7317_v54 = vadd.f32 %v8466_v60, %v7268_v3  ;;  %7543 = vmatprep.subr.bf16.mxu1 %v8704_v47 }
 0x8dd   : > { %7544 = vmatpush1.bf16.msra.mxu1 %v8703_v52 }
 0x8de   : > { %7406 = vst [vmem:[#allocation2 + $0x10] sm:$0xf] %v8294_v42  ;;  %v7329_v21 = vmax.f32 %v7309_v37, 0.0  ;;  %7412 = vst [vmem:[#allocation2 + $0x40] sm:$0xf] %v8300_v26  ;;  %v7339_v50 = vmax.f32 %v7317_v54, 0.0  ;;  %7545 = vmatprep.subr.bf16.mxu1 %v8705_v61 }
 0x8e0   : > { %v8297_v23 = vpack.c.bf16 %v7329_v21, %v7329_v21  ;;  %v8303_v41 = vpack.c.bf16 %v7339_v50, %v7339_v50 }
 0x8e1   : > { %7546 = vmatpush1.bf16.msra.mxu1 %v8706_v24 }
 0x8e2   : > { %7409 = vst [vmem:[#allocation2 + $0x28] sm:$0xf] %v8297_v23  ;;  %7415 = vst [vmem:[#allocation2 + $0x58] sm:$0xf] %v8303_v41 }
 0x8e4   : > { %8238 = vmatmul.mubr.msk.bf16.vlgmr.msra.gmra.mxu1 %vm1819_vm4, %v12940_v29 }
 0x8e9   : > { %v8677_v55 = vld [vmem:[#allocation2 + $0x40] ss:$24 sps:$4 sm:$0xff]   ;;  %v8678_v10 = vld [vmem:[#allocation2 + $0x10] ss:$24 sps:$4 sm:$0xff]  }
 0x8ea   : > { %8468 = vmatpush3.bf16.msra.mxu0 %v8677_v55 }
 0x8eb   : > { %8469 = vmatprep.subr.bf16.mxu0 %v8842_v8 }
 0x8ee   : > { %8470 = vmatpush3.bf16.msra.mxu0 %v8678_v10 }
 0x8f1   : > { %8472 = vmatmul.mubr.msk.bf16.vlgmr.msra.gmra.mxu0 %vm1819_vm4, %v12940_v29 }
 0x974   : > { %v7524_v14 = vpop.f32.mrf.mxu1 }
 0x975   : > { %v7525_v25 = vadd.f32 %v7524_v14, %v7433_v33 }
 0x976   : > { %v7526_v28 = vpop.f32.mrf.mxu1 }
 0x977   : > { %7612 = vst [vmem:[%s301_s18] sm:$0xff] %v7525_v25  ;;  %v7527_v53 = vadd.f32 %v7526_v28, %v7433_v33 }
 0x978   : > { %v7528_v1 = vpop.f32.mrf.mxu1 }
 0x979   : > { %7613 = vst [vmem:[%s301_s18 + $0x8] sm:$0xff] %v7527_v53 }
 0x97a   : > { %v7529_v38 = vpop.f32.mrf.mxu1 }
 0x9a4   : > { %v7565_v43 = vpop.f32.mrf.mxu1 }
 0x9a5   : > { %v7566_v8 = vadd.f32 %v7565_v43, %v7433_v33 }
 0x9a6   : > { %v7567_v59 = vpop.f32.mrf.mxu1 }
 0x9a7   : > { %7614 = vst [vmem:[%s301_s18 + $0x10] sm:$0xff] %v7566_v8  ;;  %v7568_v35 = vadd.f32 %v7567_v59, %v7433_v33 }
 0x9a8   : > { %v7569_v29 = vpop.f32.mrf.mxu1 }
 0x9a9   : > { %7615 = vst [vmem:[%s301_s18 + $0x18] sm:$0xff] %v7568_v35 }
 0x9aa   : > { %v7570_v15 = vpop.f32.mrf.mxu1 }
 0x9b1   : > { %v7606_v58 = vpop.f32.mrf.mxu0 }
 0x9b2   : > { %v7607_v4 = vadd.f32 %v7606_v58, %v7433_v33 }
 0x9b3   : > { %v8473_v12 = vpop.f32.mrf.mxu0 }
 0x9b4   : > { %7616 = vst [vmem:[%s301_s18 + $0x20] sm:$0xff] %v7607_v4 }
 0x9b5   : > { %v7609_v22 = vpop.f32.mrf.mxu0 }
 0x9b6   : > { %8772 = shalt.err (!%p8769_p3)
}
 0x9b7   : > { %s8773_s8 = scalar_lea.hbm %s12970_s17, 640  ;;  %s8777_s15 = scalar_lea.hbm %s13018_s7, 1280 }
 0x9b8   : > { %p8774_p2 = scmp.ne.s32.totalorder %s12970_s17, %s8773_s8  ;;  %p8778_p7 = scmp.lt.s32.totalorder %s12970_s17, %s13018_s7 }
 0x9b9   : > { %p8779_p6 = scmp.lt.s32.totalorder %s8777_s15, %s8773_s8 }
 0x9ba   : > { %p8775_p4 = pnand %p8774_p2, %p8923_p5 }
 0x9bb   : > { %p8780_p9 = por %p8779_p6, %p8778_p7 }
 0x9bc   : > { %p8776_p13 = pneg %p8775_p4 }
 0x9be   : > { %p8781_p10 = pnand %p8780_p9, %p8776_p13 }
 0x9c0   : > { %8784 = shalt.err (!%p8781_p10)
}
 0x9c1   : > { %8485 = dma.vmem_to_hbm [thread:$0]  (%p8923_p5), %s12972_s19, 640, %s12970_s17, %s7618_s22   ;;  %v8474_v9 = vpop.f32.mrf.mxu0 }
 0x9c2 PF: > { %p8502_p12 = scmp.ge.s32.totalorder %s8827_s27, 2  ;;  %s7644_s20 = sand.u32 1, %s8815_s24  }
 0x9c3   : > { %p13402_p8 = scmp.ne.s32.totalorder %s13175_s12, 0  ;;  %s7645_s21 = scalar_lea.sflag [#allocation7], %s7644_s20 }
 0x9c5   : > { %p8495_p11 = pnand %p8502_p12, %p13402_p8 }
 0x9c7   : > { %p8496_p0 = pneg %p8495_p11 }
 0x9c9   : > { %8810 = dma.done.wait (%p8496_p0), %s7645_s21, 640  }
 0x9ca   : > { %8812 = vsyncadd (%p8496_p0), %s7645_s21, 4294966656  ;;  %p19_p1 = scmp.ge.s32.totalorder %s8910_s30, 4   ;;  %s13403_s24 = smov %s8819_s25 }
 0x9cb   : > { %s13404_s25 = smov %s8823_s26  ;;  %s13405_s26 = smov %s8921_s10 }
 0x9cc   : > { %s13406_s27 = smov %s8910_s30  ;;  %21 = sbr.rel (!%p19_p1) target bundleno = 5 (0x5), region = 98 }
 0x9d1   :  { %7650 = vsyncpa [#allocation6], 1 }
 0x9d2   :  { %7652 = vsyncpa [#allocation6 + $0x1], 1 }
 0x9d3   :  { %7653 = vsyncpa [#allocation9], 1 }
 0x9d4   :  { %7654 = vsyncpa [#allocation7], 1 }
 0x9d5   :  { %7656 = vsyncpa [#allocation7 + $0x1], 1 }

</bundles_post_ra>
